<compile_context>
chip_gen: v6e
topology: v6e:2x2x1
jax: 0.10.0
libtpu: 0.0.40
codegen_flags: <defaults>
</compile_context>

<pallas_src>
import numpy as np
import jax
import jax.numpy as jnp
from jax import lax
from jax.experimental import pallas as pl
from jax.experimental.pallas import tpu as pltpu


# ---------------------------------------------------------------------------
# In-kernel helpers
# ---------------------------------------------------------------------------
def _conv_layer(a, w_ref, b_ref):
    """Conv3d(k=3, s=2, p=1) + ReLU in the merged (NB, D, H*W*Cin) layout.

    kh/kw taps, H/W padding and the stride-2 output H/W positions are
    pre-folded into `w_ref`; only the stride-2 selection along D happens here
    (even/odd sublane split), and the 3 kd slabs are concatenated along K so
    the whole layer is a single MXU GEMM.

    a     : (NB, D, L)  bf16, L = H*W*Cin      (multiple of 128)
    w_ref : (3*L, Lout) bf16, Lout = Ho*Wo*Cout (multiple of 128)
    b_ref : (1, Lout)   f32
    returns (NB*Do, Lout) f32 after bias + ReLU.
    """
    nb, d, l = a.shape
    do = d // 2
    zrow = jnp.zeros((nb, 1, l), a.dtype)
    ap = jnp.concatenate([zrow, a, zrow], axis=1)          # (NB, D+2, L), row i = d=i-1
    ap = ap.reshape(nb, do + 1, 2, l)
    even = ap[:, :, 0, :]                                   # padded rows 0,2,...,D
    odd = ap[:, :, 1, :]                                    # padded rows 1,3,...,D+1
    # Output row do needs padded rows 2do (kd=0), 2do+1 (kd=1), 2do+2 (kd=2).
    lhs = jnp.concatenate(
        [even[:, :do, :], odd[:, :do, :], even[:, 1:do + 1, :]], axis=2)
    lhs = lhs.reshape(nb * do, 3 * l)
    y = jnp.dot(lhs, w_ref[...], preferred_element_type=jnp.float32)
    return jnp.maximum(y + b_ref[...], 0.0)


def _encoder_kernel(x_ref, w1_ref, b1_ref, w2_ref, b2_ref, w3_ref, b3_ref,
                    o_ref):
    nb, d, _ = x_ref.shape
    a1 = x_ref[...].astype(jnp.bfloat16)                   # cast to bf16 once
    y1 = _conv_layer(a1, w1_ref, b1_ref)                    # (NB*D/2, (H/2)(W/2)*16)
    a2 = y1.astype(jnp.bfloat16).reshape(nb, d // 2, -1)
    y2 = _conv_layer(a2, w2_ref, b2_ref)                    # (NB*D/4, (H/4)(W/4)*32)
    # Layer 3: D is folded into the weight as well -> a single GEMM whose
    # output lanes are already in C-major (CDHW) order.
    a3 = y2.astype(jnp.bfloat16).reshape(nb, -1)             # (NB, D/4*H/4*W/4*32)
    y3 = jnp.dot(a3, w3_ref[...], preferred_element_type=jnp.float32)
    y3 = jnp.maximum(y3 + b3_ref[...], 0.0)                  # (NB, 64*D/8*H/8*W/8)
    o_ref[...] = y3.reshape(o_ref.shape)


# ---------------------------------------------------------------------------
# Host-side parameter preparation
# ---------------------------------------------------------------------------
def init_encoder_params(key):
    """Deterministic synthetic params mirroring nn.Conv3d init: [(w, b)] per layer."""
    layer_dims = [(1, 16), (16, 32), (32, 64)]
    params = []
    for i, (cin, cout) in enumerate(layer_dims):
        kw_key, kb_key = jax.random.split(jax.random.fold_in(key, i))
        bound = 1.0 / float(np.sqrt(cin * 27))
        w = jax.random.uniform(kw_key, (cout, cin, 3, 3, 3),
                               minval=-bound, maxval=bound, dtype=jnp.float32)
        b = jax.random.uniform(kb_key, (cout,),
                               minval=-bound, maxval=bound, dtype=jnp.float32)
        params.append((w, b))
    return params


def _fold_weight_kd(w, h_in, w_in):
    """(Cout,Cin,3,3,3) -> (3*H*W*Cin, Ho*Wo*Cout) bf16.

    K rows   : kd-major, then (h, w, ci)  — matches the in-kernel kd concat.
    Columns  : (ho, wo, co)               — merged channels-last output.
    kh/kw taps, H/W zero padding and stride-2 output positions are baked in.
    """
    cout, cin = int(w.shape[0]), int(w.shape[1])
    ho, wo = h_in // 2, w_in // 2
    hwc = h_in * w_in * cin
    wt = np.transpose(np.asarray(w, np.float32), (2, 3, 4, 1, 0))  # (kd,kh,kw,Cin,Cout)
    out = np.zeros((3 * hwc, ho * wo * cout), np.float32)
    for kd in range(3):
        for kh in range(3):
            for kw in range(3):
                blk = wt[kd, kh, kw]                       # (Cin, Cout)
                for oh in range(ho):
                    ih = 2 * oh + kh - 1
                    if ih < 0 or ih >= h_in:
                        continue
                    for ow in range(wo):
                        iw = 2 * ow + kw - 1
                        if iw < 0 or iw >= w_in:
                            continue
                        r = kd * hwc + (ih * w_in + iw) * cin
                        c = (oh * wo + ow) * cout
                        out[r:r + cin, c:c + cout] = blk
    return jnp.asarray(out, jnp.bfloat16)


def _fold_weight_full(w, d_in, h_in, w_in):
    """(Cout,Cin,3,3,3) -> (D*H*W*Cin, Cout*Do*Ho*Wo) bf16.

    Full fold (D included).  Columns are in C-major (co, do, ho, wo) order —
    i.e. flattened CDHW — so the kernel output reshapes straight to NCDHW.
    """
    cout, cin = int(w.shape[0]), int(w.shape[1])
    do, ho, wo = d_in // 2, h_in // 2, w_in // 2
    dhw_o = do * ho * wo
    wt = np.transpose(np.asarray(w, np.float32), (2, 3, 4, 1, 0))  # (kd,kh,kw,Cin,Cout)
    out = np.zeros((d_in * h_in * w_in * cin, cout * dhw_o), np.float32)
    for kd in range(3):
        for kh in range(3):
            for kw in range(3):
                blk = wt[kd, kh, kw]                       # (Cin, Cout)
                for od in range(do):
                    idd = 2 * od + kd - 1
                    if idd < 0 or idd >= d_in:
                        continue
                    for oh in range(ho):
                        ih = 2 * oh + kh - 1
                        if ih < 0 or ih >= h_in:
                            continue
                        for ow in range(wo):
                            iw = 2 * ow + kw - 1
                            if iw < 0 or iw >= w_in:
                                continue
                            r = ((idd * h_in + ih) * w_in + iw) * cin
                            c = (od * ho + oh) * wo + ow
                            out[r:r + cin, c::dhw_o] = blk   # stride dhw_o over co
    return jnp.asarray(out, jnp.bfloat16)


def pack_kernel_params(params, d_in, h_in, w_in):
    (cw1, cb1), (cw2, cb2), (cw3, cb3) = params
    # Spatial sizes at the input of each layer (and after the last one).
    d1, h1, w1 = d_in, h_in, w_in
    d2, h2, w2 = d1 // 2, h1 // 2, w1 // 2
    d3, h3, w3 = d2 // 2, h2 // 2, w2 // 2
    d4, h4, w4 = d3 // 2, h3 // 2, w3 // 2
    w1f = _fold_weight_kd(cw1, h1, w1)                     # (768, 1024) for 16^3
    w2f = _fold_weight_kd(cw2, h2, w2)                     # (3072, 512)
    w3f = _fold_weight_full(cw3, d3, h3, w3)               # (2048, 512)
    b1t = jnp.tile(cb1.astype(jnp.float32), h2 * w2).reshape(1, -1)
    b2t = jnp.tile(cb2.astype(jnp.float32), h3 * w3).reshape(1, -1)
    b3t = jnp.repeat(cb3.astype(jnp.float32), d4 * h4 * w4).reshape(1, -1)
    return w1f, b1t, w2f, b2t, w3f, b3t


# ---------------------------------------------------------------------------
# Forward pass (NCDHW in, NCDHW out — same as the PyTorch module)
# ---------------------------------------------------------------------------
@jax.jit
def encoder_forward(x_ncdhw, w1f, b1t, w2f, b2t, w3f, b3t):
    n, c, d, h, w = x_ncdhw.shape
    assert c == 1
    # Three stride-2 layers need even spatial dims at each stage, and the
    # merged lane widths must stay multiples of 128 for this layout.
    assert d % 8 == 0 and h % 8 == 0 and w % 8 == 0
    assert (h * w) % 128 == 0
    assert ((h // 2) * (w // 2) * 16) % 128 == 0
    out_cols = 64 * (d // 8) * (h // 8) * (w // 8)
    assert out_cols % 128 == 0

    x3 = x_ncdhw.reshape(n, d, h * w)                      # merged (N, D, H*W*Cin)

    # 2-way "parallel" batch split keeps both v7x TensorCores busy; on the
    # single-TC v5e/v6e the extra grid step costs ~0.35us and the weights are
    # fetched only once (their block index never changes).
    nblk = 2 if (n % 2 == 0 and n >= 2) else 1
    nb = n // nblk

    out = pl.pallas_call(
        _encoder_kernel,
        out_shape=jax.ShapeDtypeStruct((n, 1, out_cols), jnp.float32),
        grid=(nblk,),
        in_specs=[
            pl.BlockSpec((nb, d, h * w), lambda i: (i, 0, 0)),
            pl.BlockSpec(w1f.shape, lambda i: (0, 0)),
            pl.BlockSpec(b1t.shape, lambda i: (0, 0)),
            pl.BlockSpec(w2f.shape, lambda i: (0, 0)),
            pl.BlockSpec(b2t.shape, lambda i: (0, 0)),
            pl.BlockSpec(w3f.shape, lambda i: (0, 0)),
            pl.BlockSpec(b3t.shape, lambda i: (0, 0)),
        ],
        out_specs=pl.BlockSpec((nb, 1, out_cols), lambda i: (i, 0, 0)),
        compiler_params=pltpu.CompilerParams(
            dimension_semantics=("parallel",),
            vmem_limit_bytes=32 * 1024 * 1024),
    )(x3, w1f, b1t, w2f, b2t, w3f, b3t)

    # Output lanes are already in C-major (CDHW) order -> plain free reshape,
    # no post-kernel transpose / extra HBM round trip.
    return out.reshape(n, 64, d // 8, h // 8, w // 8)


# ---------------------------------------------------------------------------
# Pure-JAX reference (f32) for correctness check
# ---------------------------------------------------------------------------
def encoder_reference(x_ncdhw, params):
    x = x_ncdhw
    for (w, b) in params:
        x = lax.conv_general_dilated(
            x, w, window_strides=(2, 2, 2),
            padding=((1, 1), (1, 1), (1, 1)),
            dimension_numbers=("NCDHW", "OIDHW", "NCDHW"))
        x = jnp.maximum(x + b.reshape(1, -1, 1, 1, 1), 0.0)
    return x


if __name__ == "__main__":
    key = jax.random.PRNGKey(0)
    xkey, pkey = jax.random.split(key)

    # (N=2, C=1, D=H=W=16), consistent with Conv3d(1, ...)
    x = jax.random.normal(xkey, (2, 1, 16, 16, 16), dtype=jnp.float32)
    params = init_encoder_params(pkey)
    kernel_params = pack_kernel_params(params, 16, 16, 16)

    out = jax.block_until_ready(encoder_forward(x, *kernel_params))
    assert out.shape == (2, 64, 2, 2, 2), out.shape

    ref = jax.block_until_ready(encoder_reference(x, params))
    max_err = float(jnp.max(jnp.abs(out - ref)))
    # bf16 GEMM operands with f32 accumulation -> relaxed tolerance vs f32 ref.
    assert jnp.allclose(out, ref, atol=2e-2, rtol=2e-2), max_err

    print("KERNEL_OK")
</pallas_src>

<mosaic_0001>
module attributes {stable_mosaic.version = 11 : i64} {
  func.func @_encoder_kernel(%arg0: i32, %arg1: memref<1x16x256xf32, #tpu.memory_space<vmem>>, %arg2: memref<768x1024xbf16, #tpu.memory_space<vmem>>, %arg3: memref<1x1024xf32, #tpu.memory_space<vmem>>, %arg4: memref<3072x512xbf16, #tpu.memory_space<vmem>>, %arg5: memref<1x512xf32, #tpu.memory_space<vmem>>, %arg6: memref<2048x512xbf16, #tpu.memory_space<vmem>>, %arg7: memref<1x512xf32, #tpu.memory_space<vmem>>, %arg8: memref<1x1x512xf32, #tpu.memory_space<vmem>>) attributes {dimension_semantics = [#tpu.dimension_semantics<parallel>], iteration_bounds = array<i64: 2>, scalar_prefetch = 0 : i64, scratch_operands = 0 : i64, tpu.core_type = #tpu.core_type<tc>, window_params = [{transform_indices = @transform_0, window_bounds = array<i64: 1, 16, 256>}, {pipeline_mode = #tpu.pipeline_mode<synchronous>, transform_indices = @transform_1, window_bounds = array<i64: 768, 1024>}, {pipeline_mode = #tpu.pipeline_mode<synchronous>, transform_indices = @transform_2, window_bounds = array<i64: 1, 1024>}, {pipeline_mode = #tpu.pipeline_mode<synchronous>, transform_indices = @transform_3, window_bounds = array<i64: 3072, 512>}, {pipeline_mode = #tpu.pipeline_mode<synchronous>, transform_indices = @transform_4, window_bounds = array<i64: 1, 512>}, {pipeline_mode = #tpu.pipeline_mode<synchronous>, transform_indices = @transform_5, window_bounds = array<i64: 2048, 512>}, {pipeline_mode = #tpu.pipeline_mode<synchronous>, transform_indices = @transform_6, window_bounds = array<i64: 1, 512>}, {transform_indices = @transform_7, window_bounds = array<i64: 1, 1, 512>}]} {
    %c0 = arith.constant 0 : index
    %c0_0 = arith.constant 0 : index
    %c0_1 = arith.constant 0 : index
    %0 = vector.load %arg1[%c0, %c0_0, %c0_1] : memref<1x16x256xf32, #tpu.memory_space<vmem>>, vector<1x16x256xf32>
    %1 = arith.truncf %0 : vector<1x16x256xf32> to vector<1x16x256xbf16>
    %cst = arith.constant 0.000000e+00 : bf16
    %2 = vector.broadcast %cst : bf16 to vector<1x1x256xbf16>
    %3 = tpu.concatenate %2, %1, %2 in 1 : vector<1x1x256xbf16>, vector<1x16x256xbf16>, vector<1x1x256xbf16> -> vector<1x18x256xbf16>
    %4 = vector.shape_cast %3 : vector<1x18x256xbf16> to vector<1x9x2x256xbf16>
    %5 = vector.extract_strided_slice %4 {offsets = [0, 0, 0, 0], sizes = [1, 9, 1, 256], strides = [1, 1, 1, 1]} : vector<1x9x2x256xbf16> to vector<1x9x1x256xbf16>
    %6 = vector.shape_cast %5 : vector<1x9x1x256xbf16> to vector<1x9x256xbf16>
    %7 = vector.extract_strided_slice %4 {offsets = [0, 0, 1, 0], sizes = [1, 9, 1, 256], strides = [1, 1, 1, 1]} : vector<1x9x2x256xbf16> to vector<1x9x1x256xbf16>
    %8 = vector.shape_cast %7 : vector<1x9x1x256xbf16> to vector<1x9x256xbf16>
    %9 = vector.extract_strided_slice %6 {offsets = [0, 0, 0], sizes = [1, 8, 256], strides = [1, 1, 1]} : vector<1x9x256xbf16> to vector<1x8x256xbf16>
    %10 = vector.extract_strided_slice %8 {offsets = [0, 0, 0], sizes = [1, 8, 256], strides = [1, 1, 1]} : vector<1x9x256xbf16> to vector<1x8x256xbf16>
    %11 = vector.extract_strided_slice %6 {offsets = [0, 1, 0], sizes = [1, 8, 256], strides = [1, 1, 1]} : vector<1x9x256xbf16> to vector<1x8x256xbf16>
    %12 = tpu.concatenate %9, %10, %11 in 2 : vector<1x8x256xbf16>, vector<1x8x256xbf16>, vector<1x8x256xbf16> -> vector<1x8x768xbf16>
    %13 = vector.shape_cast %12 : vector<1x8x768xbf16> to vector<8x768xbf16>
    %c0_2 = arith.constant 0 : index
    %c0_3 = arith.constant 0 : index
    %14 = vector.load %arg2[%c0_2, %c0_3] : memref<768x1024xbf16, #tpu.memory_space<vmem>>, vector<768x1024xbf16>
    %cst_4 = arith.constant dense<0.000000e+00> : vector<8x1024xf32>
    %15 = tpu.matmul %13, %14, %cst_4 {dimension_numbers = #tpu.dot_dimension_numbers<[1], [0], [0], [1], [0, 0, 1, 1], [], []>} : vector<8x768xbf16>, vector<768x1024xbf16>, vector<8x1024xf32> -> vector<8x1024xf32>
    %c0_5 = arith.constant 0 : index
    %c0_6 = arith.constant 0 : index
    %16 = vector.load %arg3[%c0_5, %c0_6] : memref<1x1024xf32, #tpu.memory_space<vmem>>, vector<1x1024xf32>
    %17 = vector.broadcast %16 : vector<1x1024xf32> to vector<8x1024xf32>
    %18 = arith.addf %15, %17 : vector<8x1024xf32>
    %cst_7 = arith.constant 0.000000e+00 : f32
    %19 = vector.broadcast %cst_7 : f32 to vector<8x1024xf32>
    %20 = arith.maximumf %18, %19 : vector<8x1024xf32>
    %21 = arith.truncf %20 : vector<8x1024xf32> to vector<8x1024xbf16>
    %22 = vector.shape_cast %21 : vector<8x1024xbf16> to vector<1x8x1024xbf16>
    %cst_8 = arith.constant 0.000000e+00 : bf16
    %23 = vector.broadcast %cst_8 : bf16 to vector<1x1x1024xbf16>
    %24 = tpu.concatenate %23, %22, %23 in 1 : vector<1x1x1024xbf16>, vector<1x8x1024xbf16>, vector<1x1x1024xbf16> -> vector<1x10x1024xbf16>
    %25 = vector.shape_cast %24 : vector<1x10x1024xbf16> to vector<1x5x2x1024xbf16>
    %26 = vector.extract_strided_slice %25 {offsets = [0, 0, 0, 0], sizes = [1, 5, 1, 1024], strides = [1, 1, 1, 1]} : vector<1x5x2x1024xbf16> to vector<1x5x1x1024xbf16>
    %27 = vector.shape_cast %26 : vector<1x5x1x1024xbf16> to vector<1x5x1024xbf16>
    %28 = vector.extract_strided_slice %25 {offsets = [0, 0, 1, 0], sizes = [1, 5, 1, 1024], strides = [1, 1, 1, 1]} : vector<1x5x2x1024xbf16> to vector<1x5x1x1024xbf16>
    %29 = vector.shape_cast %28 : vector<1x5x1x1024xbf16> to vector<1x5x1024xbf16>
    %30 = vector.extract_strided_slice %27 {offsets = [0, 0, 0], sizes = [1, 4, 1024], strides = [1, 1, 1]} : vector<1x5x1024xbf16> to vector<1x4x1024xbf16>
    %31 = vector.extract_strided_slice %29 {offsets = [0, 0, 0], sizes = [1, 4, 1024], strides = [1, 1, 1]} : vector<1x5x1024xbf16> to vector<1x4x1024xbf16>
    %32 = vector.extract_strided_slice %27 {offsets = [0, 1, 0], sizes = [1, 4, 1024], strides = [1, 1, 1]} : vector<1x5x1024xbf16> to vector<1x4x1024xbf16>
    %33 = tpu.concatenate %30, %31, %32 in 2 : vector<1x4x1024xbf16>, vector<1x4x1024xbf16>, vector<1x4x1024xbf16> -> vector<1x4x3072xbf16>
    %34 = vector.shape_cast %33 : vector<1x4x3072xbf16> to vector<4x3072xbf16>
    %c0_9 = arith.constant 0 : index
    %c0_10 = arith.constant 0 : index
    %35 = vector.load %arg4[%c0_9, %c0_10] : memref<3072x512xbf16, #tpu.memory_space<vmem>>, vector<3072x512xbf16>
    %cst_11 = arith.constant dense<0.000000e+00> : vector<4x512xf32>
    %36 = tpu.matmul %34, %35, %cst_11 {dimension_numbers = #tpu.dot_dimension_numbers<[1], [0], [0], [1], [0, 0, 1, 1], [], []>} : vector<4x3072xbf16>, vector<3072x512xbf16>, vector<4x512xf32> -> vector<4x512xf32>
    %c0_12 = arith.constant 0 : index
    %c0_13 = arith.constant 0 : index
    %37 = vector.load %arg5[%c0_12, %c0_13] : memref<1x512xf32, #tpu.memory_space<vmem>>, vector<1x512xf32>
    %38 = vector.broadcast %37 : vector<1x512xf32> to vector<4x512xf32>
    %39 = arith.addf %36, %38 : vector<4x512xf32>
    %cst_14 = arith.constant 0.000000e+00 : f32
    %40 = vector.broadcast %cst_14 : f32 to vector<4x512xf32>
    %41 = arith.maximumf %39, %40 : vector<4x512xf32>
    %42 = arith.truncf %41 : vector<4x512xf32> to vector<4x512xbf16>
    %43 = vector.shape_cast %42 : vector<4x512xbf16> to vector<1x2048xbf16>
    %c0_15 = arith.constant 0 : index
    %c0_16 = arith.constant 0 : index
    %44 = vector.load %arg6[%c0_15, %c0_16] : memref<2048x512xbf16, #tpu.memory_space<vmem>>, vector<2048x512xbf16>
    %cst_17 = arith.constant dense<0.000000e+00> : vector<1x512xf32>
    %45 = tpu.matmul %43, %44, %cst_17 {dimension_numbers = #tpu.dot_dimension_numbers<[1], [0], [0], [1], [0, 0, 1, 1], [], []>} : vector<1x2048xbf16>, vector<2048x512xbf16>, vector<1x512xf32> -> vector<1x512xf32>
    %c0_18 = arith.constant 0 : index
    %c0_19 = arith.constant 0 : index
    %46 = vector.load %arg7[%c0_18, %c0_19] : memref<1x512xf32, #tpu.memory_space<vmem>>, vector<1x512xf32>
    %47 = arith.addf %45, %46 : vector<1x512xf32>
    %cst_20 = arith.constant 0.000000e+00 : f32
    %48 = vector.broadcast %cst_20 : f32 to vector<1x512xf32>
    %49 = arith.maximumf %47, %48 : vector<1x512xf32>
    %50 = vector.shape_cast %49 : vector<1x512xf32> to vector<1x1x512xf32>
    %c0_21 = arith.constant 0 : index
    %c0_22 = arith.constant 0 : index
    %c0_23 = arith.constant 0 : index
    %51 = vector.load %arg8[%c0_21, %c0_22, %c0_23] : memref<1x1x512xf32, #tpu.memory_space<vmem>>, vector<1x1x512xf32>
    tpu.vector_store %arg8[%c0_21, %c0_22, %c0_23], %50 {strides = array<i32>} : memref<1x1x512xf32, #tpu.memory_space<vmem>>, vector<1x1x512xf32>,
    return
  }
  func.func @transform_0(%arg0: i32) -> (i32, i32, i32) {
    %c0_i32 = arith.constant 0 : i32
    %c0_i32_0 = arith.constant 0 : i32
    %c0_i32_1 = arith.constant 0 : i32
    return %arg0, %c0_i32, %c0_i32_0 : i32, i32, i32
  }
  func.func @transform_1(%arg0: i32) -> (i32, i32) {
    %c0_i32 = arith.constant 0 : i32
    %c0_i32_0 = arith.constant 0 : i32
    %c0_i32_1 = arith.constant 0 : i32
    return %c0_i32, %c0_i32_0 : i32, i32
  }
  func.func @transform_2(%arg0: i32) -> (i32, i32) {
    %c0_i32 = arith.constant 0 : i32
    %c0_i32_0 = arith.constant 0 : i32
    %c0_i32_1 = arith.constant 0 : i32
    return %c0_i32, %c0_i32_0 : i32, i32
  }
  func.func @transform_3(%arg0: i32) -> (i32, i32) {
    %c0_i32 = arith.constant 0 : i32
    %c0_i32_0 = arith.constant 0 : i32
    %c0_i32_1 = arith.constant 0 : i32
    return %c0_i32, %c0_i32_0 : i32, i32
  }
  func.func @transform_4(%arg0: i32) -> (i32, i32) {
    %c0_i32 = arith.constant 0 : i32
    %c0_i32_0 = arith.constant 0 : i32
    %c0_i32_1 = arith.constant 0 : i32
    return %c0_i32, %c0_i32_0 : i32, i32
  }
  func.func @transform_5(%arg0: i32) -> (i32, i32) {
    %c0_i32 = arith.constant 0 : i32
    %c0_i32_0 = arith.constant 0 : i32
    %c0_i32_1 = arith.constant 0 : i32
    return %c0_i32, %c0_i32_0 : i32, i32
  }
  func.func @transform_6(%arg0: i32) -> (i32, i32) {
    %c0_i32 = arith.constant 0 : i32
    %c0_i32_0 = arith.constant 0 : i32
    %c0_i32_1 = arith.constant 0 : i32
    return %c0_i32, %c0_i32_0 : i32, i32
  }
  func.func @transform_7(%arg0: i32) -> (i32, i32, i32) {
    %c0_i32 = arith.constant 0 : i32
    %c0_i32_0 = arith.constant 0 : i32
    %c0_i32_1 = arith.constant 0 : i32
    return %arg0, %c0_i32, %c0_i32_0 : i32, i32, i32
  }
}

</mosaic_0001>

<bundles_post_ra>
// kernel: encoder_forward.1
= control target key start
LH: loop header
LB: loop body
LE: loop exit
PB: predicated region body
PF: predicated region fallthrough
CT: control target
= control target key end

     0   :  { %12 = vsyncpa [#allocation3], 0  ;;  %s19382_s0 = inlined_call_operand.vmem [shape: f32[2,16,256], index: 0, kind: input, shape index: {}]   ;;  %s19383_s1 = inlined_call_operand.hbm [shape: bf16[768,1024], index: 1, kind: input, shape index: {}]   ;;  %s19384_s2 = inlined_call_operand.hbm [shape: f32[1,1024], index: 2, kind: input, shape index: {}]   ;;  %s19385_s3 = inlined_call_operand.hbm [shape: bf16[3072,512], index: 3, kind: input, shape index: {}]   ;;  %s19386_s4 = inlined_call_operand.hbm [shape: f32[1,512], index: 4, kind: input, shape index: {}]   ;;  %s19387_s5 = inlined_call_operand.hbm [shape: bf16[2048,512], index: 5, kind: input, shape index: {}]   ;;  %s19388_s6 = inlined_call_operand.hbm [shape: f32[1,512], index: 6, kind: input, shape index: {}]   ;;  %s19389_s7 = inlined_call_operand.vmem [shape: f32[2,1,512], index: 7, kind: output, shape index: {}]  }
   0x1   :  { %13 = vsyncpa [#allocation5], 0 }
   0x2   :  { %14 = vsyncpa [#allocation8], 0 }
   0x3   :  { %15 = vsyncpa [#allocation11], 0  ;;  %s17848_s24 = smov 0  }
   0x4 LB: > { %s17796_s25 = smov [#allocation4]   ;;  %s17854_s27 = sadd.s32 4294967295, %s17794_s24   ;;  %s17794_s24 = sphi %s17848_s24, %s21_s24  }
   0x5   : > { %s230_s26 = sshll.u32 %s17796_s25, 4  ;;  %p13923_p0 = scmp.ge.s32.totalorder %s17794_s24, 1  ;;  %s231_s26 = int_to_ptr.vmem [resolvable:$true] %s230_s26 }
   0x6   : > { %p204_p1 = scmp.lt.s32.totalorder %s17794_s24, 3  ;;  %p19390_p2 = scmp.eq.s32.totalorder %s17854_s27, 0 }
   0x7   : > { %s17797_s29 = smov [#allocation7]   ;;  %s17798_s8 = smov [#allocation2]  }
   0x8   : > { %p17859_p3 = pnand %p13923_p0, %p204_p1  ;;  %s254_s30 = sshll.u32 %s17797_s29, 4  ;;  %s255_s30 = int_to_ptr.vmem [resolvable:$true] %s254_s30 }
   0x9   : > { %s216_s9 = sshll.u32 %s17798_s8, 4  ;;  %s17799_s11 = smov [#allocation6]   ;;  %s17871_s9 = int_to_ptr.vmem [resolvable:$true] %s216_s9 }
   0xa   : > { %s19411_s28 = scalar_select %p17859_p3, 1, 0 }
   0xb   : > { %p15641_p4 = pneg %p17859_p3  ;;  %s17873_s12 = sshll.u32 %s17799_s11, 4  ;;  %s241_s12 = int_to_ptr.vmem [resolvable:$true] %s17873_s12 }
   0xc   : > { %s17627_s14 = scalar_lea.vmem %s231_s26, 128  ;;  %p17635_p10 = scmp.lt.s32.totalorder %s231_s26, %s231_s26 }
   0xd   : > { %p17867_p5 = pnand %p19390_p2, %p15641_p4  ;;  %p17628_p7 = scmp.ne.s32.totalorder %s231_s26, %s17627_s14 }
   0xe   : > { %p17636_p11 = scmp.lt.s32.totalorder %s17627_s14, %s17627_s14 }
   0xf   : > { %p17877_p6 = pneg %p17867_p5 }
  0x10   : > { %p17637_p12 = por %p17636_p11, %p17635_p10 }
  0x11   : > { %p17630_p8 = pnand %p17628_p7, %p17877_p6 }
  0x13   : > { %p17631_p9 = pneg %p17630_p8 }
  0x15   : > { %p17638_p13 = pnand %p17637_p12, %p17631_p9 }
  0x17   : > { %17641 = shalt.err (!%p17638_p13)
}
  0x18   : > { %15647 = dma.hbm_to_vmem [thread:$0]  (!%p17867_p5), %s19384_s2, 128, %s231_s26, [#allocation5]  }
  0x19   : > { %s17653_s17 = scalar_lea.vmem %s255_s30, 64  ;;  %p17661_p2 = scmp.lt.s32.totalorder %s255_s30, %s255_s30 }
  0x1a   : > { %p17654_p0 = scmp.ne.s32.totalorder %s255_s30, %s17653_s17  ;;  %p17662_p7 = scmp.lt.s32.totalorder %s17653_s17, %s17653_s17 }
  0x1c   : > { %p17656_p1 = pnand %p17654_p0, %p17877_p6  ;;  %p17663_p8 = por %p17662_p7, %p17661_p2 }
  0x1e   : > { %p17657_p4 = pneg %p17656_p1 }
  0x20   : > { %p17664_p3 = pnand %p17663_p8, %p17657_p4 }
  0x22   : > { %17667 = shalt.err (!%p17664_p3)
}
  0x23   : > { %15653 = dma.hbm_to_vmem [thread:$0]  (!%p17867_p5), %s19386_s4, 64, %s255_s30, [#allocation8]  }
  0x24   : > { %s17679_s20 = scalar_lea.vmem %s17871_s9, 49152  ;;  %p17687_p12 = scmp.lt.s32.totalorder %s17871_s9, %s17871_s9 }
  0x25   : > { %p17680_p9 = scmp.ne.s32.totalorder %s17871_s9, %s17679_s20  ;;  %p17688_p2 = scmp.lt.s32.totalorder %s17679_s20, %s17679_s20 }
  0x27   : > { %p17682_p10 = pnand %p17680_p9, %p17877_p6  ;;  %p17689_p13 = por %p17688_p2, %p17687_p12 }
  0x29   : > { %p17683_p11 = pneg %p17682_p10 }
  0x2b   : > { %p17690_p3 = pnand %p17689_p13, %p17683_p11 }
  0x2d   : > { %17693 = shalt.err (!%p17690_p3)
}
  0x2e   : > { %s17800_s21 = smov 512   ;;  %s17801_s22 = smov 32  }
  0x2f   : > { %15644 = dma.hbm_to_vmem [thread:$0]  (!%p17867_p5), %s19383_s1, 49152, %s17871_s9, [#allocation3], %s17800_s21, %s17800_s21, %s17801_s22  }
  0x30   : > { %s17705_s26 = scalar_lea.vmem %s241_s12, 98304  ;;  %p17713_p7 = scmp.lt.s32.totalorder %s241_s12, %s241_s12 }
  0x31   : > { %p17706_p0 = scmp.ne.s32.totalorder %s241_s12, %s17705_s26  ;;  %p17714_p8 = scmp.lt.s32.totalorder %s17705_s26, %s17705_s26 }
  0x33   : > { %p17708_p1 = pnand %p17706_p0, %p17877_p6  ;;  %p17715_p9 = por %p17714_p8, %p17713_p7 }
  0x35   : > { %p17709_p4 = pneg %p17708_p1 }
  0x37   : > { %p17716_p10 = pnand %p17715_p9, %p17709_p4 }
  0x39   : > { %17719 = shalt.err (!%p17716_p10)
}
  0x3a   : > { %s17802_s29 = smov 256   ;;  %s17803_s30 = smov 16  }
  0x3b   : > { %15650 = dma.hbm_to_vmem [thread:$0]  (!%p17867_p5), %s19385_s3, 98304, %s241_s12, [#allocation5], %s17802_s29, %s17802_s29, %s17803_s30  }
  0x3c   : > { %s17804_s9 = smov [#allocation9]   ;;  %s17805_s15 = smov [#allocation10]  }
  0x3d   : > { %s264_s14 = sshll.u32 %s17804_s9, 4  ;;  %s278_s16 = sshll.u32 %s17805_s15, 4  ;;  %s265_s14 = int_to_ptr.vmem [resolvable:$true] %s264_s14  ;;  %s279_s16 = int_to_ptr.vmem [resolvable:$true] %s278_s16 }
  0x3e   : > { %s17731_s17 = scalar_lea.vmem %s265_s14, 65536  ;;  %p17739_p13 = scmp.lt.s32.totalorder %s265_s14, %s265_s14 }
  0x3f   : > { %p17732_p11 = scmp.ne.s32.totalorder %s265_s14, %s17731_s17  ;;  %p17740_p3 = scmp.lt.s32.totalorder %s17731_s17, %s17731_s17 }
  0x41   : > { %p17734_p12 = pnand %p17732_p11, %p17877_p6  ;;  %p17741_p0 = por %p17740_p3, %p17739_p13 }
  0x43   : > { %p17735_p2 = pneg %p17734_p12 }
  0x45   : > { %p17742_p1 = pnand %p17741_p0, %p17735_p2 }
  0x47   : > { %17745 = shalt.err (!%p17742_p1)
}
  0x48   : > { %15656 = dma.hbm_to_vmem [thread:$0]  (!%p17867_p5), %s19387_s5, 65536, %s265_s14, [#allocation8], %s17802_s29, %s17802_s29, %s17803_s30  }
  0x49   : > { %s17757_s12 = scalar_lea.vmem %s279_s16, 64  ;;  %p17765_p9 = scmp.lt.s32.totalorder %s279_s16, %s279_s16 }
  0x4a   : > { %p17758_p4 = scmp.ne.s32.totalorder %s279_s16, %s17757_s12  ;;  %p17766_p10 = scmp.lt.s32.totalorder %s17757_s12, %s17757_s12 }
  0x4c   : > { %p17760_p7 = pnand %p17758_p4, %p17877_p6  ;;  %p17767_p11 = por %p17766_p10, %p17765_p9 }
  0x4e   : > { %p17761_p8 = pneg %p17760_p7 }
  0x50   : > { %p17768_p12 = pnand %p17767_p11, %p17761_p8 }
  0x52   : > { %17771 = shalt.err (!%p17768_p12)
}
  0x53   : > { %15659 = dma.hbm_to_vmem [thread:$0]  (!%p17867_p5), %s19388_s6, 64, %s279_s16, [#allocation11]  }
  0x54   : > { %p19414_p2 = scmp.ne.s32.totalorder %s19411_s28, 0 }
  0x56   : > { %299 = sbr.rel (%p19414_p2) target bundleno = 2334 (0x91e), region = 48 }
  0x5b   : > { %p19415_p13 = scmp.eq.s32.totalorder %s17854_s27, 0 }
  0x5d   : > { %17777 = dma.done.wait (%p19415_p13), [#allocation3], 49152   ;;  %p19416_p6 = pmov %p19415_p13 }
  0x5f   : > { %17779 = vsyncadd (%p19416_p6), [#allocation3], 4294918144  ;;  %p19417_p3 = pmov %p19416_p6 }
  0x61   : > { %17781 = dma.done.wait (%p19417_p3), [#allocation5], 98432   ;;  %p19418_p0 = pmov %p19417_p3 }
  0x63   : > { %17783 = vsyncadd (%p19418_p0), [#allocation5], 4294868864  ;;  %p19419_p1 = pmov %p19418_p0 }
  0x64   : > { %p19420_p5 = pmov %p19418_p0 }
  0x65   : > { %17785 = dma.done.wait (%p19419_p1), [#allocation8], 65600  }
  0x66   : > { %17787 = vsyncadd (%p19420_p5), [#allocation8], 4294901696  ;;  %p19421_p4 = pmov %p19418_p0 }
  0x67   : > { %p19422_p7 = pmov %p19418_p0 }
  0x68   : > { %17789 = dma.done.wait (%p19421_p4), [#allocation11], 64  }
  0x69   : > { %17791 = vsyncadd (%p19422_p7), [#allocation11], 4294967232  ;;  %v823_v0 = vld [vmem:[#allocation2 + $0x1c0] sm:$0xff]  ;;  %p350_p8 = scmp.lt.s32.totalorder %s17854_s27, 1  ;;  %v17806_v42 = vmov 1966171168   ;;  %v19392_v44 = vlaneseq }
  0x6a   : > { %v827_v1 = vld [vmem:[#allocation2 + $0x1e0] sm:$0xff]  ;;  %v398_v43 = vunpack.c.l.s4 %v17806_v42  ;;  %vm384_vm0 = vcmask 1040384   ;;  %vm385_vm1 = vsmask.f32 256  ;;  %vm653_vm3 = vcmask 1041409  }
  0x6b   : > { %v951_v2 = vld [vmem:[#allocation2 + $0x5c0] sm:$0xff]  ;;  %v13998_v3 = vcombine.high %v823_v0, %v827_v1  ;;  %v13997_v5 = vcombine.low %v823_v0, %v827_v1  ;;  %s19466_s27 = smov (!%p350_p8, %s17854_s27), 1  ;;  %v17966_v55 = vshrl.u32 %v19392_v44, 7  ;;  %vm18049_vm2 = vmand %vm384_vm0, %vm385_vm1  ;;  %vm656_vm4 = vcmask 1042434  }
  0x6c   : > { %v955_v4 = vld [vmem:[#allocation2 + $0x5e0] sm:$0xff]  ;;  %s15616_s28 = sshll.u32 %s19466_s27, 5  ;;  %v399_v54 = vunpack.c.0.s8 %v398_v43  ;;  %vm659_vm5 = vcmask 1043459   ;;  %vm662_vm6 = vcmask 1044484   ;;  %vm665_vm7 = vcmask 1045509   ;;  %s13940_s23 = sshll.u32 %s19466_s27, 2 }
  0x6d   : > { %v815_v6 = vld [vmem:[#allocation2 + $0x180] sm:$0xff]  ;;  %v14126_v8 = vcombine.high %v951_v2, %v955_v4  ;;  %v14125_v9 = vcombine.low %v951_v2, %v955_v4  ;;  %3113 = vmatprep.subr.bf16.mxu0 %v13998_v3  ;;  %s354_s22 = scalar_lea.vmem %s19382_s0, %s15616_s28  ;;  %vm668_vm8 = vcmask 1046534   ;;  %vm671_vm9 = vcmask 1047559   ;;  %s358_s29 = scalar_lea.vmem %s19389_s7, %s13940_s23 }
  0x6e   : > { %v819_v7 = vld [vmem:[#allocation2 + $0x1a0] sm:$0xff]  ;;  %3114 = vmatpush1.bf16.msra.mxu0 %v13997_v5  ;;  %v361_v0 = vld [vmem:[%s354_s22 + $0x8] sm:$0xff]  ;;  %v362_v3 = vld [vmem:[%s354_s22 + $0x10] sm:$0xff]  ;;  %vm3693_vm10 = vcmask 1044480   ;;  %vm3694_vm11 = vsmask.f32 4352 }
  0x6f   : > { %v13990_v10 = vcombine.high %v815_v6, %v819_v7  ;;  %v943_v11 = vld [vmem:[#allocation2 + $0x580] sm:$0xff]  ;;  %3154 = vmatprep.subr.bf16.mxu1 %v14126_v8  ;;  %v13989_v18 = vcombine.low %v815_v6, %v819_v7  ;;  %v363_v4 = vld [vmem:[%s354_s22 + $0x18] sm:$0xff]  ;;  %vm18498_vm12 = vmand %vm3693_vm10, %vm3694_vm11 }
  0x70   : > { %v947_v12 = vld [vmem:[#allocation2 + $0x5a0] sm:$0xff]  ;;  %3155 = vmatpush1.bf16.msra.mxu1 %v14125_v9 }
  0x71   : > { %v807_v13 = vld [vmem:[#allocation2 + $0x140] sm:$0xff]  ;;  %v14118_v14 = vcombine.high %v943_v11, %v947_v12  ;;  %3115 = vmatprep.subr.bf16.mxu0 %v13990_v10  ;;  %v14117_v19 = vcombine.low %v943_v11, %v947_v12  ;;  %v365_v10 = vpack.c.bf16 %v363_v4, %v361_v0  ;;  %v17991_v11 = vsub.s32 %v399_v54, %v17966_v55 }
  0x72   : > { %v811_v15 = vld [vmem:[#allocation2 + $0x160] sm:$0xff]  ;;  %3116 = vmatpush1.bf16.msra.mxu0 %v13989_v18 }
  0x73   : > { %v935_v16 = vld [vmem:[#allocation2 + $0x540] sm:$0xff]  ;;  %v13982_v20 = vcombine.high %v807_v13, %v811_v15  ;;  %3156 = vmatprep.subr.bf16.mxu1 %v14118_v14  ;;  %v13981_v26 = vcombine.low %v807_v13, %v811_v15 }
  0x74   : > { %v939_v17 = vld [vmem:[#allocation2 + $0x560] sm:$0xff]  ;;  %3157 = vmatpush1.bf16.msra.mxu1 %v14117_v19 }
  0x75   : > { %v14110_v21 = vcombine.high %v935_v16, %v939_v17  ;;  %v799_v22 = vld [vmem:[#allocation2 + $0x100] sm:$0xff]  ;;  %3117 = vmatprep.subr.bf16.mxu0 %v13982_v20  ;;  %v14109_v27 = vcombine.low %v935_v16, %v939_v17 }
  0x76   : > { %v803_v23 = vld [vmem:[#allocation2 + $0x120] sm:$0xff]  ;;  %3118 = vmatpush1.bf16.msra.mxu0 %v13981_v26 }
  0x77   : > { %v927_v24 = vld [vmem:[#allocation2 + $0x500] sm:$0xff]  ;;  %v13974_v28 = vcombine.high %v799_v22, %v803_v23  ;;  %3158 = vmatprep.subr.bf16.mxu1 %v14110_v21  ;;  %v13973_v34 = vcombine.low %v799_v22, %v803_v23  ;;  %v374_v23 = vshrl.u32 %v365_v10, 16 }
  0x78   : > { %v931_v25 = vld [vmem:[#allocation2 + $0x520] sm:$0xff]  ;;  %3159 = vmatpush1.bf16.msra.mxu1 %v14109_v27 }
  0x79   : > { %v14102_v29 = vcombine.high %v927_v24, %v931_v25  ;;  %v791_v30 = vld [vmem:[#allocation2 + $0xc0] sm:$0xff]  ;;  %3119 = vmatprep.subr.bf16.mxu0 %v13974_v28  ;;  %v14101_v35 = vcombine.low %v927_v24, %v931_v25  ;;  %v377_v24 = vshll.u32 %v365_v10, 16 }
  0x7a   : > { %v795_v31 = vld [vmem:[#allocation2 + $0xe0] sm:$0xff]  ;;  %3120 = vmatpush1.bf16.msra.mxu0 %v13973_v34 }
  0x7b   : > { %v919_v32 = vld [vmem:[#allocation2 + $0x4c0] sm:$0xff]  ;;  %v13966_v36 = vcombine.high %v791_v30, %v795_v31  ;;  %3160 = vmatprep.subr.bf16.mxu1 %v14102_v29  ;;  %v13965_v45 = vcombine.low %v791_v30, %v795_v31 }
  0x7c   : > { %v923_v33 = vld [vmem:[#allocation2 + $0x4e0] sm:$0xff]  ;;  %3161 = vmatpush1.bf16.msra.mxu1 %v14101_v35 }
  0x7d   : > { %v14094_v37 = vcombine.high %v919_v32, %v923_v33  ;;  %v783_v38 = vld [vmem:[#allocation2 + $0x80] sm:$0xff]  ;;  %3121 = vmatprep.subr.bf16.mxu0 %v13966_v36  ;;  %v14093_v46 = vcombine.low %v919_v32, %v923_v33 }
  0x7e   : > { %v787_v39 = vld [vmem:[#allocation2 + $0xa0] sm:$0xff]  ;;  %3122 = vmatpush1.bf16.msra.mxu0 %v13965_v45 }
  0x7f   : > { %v911_v40 = vld [vmem:[#allocation2 + $0x480] sm:$0xff]  ;;  %v13958_v47 = vcombine.high %v783_v38, %v787_v39  ;;  %3162 = vmatprep.subr.bf16.mxu1 %v14094_v37  ;;  %v13957_v56 = vcombine.low %v783_v38, %v787_v39  ;;  %v18037_v38 = vrot.slane %v374_v23, 7 }
  0x80   : > { %v915_v41 = vld [vmem:[#allocation2 + $0x4a0] sm:$0xff]  ;;  %3163 = vmatpush1.bf16.msra.mxu1 %v14093_v46 }
  0x81   : > { %v14086_v48 = vcombine.high %v911_v40, %v915_v41  ;;  %v17952_v49 = vld [vmem:[#allocation2 + $0x40] sm:$0xff]  ;;  %3123 = vmatprep.subr.bf16.mxu0 %v13958_v47  ;;  %v14085_v60 = vcombine.low %v911_v40, %v915_v41 }
  0x82   : > { %v17954_v50 = vld [vmem:[#allocation2 + $0x60] sm:$0xff]  ;;  %3124 = vmatpush1.bf16.msra.mxu0 %v13957_v56 }
  0x83   : > { %v17959_v51 = vld [vmem:[#allocation2 + $0x440] sm:$0xff]  ;;  %v13950_v61 = vcombine.high %v17952_v49, %v17954_v50  ;;  %3164 = vmatprep.subr.bf16.mxu1 %v14086_v48  ;;  %v13949_v5 = vcombine.low %v17952_v49, %v17954_v50  ;;  %v379_v50 = vor.u32 %v377_v24, %v18037_v38 }
  0x84   : > { %v17961_v52 = vld [vmem:[#allocation2 + $0x460] sm:$0xff]  ;;  %3165 = vmatpush1.bf16.msra.mxu1 %v14085_v60 }
  0x85   : > { %v17963_v53 = vld [vmem:[#allocation2] sm:$0xff]  ;;  %v14078_v1 = vcombine.high %v17959_v51, %v17961_v52  ;;  %v14077_v12 = vcombine.low %v17959_v51, %v17961_v52  ;;  %3125 = vmatprep.subr.bf16.mxu0 %v13950_v61 }
  0x86   : > { %v17968_v57 = vld [vmem:[#allocation2 + $0x20] sm:$0xff]  ;;  %3126 = vmatpush1.bf16.msra.mxu0 %v13949_v5 }
  0x87   : > { %v17970_v58 = vld [vmem:[#allocation2 + $0x400] sm:$0xff]  ;;  %v13942_v13 = vcombine.high %v17963_v53, %v17968_v57  ;;  %v13941_v15 = vcombine.low %v17963_v53, %v17968_v57  ;;  %3166 = vmatprep.subr.bf16.mxu1 %v14078_v1 }
  0x88   : > { %v17972_v59 = vld [vmem:[#allocation2 + $0x420] sm:$0xff]  ;;  %3167 = vmatpush1.bf16.msra.mxu1 %v14077_v12 }
  0x89   : > { %v17976_v62 = vld [vmem:[#allocation2 + $0x3c0] sm:$0xff]  ;;  %v14070_v14 = vcombine.high %v17970_v58, %v17972_v59  ;;  %v14069_v25 = vcombine.low %v17970_v58, %v17972_v59  ;;  %3127 = vmatprep.subr.bf16.mxu0 %v13942_v13 }
  0x8a   : > { %v360_v63 = vld [vmem:[%s354_s22] sm:$0xff]  ;;  %3128 = vmatpush1.bf16.msra.mxu0 %v13941_v15 }
  0x8b   : > { %v17980_v2 = vld [vmem:[#allocation2 + $0x3e0] sm:$0xff]  ;;  %v364_v9 = vpack.c.bf16 %v362_v3, %v360_v63  ;;  %3168 = vmatprep.subr.bf16.mxu1 %v14070_v14  ;;  %v388_v3 = vsel %vm18049_vm2, 0, %v379_v50 }
  0x8c   : > { %v17984_v6 = vld [vmem:[#allocation2 + $0x7c0] sm:$0xff]  ;;  %v14062_v26 = vcombine.high %v17976_v62, %v17980_v2  ;;  %v14061_v28 = vcombine.low %v17976_v62, %v17980_v2  ;;  %3169 = vmatpush1.bf16.msra.mxu1 %v14069_v25 }
  0x8d   : > { %v17986_v7 = vld [vmem:[#allocation2 + $0x7e0] sm:$0xff]  ;;  %v367_v21 = vshrl.u32 %v364_v9, 16  ;;  %v370_v22 = vshll.u32 %v364_v9, 16 }
  0x8e   : > { %v17988_v8 = vld [vmem:[#allocation2 + $0x380] sm:$0xff]  ;;  %v14190_v27 = vcombine.high %v17984_v6, %v17986_v7  ;;  %v14189_v32 = vcombine.low %v17984_v6, %v17986_v7  ;;  %3129 = vmatprep.subr.bf16.mxu0 %v14062_v26 }
  0x8f   : > { %v18001_v16 = vld [vmem:[#allocation2 + $0x3a0] sm:$0xff]  ;;  %v18035_v37 = vrot.slane %v367_v21, 7  ;;  %3130 = vmatpush2.bf16.msra.mxu0 %v14061_v28 }
  0x90   : > { %v18003_v17 = vld [vmem:[#allocation2 + $0x780] sm:$0xff]  ;;  %v14054_v33 = vcombine.high %v17988_v8, %v18001_v16  ;;  %v14053_v40 = vcombine.low %v17988_v8, %v18001_v16  ;;  %3170 = vmatprep.subr.bf16.mxu1 %v14190_v27 }
  0x91   : > { %v18005_v18 = vld [vmem:[#allocation2 + $0x7a0] sm:$0xff]  ;;  %v372_v49 = vor.u32 %v370_v22, %v18035_v37  ;;  %3171 = vmatpush2.bf16.msra.mxu1 %v14189_v32 }
  0x92   : > { %v18007_v19 = vld [vmem:[#allocation2 + $0x340] sm:$0xff]  ;;  %v14182_v39 = vcombine.high %v18003_v17, %v18005_v18  ;;  %v14181_v41 = vcombine.low %v18003_v17, %v18005_v18  ;;  %3131 = vmatprep.subr.bf16.mxu0 %v14054_v33 }
  0x93   : > { %v18009_v20 = vld [vmem:[#allocation2 + $0x360] sm:$0xff]  ;;  %v387_v1 = vsel %vm18049_vm2, 0, %v372_v49  ;;  %3132 = vmatpush2.bf16.msra.mxu0 %v14053_v40 }
  0x94   : > { %v18019_v29 = vld [vmem:[#allocation2 + $0x740] sm:$0xff]  ;;  %v14046_v42 = vcombine.high %v18007_v19, %v18009_v20  ;;  %v14045_v45 = vcombine.low %v18007_v19, %v18009_v20  ;;  %v395_v13 = vcombine.low %v387_v1, %v388_v3  ;;  %v396_v14 = vcombine.high %v387_v1, %v388_v3  ;;  %3172 = vmatprep.subr.bf16.mxu1 %v14182_v39 }
  0x95   : > { %v18021_v30 = vld [vmem:[#allocation2 + $0x760] sm:$0xff]  ;;  %3173 = vmatpush2.bf16.msra.mxu1 %v14181_v41 }
  0x96   : > { %v18023_v31 = vld [vmem:[#allocation2 + $0x300] sm:$0xff]  ;;  %v14174_v51 = vcombine.high %v18019_v29, %v18021_v30  ;;  %v14173_v52 = vcombine.low %v18019_v29, %v18021_v30  ;;  %v403_v26 = vrot.slane %v395_v13, %v17991_v11  ;;  %v410_v50 = vrot.slane %v396_v14, %v17991_v11  ;;  %3133 = vmatprep.subr.bf16.mxu0 %v14046_v42 }
  0x97   : > { %v18029_v34 = vld [vmem:[#allocation2 + $0x320] sm:$0xff]  ;;  %3134 = vmatpush2.bf16.msra.mxu0 %v14045_v45 }
  0x98   : > { %v18031_v35 = vld [vmem:[#allocation2 + $0x700] sm:$0xff]  ;;  %v14038_v53 = vcombine.high %v18023_v31, %v18029_v34  ;;  %v14037_v59 = vcombine.low %v18023_v31, %v18029_v34  ;;  %v411_v14 = vcombine.high %v403_v26, %v403_v26  ;;  %v412_v23 = vcombine.high %v410_v50, %v410_v50  ;;  %3174 = vmatprep.subr.bf16.mxu1 %v14174_v51 }
  0x99   : > { %v18033_v36 = vld [vmem:[#allocation2 + $0x720] sm:$0xff]  ;;  %v419_v1 = vrot.slane %v403_v26, %v17991_v11  ;;  %v426_v27 = vrot.slane %v410_v50, %v17991_v11  ;;  %3175 = vmatpush2.bf16.msra.mxu1 %v14173_v52 }
  0x9a   : > { %v18055_v46 = vld [vmem:[#allocation2 + $0x2c0] sm:$0xff]  ;;  %v14166_v54 = vcombine.high %v18031_v35, %v18033_v36  ;;  %v14165_v60 = vcombine.low %v18031_v35, %v18033_v36  ;;  %v433_v6 = vrot.slane %v411_v14, %v17991_v11  ;;  %v440_v7 = vrot.slane %v412_v23, %v17991_v11  ;;  %3135 = vmatprep.subr.bf16.mxu0 %v14038_v53 }
  0x9b   : > { %v18057_v47 = vld [vmem:[#allocation2 + $0x2e0] sm:$0xff]  ;;  %v441_v32 = vcombine.high %v419_v1, %v419_v1  ;;  %v442_v26 = vcombine.high %v426_v27, %v426_v27  ;;  %v18156_v2 = vrot.slane %v419_v1, %v17991_v11  ;;  %v18159_v28 = vrot.slane %v426_v27, %v17991_v11  ;;  %3136 = vmatpush2.bf16.msra.mxu0 %v14037_v59 }
  0x9c   : > { %v18059_v48 = vld [vmem:[#allocation2 + $0x6c0] sm:$0xff]  ;;  %v14030_v4 = vcombine.high %v18055_v46, %v18057_v47  ;;  %v14029_v5 = vcombine.low %v18055_v46, %v18057_v47  ;;  %v443_v39 = vcombine.high %v433_v6, %v433_v6  ;;  %v444_v23 = vcombine.high %v440_v7, %v440_v7  ;;  %3176 = vmatprep.subr.bf16.mxu1 %v14166_v54 }
  0x9d   : > { %v18071_v56 = vld [vmem:[#allocation2 + $0x6e0] sm:$0xff]  ;;  %v18165_v14 = vrot.slane %v433_v6, %v17991_v11  ;;  %v18168_v33 = vrot.slane %v441_v32, %v17991_v11  ;;  %v467_v8 = vcombine.high %v18156_v2, %v18156_v2  ;;  %v555_v16 = vcombine.high %v18159_v28, %v18159_v28  ;;  %3177 = vmatpush2.bf16.msra.mxu1 %v14165_v60 }
  0x9e   : > { %v18073_v57 = vld [vmem:[#allocation2 + $0x280] sm:$0xff]  ;;  %v14158_v21 = vcombine.high %v18059_v48, %v18071_v56  ;;  %v14157_v15 = vcombine.low %v18059_v48, %v18071_v56  ;;  %v18181_v40 = vrot.slane %v440_v7, %v17991_v11  ;;  %v18191_v41 = vrot.slane %v443_v39, %v17991_v11  ;;  %3137 = vmatprep.subr.bf16.mxu0 %v14030_v4 }
  0x9f   : > { %v18075_v58 = vld [vmem:[#allocation2 + $0x2a0] sm:$0xff]  ;;  %v489_v17 = vcombine.high %v18165_v14, %v18165_v14  ;;  %v511_v18 = vcombine.high %v18168_v33, %v18168_v33  ;;  %v18194_v42 = vrot.slane %v442_v26, %v17991_v11  ;;  %v481_v1 = vrot.slane %v467_v8, %v17991_v11  ;;  %3138 = vmatpush2.bf16.msra.mxu0 %v14029_v5 }
  0xa0   : > { %v18081_v61 = vld [vmem:[#allocation2 + $0x680] sm:$0xff]  ;;  %v14022_v22 = vcombine.high %v18073_v57, %v18075_v58  ;;  %v569_v27 = vrot.slane %v555_v16, %v17991_v11  ;;  %v577_v51 = vcombine.high %v18181_v40, %v18181_v40  ;;  %v18201_v6 = vrot.slane %v444_v23, %v17991_v11  ;;  %3178 = vmatprep.subr.bf16.mxu1 %v14158_v21 }
  0xa1   : > { %v18083_v63 = vld [vmem:[#allocation2 + $0x6a0] sm:$0xff]  ;;  %v503_v7 = vrot.slane %v489_v17, %v17991_v11  ;;  %v525_v32 = vrot.slane %v511_v18, %v17991_v11  ;;  %v533_v26 = vcombine.high %v18191_v41, %v18191_v41  ;;  %v599_v39 = vcombine.high %v18194_v42, %v18194_v42  ;;  %3179 = vmatpush2.bf16.msra.mxu1 %v14157_v15 }
  0xa2   : > { %v18085_v0 = vld [vmem:[#allocation2 + $0x240] sm:$0xff]  ;;  %v591_v19 = vrot.slane %v577_v51, %v17991_v11  ;;  %v621_v20 = vcombine.high %v18201_v6, %v18201_v6  ;;  %v637_v45 = vunpack.c.l.b16 %v481_v1  ;;  %v645_v23 = vunpack.c.l.b16 %v569_v27  ;;  %3139 = vmatprep.subr.bf16.mxu0 %v14022_v22 }
  0xa3   : > { %v18095_v9 = vld [vmem:[#allocation2 + $0x260] sm:$0xff]  ;;  %v547_v8 = vrot.slane %v533_v26, %v17991_v11  ;;  %v613_v29 = vrot.slane %v599_v39, %v17991_v11  ;;  %v18226_v30 = vunpack.c.l.b16 %v503_v7  ;;  %v641_v52 = vunpack.c.l.b16 %v525_v32 }
  0xa4   : > { %v18097_v10 = vld [vmem:[#allocation2 + $0x640] sm:$0xff]  ;;  %v14013_v44 = vcombine.low %v18085_v0, %v18095_v9  ;;  %v635_v53 = vrot.slane %v621_v20, %v17991_v11  ;;  %v647_v16 = vunpack.c.l.b16 %v591_v19  ;;  %v679_v17 = vrot.slane %v645_v23, 4 }
  0xa5   : > { %v18099_v12 = vld [vmem:[#allocation2 + $0x660] sm:$0xff]  ;;  %v705_v18 = vrot.slane %v637_v45, 1  ;;  %v643_v1 = vunpack.c.l.b16 %v547_v8  ;;  %v649_v27 = vunpack.c.l.b16 %v613_v29  ;;  %v673_v54 = vrot.slane %v18226_v30, 7 }
  0xa6   : > { %v18111_v49 = vld [vmem:[#allocation2 + $0x200] sm:$0xff]  ;;  %v14142_v3 = vcombine.high %v18097_v10, %v18099_v12  ;;  %v14141_v62 = vcombine.low %v18097_v10, %v18099_v12  ;;  %v675_v51 = vrot.slane %v641_v52, 6  ;;  %v651_v7 = vunpack.c.l.b16 %v635_v53 }
  0xa7   : > { %v18113_v25 = vld [vmem:[#allocation2 + $0x220] sm:$0xff]  ;;  %v681_v32 = vrot.slane %v647_v16, 3  ;;  %v706_v26 = vsel %vm653_vm3, %v18226_v30, %v705_v18  ;;  %v18241_v31 = vrot.slane %v641_v52, 7  ;;  %v674_v34 = vsel %vm653_vm3, %v673_v54, %v637_v45 }
  0xa8   : > { %v18128_v24 = vld [vmem:[#allocation2 + $0x600] sm:$0xff]  ;;  %v677_v59 = vrot.slane %v643_v1, 5  ;;  %v683_v35 = vrot.slane %v649_v27, 2  ;;  %v18247_v36 = vrot.slane %v643_v1, 6  ;;  %v676_v60 = vsel %vm656_vm4, %v675_v51, %v674_v34 }
  0xa9   : > { %v18130_v13 = vld [vmem:[#allocation2 + $0x620] sm:$0xff]  ;;  %v685_v4 = vrot.slane %v651_v7, 1  ;;  %v708_v39 = vsel %vm656_vm4, %v18241_v31, %v706_v26  ;;  %v18252_v19 = vrot.slane %v645_v23, 5  ;;  %v18260_v45 = vrot.slane %v647_v16, 4  ;;  %v18333_v26 = vld [vmem:[#allocation2 + $0x1e8] sm:$0xff] }
  0xaa   : > { %v14133_v50 = vcombine.low %v18128_v24, %v18130_v13  ;;  %v678_v21 = vsel %vm659_vm5, %v677_v59, %v676_v60  ;;  %v710_v20 = vsel %vm659_vm5, %v18247_v36, %v708_v39  ;;  %v18262_v8 = vrot.slane %v649_v27, 3  ;;  %v18304_v27 = vld [vmem:[#allocation2 + $0x9c0] sm:$0xff] }
  0xab   : > { %v680_v46 = vsel %vm662_vm6, %v679_v17, %v678_v21  ;;  %v712_v47 = vsel %vm662_vm6, %v18252_v19, %v710_v20  ;;  %v18273_v5 = vrot.slane %v651_v7, 2  ;;  %v474_v23 = vrot.slane %v18156_v2, %v17991_v11 }
  0xac   : > { %v19425_v29 = vcombine.high %v18081_v61, %v18083_v63  ;;  %v682_v48 = vsel %vm665_vm7, %v681_v32, %v680_v46  ;;  %v714_v56 = vsel %vm665_vm7, %v18260_v45, %v712_v47  ;;  %v496_v15 = vrot.slane %v18165_v14, %v17991_v11  ;;  %v18331_v32 = vld [vmem:[#allocation2 + $0x1c8] sm:$0xff] }
  0xad   : > { %v518_v22 = vrot.slane %v18168_v33, %v17991_v11  ;;  %v684_v52 = vsel %vm668_vm8, %v683_v35, %v682_v48  ;;  %v716_v2 = vsel %vm668_vm8, %v18262_v8, %v714_v56  ;;  %v540_v53 = vrot.slane %v18191_v41, %v17991_v11  ;;  %v18306_v41 = vld [vmem:[#allocation2 + $0x9e0] sm:$0xff] }
  0xae   : > { %3180 = vmatprep.subr.bf16.mxu1 %v19425_v29  ;;  %v562_v16 = vrot.slane %v18159_v28, %v17991_v11  ;;  %v19426_v17 = vcombine.low %v18073_v57, %v18075_v58  ;;  %v686_v14 = vsel %vm671_vm9, %v685_v4, %v684_v52  ;;  %v718_v33 = vsel %vm671_vm9, %v18273_v5, %v716_v2 }
  0xaf   : > { %v584_v18 = vrot.slane %v18181_v40, %v17991_v11  ;;  %v606_v1 = vrot.slane %v18194_v42, %v17991_v11  ;;  %v19427_v28 = vcombine.low %v18081_v61, %v18083_v63  ;;  %v19428_v57 = vcombine.high %v18085_v0, %v18095_v9 }
  0xb0   : > { %3140 = vmatpush2.bf16.msra.mxu0 %v19426_v17  ;;  %v18314_v58 = vpack.c.b16 %v686_v14, %v686_v14  ;;  %v18316_v54 = vpack.c.b16 %v718_v33, %v718_v33  ;;  %v628_v40 = vrot.slane %v18201_v6, %v17991_v11  ;;  %v636_v42 = vunpack.c.l.b16 %v474_v23  ;;  %v816_v14 = vld [vmem:[#allocation2 + $0x188] sm:$0xff] }
  0xb1   : > { %3181 = vmatpush2.bf16.msra.mxu1 %v19427_v28  ;;  %3141 = vmatprep.subr.bf16.mxu0 %v19428_v57  ;;  %v18323_v51 = vunpack.c.l.b16 %v496_v15  ;;  %v18325_v61 = vunpack.c.l.b16 %v518_v22  ;;  %v18327_v63 = vunpack.c.l.b16 %v540_v53  ;;  %v18329_v7 = vunpack.c.l.b16 %v562_v16 }
  0xb2   : > { %3182 = vmatprep.subr.bf16.mxu1 %v14142_v3  ;;  %3145 = vmatprep.mubr.bf16.mxu0 %v18314_v58  ;;  %v18337_v6 = vunpack.c.l.b16 %v584_v18  ;;  %v18339_v34 = vunpack.c.l.b16 %v606_v1  ;;  %v691_v3 = vrot.slane %v636_v42, 1  ;;  %v14254_v59 = vcombine.high %v18304_v27, %v18306_v41  ;;  %v820_v1 = vld [vmem:[#allocation2 + $0x1a8] sm:$0xff] }
  0xb3   : > { %3186 = vmatprep.mubr.bf16.mxu1 %v18316_v54  ;;  %v18346_v35 = vunpack.c.l.b16 %v628_v40  ;;  %v652_v60 = vrot.slane %v18323_v51, 7  ;;  %v655_v4 = vrot.slane %v18325_v61, 6  ;;  %v658_v39 = vrot.slane %v18327_v63, 5 }
  0xb4   : > { %3142 = vmatpush2.bf16.msra.mxu0 %v14013_v44  ;;  %v19429_v21 = vcombine.high %v18111_v49, %v18113_v25  ;;  %v661_v20 = vrot.slane %v18329_v7, 4  ;;  %v664_v44 = vrot.slane %v18337_v6, 3  ;;  %v692_v0 = vsel %vm653_vm3, %v18323_v51, %v691_v3  ;;  %v1063_v3 = vld [vmem:[#allocation2 + $0x940] sm:$0xff] }
  0xb5   : > { %3183 = vmatpush2.bf16.msra.mxu1 %v14141_v62  ;;  %v14000_v9 = vcombine.high %v18331_v32, %v18333_v26  ;;  %v19430_v46 = vcombine.high %v18128_v24, %v18130_v13  ;;  %v654_v10 = vsel %vm653_vm3, %v652_v60, %v636_v42  ;;  %v693_v12 = vrot.slane %v18325_v61, 7  ;;  %v808_v60 = vld [vmem:[#allocation2 + $0x148] sm:$0xff] }
  0xb6   : > { %3143 = vmatprep.subr.bf16.mxu0 %v19429_v21  ;;  %v695_v62 = vrot.slane %v18327_v63, 6  ;;  %v697_v47 = vrot.slane %v18329_v7, 5  ;;  %v657_v23 = vsel %vm656_vm4, %v655_v4, %v654_v10  ;;  %v667_v29 = vrot.slane %v18339_v34, 2  ;;  %v812_v21 = vld [vmem:[#allocation2 + $0x168] sm:$0xff] }
  0xb7   : > { %3184 = vmatprep.subr.bf16.mxu1 %v19430_v46  ;;  %v699_v48 = vrot.slane %v18337_v6, 4  ;;  %v19431_v56 = vcombine.low %v18111_v49, %v18113_v25  ;;  %v660_v15 = vsel %vm659_vm5, %v658_v39, %v657_v23  ;;  %v670_v22 = vrot.slane %v18346_v35, 1  ;;  %v1071_v49 = vld [vmem:[#allocation2 + $0x980] sm:$0xff]  ;;  %v804_v10 = vld [vmem:[#allocation2 + $0x128] sm:$0xff] }
  0xb8   : > { %v694_v52 = vsel %vm656_vm4, %v693_v12, %v692_v0  ;;  %v701_v2 = vrot.slane %v18339_v34, 3  ;;  %v663_v53 = vsel %vm662_vm6, %v661_v20, %v660_v15  ;;  %v703_v17 = vrot.slane %v18346_v35, 2  ;;  %v1075_v25 = vld [vmem:[#allocation2 + $0x9a0] sm:$0xff] }
  0xb9   : > { %3144 = vmatpush2.bf16.msra.mxu0 %v19431_v56  ;;  %3185 = vmatpush2.bf16.msra.mxu1 %v14133_v50  ;;  %v696_v16 = vsel %vm659_vm5, %v695_v62, %v694_v52  ;;  %v666_v33 = vsel %vm665_vm7, %v664_v44, %v663_v53  ;;  %v14253_v57 = vcombine.low %v18304_v27, %v18306_v41  ;;  %v389_v27 = vsel %vm18049_vm2, %v18035_v37, 0  ;;  %v1055_v44 = vld [vmem:[#allocation2 + $0x900] sm:$0xff] }
  0xba   : > { %3195 = vmatprep.subr.bf16.mxu0 %v14254_v59  ;;  %v698_v18 = vsel %vm662_vm6, %v697_v47, %v696_v16  ;;  %3236 = vmatprep.subr.bf16.mxu1 %v14000_v9  ;;  %v669_v24 = vsel %vm668_vm8, %v667_v29, %v666_v33  ;;  %v13999_v61 = vcombine.low %v18331_v32, %v18333_v26  ;;  %v1067_v59 = vld [vmem:[#allocation2 + $0x960] sm:$0xff]  ;;  %v390_v41 = vsel %vm18049_vm2, %v18037_v38, 0  ;;  %v800_v9 = vld [vmem:[#allocation2 + $0x108] sm:$0xff] }
  0xbb   : > { %v700_v13 = vsel %vm665_vm7, %v699_v48, %v698_v18  ;;  %v672_v50 = vsel %vm671_vm9, %v670_v22, %v669_v24  ;;  %v14246_v63 = vcombine.high %v1071_v49, %v1075_v25  ;;  %v13992_v39 = vcombine.high %v816_v14, %v820_v1  ;;  %v1059_v0 = vld [vmem:[#allocation2 + $0x920] sm:$0xff]  ;;  %v784_v24 = vld [vmem:[#allocation2 + $0x88] sm:$0xff] }
  0xbc   : > { %v702_v28 = vsel %vm668_vm8, %v701_v2, %v700_v13  ;;  %v18400_v40 = vpack.c.b16 %v672_v50, %v672_v50  ;;  %v14245_v32 = vcombine.low %v1071_v49, %v1075_v25  ;;  %v13991_v26 = vcombine.low %v816_v14, %v820_v1  ;;  %v1047_v16 = vld [vmem:[#allocation2 + $0x8c0] sm:$0xff]  ;;  %v796_v49 = vld [vmem:[#allocation2 + $0xe8] sm:$0xff] }
  0xbd   : > { %v704_v42 = vsel %vm671_vm9, %v703_v17, %v702_v28  ;;  %v14238_v20 = vcombine.high %v1063_v3, %v1067_v59  ;;  %v13984_v46 = vcombine.high %v808_v60, %v812_v21  ;;  %v445_v23 = vcombine.low %v389_v27, %v390_v41  ;;  %v1039_v1 = vld [vmem:[#allocation2 + $0x880] sm:$0xff] }
  0xbe   : > { %v18407_v4 = vpack.c.b16 %v704_v42, %v704_v42  ;;  %3146 = vmatmul.mubr.bf16.vlgmr.msra.gmra.mxu0 %v18400_v40  ;;  %v755_v37 = vsel %vm653_vm3, %v18241_v31, %v18226_v30  ;;  %v747_v38 = vsel %vm653_vm3, %v693_v12, %v18323_v51  ;;  %v14237_v29 = vcombine.low %v1063_v3, %v1067_v59  ;;  %v1051_v30 = vld [vmem:[#allocation2 + $0x8e0] sm:$0xff]  ;;  %v792_v31 = vld [vmem:[#allocation2 + $0xc8] sm:$0xff] }
  0xbf   : > { %3196 = vmatpush1.bf16.msra.mxu0 %v14253_v57  ;;  %v452_v56 = vrot.slane %v445_v23, %v17991_v11  ;;  %v756_v15 = vsel %vm656_vm4, %v18247_v36, %v755_v37  ;;  %v748_v22 = vsel %vm656_vm4, %v695_v62, %v747_v38  ;;  %v13983_v52 = vcombine.low %v808_v60, %v812_v21  ;;  %v1043_v6 = vld [vmem:[#allocation2 + $0x8a0] sm:$0xff]  ;;  %v776_v3 = vld [vmem:[#allocation2 + $0x48] sm:$0xff] }
  0xc0   : > { %3187 = vmatmul.mubr.bf16.vlgmr.msra.gmra.mxu1 %v18407_v4  ;;  %3197 = vmatprep.subr.bf16.mxu0 %v14246_v63  ;;  %v14230_v53 = vcombine.high %v1055_v44, %v1059_v0  ;;  %v749_v51 = vsel %vm659_vm5, %v697_v47, %v748_v22  ;;  %v13976_v12 = vcombine.high %v800_v9, %v804_v10  ;;  %v1031_v63 = vld [vmem:[#allocation2 + $0x840] sm:$0xff]  ;;  %v780_v60 = vld [vmem:[#allocation2 + $0x68] sm:$0xff] }
  0xc1   : > { %3237 = vmatpush1.bf16.msra.mxu1 %v13999_v61  ;;  %3268 = vmatprep.mubr.bf16.mxu1 %v18314_v58  ;;  %v459_v25 = vrot.slane %v452_v56, %v17991_v11  ;;  %v757_v36 = vsel %vm659_vm5, %v18252_v19, %v756_v15  ;;  %v750_v62 = vsel %vm662_vm6, %v699_v48, %v749_v51  ;;  %v1143_v56 = vld [vmem:[#allocation2 + $0xbc0] sm:$0xff]  ;;  %v888_v22 = vld [vmem:[#allocation2 + $0x3c8] sm:$0xff] }
  0xc2   : > { %3238 = vmatprep.subr.bf16.mxu1 %v13992_v39  ;;  %v751_v14 = vsel %vm665_vm7, %v701_v2, %v750_v62  ;;  %v14229_v7 = vcombine.low %v1055_v44, %v1059_v0  ;;  %v13975_v18 = vcombine.low %v800_v9, %v804_v10  ;;  %v14222_v19 = vcombine.high %v1047_v16, %v1051_v30  ;;  %v788_v2 = vld [vmem:[#allocation2 + $0xa8] sm:$0xff]  ;;  %v1023_v44 = vld [vmem:[#allocation2 + $0x800] sm:$0xff] }
  0xc3   : > { %3198 = vmatpush1.bf16.msra.mxu0 %v14245_v32  ;;  %v729_v47 = vrot.slane %v459_v25, %v17991_v11  ;;  %v752_v33 = vsel %vm668_vm8, %v703_v17, %v751_v14  ;;  %v758_v34 = vsel %vm662_vm6, %v18260_v45, %v757_v36  ;;  %v13968_v48 = vcombine.high %v792_v31, %v796_v49  ;;  %v1035_v45 = vld [vmem:[#allocation2 + $0x860] sm:$0xff]  ;;  %v768_v9 = vld [vmem:[#allocation2 + $0x8] sm:$0xff] }
  0xc4   : > { %3199 = vmatprep.subr.bf16.mxu0 %v14238_v20  ;;  %v14221_v35 = vcombine.low %v1047_v16, %v1051_v30  ;;  %v759_v28 = vsel %vm665_vm7, %v18262_v8, %v758_v34  ;;  %v13967_v42 = vcombine.low %v792_v31, %v796_v49  ;;  %v14214_v61 = vcombine.high %v1039_v1, %v1043_v6  ;;  %v1027_v0 = vld [vmem:[#allocation2 + $0x820] sm:$0xff]  ;;  %v772_v10 = vld [vmem:[#allocation2 + $0x28] sm:$0xff] }
  0xc5   : > { %3239 = vmatpush1.bf16.msra.mxu1 %v13991_v26  ;;  %v730_v13 = vcombine.high %v729_v47, %v729_v47  ;;  %v737_v50 = vrot.slane %v729_v47, %v17991_v11  ;;  %v13960_v59 = vcombine.high %v784_v24, %v788_v2  ;;  %v760_v27 = vsel %vm668_vm8, %v18273_v5, %v759_v28  ;;  %v1147_v15 = vld [vmem:[#allocation2 + $0xbe0] sm:$0xff]  ;;  %v880_v49 = vld [vmem:[#allocation2 + $0x388] sm:$0xff] }
  0xc6   : > { %3240 = vmatprep.subr.bf16.mxu1 %v13984_v46  ;;  %v14213_v41 = vcombine.low %v1039_v1, %v1043_v6  ;;  %v13959_v26 = vcombine.low %v784_v24, %v788_v2  ;;  %v14206_v20 = vcombine.high %v1031_v63, %v1035_v45  ;;  %v13952_v46 = vcombine.high %v776_v3, %v780_v60  ;;  %v1135_v51 = vld [vmem:[#allocation2 + $0xb80] sm:$0xff]  ;;  %v884_v36 = vld [vmem:[#allocation2 + $0x3a8] sm:$0xff] }
  0xc7   : > { %3200 = vmatpush1.bf16.msra.mxu0 %v14237_v29  ;;  %v744_v17 = vrot.slane %v730_v13, %v17991_v11  ;;  %v745_v57 = vunpack.c.l.b16 %v737_v50  ;;  %v14205_v5 = vcombine.low %v1031_v63, %v1035_v45  ;;  %v13951_v38 = vcombine.low %v776_v3, %v780_v60  ;;  %v1127_v47 = vld [vmem:[#allocation2 + $0xb40] sm:$0xff]  ;;  %v876_v1 = vld [vmem:[#allocation2 + $0x368] sm:$0xff] }
  0xc8   : > { %3201 = vmatprep.subr.bf16.mxu0 %v14230_v53  ;;  %v14198_v29 = vcombine.high %v1023_v44, %v1027_v0  ;;  %v892_v53 = vld [vmem:[#allocation2 + $0x3e8] sm:$0xff]  ;;  %v14197_v16 = vcombine.low %v1023_v44, %v1027_v0  ;;  %v13943_v30 = vcombine.low %v768_v9, %v772_v10  ;;  %v14318_v31 = vcombine.high %v1143_v56, %v1147_v15  ;;  %v1123_v2 = vld [vmem:[#allocation2 + $0xb20] sm:$0xff] }
  0xc9   : > { %3241 = vmatpush1.bf16.msra.mxu1 %v13983_v52  ;;  %v746_v39 = vunpack.c.l.b16 %v744_v17  ;;  %v753_v21 = vrot.slane %v745_v57, 1  ;;  %v13944_v52 = vcombine.high %v768_v9, %v772_v10  ;;  %v14064_v25 = vcombine.high %v888_v22, %v892_v53  ;;  %v864_v13 = vld [vmem:[#allocation2 + $0x308] sm:$0xff]  ;;  %v1095_v9 = vld [vmem:[#allocation2 + $0xa40] sm:$0xff] }
  0xca   : > { %3242 = vmatprep.subr.bf16.mxu1 %v13976_v12  ;;  %v1139_v12 = vld [vmem:[#allocation2 + $0xba0] sm:$0xff]  ;;  %v14317_v62 = vcombine.low %v1143_v56, %v1147_v15  ;;  %v14063_v14 = vcombine.low %v888_v22, %v892_v53  ;;  %v14055_v24 = vcombine.low %v880_v49, %v884_v36  ;;  %v856_v63 = vld [vmem:[#allocation2 + $0x2c8] sm:$0xff] }
  0xcb   : > { %3202 = vmatpush1.bf16.msra.mxu0 %v14229_v7  ;;  %v761_v32 = vrot.slane %v746_v39, 1  ;;  %v18452_v8 = vsel %vm671_vm9, %v753_v21, %v752_v33  ;;  %v14310_v7 = vcombine.high %v1135_v51, %v1139_v12  ;;  %v1131_v33 = vld [vmem:[#allocation2 + $0xb60] sm:$0xff]  ;;  %v14309_v6 = vcombine.low %v1135_v51, %v1139_v12  ;;  %v860_v3 = vld [vmem:[#allocation2 + $0x2e8] sm:$0xff] }
  0xcc   : > { %3203 = vmatprep.subr.bf16.mxu0 %v14222_v19  ;;  %v14056_v19 = vcombine.high %v880_v49, %v884_v36  ;;  %v14302_v34 = vcombine.high %v1127_v47, %v1131_v33  ;;  %v14301_v17 = vcombine.low %v1127_v47, %v1131_v33  ;;  %v1103_v21 = vld [vmem:[#allocation2 + $0xa80] sm:$0xff]  ;;  %v14031_v44 = vcombine.low %v856_v63, %v860_v3  ;;  %v840_v10 = vld [vmem:[#allocation2 + $0x248] sm:$0xff] }
  0xcd   : > { %3243 = vmatpush1.bf16.msra.mxu1 %v13975_v18  ;;  %v762_v23 = vsel %vm671_vm9, %v761_v32, %v760_v27  ;;  %v872_v18 = vld [vmem:[#allocation2 + $0x348] sm:$0xff]  ;;  %v1107_v27 = vld [vmem:[#allocation2 + $0xaa0] sm:$0xff]  ;;  %v14032_v32 = vcombine.high %v856_v63, %v860_v3 }
  0xce   : > { %3244 = vmatprep.subr.bf16.mxu1 %v13968_v48  ;;  %v18455_v37 = vpack.c.b16 %v762_v23, %v762_v23  ;;  %v1119_v48 = vld [vmem:[#allocation2 + $0xb00] sm:$0xff]  ;;  %v14048_v50 = vcombine.high %v872_v18, %v876_v1  ;;  %v14047_v28 = vcombine.low %v872_v18, %v876_v1  ;;  %v14278_v0 = vcombine.high %v1103_v21, %v1107_v27  ;;  %v952_v12 = vld [vmem:[#allocation2 + $0x5c8] sm:$0xff] }
  0xcf   : > { %3204 = vmatpush1.bf16.msra.mxu0 %v14221_v35  ;;  %v868_v35 = vld [vmem:[#allocation2 + $0x328] sm:$0xff]  ;;  %v14294_v57 = vcombine.high %v1119_v48, %v1123_v2  ;;  %v1087_v15 = vld [vmem:[#allocation2 + $0xa00] sm:$0xff] }
  0xd0   : > { %3205 = vmatprep.subr.bf16.mxu0 %v14214_v61  ;;  %3227 = vmatprep.mubr.bf16.mxu0 %v18455_v37  ;;  %v1115_v61 = vld [vmem:[#allocation2 + $0xae0] sm:$0xff]  ;;  %v14040_v45 = vcombine.high %v864_v13, %v868_v35  ;;  %v14039_v60 = vcombine.low %v864_v13, %v868_v35  ;;  %v956_v49 = vld [vmem:[#allocation2 + $0x5e8] sm:$0xff] }
  0xd1   : > { %3245 = vmatpush1.bf16.msra.mxu1 %v13967_v42  ;;  %v1111_v42 = vld [vmem:[#allocation2 + $0xac0] sm:$0xff]  ;;  %v14128_v47 = vcombine.high %v952_v12, %v956_v49  ;;  %v944_v33 = vld [vmem:[#allocation2 + $0x588] sm:$0xff] }
  0xd2   : > { %3246 = vmatprep.subr.bf16.mxu1 %v13960_v59  ;;  %v14293_v59 = vcombine.low %v1119_v48, %v1123_v2  ;;  %v14286_v39 = vcombine.high %v1111_v42, %v1115_v61  ;;  %v1091_v22 = vld [vmem:[#allocation2 + $0xa20] sm:$0xff]  ;;  %v948_v18 = vld [vmem:[#allocation2 + $0x5a8] sm:$0xff] }
  0xd3   : > { %3206 = vmatpush1.bf16.msra.mxu0 %v14213_v41  ;;  %v848_v41 = vld [vmem:[#allocation2 + $0x288] sm:$0xff]  ;;  %v14262_v51 = vcombine.high %v1087_v15, %v1091_v22  ;;  %v14120_v2 = vcombine.high %v944_v33, %v948_v18 }
  0xd4   : > { %3207 = vmatprep.subr.bf16.mxu0 %v14206_v20  ;;  %v14285_v20 = vcombine.low %v1111_v42, %v1115_v61  ;;  %v936_v13 = vld [vmem:[#allocation2 + $0x548] sm:$0xff] }
  0xd5   : > { %3247 = vmatpush1.bf16.msra.mxu1 %v13959_v26  ;;  %v852_v26 = vld [vmem:[#allocation2 + $0x2a8] sm:$0xff] }
  0xd6   : > { %3248 = vmatprep.subr.bf16.mxu1 %v13952_v46  ;;  %v1099_v46 = vld [vmem:[#allocation2 + $0xa60] sm:$0xff]  ;;  %v14024_v23 = vcombine.high %v848_v41, %v852_v26  ;;  %v928_v61 = vld [vmem:[#allocation2 + $0x508] sm:$0xff] }
  0xd7   : > { %3208 = vmatpush1.bf16.msra.mxu0 %v14205_v5  ;;  %v844_v5 = vld [vmem:[#allocation2 + $0x268] sm:$0xff]  ;;  %v14270_v56 = vcombine.high %v1095_v9, %v1099_v46 }
  0xd8   : > { %3209 = vmatprep.subr.bf16.mxu0 %v14198_v29  ;;  %v14023_v29 = vcombine.low %v848_v41, %v852_v26  ;;  %v14016_v53 = vcombine.high %v840_v10, %v844_v5  ;;  %v932_v63 = vld [vmem:[#allocation2 + $0x528] sm:$0xff] }
  0xd9   : > { %3249 = vmatpush1.bf16.msra.mxu1 %v13951_v38  ;;  %v14277_v38 = vcombine.low %v1103_v21, %v1107_v27  ;;  %v14104_v21 = vcombine.high %v928_v61, %v932_v63  ;;  %v920_v27 = vld [vmem:[#allocation2 + $0x4c8] sm:$0xff] }
  0xda   : > { %3250 = vmatprep.subr.bf16.mxu1 %v13944_v52  ;;  %v832_v52 = vld [vmem:[#allocation2 + $0x208] sm:$0xff] }
  0xdb   : > { %3210 = vmatpush1.bf16.msra.mxu0 %v14197_v16  ;;  %v836_v16 = vld [vmem:[#allocation2 + $0x228] sm:$0xff] }
  0xdc   : > { %3211 = vmatprep.subr.bf16.mxu0 %v14318_v31  ;;  %v14015_v31 = vcombine.low %v840_v10, %v844_v5  ;;  %v14008_v36 = vcombine.high %v832_v52, %v836_v16  ;;  %v924_v41 = vld [vmem:[#allocation2 + $0x4e8] sm:$0xff] }
  0xdd   : > { %3251 = vmatpush1.bf16.msra.mxu1 %v13943_v30  ;;  %v14269_v30 = vcombine.low %v1095_v9, %v1099_v46  ;;  %v14096_v9 = vcombine.high %v920_v27, %v924_v41  ;;  %v912_v46 = vld [vmem:[#allocation2 + $0x488] sm:$0xff] }
  0xde   : > { %3252 = vmatprep.subr.bf16.mxu1 %v14064_v25  ;;  %v1080_v25 = vld [vmem:[#allocation2 + $0x9c8] sm:$0xff] }
  0xdf   : > { %3212 = vmatpush2.bf16.msra.mxu0 %v14317_v62  ;;  %v1084_v62 = vld [vmem:[#allocation2 + $0x9e8] sm:$0xff] }
  0xe0   : > { %3213 = vmatprep.subr.bf16.mxu0 %v14310_v7  ;;  %v14007_v7 = vcombine.low %v832_v52, %v836_v16  ;;  %v14256_v1 = vcombine.high %v1080_v25, %v1084_v62  ;;  %v14255_v48 = vcombine.low %v1080_v25, %v1084_v62  ;;  %v916_v10 = vld [vmem:[#allocation2 + $0x4a8] sm:$0xff] }
  0xe1   : > { %3253 = vmatpush2.bf16.msra.mxu1 %v14063_v14  ;;  %v14261_v14 = vcombine.low %v1087_v15, %v1091_v22  ;;  %v14088_v15 = vcombine.high %v912_v46, %v916_v10  ;;  %v904_v22 = vld [vmem:[#allocation2 + $0x448] sm:$0xff] }
  0xe2   : > { %3254 = vmatprep.subr.bf16.mxu1 %v14056_v19  ;;  %v1072_v19 = vld [vmem:[#allocation2 + $0x988] sm:$0xff] }
  0xe3   : > { %3214 = vmatpush2.bf16.msra.mxu0 %v14309_v6  ;;  %v1076_v6 = vld [vmem:[#allocation2 + $0x9a8] sm:$0xff] }
  0xe4   : > { %3215 = vmatprep.subr.bf16.mxu0 %v14302_v34  ;;  %v14127_v34 = vcombine.low %v952_v12, %v956_v49  ;;  %v14248_v35 = vcombine.high %v1072_v19, %v1076_v6  ;;  %v908_v52 = vld [vmem:[#allocation2 + $0x468] sm:$0xff] }
  0xe5   : > { %3255 = vmatpush2.bf16.msra.mxu1 %v14055_v24  ;;  %v18460_v24 = vpack.c.b16 %v18452_v8, %v18452_v8  ;;  %v14247_v8 = vcombine.low %v1072_v19, %v1076_v6  ;;  %v14080_v12 = vcombine.high %v904_v22, %v908_v52  ;;  %v896_v49 = vld [vmem:[#allocation2 + $0x408] sm:$0xff] }
  0xe6   : > { %3256 = vmatprep.subr.bf16.mxu1 %v14048_v50  ;;  %v940_v50 = vld [vmem:[#allocation2 + $0x568] sm:$0xff] }
  0xe7   : > { %3216 = vmatpush2.bf16.msra.mxu0 %v14301_v17  ;;  %v1064_v17 = vld [vmem:[#allocation2 + $0x948] sm:$0xff]  ;;  %v14112_v42 = vcombine.high %v936_v13, %v940_v50 }
  0xe8   : > { %3217 = vmatprep.subr.bf16.mxu0 %v14294_v57  ;;  %v14119_v57 = vcombine.low %v944_v33, %v948_v18  ;;  %v900_v25 = vld [vmem:[#allocation2 + $0x428] sm:$0xff] }
  0xe9   : > { %3257 = vmatpush2.bf16.msra.mxu1 %v14047_v28  ;;  %v1068_v28 = vld [vmem:[#allocation2 + $0x968] sm:$0xff]  ;;  %v14072_v33 = vcombine.high %v896_v49, %v900_v25 }
  0xea   : > { %3258 = vmatprep.subr.bf16.mxu1 %v14040_v45  ;;  %v1056_v45 = vld [vmem:[#allocation2 + $0x908] sm:$0xff]  ;;  %v14240_v3 = vcombine.high %v1064_v17, %v1068_v28 }
  0xeb   : > { %3218 = vmatpush2.bf16.msra.mxu0 %v14293_v59  ;;  %v1060_v59 = vld [vmem:[#allocation2 + $0x928] sm:$0xff] }
  0xec   : > { %3219 = vmatprep.subr.bf16.mxu0 %v14286_v39  ;;  %v14239_v39 = vcombine.low %v1064_v17, %v1068_v28  ;;  %v14232_v26 = vcombine.high %v1056_v45, %v1060_v59  ;;  %v1016_v18 = vld [vmem:[#allocation2 + $0x7c8] sm:$0xff] }
  0xed   : > { %3259 = vmatpush2.bf16.msra.mxu1 %v14039_v60  ;;  %v14111_v60 = vcombine.low %v936_v13, %v940_v50  ;;  %v1020_v19 = vld [vmem:[#allocation2 + $0x7e8] sm:$0xff] }
  0xee   : > { %3260 = vmatprep.subr.bf16.mxu1 %v14032_v32  ;;  %v1048_v32 = vld [vmem:[#allocation2 + $0x8c8] sm:$0xff]  ;;  %v14192_v13 = vcombine.high %v1016_v18, %v1020_v19 }
  0xef   : > { %3220 = vmatpush2.bf16.msra.mxu0 %v14285_v20  ;;  %v1052_v20 = vld [vmem:[#allocation2 + $0x8e8] sm:$0xff] }
  0xf0   : > { %3221 = vmatprep.subr.bf16.mxu0 %v14278_v0  ;;  %v14231_v0 = vcombine.low %v1056_v45, %v1060_v59  ;;  %v14224_v5 = vcombine.high %v1048_v32, %v1052_v20  ;;  %v1008_v50 = vld [vmem:[#allocation2 + $0x788] sm:$0xff] }
  0xf1   : > { %3261 = vmatpush2.bf16.msra.mxu1 %v14031_v44  ;;  %v14103_v44 = vcombine.low %v928_v61, %v932_v63  ;;  %v1136_v17 = vld [vmem:[#allocation2 + $0xb88] sm:$0xff] }
  0xf2   : > { %3262 = vmatprep.subr.bf16.mxu1 %v14024_v23  ;;  %v1040_v23 = vld [vmem:[#allocation2 + $0x888] sm:$0xff] }
  0xf3   : > { %3222 = vmatpush2.bf16.msra.mxu0 %v14277_v38  ;;  %v1044_v38 = vld [vmem:[#allocation2 + $0x8a8] sm:$0xff] }
  0xf4   : > { %3223 = vmatprep.subr.bf16.mxu0 %v14270_v56  ;;  %v14223_v56 = vcombine.low %v1048_v32, %v1052_v20  ;;  %v14216_v16 = vcombine.high %v1040_v23, %v1044_v38  ;;  %v1000_v63 = vld [vmem:[#allocation2 + $0x748] sm:$0xff] }
  0xf5   : > { %3263 = vmatpush2.bf16.msra.mxu1 %v14023_v29  ;;  %v14095_v29 = vcombine.low %v920_v27, %v924_v41  ;;  %v1004_v45 = vld [vmem:[#allocation2 + $0x768] sm:$0xff] }
  0xf6   : > { %3264 = vmatprep.subr.bf16.mxu1 %v14016_v53  ;;  %v1032_v53 = vld [vmem:[#allocation2 + $0x848] sm:$0xff]  ;;  %v14176_v27 = vcombine.high %v1000_v63, %v1004_v45 }
  0xf7   : > { %3224 = vmatpush2.bf16.msra.mxu0 %v14269_v30  ;;  %v1036_v30 = vld [vmem:[#allocation2 + $0x868] sm:$0xff] }
  0xf8   : > { %3225 = vmatprep.subr.bf16.mxu0 %v14262_v51  ;;  %v14215_v51 = vcombine.low %v1040_v23, %v1044_v38  ;;  %v14208_v62 = vcombine.high %v1032_v53, %v1036_v30  ;;  %v992_v41 = vld [vmem:[#allocation2 + $0x708] sm:$0xff] }
  0xf9   : > { %3265 = vmatpush2.bf16.msra.mxu1 %v14015_v31  ;;  %v14087_v31 = vcombine.low %v912_v46, %v916_v10  ;;  %v996_v32 = vld [vmem:[#allocation2 + $0x728] sm:$0xff] }
  0xfa   : > { %3266 = vmatprep.subr.bf16.mxu1 %v14008_v36  ;;  %v1024_v36 = vld [vmem:[#allocation2 + $0x808] sm:$0xff]  ;;  %v14168_v46 = vcombine.high %v992_v41, %v996_v32 }
  0xfb   : > { %3226 = vmatpush2.bf16.msra.mxu0 %v14261_v14  ;;  %v1028_v14 = vld [vmem:[#allocation2 + $0x828] sm:$0xff] }
  0xfc   : > { %3277 = vmatprep.subr.bf16.mxu0 %v14128_v47  ;;  %v14207_v47 = vcombine.low %v1032_v53, %v1036_v30  ;;  %v14200_v6 = vcombine.high %v1024_v36, %v1028_v14  ;;  %v984_v10 = vld [vmem:[#allocation2 + $0x6c8] sm:$0xff] }
  0xfd   : > { %3267 = vmatpush2.bf16.msra.mxu1 %v14007_v7  ;;  %v14079_v7 = vcombine.low %v904_v22, %v908_v52  ;;  %v988_v23 = vld [vmem:[#allocation2 + $0x6e8] sm:$0xff] }
  0xfe   : > { %3318 = vmatprep.subr.bf16.mxu1 %v14256_v1  ;;  %3228 = vmatmul.mubr.bf16.vlgmr.msra.gmra.mxu0 %v18460_v24  ;;  %v1144_v1 = vld [vmem:[#allocation2 + $0xbc8] sm:$0xff]  ;;  %v14160_v22 = vcombine.high %v984_v10, %v988_v23 }
  0xff   : > { %3278 = vmatpush1.bf16.msra.mxu0 %v14127_v34  ;;  %3309 = vmatprep.mubr.bf16.mxu0 %v18316_v54  ;;  %v1148_v34 = vld [vmem:[#allocation2 + $0xbe8] sm:$0xff] }
 0x100   : > { %3269 = vmatmul.mubr.bf16.vlgmr.msra.gmra.mxu1 %v18400_v40  ;;  %3279 = vmatprep.subr.bf16.mxu0 %v14120_v2  ;;  %v14199_v2 = vcombine.low %v1024_v36, %v1028_v14  ;;  %v14320_v28 = vcombine.high %v1144_v1, %v1148_v34  ;;  %v976_v52 = vld [vmem:[#allocation2 + $0x688] sm:$0xff] }
 0x101   : > { %3319 = vmatpush1.bf16.msra.mxu1 %v14255_v48  ;;  %3350 = vmatprep.mubr.bf16.mxu1 %v18455_v37  ;;  %v14071_v48 = vcombine.low %v896_v49, %v900_v25  ;;  %v980_v53 = vld [vmem:[#allocation2 + $0x6a8] sm:$0xff] }
 0x102   : > { %3320 = vmatprep.subr.bf16.mxu1 %v14248_v35  ;;  %v1012_v35 = vld [vmem:[#allocation2 + $0x7a8] sm:$0xff]  ;;  %v14152_v49 = vcombine.high %v976_v52, %v980_v53 }
 0x103   : > { %3280 = vmatpush1.bf16.msra.mxu0 %v14119_v57  ;;  %v1140_v57 = vld [vmem:[#allocation2 + $0xba8] sm:$0xff]  ;;  %v14184_v61 = vcombine.high %v1008_v50, %v1012_v35 }
 0x104   : > { %3281 = vmatprep.subr.bf16.mxu0 %v14112_v42  ;;  %v14319_v42 = vcombine.low %v1144_v1, %v1148_v34  ;;  %v14312_v59 = vcombine.high %v1136_v17, %v1140_v57  ;;  %v968_v25 = vld [vmem:[#allocation2 + $0x648] sm:$0xff] }
 0x105   : > { %3321 = vmatpush1.bf16.msra.mxu1 %v14247_v8  ;;  %v14191_v8 = vcombine.low %v1016_v18, %v1020_v19  ;;  %v972_v36 = vld [vmem:[#allocation2 + $0x668] sm:$0xff] }
 0x106   : > { %3322 = vmatprep.subr.bf16.mxu1 %v14240_v3  ;;  %v1128_v3 = vld [vmem:[#allocation2 + $0xb48] sm:$0xff]  ;;  %v14144_v18 = vcombine.high %v968_v25, %v972_v36 }
 0x107   : > { %3282 = vmatpush1.bf16.msra.mxu0 %v14111_v60  ;;  %v1132_v60 = vld [vmem:[#allocation2 + $0xb68] sm:$0xff] }
 0x108   : > { %3283 = vmatprep.subr.bf16.mxu0 %v14104_v21  ;;  %v14311_v21 = vcombine.low %v1136_v17, %v1140_v57  ;;  %v14304_v20 = vcombine.high %v1128_v3, %v1132_v60  ;;  %v960_v19 = vld [vmem:[#allocation2 + $0x608] sm:$0xff]  ;;  %v829_v17 = vld [vmem:[#allocation2 + $0x1f0] sm:$0xff] }
 0x109   : > { %3323 = vmatpush1.bf16.msra.mxu1 %v14239_v39  ;;  %v14183_v39 = vcombine.low %v1008_v50, %v1012_v35  ;;  %v964_v1 = vld [vmem:[#allocation2 + $0x628] sm:$0xff]  ;;  %v825_v35 = vld [vmem:[#allocation2 + $0x1d0] sm:$0xff] }
 0x10a   : > { %3324 = vmatprep.subr.bf16.mxu1 %v14232_v26  ;;  %v1120_v26 = vld [vmem:[#allocation2 + $0xb08] sm:$0xff]  ;;  %v14136_v50 = vcombine.high %v960_v19, %v964_v1 }
 0x10b   : > { %3284 = vmatpush1.bf16.msra.mxu0 %v14103_v44  ;;  %v1124_v44 = vld [vmem:[#allocation2 + $0xb28] sm:$0xff] }
 0x10c   : > { %3285 = vmatprep.subr.bf16.mxu0 %v14096_v9  ;;  %v14303_v9 = vcombine.low %v1128_v3, %v1132_v60  ;;  %v14296_v38 = vcombine.high %v1120_v26, %v1124_v44  ;;  %v821_v3 = vld [vmem:[#allocation2 + $0x1b0] sm:$0xff] }
 0x10d   : > { %3325 = vmatpush1.bf16.msra.mxu1 %v14231_v0  ;;  %v14175_v0 = vcombine.low %v1000_v63, %v1004_v45  ;;  %v14002_v63 = vcombine.high %v825_v35, %v829_v17  ;;  %v817_v45 = vld [vmem:[#allocation2 + $0x190] sm:$0xff] }
 0x10e   : > { %3326 = vmatprep.subr.bf16.mxu1 %v14224_v5  ;;  %v1112_v5 = vld [vmem:[#allocation2 + $0xac8] sm:$0xff] }
 0x10f   : > { %3286 = vmatpush1.bf16.msra.mxu0 %v14095_v29  ;;  %v1116_v29 = vld [vmem:[#allocation2 + $0xae8] sm:$0xff] }
 0x110   : > { %3287 = vmatprep.subr.bf16.mxu0 %v14088_v15  ;;  %v14295_v15 = vcombine.low %v1120_v26, %v1124_v44  ;;  %v14288_v30 = vcombine.high %v1112_v5, %v1116_v29  ;;  %v813_v26 = vld [vmem:[#allocation2 + $0x170] sm:$0xff] }
 0x111   : > { %3327 = vmatpush1.bf16.msra.mxu1 %v14223_v56  ;;  %v14167_v56 = vcombine.low %v992_v41, %v996_v32  ;;  %v13994_v41 = vcombine.high %v817_v45, %v821_v3  ;;  %v809_v32 = vld [vmem:[#allocation2 + $0x150] sm:$0xff] }
 0x112   : > { %3328 = vmatprep.subr.bf16.mxu1 %v14216_v16  ;;  %v1104_v16 = vld [vmem:[#allocation2 + $0xa88] sm:$0xff] }
 0x113   : > { %3288 = vmatpush1.bf16.msra.mxu0 %v14087_v31  ;;  %v1108_v31 = vld [vmem:[#allocation2 + $0xaa8] sm:$0xff] }
 0x114   : > { %3289 = vmatprep.subr.bf16.mxu0 %v14080_v12  ;;  %v14287_v12 = vcombine.low %v1112_v5, %v1116_v29  ;;  %v14280_v14 = vcombine.high %v1104_v16, %v1108_v31  ;;  %v805_v5 = vld [vmem:[#allocation2 + $0x130] sm:$0xff] }
 0x115   : > { %3329 = vmatpush1.bf16.msra.mxu1 %v14215_v51  ;;  %v14159_v51 = vcombine.low %v984_v10, %v988_v23  ;;  %v13986_v10 = vcombine.high %v809_v32, %v813_v26  ;;  %v801_v23 = vld [vmem:[#allocation2 + $0x110] sm:$0xff] }
 0x116   : > { %3330 = vmatprep.subr.bf16.mxu1 %v14208_v62  ;;  %v1096_v62 = vld [vmem:[#allocation2 + $0xa48] sm:$0xff] }
 0x117   : > { %3290 = vmatpush1.bf16.msra.mxu0 %v14079_v7  ;;  %v1100_v7 = vld [vmem:[#allocation2 + $0xa68] sm:$0xff] }
 0x118   : > { %3291 = vmatprep.subr.bf16.mxu0 %v14072_v33  ;;  %v14279_v33 = vcombine.low %v1104_v16, %v1108_v31  ;;  %v14272_v34 = vcombine.high %v1096_v62, %v1100_v7  ;;  %v797_v16 = vld [vmem:[#allocation2 + $0xf0] sm:$0xff] }
 0x119   : > { %3331 = vmatpush1.bf16.msra.mxu1 %v14207_v47  ;;  %v14151_v47 = vcombine.low %v976_v52, %v980_v53  ;;  %v13978_v52 = vcombine.high %v801_v23, %v805_v5  ;;  %v793_v53 = vld [vmem:[#allocation2 + $0xd0] sm:$0xff] }
 0x11a   : > { %3332 = vmatprep.subr.bf16.mxu1 %v14200_v6  ;;  %v1088_v6 = vld [vmem:[#allocation2 + $0xa08] sm:$0xff] }
 0x11b   : > { %3292 = vmatpush1.bf16.msra.mxu0 %v14071_v48  ;;  %v1092_v48 = vld [vmem:[#allocation2 + $0xa28] sm:$0xff] }
 0x11c   : > { %3293 = vmatprep.subr.bf16.mxu0 %v14192_v13  ;;  %v14271_v13 = vcombine.low %v1096_v62, %v1100_v7  ;;  %v14264_v57 = vcombine.high %v1088_v6, %v1092_v48  ;;  %v789_v62 = vld [vmem:[#allocation2 + $0xb0] sm:$0xff] }
 0x11d   : > { %3333 = vmatpush1.bf16.msra.mxu1 %v14199_v2  ;;  %v14143_v2 = vcombine.low %v968_v25, %v972_v36  ;;  %v13970_v25 = vcombine.high %v793_v53, %v797_v16  ;;  %v785_v36 = vld [vmem:[#allocation2 + $0x90] sm:$0xff] }
 0x11e   : > { %3334 = vmatprep.subr.bf16.mxu1 %v14320_v28  ;;  %v953_v28 = vld [vmem:[#allocation2 + $0x5d0] sm:$0xff] }
 0x11f   : > { %3294 = vmatpush2.bf16.msra.mxu0 %v14191_v8  ;;  %v957_v8 = vld [vmem:[#allocation2 + $0x5f0] sm:$0xff] }
 0x120   : > { %3295 = vmatprep.subr.bf16.mxu0 %v14184_v61  ;;  %v14263_v61 = vcombine.low %v1088_v6, %v1092_v48  ;;  %v14130_v60 = vcombine.high %v953_v28, %v957_v8  ;;  %v781_v6 = vld [vmem:[#allocation2 + $0x70] sm:$0xff] }
 0x121   : > { %3335 = vmatpush2.bf16.msra.mxu1 %v14319_v42  ;;  %v14135_v42 = vcombine.low %v960_v19, %v964_v1  ;;  %v13962_v19 = vcombine.high %v785_v36, %v789_v62  ;;  %v777_v1 = vld [vmem:[#allocation2 + $0x50] sm:$0xff] }
 0x122   : > { %3336 = vmatprep.subr.bf16.mxu1 %v14312_v59  ;;  %v945_v59 = vld [vmem:[#allocation2 + $0x590] sm:$0xff] }
 0x123   : > { %3296 = vmatpush2.bf16.msra.mxu0 %v14183_v39  ;;  %v949_v39 = vld [vmem:[#allocation2 + $0x5b0] sm:$0xff] }
 0x124   : > { %3297 = vmatprep.subr.bf16.mxu0 %v14176_v27  ;;  %v14129_v27 = vcombine.low %v953_v28, %v957_v8  ;;  %v14122_v44 = vcombine.high %v945_v59, %v949_v39  ;;  %v905_v48 = vld [vmem:[#allocation2 + $0x450] sm:$0xff] }
 0x125   : > { %3337 = vmatpush2.bf16.msra.mxu1 %v14311_v21  ;;  %v14001_v21 = vcombine.low %v825_v35, %v829_v17  ;;  %v13954_v35 = vcombine.high %v777_v1, %v781_v6  ;;  %v769_v17 = vld [vmem:[#allocation2 + $0x10] sm:$0xff] }
 0x126   : > { %3338 = vmatprep.subr.bf16.mxu1 %v14304_v20  ;;  %v937_v20 = vld [vmem:[#allocation2 + $0x550] sm:$0xff] }
 0x127   : > { %3298 = vmatpush2.bf16.msra.mxu0 %v14175_v0  ;;  %v941_v0 = vld [vmem:[#allocation2 + $0x570] sm:$0xff] }
 0x128   : > { %3299 = vmatprep.subr.bf16.mxu0 %v14168_v46  ;;  %v14121_v46 = vcombine.low %v945_v59, %v949_v39  ;;  %v14114_v29 = vcombine.high %v937_v20, %v941_v0  ;;  %v773_v28 = vld [vmem:[#allocation2 + $0x30] sm:$0xff] }
 0x129   : > { %3339 = vmatpush2.bf16.msra.mxu1 %v14303_v9  ;;  %v13993_v9 = vcombine.low %v817_v45, %v821_v3  ;;  %v13946_v45 = vcombine.high %v769_v17, %v773_v28  ;;  %v889_v3 = vld [vmem:[#allocation2 + $0x3d0] sm:$0xff] }
 0x12a   : > { %3340 = vmatprep.subr.bf16.mxu1 %v14296_v38  ;;  %v929_v38 = vld [vmem:[#allocation2 + $0x510] sm:$0xff] }
 0x12b   : > { %3300 = vmatpush2.bf16.msra.mxu0 %v14167_v56  ;;  %v933_v56 = vld [vmem:[#allocation2 + $0x530] sm:$0xff] }
 0x12c   : > { %3301 = vmatprep.subr.bf16.mxu0 %v14160_v22  ;;  %v14113_v22 = vcombine.low %v937_v20, %v941_v0  ;;  %v14106_v31 = vcombine.high %v929_v38, %v933_v56  ;;  %v893_v59 = vld [vmem:[#allocation2 + $0x3f0] sm:$0xff] }
 0x12d   : > { %3341 = vmatpush2.bf16.msra.mxu1 %v14295_v15  ;;  %v13985_v15 = vcombine.low %v809_v32, %v813_v26  ;;  %v14066_v32 = vcombine.high %v889_v3, %v893_v59  ;;  %v881_v26 = vld [vmem:[#allocation2 + $0x390] sm:$0xff] }
 0x12e   : > { %3342 = vmatprep.subr.bf16.mxu1 %v14288_v30  ;;  %v921_v30 = vld [vmem:[#allocation2 + $0x4d0] sm:$0xff] }
 0x12f   : > { %3302 = vmatpush2.bf16.msra.mxu0 %v14159_v51  ;;  %v925_v51 = vld [vmem:[#allocation2 + $0x4f0] sm:$0xff] }
 0x130   : > { %3303 = vmatprep.subr.bf16.mxu0 %v14152_v49  ;;  %v14105_v49 = vcombine.low %v929_v38, %v933_v56  ;;  %v14098_v7 = vcombine.high %v921_v30, %v925_v51  ;;  %v885_v20 = vld [vmem:[#allocation2 + $0x3b0] sm:$0xff] }
 0x131   : > { %3343 = vmatpush2.bf16.msra.mxu1 %v14287_v12  ;;  %v13977_v12 = vcombine.low %v801_v23, %v805_v5  ;;  %v14058_v23 = vcombine.high %v881_v26, %v885_v20  ;;  %v873_v5 = vld [vmem:[#allocation2 + $0x350] sm:$0xff] }
 0x132   : > { %3344 = vmatprep.subr.bf16.mxu1 %v14280_v14  ;;  %v913_v14 = vld [vmem:[#allocation2 + $0x490] sm:$0xff] }
 0x133   : > { %3304 = vmatpush2.bf16.msra.mxu0 %v14151_v47  ;;  %v917_v47 = vld [vmem:[#allocation2 + $0x4b0] sm:$0xff] }
 0x134   : > { %3305 = vmatprep.subr.bf16.mxu0 %v14144_v18  ;;  %v14097_v18 = vcombine.low %v921_v30, %v925_v51  ;;  %v877_v38 = vld [vmem:[#allocation2 + $0x370] sm:$0xff] }
 0x135   : > { %3345 = vmatpush2.bf16.msra.mxu1 %v14279_v33  ;;  %v13969_v33 = vcombine.low %v793_v53, %v797_v16  ;;  %v14050_v53 = vcombine.high %v873_v5, %v877_v38  ;;  %v865_v16 = vld [vmem:[#allocation2 + $0x310] sm:$0xff] }
 0x136   : > { %3346 = vmatprep.subr.bf16.mxu1 %v14272_v34  ;;  %v14090_v34 = vcombine.high %v913_v14, %v917_v47  ;;  %v869_v30 = vld [vmem:[#allocation2 + $0x330] sm:$0xff] }
 0x137   : > { %3306 = vmatpush2.bf16.msra.mxu0 %v14143_v2  ;;  %v909_v2 = vld [vmem:[#allocation2 + $0x470] sm:$0xff] }
 0x138   : > { %3307 = vmatprep.subr.bf16.mxu0 %v14136_v50  ;;  %v14089_v50 = vcombine.low %v913_v14, %v917_v47  ;;  %v14082_v8 = vcombine.high %v905_v48, %v909_v2  ;;  %v861_v14 = vld [vmem:[#allocation2 + $0x2f0] sm:$0xff] }
 0x139   : > { %3347 = vmatpush2.bf16.msra.mxu1 %v14271_v13  ;;  %v13961_v13 = vcombine.low %v785_v36, %v789_v62  ;;  %v14042_v36 = vcombine.high %v865_v16, %v869_v30  ;;  %v857_v62 = vld [vmem:[#allocation2 + $0x2d0] sm:$0xff] }
 0x13a   : > { %3348 = vmatprep.subr.bf16.mxu1 %v14264_v57  ;;  %v897_v57 = vld [vmem:[#allocation2 + $0x410] sm:$0xff] }
 0x13b   : > { %3308 = vmatpush2.bf16.msra.mxu0 %v14135_v42  ;;  %v901_v42 = vld [vmem:[#allocation2 + $0x430] sm:$0xff] }
 0x13c   : > { %3359 = vmatprep.subr.bf16.mxu0 %v14002_v63  ;;  %v14081_v63 = vcombine.low %v905_v48, %v909_v2  ;;  %v14074_v39 = vcombine.high %v897_v57, %v901_v42  ;;  %v977_v48 = vld [vmem:[#allocation2 + $0x690] sm:$0xff] }
 0x13d   : > { %3349 = vmatpush2.bf16.msra.mxu1 %v14263_v61  ;;  %v13953_v61 = vcombine.low %v777_v1, %v781_v6  ;;  %v14034_v1 = vcombine.high %v857_v62, %v861_v14  ;;  %v849_v6 = vld [vmem:[#allocation2 + $0x290] sm:$0xff] }
 0x13e   : > { %3400 = vmatprep.subr.bf16.mxu1 %v14130_v60  ;;  %3310 = vmatmul.mubr.bf16.vlgmr.msra.gmra.mxu0 %v18407_v4  ;;  %v1017_v60 = vld [vmem:[#allocation2 + $0x7d0] sm:$0xff] }
 0x13f   : > { %3360 = vmatpush1.bf16.msra.mxu0 %v14001_v21  ;;  %3391 = vmatprep.mubr.bf16.mxu0 %v18314_v58  ;;  %v1021_v21 = vld [vmem:[#allocation2 + $0x7f0] sm:$0xff] }
 0x140   : > { %3351 = vmatmul.mubr.bf16.vlgmr.msra.gmra.mxu1 %v18460_v24  ;;  %3361 = vmatprep.subr.bf16.mxu0 %v13994_v41  ;;  %v14073_v41 = vcombine.low %v897_v57, %v901_v42  ;;  %v14194_v0 = vcombine.high %v1017_v60, %v1021_v21  ;;  %v845_v57 = vld [vmem:[#allocation2 + $0x270] sm:$0xff] }
 0x141   : > { %3401 = vmatpush1.bf16.msra.mxu1 %v14129_v27  ;;  %3432 = vmatprep.mubr.bf16.mxu1 %v18316_v54  ;;  %v13945_v27 = vcombine.low %v769_v17, %v773_v28  ;;  %v841_v28 = vld [vmem:[#allocation2 + $0x250] sm:$0xff] }
 0x142   : > { %3402 = vmatprep.subr.bf16.mxu1 %v14122_v44  ;;  %v1009_v44 = vld [vmem:[#allocation2 + $0x790] sm:$0xff] }
 0x143   : > { %3362 = vmatpush1.bf16.msra.mxu0 %v13993_v9  ;;  %v1013_v9 = vld [vmem:[#allocation2 + $0x7b0] sm:$0xff] }
 0x144   : > { %3363 = vmatprep.subr.bf16.mxu0 %v13986_v10  ;;  %v14193_v10 = vcombine.low %v1017_v60, %v1021_v21  ;;  %v14186_v56 = vcombine.high %v1009_v44, %v1013_v9  ;;  %v837_v60 = vld [vmem:[#allocation2 + $0x230] sm:$0xff] }
 0x145   : > { %3403 = vmatpush1.bf16.msra.mxu1 %v14121_v46  ;;  %v14065_v46 = vcombine.low %v889_v3, %v893_v59  ;;  %v14018_v3 = vcombine.high %v841_v28, %v845_v57  ;;  %v833_v59 = vld [vmem:[#allocation2 + $0x210] sm:$0xff] }
 0x146   : > { %3404 = vmatprep.subr.bf16.mxu1 %v14114_v29  ;;  %v1001_v29 = vld [vmem:[#allocation2 + $0x750] sm:$0xff] }
 0x147   : > { %3364 = vmatpush1.bf16.msra.mxu0 %v13985_v15  ;;  %v1005_v15 = vld [vmem:[#allocation2 + $0x770] sm:$0xff] }
 0x148   : > { %3365 = vmatprep.subr.bf16.mxu0 %v13978_v52  ;;  %v14185_v52 = vcombine.low %v1009_v44, %v1013_v9  ;;  %v14178_v51 = vcombine.high %v1001_v29, %v1005_v15  ;;  %v1085_v44 = vld [vmem:[#allocation2 + $0x9f0] sm:$0xff] }
 0x149   : > { %3405 = vmatpush1.bf16.msra.mxu1 %v14113_v22  ;;  %v14057_v22 = vcombine.low %v881_v26, %v885_v20  ;;  %v14010_v26 = vcombine.high %v833_v59, %v837_v60  ;;  %v1081_v20 = vld [vmem:[#allocation2 + $0x9d0] sm:$0xff] }
 0x14a   : > { %3406 = vmatprep.subr.bf16.mxu1 %v14106_v31  ;;  %v993_v31 = vld [vmem:[#allocation2 + $0x710] sm:$0xff] }
 0x14b   : > { %3366 = vmatpush1.bf16.msra.mxu0 %v13977_v12  ;;  %v997_v12 = vld [vmem:[#allocation2 + $0x730] sm:$0xff] }
 0x14c   : > { %3367 = vmatprep.subr.bf16.mxu0 %v13970_v25  ;;  %v14177_v25 = vcombine.low %v1001_v29, %v1005_v15  ;;  %v14170_v47 = vcombine.high %v993_v31, %v997_v12  ;;  %v14258_v29 = vcombine.high %v1081_v20, %v1085_v44  ;;  %v1077_v15 = vld [vmem:[#allocation2 + $0x9b0] sm:$0xff] }
 0x14d   : > { %3407 = vmatpush1.bf16.msra.mxu1 %v14105_v49  ;;  %v14049_v49 = vcombine.low %v873_v5, %v877_v38  ;;  %v18471_v5 = vsub.s32 0, %v17966_v55 }
 0x14e   : > { %3408 = vmatprep.subr.bf16.mxu1 %v14098_v7  ;;  %v985_v7 = vld [vmem:[#allocation2 + $0x6d0] sm:$0xff] }
 0x14f   : > { %3368 = vmatpush1.bf16.msra.mxu0 %v13969_v33  ;;  %v989_v33 = vld [vmem:[#allocation2 + $0x6f0] sm:$0xff] }
 0x150   : > { %3369 = vmatprep.subr.bf16.mxu0 %v13962_v19  ;;  %v14169_v19 = vcombine.low %v993_v31, %v997_v12  ;;  %v14162_v2 = vcombine.high %v985_v7, %v989_v33  ;;  %v14257_v31 = vcombine.low %v1081_v20, %v1085_v44  ;;  %v1069_v12 = vld [vmem:[#allocation2 + $0x970] sm:$0xff] }
 0x151   : > { %3409 = vmatpush1.bf16.msra.mxu1 %v14097_v18  ;;  %v14041_v18 = vcombine.low %v865_v16, %v869_v30  ;;  %v822_v16 = vld [vmem:[#allocation2 + $0x1b8] sm:$0xff]  ;;  %v1045_v20 = vld [vmem:[#allocation2 + $0x8b0] sm:$0xff] }
 0x152   : > { %3410 = vmatprep.subr.bf16.mxu1 %v14090_v34  ;;  %v853_v34 = vld [vmem:[#allocation2 + $0x2b0] sm:$0xff] }
 0x153   : > { %3370 = vmatpush1.bf16.msra.mxu0 %v13961_v13  ;;  %v981_v13 = vld [vmem:[#allocation2 + $0x6b0] sm:$0xff]  ;;  %v14026_v17 = vcombine.high %v849_v6, %v853_v34 }
 0x154   : > { %3371 = vmatprep.subr.bf16.mxu0 %v13954_v35  ;;  %v14161_v35 = vcombine.low %v985_v7, %v989_v33  ;;  %v14154_v42 = vcombine.high %v977_v48, %v981_v13 }
 0x155   : > { %3411 = vmatpush1.bf16.msra.mxu1 %v14089_v50  ;;  %v14033_v50 = vcombine.low %v857_v62, %v861_v14  ;;  %v814_v62 = vld [vmem:[#allocation2 + $0x178] sm:$0xff] }
 0x156   : > { %3412 = vmatprep.subr.bf16.mxu1 %v14082_v8  ;;  %v969_v8 = vld [vmem:[#allocation2 + $0x650] sm:$0xff] }
 0x157   : > { %3372 = vmatpush1.bf16.msra.mxu0 %v13953_v61  ;;  %v973_v61 = vld [vmem:[#allocation2 + $0x670] sm:$0xff] }
 0x158   : > { %3373 = vmatprep.subr.bf16.mxu0 %v13946_v45  ;;  %v14153_v45 = vcombine.low %v977_v48, %v981_v13  ;;  %v14146_v21 = vcombine.high %v969_v8, %v973_v61  ;;  %v802_v13 = vld [vmem:[#allocation2 + $0x118] sm:$0xff] }
 0x159   : > { %3413 = vmatpush1.bf16.msra.mxu1 %v14081_v63  ;;  %v14025_v63 = vcombine.low %v849_v6, %v853_v34  ;;  %v1061_v6 = vld [vmem:[#allocation2 + $0x930] sm:$0xff] }
 0x15a   : > { %3414 = vmatprep.subr.bf16.mxu1 %v14074_v39  ;;  %v961_v39 = vld [vmem:[#allocation2 + $0x610] sm:$0xff] }
 0x15b   : > { %3374 = vmatpush1.bf16.msra.mxu0 %v13945_v27  ;;  %v965_v27 = vld [vmem:[#allocation2 + $0x630] sm:$0xff] }
 0x15c   : > { %3375 = vmatprep.subr.bf16.mxu0 %v14066_v32  ;;  %v14145_v32 = vcombine.low %v969_v8, %v973_v61  ;;  %v14138_v9 = vcombine.high %v961_v39, %v965_v27  ;;  %v14137_v38 = vcombine.low %v961_v39, %v965_v27  ;;  %v798_v27 = vld [vmem:[#allocation2 + $0xf8] sm:$0xff] }
 0x15d   : > { %3415 = vmatpush1.bf16.msra.mxu1 %v14073_v41  ;;  %v14017_v41 = vcombine.low %v841_v28, %v845_v57 }
 0x15e   : > { %3416 = vmatprep.subr.bf16.mxu1 %v14194_v0  ;;  %v826_v0 = vld [vmem:[#allocation2 + $0x1d8] sm:$0xff] }
 0x15f   : > { %3376 = vmatpush2.bf16.msra.mxu0 %v14065_v46  ;;  %v830_v46 = vld [vmem:[#allocation2 + $0x1f8] sm:$0xff] }
 0x160   : > { %3377 = vmatprep.subr.bf16.mxu0 %v14058_v23  ;;  %v14009_v23 = vcombine.low %v833_v59, %v837_v60 }
 0x161   : > { %3417 = vmatpush2.bf16.msra.mxu1 %v14193_v10  ;;  %v1151_v10 = vld [vmem:[#allocation4] sm:$0xff] }
 0x162   : > { %3418 = vmatprep.subr.bf16.mxu1 %v14186_v56  ;;  %v1073_v56 = vld [vmem:[#allocation2 + $0x990] sm:$0xff]  ;;  %v1156_v30 = vrot.slane %v1151_v10, %v18471_v5 }
 0x163   : > { %3378 = vmatpush2.bf16.msra.mxu0 %v14057_v22  ;;  %v818_v22 = vld [vmem:[#allocation2 + $0x198] sm:$0xff] }
 0x164   : > { %3379 = vmatprep.subr.bf16.mxu0 %v14050_v53  ;;  %v18474_v53 = vsub.s32 1, %v17966_v55  ;;  %v13996_v7 = vcombine.high %v818_v22, %v822_v16  ;;  %v13995_v48 = vcombine.low %v818_v22, %v822_v16  ;;  %v778_v22 = vld [vmem:[#allocation2 + $0x58] sm:$0xff] }
 0x165   : > { %3419 = vmatpush2.bf16.msra.mxu1 %v14185_v52  ;;  %v14004_v52 = vcombine.high %v826_v0, %v830_v46 }
 0x166   : > { %3420 = vmatprep.subr.bf16.mxu1 %v14178_v51  ;;  %v1065_v51 = vld [vmem:[#allocation2 + $0x950] sm:$0xff]  ;;  %v1160_v14 = vrot.slane %v1151_v10, %v18474_v53 }
 0x167   : > { %3380 = vmatpush2.bf16.msra.mxu0 %v14049_v49  ;;  %v14003_v49 = vcombine.low %v826_v0, %v830_v46  ;;  %v790_v46 = vld [vmem:[#allocation2 + $0xb8] sm:$0xff] }
 0x168   : > { %3381 = vmatprep.subr.bf16.mxu0 %v14042_v36  ;;  %v810_v36 = vld [vmem:[#allocation2 + $0x158] sm:$0xff] }
 0x169   : > { %3421 = vmatpush2.bf16.msra.mxu1 %v14177_v25  ;;  %v14250_v25 = vcombine.high %v1073_v56, %v1077_v15  ;;  %v13988_v57 = vcombine.high %v810_v36, %v814_v62  ;;  %v13987_v60 = vcombine.low %v810_v36, %v814_v62  ;;  %v774_v36 = vld [vmem:[#allocation2 + $0x38] sm:$0xff] }
 0x16a   : > { %3422 = vmatprep.subr.bf16.mxu1 %v14170_v47 }
 0x16b   : > { %3382 = vmatpush2.bf16.msra.mxu0 %v14041_v18 }
 0x16c   : > { %3383 = vmatprep.subr.bf16.mxu0 %v14034_v1  ;;  %v1057_v1 = vld [vmem:[#allocation2 + $0x910] sm:$0xff] }
 0x16d   : > { %3423 = vmatpush2.bf16.msra.mxu1 %v14169_v19  ;;  %v14249_v19 = vcombine.low %v1073_v56, %v1077_v15  ;;  %v14234_v39 = vcombine.high %v1057_v1, %v1061_v6 }
 0x16e   : > { %3424 = vmatprep.subr.bf16.mxu1 %v14162_v2  ;;  %v14242_v2 = vcombine.high %v1065_v51, %v1069_v12 }
 0x16f   : > { %3384 = vmatpush2.bf16.msra.mxu0 %v14033_v50  ;;  %v806_v50 = vld [vmem:[#allocation2 + $0x138] sm:$0xff] }
 0x170   : > { %3385 = vmatprep.subr.bf16.mxu0 %v14026_v17  ;;  %v13979_v44 = vcombine.low %v802_v13, %v806_v50 }
 0x171   : > { %3425 = vmatpush2.bf16.msra.mxu1 %v14161_v35 }
 0x172   : > { %3426 = vmatprep.subr.bf16.mxu1 %v14154_v42 }
 0x173   : > { %3386 = vmatpush2.bf16.msra.mxu0 %v14025_v63  ;;  %v14241_v63 = vcombine.low %v1065_v51, %v1069_v12  ;;  %v1029_v51 = vld [vmem:[#allocation2 + $0x830] sm:$0xff] }
 0x174   : > { %3387 = vmatprep.subr.bf16.mxu0 %v14018_v3  ;;  %v1053_v3 = vld [vmem:[#allocation2 + $0x8f0] sm:$0xff] }
 0x175   : > { %3427 = vmatpush2.bf16.msra.mxu1 %v14153_v45  ;;  %v1049_v45 = vld [vmem:[#allocation2 + $0x8d0] sm:$0xff] }
 0x176   : > { %3428 = vmatprep.subr.bf16.mxu1 %v14146_v21  ;;  %v794_v21 = vld [vmem:[#allocation2 + $0xd8] sm:$0xff]  ;;  %v14226_v0 = vcombine.high %v1049_v45, %v1053_v3 }
 0x177   : > { %3388 = vmatpush2.bf16.msra.mxu0 %v14017_v41  ;;  %v13972_v10 = vcombine.high %v794_v21, %v798_v27  ;;  %v13971_v56 = vcombine.low %v794_v21, %v798_v27  ;;  %v1121_v27 = vld [vmem:[#allocation2 + $0xb10] sm:$0xff] }
 0x178   : > { %3389 = vmatprep.subr.bf16.mxu0 %v14010_v26  ;;  %v14233_v26 = vcombine.low %v1057_v1, %v1061_v6  ;;  %v894_v1 = vld [vmem:[#allocation2 + $0x3f8] sm:$0xff] }
 0x179   : > { %3429 = vmatpush2.bf16.msra.mxu1 %v14145_v32  ;;  %v13980_v32 = vcombine.high %v802_v13, %v806_v50 }
 0x17a   : > { %3430 = vmatprep.subr.bf16.mxu1 %v14138_v9  ;;  %v786_v9 = vld [vmem:[#allocation2 + $0x98] sm:$0xff] }
 0x17b   : > { %3390 = vmatpush2.bf16.msra.mxu0 %v14009_v23  ;;  %v14225_v23 = vcombine.low %v1049_v45, %v1053_v3  ;;  %v13964_v16 = vcombine.high %v786_v9, %v790_v46  ;;  %v13963_v12 = vcombine.low %v786_v9, %v790_v46  ;;  %v1113_v9 = vld [vmem:[#allocation2 + $0xad0] sm:$0xff] }
 0x17c   : > { %3441 = vmatprep.subr.bf16.mxu0 %v14258_v29  ;;  %v1037_v29 = vld [vmem:[#allocation2 + $0x870] sm:$0xff] }
 0x17d   : > { %3431 = vmatpush2.bf16.msra.mxu1 %v14137_v38  ;;  %v1033_v38 = vld [vmem:[#allocation2 + $0x850] sm:$0xff] }
 0x17e   : > { %3482 = vmatprep.subr.bf16.mxu1 %v14004_v52  ;;  %v3147_v47 = vpop.f32.mrf.mxu0  ;;  %3392 = vmatmul.mubr.bf16.vlgmr.msra.gmra.mxu0 %v18400_v40  ;;  %v782_v52 = vld [vmem:[#allocation2 + $0x78] sm:$0xff]  ;;  %v1117_v46 = vld [vmem:[#allocation2 + $0xaf0] sm:$0xff] }
 0x17f   : > { %v3148_v33 = vadd.f32 %v3147_v47, %v1156_v30  ;;  %3442 = vmatpush1.bf16.msra.mxu0 %v14257_v31  ;;  %3473 = vmatprep.mubr.bf16.mxu0 %v18455_v37  ;;  %v1025_v31 = vld [vmem:[#allocation2 + $0x810] sm:$0xff]  ;;  %v13956_v62 = vcombine.high %v778_v22, %v782_v52 }
 0x180   : > { %v3188_v18 = vpop.f32.mrf.mxu1  ;;  %3433 = vmatmul.mubr.bf16.vlgmr.msra.gmra.mxu1 %v18407_v4  ;;  %v3149_v34 = vpop.f32.mrf.mxu0  ;;  %3443 = vmatprep.subr.bf16.mxu0 %v14250_v25  ;;  %v770_v25 = vld [vmem:[#allocation2 + $0x18] sm:$0xff]  ;;  %v1149_v47 = vld [vmem:[#allocation2 + $0xbf0] sm:$0xff] }
 0x181   : > { %3483 = vmatpush1.bf16.msra.mxu1 %v14003_v49  ;;  %v18480_v35 = vadd.f32 %v3188_v18, %v3148_v33  ;;  %v3150_v17 = vadd.f32 %v3149_v34, %v1160_v14  ;;  %3514 = vmatprep.mubr.bf16.mxu1 %v18314_v58  ;;  %v1041_v58 = vld [vmem:[#allocation2 + $0x890] sm:$0xff]  ;;  %v14210_v49 = vcombine.high %v1033_v38, %v1037_v29 }
 0x182   : > { %v3190_v28 = vpop.f32.mrf.mxu1  ;;  %3484 = vmatprep.subr.bf16.mxu1 %v13996_v7  ;;  %v3151_v8 = vpop.f32.mrf.mxu0  ;;  %v14218_v15 = vcombine.high %v1041_v58, %v1045_v20  ;;  %v14217_v30 = vcombine.low %v1041_v58, %v1045_v20  ;;  %v14209_v14 = vcombine.low %v1033_v38, %v1037_v29  ;;  %v1145_v7 = vld [vmem:[#allocation2 + $0xbd0] sm:$0xff]  ;;  %v13955_v33 = vcombine.low %v778_v22, %v782_v52  ;;  %v866_v58 = vld [vmem:[#allocation2 + $0x318] sm:$0xff] }
 0x183   : > { %v18484_v42 = vadd.f32 %v3190_v28, %v3150_v17  ;;  %3444 = vmatpush1.bf16.msra.mxu0 %v14249_v19  ;;  %v14202_v18 = vcombine.high %v1025_v31, %v1029_v51  ;;  %v890_v19 = vld [vmem:[#allocation2 + $0x3d8] sm:$0xff]  ;;  %v13948_v6 = vcombine.high %v770_v25, %v774_v36  ;;  %v14201_v34 = vcombine.low %v1025_v31, %v1029_v51  ;;  %v1105_v22 = vld [vmem:[#allocation2 + $0xa90] sm:$0xff] }
 0x184   : > { %v3192_v61 = vpop.f32.mrf.mxu1  ;;  %v3152_v59 = vpop.f32.mrf.mxu0  ;;  %3445 = vmatprep.subr.bf16.mxu0 %v14242_v2  ;;  %v1141_v2 = vld [vmem:[#allocation2 + $0xbb0] sm:$0xff]  ;;  %v13947_v13 = vcombine.low %v770_v25, %v774_v36  ;;  %v14322_v50 = vcombine.high %v1145_v7, %v1149_v47  ;;  %v882_v17 = vld [vmem:[#allocation2 + $0x398] sm:$0xff]  ;;  %v14321_v8 = vcombine.low %v1145_v7, %v1149_v47  ;;  %v14067_v45 = vcombine.low %v890_v19, %v894_v1 }
 0x185   : > { %3485 = vmatpush1.bf16.msra.mxu1 %v13995_v48  ;;  %v1137_v48 = vld [vmem:[#allocation2 + $0xb90] sm:$0xff]  ;;  %v886_v28 = vld [vmem:[#allocation2 + $0x3b8] sm:$0xff] }
 0x186   : > { %v3193_v41 = vpop.f32.mrf.mxu1  ;;  %3486 = vmatprep.subr.bf16.mxu1 %v13988_v57  ;;  %v14068_v57 = vcombine.high %v890_v19, %v894_v1  ;;  %v1129_v61 = vld [vmem:[#allocation2 + $0xb50] sm:$0xff]  ;;  %v14314_v3 = vcombine.high %v1137_v48, %v1141_v2  ;;  %v874_v59 = vld [vmem:[#allocation2 + $0x358] sm:$0xff]  ;;  %v14313_v21 = vcombine.low %v1137_v48, %v1141_v2 }
 0x187   : > { %3446 = vmatpush1.bf16.msra.mxu0 %v14241_v63  ;;  %v1133_v63 = vld [vmem:[#allocation2 + $0xb70] sm:$0xff]  ;;  %v870_v20 = vld [vmem:[#allocation2 + $0x338] sm:$0xff] }
 0x188   : > { %3447 = vmatprep.subr.bf16.mxu0 %v14234_v39  ;;  %v14060_v39 = vcombine.high %v882_v17, %v886_v28  ;;  %v1125_v41 = vld [vmem:[#allocation2 + $0xb30] sm:$0xff]  ;;  %v858_v38 = vld [vmem:[#allocation2 + $0x2d8] sm:$0xff] }
 0x189   : > { %3487 = vmatpush1.bf16.msra.mxu1 %v13987_v60  ;;  %v878_v60 = vld [vmem:[#allocation2 + $0x378] sm:$0xff]  ;;  %v1109_v52 = vld [vmem:[#allocation2 + $0xab0] sm:$0xff] }
 0x18a   : > { %3488 = vmatprep.subr.bf16.mxu1 %v13980_v32  ;;  %v14059_v32 = vcombine.low %v882_v17, %v886_v28  ;;  %v862_v29 = vld [vmem:[#allocation2 + $0x2f8] sm:$0xff]  ;;  %v1097_v25 = vld [vmem:[#allocation2 + $0xa50] sm:$0xff] }
 0x18b   : > { %3448 = vmatpush1.bf16.msra.mxu0 %v14233_v26  ;;  %v14306_v26 = vcombine.high %v1129_v61, %v1133_v63  ;;  %v850_v31 = vld [vmem:[#allocation2 + $0x298] sm:$0xff]  ;;  %v1101_v36 = vld [vmem:[#allocation2 + $0xa70] sm:$0xff] }
 0x18c   : > { %3449 = vmatprep.subr.bf16.mxu0 %v14226_v0  ;;  %v14305_v0 = vcombine.low %v1129_v61, %v1133_v63  ;;  %v854_v51 = vld [vmem:[#allocation2 + $0x2b8] sm:$0xff]  ;;  %v1089_v19 = vld [vmem:[#allocation2 + $0xa10] sm:$0xff] }
 0x18d   : > { %3489 = vmatpush1.bf16.msra.mxu1 %v13979_v44  ;;  %v14052_v44 = vcombine.high %v874_v59, %v878_v60  ;;  %v842_v7 = vld [vmem:[#allocation2 + $0x258] sm:$0xff]  ;;  %v1093_v1 = vld [vmem:[#allocation2 + $0xa30] sm:$0xff] }
 0x18e   : > { %3490 = vmatprep.subr.bf16.mxu1 %v13972_v10  ;;  %v14051_v10 = vcombine.low %v874_v59, %v878_v60  ;;  %v846_v47 = vld [vmem:[#allocation2 + $0x278] sm:$0xff] }
 0x18f   : > { %3450 = vmatpush1.bf16.msra.mxu0 %v14225_v23  ;;  %v14298_v23 = vcombine.high %v1121_v27, %v1125_v41  ;;  %v834_v48 = vld [vmem:[#allocation2 + $0x218] sm:$0xff] }
 0x190   : > { %3451 = vmatprep.subr.bf16.mxu0 %v14218_v15  ;;  %v14297_v15 = vcombine.low %v1121_v27, %v1125_v41  ;;  %v838_v2 = vld [vmem:[#allocation2 + $0x238] sm:$0xff] }
 0x191   : > { %3491 = vmatpush1.bf16.msra.mxu1 %v13971_v56  ;;  %v14044_v56 = vcombine.high %v866_v58, %v870_v20  ;;  %v954_v17 = vld [vmem:[#allocation2 + $0x5d8] sm:$0xff] }
 0x192   : > { %3492 = vmatprep.subr.bf16.mxu1 %v13964_v16  ;;  %v14043_v16 = vcombine.low %v866_v58, %v870_v20  ;;  %v958_v28 = vld [vmem:[#allocation2 + $0x5f8] sm:$0xff] }
 0x193   : > { %3452 = vmatpush1.bf16.msra.mxu0 %v14217_v30  ;;  %v14290_v30 = vcombine.high %v1113_v9, %v1117_v46  ;;  %v1082_v61 = vld [vmem:[#allocation2 + $0x9d8] sm:$0xff] }
 0x194   : > { %3453 = vmatprep.subr.bf16.mxu0 %v14210_v49  ;;  %v14289_v49 = vcombine.low %v1113_v9, %v1117_v46  ;;  %v1086_v63 = vld [vmem:[#allocation2 + $0x9f8] sm:$0xff] }
 0x195   : > { %3493 = vmatpush1.bf16.msra.mxu1 %v13963_v12  ;;  %v14036_v12 = vcombine.high %v858_v38, %v862_v29  ;;  %v946_v59 = vld [vmem:[#allocation2 + $0x598] sm:$0xff] }
 0x196   : > { %3494 = vmatprep.subr.bf16.mxu1 %v13956_v62  ;;  %v14035_v62 = vcombine.low %v858_v38, %v862_v29  ;;  %v950_v60 = vld [vmem:[#allocation2 + $0x5b8] sm:$0xff] }
 0x197   : > { %3454 = vmatpush1.bf16.msra.mxu0 %v14209_v14  ;;  %v14282_v14 = vcombine.high %v1105_v22, %v1109_v52  ;;  %v1074_v27 = vld [vmem:[#allocation2 + $0x998] sm:$0xff] }
 0x198   : > { %3455 = vmatprep.subr.bf16.mxu0 %v14202_v18  ;;  %v14281_v18 = vcombine.low %v1105_v22, %v1109_v52  ;;  %v1078_v41 = vld [vmem:[#allocation2 + $0x9b8] sm:$0xff] }
 0x199   : > { %3495 = vmatpush1.bf16.msra.mxu1 %v13955_v33  ;;  %v14028_v33 = vcombine.high %v850_v31, %v854_v51  ;;  %v938_v58 = vld [vmem:[#allocation2 + $0x558] sm:$0xff] }
 0x19a   : > { %3496 = vmatprep.subr.bf16.mxu1 %v13948_v6  ;;  %v14027_v6 = vcombine.low %v850_v31, %v854_v51  ;;  %v942_v20 = vld [vmem:[#allocation2 + $0x578] sm:$0xff] }
 0x19b   : > { %3456 = vmatpush1.bf16.msra.mxu0 %v14201_v34  ;;  %v14274_v34 = vcombine.high %v1097_v25, %v1101_v36  ;;  %v1066_v9 = vld [vmem:[#allocation2 + $0x958] sm:$0xff] }
 0x19c   : > { %3457 = vmatprep.subr.bf16.mxu0 %v14322_v50  ;;  %v14273_v50 = vcombine.low %v1097_v25, %v1101_v36  ;;  %v1070_v46 = vld [vmem:[#allocation2 + $0x978] sm:$0xff] }
 0x19d   : > { %3497 = vmatpush1.bf16.msra.mxu1 %v13947_v13  ;;  %v14020_v13 = vcombine.high %v842_v7, %v846_v47  ;;  %v934_v22 = vld [vmem:[#allocation2 + $0x538] sm:$0xff] }
 0x19e   : > { %3498 = vmatprep.subr.bf16.mxu1 %v14068_v57  ;;  %v14019_v57 = vcombine.low %v842_v7, %v846_v47  ;;  %v1058_v31 = vld [vmem:[#allocation2 + $0x918] sm:$0xff] }
 0x19f   : > { %3458 = vmatpush2.bf16.msra.mxu0 %v14321_v8  ;;  %v14266_v8 = vcombine.high %v1089_v19, %v1093_v1  ;;  %v1062_v51 = vld [vmem:[#allocation2 + $0x938] sm:$0xff] }
 0x1a0   : > { %3459 = vmatprep.subr.bf16.mxu0 %v14314_v3  ;;  %v14265_v3 = vcombine.low %v1089_v19, %v1093_v1  ;;  %v922_v47 = vld [vmem:[#allocation2 + $0x4d8] sm:$0xff] }
 0x1a1   : > { %3499 = vmatpush2.bf16.msra.mxu1 %v14067_v45  ;;  %v14012_v45 = vcombine.high %v834_v48, %v838_v2  ;;  %v1050_v1 = vld [vmem:[#allocation2 + $0x8d8] sm:$0xff] }
 0x1a2   : > { %3500 = vmatprep.subr.bf16.mxu1 %v14060_v39  ;;  %v14011_v39 = vcombine.low %v834_v48, %v838_v2  ;;  %v14236_v2 = vcombine.high %v1058_v31, %v1062_v51 }
 0x1a3   : > { %3460 = vmatpush2.bf16.msra.mxu0 %v14313_v21  ;;  %v14132_v21 = vcombine.high %v954_v17, %v958_v28 }
 0x1a4   : > { %3461 = vmatprep.subr.bf16.mxu0 %v14306_v26  ;;  %v14131_v26 = vcombine.low %v954_v17, %v958_v28 }
 0x1a5   : > { %3501 = vmatpush2.bf16.msra.mxu1 %v14059_v32  ;;  %v14260_v32 = vcombine.high %v1082_v61, %v1086_v63 }
 0x1a6   : > { %3502 = vmatprep.subr.bf16.mxu1 %v14052_v44  ;;  %v14259_v44 = vcombine.low %v1082_v61, %v1086_v63  ;;  %v14235_v61 = vcombine.low %v1058_v31, %v1062_v51  ;;  %v1026_v51 = vld [vmem:[#allocation2 + $0x818] sm:$0xff] }
 0x1a7   : > { %3462 = vmatpush2.bf16.msra.mxu0 %v14305_v0  ;;  %v14124_v0 = vcombine.high %v946_v59, %v950_v60 }
 0x1a8   : > { %3463 = vmatprep.subr.bf16.mxu0 %v14298_v23 }
 0x1a9   : > { %3503 = vmatpush2.bf16.msra.mxu1 %v14051_v10  ;;  %v14252_v10 = vcombine.high %v1074_v27, %v1078_v41 }
 0x1aa   : > { %3504 = vmatprep.subr.bf16.mxu1 %v14044_v56  ;;  %v14123_v56 = vcombine.low %v946_v59, %v950_v60 }
 0x1ab   : > { %3464 = vmatpush2.bf16.msra.mxu0 %v14297_v15  ;;  %v930_v15 = vld [vmem:[#allocation2 + $0x518] sm:$0xff] }
 0x1ac   : > { %3465 = vmatprep.subr.bf16.mxu0 %v14290_v30  ;;  %v14116_v30 = vcombine.high %v938_v58, %v942_v20  ;;  %v14108_v19 = vcombine.high %v930_v15, %v934_v22  ;;  %v14107_v28 = vcombine.low %v930_v15, %v934_v22 }
 0x1ad   : > { %3505 = vmatpush2.bf16.msra.mxu1 %v14043_v16  ;;  %v14251_v16 = vcombine.low %v1074_v27, %v1078_v41 }
 0x1ae   : > { %3506 = vmatprep.subr.bf16.mxu1 %v14036_v12 }
 0x1af   : > { %3466 = vmatpush2.bf16.msra.mxu0 %v14289_v49 }
 0x1b0   : > { %3467 = vmatprep.subr.bf16.mxu0 %v14282_v14 }
 0x1b1   : > { %3507 = vmatpush2.bf16.msra.mxu1 %v14035_v62 }
 0x1b2   : > { %3508 = vmatprep.subr.bf16.mxu1 %v14028_v33  ;;  %v926_v33 = vld [vmem:[#allocation2 + $0x4f8] sm:$0xff] }
 0x1b3   : > { %3468 = vmatpush2.bf16.msra.mxu0 %v14281_v18  ;;  %v14100_v63 = vcombine.high %v922_v47, %v926_v33 }
 0x1b4   : > { %3469 = vmatprep.subr.bf16.mxu0 %v14274_v34 }
 0x1b5   : > { %3509 = vmatpush2.bf16.msra.mxu1 %v14027_v6 }
 0x1b6   : > { %3510 = vmatprep.subr.bf16.mxu1 %v14020_v13 }
 0x1b7   : > { %3470 = vmatpush2.bf16.msra.mxu0 %v14273_v50 }
 0x1b8   : > { %3471 = vmatprep.subr.bf16.mxu0 %v14266_v8  ;;  %v918_v8 = vld [vmem:[#allocation2 + $0x4b8] sm:$0xff] }
 0x1b9   : > { %3511 = vmatpush2.bf16.msra.mxu1 %v14019_v57  ;;  %v914_v57 = vld [vmem:[#allocation2 + $0x498] sm:$0xff] }
 0x1ba   : > { %3512 = vmatprep.subr.bf16.mxu1 %v14012_v45  ;;  %v1042_v45 = vld [vmem:[#allocation2 + $0x898] sm:$0xff]  ;;  %v14091_v22 = vcombine.low %v914_v57, %v918_v8 }
 0x1bb   : > { %3472 = vmatpush2.bf16.msra.mxu0 %v14265_v3  ;;  %v1046_v3 = vld [vmem:[#allocation2 + $0x8b8] sm:$0xff] }
 0x1bc   : > { %3523 = vmatprep.subr.bf16.mxu0 %v14132_v21 }
 0x1bd   : > { %3513 = vmatpush2.bf16.msra.mxu1 %v14011_v39 }
 0x1be   : > { %3564 = vmatprep.subr.bf16.mxu1 %v14260_v32  ;;  %v3229_v23 = vpop.f32.mrf.mxu0  ;;  %3474 = vmatmul.mubr.bf16.vlgmr.msra.gmra.mxu0 %v18460_v24  ;;  %v14099_v32 = vcombine.low %v922_v47, %v926_v33  ;;  %v1150_v47 = vld [vmem:[#allocation2 + $0xbf8] sm:$0xff] }
 0x1bf   : > { %v3230_v38 = vadd.f32 %v3229_v23, %v18480_v35  ;;  %3524 = vmatpush1.bf16.msra.mxu0 %v14131_v26  ;;  %3555 = vmatprep.mubr.bf16.mxu0 %v18316_v54  ;;  %v14243_v54 = vcombine.low %v1066_v9, %v1070_v46  ;;  %v906_v26 = vld [vmem:[#allocation2 + $0x458] sm:$0xff] }
 0x1c0   : > { %v18488_v29 = vpop.f32.mrf.mxu1  ;;  %3515 = vmatmul.mubr.bf16.vlgmr.msra.gmra.mxu1 %v18400_v40  ;;  %v3231_v52 = vpop.f32.mrf.mxu0  ;;  %3525 = vmatprep.subr.bf16.mxu0 %v14124_v0  ;;  %v14244_v40 = vcombine.high %v1066_v9, %v1070_v46  ;;  %v1034_v0 = vld [vmem:[#allocation2 + $0x858] sm:$0xff] }
 0x1c1   : > { %3565 = vmatpush1.bf16.msra.mxu1 %v14259_v44  ;;  %v3605_v12 = vmax.f32 %v3230_v38, 0.0  ;;  %v3232_v35 = vadd.f32 %v3231_v52, %v18484_v42  ;;  %3596 = vmatprep.mubr.bf16.mxu1 %v18455_v37  ;;  %v14115_v42 = vcombine.low %v938_v58, %v942_v20  ;;  %v1054_v37 = vld [vmem:[#allocation2 + $0x8f8] sm:$0xff]  ;;  %v14092_v44 = vcombine.high %v914_v57, %v918_v8 }
 0x1c2   : > { %v18492_v49 = vpop.f32.mrf.mxu1  ;;  %3566 = vmatprep.subr.bf16.mxu1 %v14252_v10  ;;  %v3233_v25 = vpop.f32.mrf.mxu0  ;;  %v14228_v21 = vcombine.high %v1050_v1, %v1054_v37  ;;  %v910_v58 = vld [vmem:[#allocation2 + $0x478] sm:$0xff]  ;;  %v14227_v20 = vcombine.low %v1050_v1, %v1054_v37  ;;  %v14220_v10 = vcombine.high %v1042_v45, %v1046_v3 }
 0x1c3   : > { %v3613_v36 = vpack.c.bf16 %v3605_v12, %v3605_v12  ;;  %v3606_v14 = vmax.f32 %v3232_v35, 0.0  ;;  %3526 = vmatpush1.bf16.msra.mxu0 %v14123_v56  ;;  %v1038_v9 = vld [vmem:[#allocation2 + $0x878] sm:$0xff]  ;;  %v14084_v31 = vcombine.high %v906_v26, %v910_v58 }
 0x1c4   : > { %v3274_v7 = vpop.f32.mrf.mxu1  ;;  %v3234_v18 = vpop.f32.mrf.mxu0  ;;  %3527 = vmatprep.subr.bf16.mxu0 %v14116_v30  ;;  %v898_v52 = vld [vmem:[#allocation2 + $0x418] sm:$0xff]  ;;  %v14219_v30 = vcombine.low %v1042_v45, %v1046_v3  ;;  %v14212_v35 = vcombine.high %v1034_v0, %v1038_v9 }
 0x1c5   : > { %3567 = vmatpush1.bf16.msra.mxu1 %v14251_v16  ;;  %v3622_v6 = vshrl.u32 %v3613_v36, 16  ;;  %v3614_v34 = vpack.c.bf16 %v3606_v14, %v3606_v14  ;;  %v3625_v50 = vshll.u32 %v3613_v36, 16  ;;  %v902_v16 = vld [vmem:[#allocation2 + $0x438] sm:$0xff]  ;;  %v14211_v14 = vcombine.low %v1034_v0, %v1038_v9 }
 0x1c6   : > { %v3275_v48 = vpop.f32.mrf.mxu1  ;;  %3568 = vmatprep.subr.bf16.mxu1 %v14244_v40  ;;  %v1030_v12 = vld [vmem:[#allocation2 + $0x838] sm:$0xff]  ;;  %v14083_v40 = vcombine.low %v906_v26, %v910_v58  ;;  %v14076_v7 = vcombine.high %v898_v52, %v902_v16  ;;  %v14075_v18 = vcombine.low %v898_v52, %v902_v16 }
 0x1c7   : > { %v3624_v13 = vrot.slane %v3622_v6, 7  ;;  %v3629_v17 = vshrl.u32 %v3614_v34, 16  ;;  %3528 = vmatpush1.bf16.msra.mxu0 %v14115_v42  ;;  %v3632_v39 = vshll.u32 %v3614_v34, 16  ;;  %v1018_v25 = vld [vmem:[#allocation2 + $0x7d8] sm:$0xff]  ;;  %v14204_v33 = vcombine.high %v1026_v51, %v1030_v12 }
 0x1c8   : > { %3529 = vmatprep.subr.bf16.mxu0 %v14108_v19  ;;  %v1022_v36 = vld [vmem:[#allocation2 + $0x7f8] sm:$0xff]  ;;  %v14203_v1 = vcombine.low %v1026_v51, %v1030_v12 }
 0x1c9   : > { %3569 = vmatpush1.bf16.msra.mxu1 %v14243_v54  ;;  %v3627_v59 = vor.u32 %v3625_v50, %v3624_v13  ;;  %v3631_v60 = vrot.slane %v3629_v17, 7  ;;  %v1146_v42 = vld [vmem:[#allocation2 + $0xbd8] sm:$0xff]  ;;  %v14196_v37 = vcombine.high %v1018_v25, %v1022_v36 }
 0x1ca   : > { %3570 = vmatprep.subr.bf16.mxu1 %v14236_v2  ;;  %v1010_v54 = vld [vmem:[#allocation2 + $0x798] sm:$0xff]  ;;  %v14324_v48 = vcombine.high %v1146_v42, %v1150_v47  ;;  %v14195_v2 = vcombine.low %v1018_v25, %v1022_v36  ;;  %v14323_v17 = vcombine.low %v1146_v42, %v1150_v47 }
 0x1cb   : > { %v3685_v27 = vsel %vm18049_vm2, 0, %v3627_v59  ;;  %v3634_v41 = vor.u32 %v3632_v39, %v3631_v60  ;;  %3530 = vmatpush1.bf16.msra.mxu0 %v14107_v28  ;;  %v1014_v19 = vld [vmem:[#allocation2 + $0x7b8] sm:$0xff] }
 0x1cc   : > { %3531 = vmatprep.subr.bf16.mxu0 %v14100_v63  ;;  %v18508_v23 = vsel %vm18498_vm12, %v3685_v27, 0  ;;  %v1138_v6 = vld [vmem:[#allocation2 + $0xb98] sm:$0xff]  ;;  %v14188_v28 = vcombine.high %v1010_v54, %v1014_v19  ;;  %v14187_v63 = vcombine.low %v1010_v54, %v1014_v19 }
 0x1cd   : > { %3571 = vmatpush1.bf16.msra.mxu1 %v14235_v61  ;;  %v3686_v46 = vsel %vm18049_vm2, 0, %v3634_v41  ;;  %v1142_v34 = vld [vmem:[#allocation2 + $0xbb8] sm:$0xff] }
 0x1ce   : > { %3572 = vmatprep.subr.bf16.mxu1 %v14228_v21  ;;  %v18512_v38 = vsel %vm18498_vm12, %v3686_v46, 0  ;;  %v1002_v13 = vld [vmem:[#allocation2 + $0x758] sm:$0xff]  ;;  %v14316_v61 = vcombine.high %v1138_v6, %v1142_v34  ;;  %v14315_v59 = vcombine.low %v1138_v6, %v1142_v34 }
 0x1cf   : > { %v3712_v56 = vcombine.low %v18508_v23, %v18512_v38  ;;  %v3713_v15 = vcombine.high %v18508_v23, %v18512_v38  ;;  %3532 = vmatpush1.bf16.msra.mxu0 %v14099_v32  ;;  %v1006_v50 = vld [vmem:[#allocation2 + $0x778] sm:$0xff] }
 0x1d0   : > { %3533 = vmatprep.subr.bf16.mxu0 %v14092_v44  ;;  %v1130_v57 = vld [vmem:[#allocation2 + $0xb58] sm:$0xff]  ;;  %v14180_v60 = vcombine.high %v1002_v13, %v1006_v50  ;;  %v14179_v41 = vcombine.low %v1002_v13, %v1006_v50  ;;  %v18519_v13 = vsub.s32 2, %v17966_v55 }
 0x1d1   : > { %3573 = vmatpush1.bf16.msra.mxu1 %v14227_v20  ;;  %v1134_v8 = vld [vmem:[#allocation2 + $0xb78] sm:$0xff] }
 0x1d2   : > { %3574 = vmatprep.subr.bf16.mxu1 %v14220_v10  ;;  %v994_v45 = vld [vmem:[#allocation2 + $0x718] sm:$0xff]  ;;  %v14308_v27 = vcombine.high %v1130_v57, %v1134_v8  ;;  %v14307_v58 = vcombine.low %v1130_v57, %v1134_v8  ;;  %v18524_v8 = vld [vmem:[#allocation4] sm:$0xff] }
 0x1d3   : > { %3534 = vmatpush1.bf16.msra.mxu0 %v14091_v22  ;;  %v998_v3 = vld [vmem:[#allocation2 + $0x738] sm:$0xff] }
 0x1d4   : > { %3535 = vmatprep.subr.bf16.mxu0 %v14084_v31  ;;  %v1122_v39 = vld [vmem:[#allocation2 + $0xb18] sm:$0xff]  ;;  %v14172_v20 = vcombine.high %v994_v45, %v998_v3  ;;  %v14171_v46 = vcombine.low %v994_v45, %v998_v3 }
 0x1d5   : > { %3575 = vmatpush1.bf16.msra.mxu1 %v14219_v30  ;;  %v1126_v21 = vld [vmem:[#allocation2 + $0xb38] sm:$0xff] }
 0x1d6   : > { %3576 = vmatprep.subr.bf16.mxu1 %v14212_v35  ;;  %v986_v32 = vld [vmem:[#allocation2 + $0x6d8] sm:$0xff]  ;;  %v14300_v9 = vcombine.high %v1122_v39, %v1126_v21  ;;  %v14299_v52 = vcombine.low %v1122_v39, %v1126_v21 }
 0x1d7   : > { %3536 = vmatpush1.bf16.msra.mxu0 %v14083_v40  ;;  %v990_v26 = vld [vmem:[#allocation2 + $0x6f8] sm:$0xff] }
 0x1d8   : > { %3537 = vmatprep.subr.bf16.mxu0 %v14076_v7  ;;  %v1114_v44 = vld [vmem:[#allocation2 + $0xad8] sm:$0xff]  ;;  %v14164_v16 = vcombine.high %v986_v32, %v990_v26  ;;  %v14163_v12 = vcombine.low %v986_v32, %v990_v26 }
 0x1d9   : > { %3577 = vmatpush1.bf16.msra.mxu1 %v14211_v14  ;;  %v1118_v0 = vld [vmem:[#allocation2 + $0xaf8] sm:$0xff] }
 0x1da   : > { %3578 = vmatprep.subr.bf16.mxu1 %v14204_v33  ;;  %v978_v10 = vld [vmem:[#allocation2 + $0x698] sm:$0xff]  ;;  %v14292_v51 = vcombine.high %v1114_v44, %v1118_v0  ;;  %v14291_v25 = vcombine.low %v1114_v44, %v1118_v0 }
 0x1db   : > { %3538 = vmatpush1.bf16.msra.mxu0 %v14075_v18  ;;  %v982_v22 = vld [vmem:[#allocation2 + $0x6b8] sm:$0xff] }
 0x1dc   : > { %3539 = vmatprep.subr.bf16.mxu0 %v14196_v37  ;;  %v1106_v30 = vld [vmem:[#allocation2 + $0xa98] sm:$0xff]  ;;  %v14156_v36 = vcombine.high %v978_v10, %v982_v22  ;;  %v14155_v47 = vcombine.low %v978_v10, %v982_v22 }
 0x1dd   : > { %3579 = vmatpush1.bf16.msra.mxu1 %v14203_v1  ;;  %v1110_v31 = vld [vmem:[#allocation2 + $0xab8] sm:$0xff] }
 0x1de   : > { %3580 = vmatprep.subr.bf16.mxu1 %v14324_v48  ;;  %v970_v35 = vld [vmem:[#allocation2 + $0x658] sm:$0xff]  ;;  %v14284_v42 = vcombine.high %v1106_v30, %v1110_v31  ;;  %v14283_v54 = vcombine.low %v1106_v30, %v1110_v31 }
 0x1df   : > { %3540 = vmatpush2.bf16.msra.mxu0 %v14195_v2  ;;  %v974_v40 = vld [vmem:[#allocation2 + $0x678] sm:$0xff] }
 0x1e0   : > { %3541 = vmatprep.subr.bf16.mxu0 %v14188_v28  ;;  %v1098_v14 = vld [vmem:[#allocation2 + $0xa58] sm:$0xff]  ;;  %v14148_v19 = vcombine.high %v970_v35, %v974_v40  ;;  %v14147_v34 = vcombine.low %v970_v35, %v974_v40 }
 0x1e1   : > { %3581 = vmatpush2.bf16.msra.mxu1 %v14323_v17  ;;  %v1102_v7 = vld [vmem:[#allocation2 + $0xa78] sm:$0xff]  ;;  %v18522_v17 = vsub.s32 3, %v17966_v55 }
 0x1e2   : > { %3582 = vmatprep.subr.bf16.mxu1 %v14316_v61  ;;  %v962_v33 = vld [vmem:[#allocation2 + $0x618] sm:$0xff]  ;;  %v14276_v6 = vcombine.high %v1098_v14, %v1102_v7  ;;  %v14275_v48 = vcombine.low %v1098_v14, %v1102_v7  ;;  %v1164_v61 = vrot.slane %v18524_v8, %v18519_v13 }
 0x1e3   : > { %3542 = vmatpush2.bf16.msra.mxu0 %v14187_v63  ;;  %v966_v18 = vld [vmem:[#allocation2 + $0x638] sm:$0xff]  ;;  %v1168_v63 = vrot.slane %v18524_v8, %v18522_v17 }
 0x1e4   : > { %3543 = vmatprep.subr.bf16.mxu0 %v14180_v60  ;;  %v1090_v1 = vld [vmem:[#allocation2 + $0xa18] sm:$0xff]  ;;  %v14140_v2 = vcombine.high %v962_v33, %v966_v18  ;;  %v14139_v28 = vcombine.low %v962_v33, %v966_v18  ;;  %v3271_v45 = vadd.f32 %v18488_v29, %v1164_v61  ;;  %v18546_v18 = vrot.slane %v3712_v56, %v17991_v11 }
 0x1e5   : > { %3583 = vmatpush2.bf16.msra.mxu1 %v14315_v59  ;;  %v1094_v37 = vld [vmem:[#allocation2 + $0xa38] sm:$0xff]  ;;  %v3273_v59 = vadd.f32 %v18492_v49, %v1168_v63 }
 0x1e6   : > { %3584 = vmatprep.subr.bf16.mxu1 %v14308_v27  ;;  %v14268_v50 = vcombine.high %v1090_v1, %v1094_v37  ;;  %v14267_v57 = vcombine.low %v1090_v1, %v1094_v37  ;;  %v15692_v14 = vld [vmem:[#allocation6 + $0xe0] ss:$16 sps:$4 sm:$0xff]   ;;  %v15694_v7 = vld [vmem:[#allocation6 + $0xe4] ss:$16 sps:$4 sm:$0xff]  }
 0x1e7   : > { %3544 = vmatpush2.bf16.msra.mxu0 %v14179_v41  ;;  %v15700_v33 = vld [vmem:[#allocation6 + $0xc4] ss:$16 sps:$4 sm:$0xff]   ;;  %v15701_v38 = vld [vmem:[#allocation6 + $0x2c0] ss:$16 sps:$4 sm:$0xff]  }
 0x1e8   : > { %3545 = vmatprep.subr.bf16.mxu0 %v14172_v20  ;;  %v15703_v37 = vld [vmem:[#allocation6 + $0x2c4] ss:$16 sps:$4 sm:$0xff]   ;;  %v15710_v61 = vld [vmem:[#allocation6 + $0x80] ss:$16 sps:$4 sm:$0xff]  }
 0x1e9   : > { %3585 = vmatpush2.bf16.msra.mxu1 %v14307_v58  ;;  %v15713_v63 = vld [vmem:[#allocation6 + $0x280] ss:$16 sps:$4 sm:$0xff]  }
 0x1ea   : > { %3586 = vmatprep.subr.bf16.mxu1 %v14300_v9 }
 0x1eb   : > { %3546 = vmatpush2.bf16.msra.mxu0 %v14171_v46 }
 0x1ec   : > { %3547 = vmatprep.subr.bf16.mxu0 %v14164_v16 }
 0x1ed   : > { %3587 = vmatpush2.bf16.msra.mxu1 %v14299_v52 }
 0x1ee   : > { %3588 = vmatprep.subr.bf16.mxu1 %v14292_v51 }
 0x1ef   : > { %3548 = vmatpush2.bf16.msra.mxu0 %v14163_v12 }
 0x1f0   : > { %3549 = vmatprep.subr.bf16.mxu0 %v14156_v36 }
 0x1f1   : > { %3589 = vmatpush2.bf16.msra.mxu1 %v14291_v25 }
 0x1f2   : > { %3590 = vmatprep.subr.bf16.mxu1 %v14284_v42  ;;  %v15695_v42 = vld [vmem:[#allocation6 + $0x2e0] ss:$16 sps:$4 sm:$0xff]  }
 0x1f3   : > { %3550 = vmatpush2.bf16.msra.mxu0 %v14155_v47  ;;  %v15697_v47 = vld [vmem:[#allocation6 + $0x2e4] ss:$16 sps:$4 sm:$0xff]  }
 0x1f4   : > { %3551 = vmatprep.subr.bf16.mxu0 %v14148_v19 }
 0x1f5   : > { %3591 = vmatpush2.bf16.msra.mxu1 %v14283_v54  ;;  %v18552_v54 = vrot.slane %v3713_v15, %v17991_v11  ;;  %v15706_v15 = vld [vmem:[#allocation6 + $0xa4] ss:$16 sps:$4 sm:$0xff]  }
 0x1f6   : > { %3592 = vmatprep.subr.bf16.mxu1 %v14276_v6  ;;  %v15698_v6 = vld [vmem:[#allocation6 + $0xc0] ss:$16 sps:$4 sm:$0xff]  }
 0x1f7   : > { %3552 = vmatpush2.bf16.msra.mxu0 %v14147_v34 }
 0x1f8   : > { %3553 = vmatprep.subr.bf16.mxu0 %v14140_v2  ;;  %v15709_v2 = vld [vmem:[#allocation6 + $0x2a4] ss:$16 sps:$4 sm:$0xff]  }
 0x1f9   : > { %3593 = vmatpush2.bf16.msra.mxu1 %v14275_v48  ;;  %v15704_v48 = vld [vmem:[#allocation6 + $0xa0] ss:$16 sps:$4 sm:$0xff]  }
 0x1fa   : > { %3594 = vmatprep.subr.bf16.mxu1 %v14268_v50  ;;  %v15707_v50 = vld [vmem:[#allocation6 + $0x2a0] ss:$16 sps:$4 sm:$0xff]  }
 0x1fb   : > { %3554 = vmatpush2.bf16.msra.mxu0 %v14139_v28  ;;  %v15712_v28 = vld [vmem:[#allocation6 + $0x84] ss:$16 sps:$4 sm:$0xff]  }
 0x1fc   : > { %8920 = vmatprep.subr.bf16.mxu0 %v15694_v7  ;;  %v15745_v7 = vld [vmem:[#allocation6 + $0x3e4] ss:$16 sps:$4 sm:$0xff]  }
 0x1fd   : > { %3595 = vmatpush2.bf16.msra.mxu1 %v14267_v57  ;;  %v15715_v57 = vld [vmem:[#allocation6 + $0x284] ss:$16 sps:$4 sm:$0xff]  }
 0x1fe   : > { %v3311_v3 = vpop.f32.mrf.mxu0  ;;  %3556 = vmatmul.mubr.bf16.vlgmr.msra.gmra.mxu0 %v18407_v4  ;;  %8961 = vmatprep.subr.bf16.mxu1 %v15697_v47  ;;  %v15748_v47 = vld [vmem:[#allocation6 + $0x1c4] ss:$16 sps:$4 sm:$0xff]  }
 0x1ff   : > { %v3312_v60 = vadd.f32 %v3311_v3, %v3271_v45  ;;  %8921 = vmatpush1.bf16.msra.mxu0 %v15692_v14  ;;  %v15718_v45 = vld [vmem:[#allocation6 + $0x64] ss:$16 sps:$4 sm:$0xff]   ;;  %v15740_v14 = vld [vmem:[#allocation6 + $0x1e0] ss:$16 sps:$4 sm:$0xff]  }
 0x200   : > { %v3352_v39 = vpop.f32.mrf.mxu1  ;;  %3597 = vmatmul.mubr.bf16.vlgmr.msra.gmra.mxu1 %v18460_v24  ;;  %v3313_v21 = vpop.f32.mrf.mxu0  ;;  %8922 = vmatprep.subr.bf16.mxu0 %v15700_v33  ;;  %v15721_v3 = vld [vmem:[#allocation6 + $0x264] ss:$16 sps:$4 sm:$0xff]   ;;  %v15746_v33 = vld [vmem:[#allocation6 + $0x1c0] ss:$16 sps:$4 sm:$0xff]  }
 0x201   : > { %v3353_v27 = vadd.f32 %v3352_v39, %v3312_v60  ;;  %v3314_v41 = vadd.f32 %v3313_v21, %v3273_v59  ;;  %8962 = vmatpush1.bf16.msra.mxu1 %v15695_v42  ;;  %v15716_v59 = vld [vmem:[#allocation6 + $0x60] ss:$16 sps:$4 sm:$0xff]   ;;  %v18567_v39 = vsub.s32 4, %v17966_v55  ;;  %v18570_v21 = vsub.s32 5, %v17966_v55 }
 0x202   : > { %v3354_v32 = vpop.f32.mrf.mxu1  ;;  %v3315_v26 = vpop.f32.mrf.mxu0  ;;  %8963 = vmatprep.subr.bf16.mxu1 %v15703_v37  ;;  %v15719_v60 = vld [vmem:[#allocation6 + $0x260] ss:$16 sps:$4 sm:$0xff]   ;;  %v15751_v37 = vld [vmem:[#allocation6 + $0x3c4] ss:$16 sps:$4 sm:$0xff]  }
 0x203   : > { %v3607_v58 = vmax.f32 %v3353_v27, 0.0  ;;  %v3355_v20 = vadd.f32 %v3354_v32, %v3314_v41  ;;  %8923 = vmatpush1.bf16.msra.mxu0 %v15698_v6  ;;  %19434 = vst [vmem:[#allocation16_spill] sm:$0xff] %v18567_v39  ;;  %v1172_v27 = vrot.slane %v18524_v8, %v18567_v39  ;;  %v1176_v41 = vrot.slane %v18524_v8, %v18570_v21  ;;  %v15724_v32 = vld [vmem:[#allocation6 + $0x44] ss:$16 sps:$4 sm:$0xff]   ;;  %v15743_v42 = vld [vmem:[#allocation6 + $0x3e0] ss:$16 sps:$4 sm:$0xff]  }
 0x204   : > { %v3356_v44 = vpop.f32.mrf.mxu1  ;;  %v3316_v0 = vpop.f32.mrf.mxu0  ;;  %8924 = vmatprep.subr.bf16.mxu0 %v15706_v15  ;;  %v15749_v6 = vld [vmem:[#allocation6 + $0x3c0] ss:$16 sps:$4 sm:$0xff]  }
 0x205   : > { %v3615_v9 = vpack.c.bf16 %v3607_v58, %v3607_v58  ;;  %v3608_v29 = vmax.f32 %v3355_v20, 0.0  ;;  %8964 = vmatpush1.bf16.msra.mxu1 %v15701_v38  ;;  %v15722_v58 = vld [vmem:[#allocation6 + $0x40] ss:$16 sps:$4 sm:$0xff]   ;;  %v15727_v0 = vld [vmem:[#allocation6 + $0x244] ss:$16 sps:$4 sm:$0xff]  }
 0x206   : > { %v3357_v46 = vpop.f32.mrf.mxu1  ;;  %8965 = vmatprep.subr.bf16.mxu1 %v15709_v2  ;;  %v15754_v38 = vld [vmem:[#allocation6 + $0x1a4] ss:$16 sps:$4 sm:$0xff]   ;;  %v15752_v15 = vld [vmem:[#allocation6 + $0x1a0] ss:$16 sps:$4 sm:$0xff]  }
 0x207   : > { %v3636_v10 = vshrl.u32 %v3615_v9, 16  ;;  %v3616_v4 = vpack.c.bf16 %v3608_v29, %v3608_v29  ;;  %v3639_v49 = vshll.u32 %v3615_v9, 16  ;;  %8925 = vmatpush1.bf16.msra.mxu0 %v15704_v48  ;;  %v15725_v29 = vld [vmem:[#allocation6 + $0x240] ss:$16 sps:$4 sm:$0xff]   ;;  %v15757_v48 = vld [vmem:[#allocation6 + $0x3a4] ss:$16 sps:$4 sm:$0xff]  }
 0x208   : > { %8926 = vmatprep.subr.bf16.mxu0 %v15712_v28  ;;  %v15755_v2 = vld [vmem:[#allocation6 + $0x3a0] ss:$16 sps:$4 sm:$0xff]  }
 0x209   : > { %v3638_v22 = vrot.slane %v3636_v10, 7  ;;  %v3643_v52 = vshrl.u32 %v3616_v4, 16  ;;  %v3646_v24 = vshll.u32 %v3616_v4, 16  ;;  %8966 = vmatpush1.bf16.msra.mxu1 %v15707_v50  ;;  %v15760_v50 = vld [vmem:[#allocation6 + $0x184] ss:$16 sps:$4 sm:$0xff]  }
 0x20a   : > { %8967 = vmatprep.subr.bf16.mxu1 %v15715_v57  ;;  %v15758_v28 = vld [vmem:[#allocation6 + $0x180] ss:$16 sps:$4 sm:$0xff]   ;;  %v15763_v57 = vld [vmem:[#allocation6 + $0x384] ss:$16 sps:$4 sm:$0xff]  }
 0x20b   : > { %v3641_v16 = vor.u32 %v3639_v49, %v3638_v22  ;;  %v3645_v30 = vrot.slane %v3643_v52, 7  ;;  %8927 = vmatpush1.bf16.msra.mxu0 %v15710_v61  ;;  %v15730_v22 = vld [vmem:[#allocation6 + $0x24] ss:$16 sps:$4 sm:$0xff]   ;;  %v15728_v52 = vld [vmem:[#allocation6 + $0x20] ss:$16 sps:$4 sm:$0xff]  }
 0x20c   : > { %8928 = vmatprep.subr.bf16.mxu0 %v15718_v45  ;;  %v15761_v61 = vld [vmem:[#allocation6 + $0x380] ss:$16 sps:$4 sm:$0xff]   ;;  %v15766_v45 = vld [vmem:[#allocation6 + $0x164] ss:$16 sps:$4 sm:$0xff]  }
 0x20d   : > { %v3687_v31 = vsel %vm18049_vm2, 0, %v3641_v16  ;;  %v3648_v51 = vor.u32 %v3646_v24, %v3645_v30  ;;  %8968 = vmatpush1.bf16.msra.mxu1 %v15713_v63  ;;  %v15733_v30 = vld [vmem:[#allocation6 + $0x224] ss:$16 sps:$4 sm:$0xff]   ;;  %v15764_v63 = vld [vmem:[#allocation6 + $0x160] ss:$16 sps:$4 sm:$0xff]  }
 0x20e   : > { %v3698_v35 = vsel %vm18498_vm12, %v3687_v31, 0  ;;  %8969 = vmatprep.subr.bf16.mxu1 %v15721_v3  ;;  %v15731_v31 = vld [vmem:[#allocation6 + $0x220] ss:$16 sps:$4 sm:$0xff]  }
 0x20f   : > { %v3688_v12 = vsel %vm18049_vm2, 0, %v3648_v51  ;;  %8929 = vmatpush1.bf16.msra.mxu0 %v15716_v59  ;;  %v15767_v3 = vld [vmem:[#allocation6 + $0x360] ss:$16 sps:$4 sm:$0xff]   ;;  %v15769_v59 = vld [vmem:[#allocation6 + $0x364] ss:$16 sps:$4 sm:$0xff]  }
 0x210   : > { %v3699_v40 = vsel %vm18498_vm12, %v3688_v12, 0  ;;  %8930 = vmatprep.subr.bf16.mxu0 %v15724_v32  ;;  %v15736_v12 = vld [vmem:[#allocation6 + $0x4] ss:$16 sps:$4 sm:$0xff]   ;;  %v15773_v32 = vld [vmem:[#allocation6 + $0x340] ss:$16 sps:$4 sm:$0xff]  }
 0x211   : > { %v3714_v25 = vcombine.low %v3698_v35, %v3699_v40  ;;  %v3715_v36 = vcombine.high %v3698_v35, %v3699_v40  ;;  %8970 = vmatpush1.bf16.msra.mxu1 %v15719_v60  ;;  %v15734_v35 = vld [vmem:[#allocation6] ss:$16 sps:$4 sm:$0xff]   ;;  %v15739_v40 = vld [vmem:[#allocation6 + $0x204] ss:$16 sps:$4 sm:$0xff]  }
 0x212   : > { %8971 = vmatprep.subr.bf16.mxu1 %v15727_v0  ;;  %v15772_v60 = vld [vmem:[#allocation6 + $0x144] ss:$16 sps:$4 sm:$0xff]   ;;  %v15779_v0 = vld [vmem:[#allocation6 + $0x320] ss:$16 sps:$4 sm:$0xff]  }
 0x213   : > { %v18555_v19 = vrot.slane %v3714_v25, %v17991_v11  ;;  %v18558_v1 = vrot.slane %v3715_v36, %v17991_v11  ;;  %8931 = vmatpush1.bf16.msra.mxu0 %v15722_v58  ;;  %v15737_v25 = vld [vmem:[#allocation6 + $0x200] ss:$16 sps:$4 sm:$0xff]   ;;  %v15742_v36 = vld [vmem:[#allocation6 + $0x1e4] ss:$16 sps:$4 sm:$0xff]  }
 0x214   : > { %8932 = vmatprep.subr.bf16.mxu0 %v15730_v22  ;;  %v15776_v58 = vld [vmem:[#allocation6 + $0x120] ss:$16 sps:$4 sm:$0xff]   ;;  %v15793_v22 = vld [vmem:[#allocation6 + $0x6e4] ss:$16 sps:$4 sm:$0xff]  }
 0x215   : > { %v3776_v56 = vcombine.low %v18546_v18, %v18555_v19  ;;  %v3777_v34 = vcombine.high %v18546_v18, %v18555_v19  ;;  %8972 = vmatpush1.bf16.msra.mxu1 %v15725_v29  ;;  %v15782_v29 = vld [vmem:[#allocation6 + $0x100] ss:$16 sps:$4 sm:$0xff]  }
 0x216   : > { %8973 = vmatprep.subr.bf16.mxu1 %v15733_v30 }
 0x217   : > { %8933 = vmatpush1.bf16.msra.mxu0 %v15728_v52  ;;  %v3788_v62 = vrot.slane %v3776_v56, %v17991_v11 }
 0x218   : > { %8934 = vmatprep.subr.bf16.mxu0 %v15736_v12 }
 0x219   : > { %8974 = vmatpush1.bf16.msra.mxu1 %v15731_v31 }
 0x21a   : > { %8975 = vmatprep.subr.bf16.mxu1 %v15739_v40 }
 0x21b   : > { %8935 = vmatpush1.bf16.msra.mxu0 %v15734_v35 }
 0x21c   : > { %8936 = vmatprep.subr.bf16.mxu0 %v15742_v36 }
 0x21d   : > { %8976 = vmatpush1.bf16.msra.mxu1 %v15737_v25 }
 0x21e   : > { %8977 = vmatprep.subr.bf16.mxu1 %v15745_v7 }
 0x21f   : > { %8937 = vmatpush2.bf16.msra.mxu0 %v15740_v14 }
 0x220   : > { %8938 = vmatprep.subr.bf16.mxu0 %v15748_v47 }
 0x221   : > { %8978 = vmatpush2.bf16.msra.mxu1 %v15743_v42 }
 0x222   : > { %8979 = vmatprep.subr.bf16.mxu1 %v15751_v37 }
 0x223   : > { %8939 = vmatpush2.bf16.msra.mxu0 %v15746_v33 }
 0x224   : > { %8940 = vmatprep.subr.bf16.mxu0 %v15754_v38 }
 0x225   : > { %8980 = vmatpush2.bf16.msra.mxu1 %v15749_v6 }
 0x226   : > { %8981 = vmatprep.subr.bf16.mxu1 %v15757_v48 }
 0x227   : > { %8941 = vmatpush2.bf16.msra.mxu0 %v15752_v15 }
 0x228   : > { %8942 = vmatprep.subr.bf16.mxu0 %v15760_v50 }
 0x229   : > { %8982 = vmatpush2.bf16.msra.mxu1 %v15755_v2 }
 0x22a   : > { %8983 = vmatprep.subr.bf16.mxu1 %v15763_v57 }
 0x22b   : > { %8943 = vmatpush2.bf16.msra.mxu0 %v15758_v28 }
 0x22c   : > { %8944 = vmatprep.subr.bf16.mxu0 %v15766_v45  ;;  %v17613_v45 = vld [vmem:[#allocation4] sm:$0xff] }
 0x22d   : > { %8984 = vmatpush2.bf16.msra.mxu1 %v15761_v61  ;;  %v18591_v61 = vsub.s32 6, %v17966_v55 }
 0x22e   : > { %8985 = vmatprep.subr.bf16.mxu1 %v15769_v59 }
 0x22f   : > { %8945 = vmatpush2.bf16.msra.mxu0 %v15764_v63  ;;  %19435 = vst [vmem:[#allocation17_spill] sm:$0xff] %v18591_v61  ;;  %v18594_v63 = vsub.s32 7, %v17966_v55 }
 0x230   : > { %8946 = vmatprep.subr.bf16.mxu0 %v15772_v60 }
 0x231   : > { %8986 = vmatpush2.bf16.msra.mxu1 %v15767_v3  ;;  %19436 = vst [vmem:[#allocation18_spill] sm:$0xff] %v18594_v63  ;;  %v1180_v3 = vrot.slane %v17613_v45, %v18591_v61  ;;  %v1184_v59 = vrot.slane %v17613_v45, %v18594_v63 }
 0x23e   : > { %v3393_v26 = vpop.f32.mrf.mxu0 }
 0x23f   : > { %v3394_v20 = vadd.f32 %v3393_v26, %v1172_v27  ;;  %v15775_v27 = vld [vmem:[#allocation6 + $0x344] ss:$16 sps:$4 sm:$0xff]  }
 0x240   : > { %v3434_v44 = vpop.f32.mrf.mxu1  ;;  %v3395_v9 = vpop.f32.mrf.mxu0  ;;  %v15778_v26 = vld [vmem:[#allocation6 + $0x124] ss:$16 sps:$4 sm:$0xff]   ;;  %8987 = vmatprep.subr.bf16.mxu1 %v15775_v27 }
 0x241   : > { %v18576_v46 = vadd.f32 %v3434_v44, %v3394_v20  ;;  %v3396_v10 = vadd.f32 %v3395_v9, %v1176_v41  ;;  %v15770_v41 = vld [vmem:[#allocation6 + $0x140] ss:$16 sps:$4 sm:$0xff]   ;;  %v15781_v20 = vld [vmem:[#allocation6 + $0x324] ss:$16 sps:$4 sm:$0xff]   ;;  %8988 = vmatpush2.bf16.msra.mxu1 %v15773_v32 }
 0x242   : > { %v3436_v4 = vpop.f32.mrf.mxu1  ;;  %v3397_v49 = vpop.f32.mrf.mxu0  ;;  %v15784_v44 = vld [vmem:[#allocation6 + $0x104] ss:$16 sps:$4 sm:$0xff]   ;;  %8947 = vmatpush2.bf16.msra.mxu0 %v15770_v41  ;;  %8989 = vmatprep.subr.bf16.mxu1 %v15781_v20 }
 0x243   : > { %v18578_v8 = vadd.f32 %v3436_v4, %v3396_v10  ;;  %8948 = vmatprep.subr.bf16.mxu0 %v15778_v26  ;;  %v15787_v9 = vld [vmem:[#allocation6 + $0x304] ss:$16 sps:$4 sm:$0xff]   ;;  %v15785_v10 = vld [vmem:[#allocation6 + $0x300] ss:$16 sps:$4 sm:$0xff]  }
 0x244   : > { %v3438_v16 = vpop.f32.mrf.mxu1  ;;  %v3398_v24 = vpop.f32.mrf.mxu0  ;;  %v15790_v4 = vld [vmem:[#allocation6 + $0x4e4] ss:$16 sps:$4 sm:$0xff]  }
 0x245   : > { %8990 = vmatpush2.bf16.msra.mxu1 %v15779_v0 }
 0x246   : > { %v3439_v51 = vpop.f32.mrf.mxu1  ;;  %8949 = vmatpush2.bf16.msra.mxu0 %v15776_v58  ;;  %8991 = vmatprep.subr.bf16.mxu1 %v15787_v9 }
 0x247   : > { %8950 = vmatprep.subr.bf16.mxu0 %v15784_v44 }
 0x249   : > { %8992 = vmatpush2.bf16.msra.mxu1 %v15785_v10 }
 0x24a   : > { %8951 = vmatpush2.bf16.msra.mxu0 %v15782_v29  ;;  %9043 = vmatprep.subr.bf16.mxu1 %v15793_v22 }
 0x24b   : > { %9002 = vmatprep.subr.bf16.mxu0 %v15790_v4 }
 0x27e   : > { %v3475_v49 = vpop.f32.mrf.mxu0 }
 0x27f   : > { %v3476_v52 = vadd.f32 %v3475_v49, %v18576_v46 }
 0x280   : > { %v3516_v16 = vpop.f32.mrf.mxu1  ;;  %v3477_v30 = vpop.f32.mrf.mxu0 }
 0x281   : > { %v3609_v24 = vmax.f32 %v3476_v52, 0.0  ;;  %v3478_v31 = vadd.f32 %v3477_v30, %v18578_v8  ;;  %v3517_v60 = vadd.f32 %v3516_v16, %v1180_v3 }
 0x282   : > { %v3518_v51 = vpop.f32.mrf.mxu1  ;;  %v3479_v12 = vpop.f32.mrf.mxu0 }
 0x283   : > { %v3617_v35 = vpack.c.bf16 %v3609_v24, %v3609_v24  ;;  %v3610_v40 = vmax.f32 %v3478_v31, 0.0  ;;  %v3519_v41 = vadd.f32 %v3518_v51, %v1184_v59 }
 0x284   : > { %v3520_v25 = vpop.f32.mrf.mxu1  ;;  %v3480_v36 = vpop.f32.mrf.mxu0 }
 0x285   : > { %v3650_v14 = vshrl.u32 %v3617_v35, 16  ;;  %v3618_v7 = vpack.c.bf16 %v3610_v40, %v3610_v40  ;;  %v3653_v33 = vshll.u32 %v3617_v35, 16 }
 0x286   : > { %v3521_v42 = vpop.f32.mrf.mxu1 }
 0x287   : > { %v3652_v47 = vrot.slane %v3650_v14, 7  ;;  %v3657_v37 = vshrl.u32 %v3618_v7, 16  ;;  %v3660_v46 = vshll.u32 %v3618_v7, 16 }
 0x289   : > { %v3655_v6 = vor.u32 %v3653_v33, %v3652_v47  ;;  %v3659_v38 = vrot.slane %v3657_v37, 7 }
 0x28b   : > { %v3689_v15 = vsel %vm18049_vm2, 0, %v3655_v6  ;;  %v3662_v48 = vor.u32 %v3660_v46, %v3659_v38 }
 0x28c   : > { %v3700_v2 = vsel %vm18498_vm12, %v3689_v15, 0 }
 0x28d   : > { %v3690_v8 = vsel %vm18049_vm2, 0, %v3662_v48 }
 0x28e   : > { %v3701_v50 = vsel %vm18498_vm12, %v3690_v8, 0 }
 0x28f   : > { %v3716_v28 = vcombine.low %v3700_v2, %v3701_v50  ;;  %v3717_v57 = vcombine.high %v3700_v2, %v3701_v50  ;;  %v3802_v2 = vrot.slane %v3777_v34, %v17991_v11 }
 0x291   : > { %v3754_v6 = vrot.slane %v3716_v28, %v17991_v11  ;;  %v18608_v38 = vrot.slane %v3717_v57, %v17991_v11 }
 0x2be   : > { %v3557_v27 = vpop.f32.mrf.mxu0 }
 0x2bf   : > { %v3558_v32 = vadd.f32 %v3557_v27, %v3517_v60 }
 0x2c0   : > { %v3598_v26 = vpop.f32.mrf.mxu1  ;;  %v3559_v58 = vpop.f32.mrf.mxu0 }
 0x2c1   : > { %v3599_v20 = vadd.f32 %v3598_v26, %v3558_v32  ;;  %v3560_v44 = vadd.f32 %v3559_v58, %v3519_v41 }
 0x2c2   : > { %v3600_v0 = vpop.f32.mrf.mxu1  ;;  %v3561_v9 = vpop.f32.mrf.mxu0 }
 0x2c3   : > { %v3611_v29 = vmax.f32 %v3599_v20, 0.0  ;;  %v3601_v10 = vadd.f32 %v3600_v0, %v3560_v44 }
 0x2c4   : > { %v3602_v4 = vpop.f32.mrf.mxu1  ;;  %v3562_v22 = vpop.f32.mrf.mxu0 }
 0x2c5   : > { %v3619_v49 = vpack.c.bf16 %v3611_v29, %v3611_v29  ;;  %v3612_v52 = vmax.f32 %v3601_v10, 0.0 }
 0x2c6   : > { %v3603_v30 = vpop.f32.mrf.mxu1 }
 0x2c7   : > { %v3664_v24 = vshrl.u32 %v3619_v49, 16  ;;  %v3620_v31 = vpack.c.bf16 %v3612_v52, %v3612_v52  ;;  %v3667_v16 = vshll.u32 %v3619_v49, 16 }
 0x2c9   : > { %v3666_v12 = vrot.slane %v3664_v24, 7  ;;  %v3671_v35 = vshrl.u32 %v3620_v31, 16  ;;  %v3674_v25 = vshll.u32 %v3620_v31, 16 }
 0x2cb   : > { %v3669_v51 = vor.u32 %v3667_v16, %v3666_v12  ;;  %v3673_v40 = vrot.slane %v3671_v35, 7 }
 0x2cd   : > { %v3691_v36 = vsel %vm18049_vm2, 0, %v3669_v51  ;;  %v3676_v14 = vor.u32 %v3674_v25, %v3673_v40 }
 0x2ce   : > { %v3702_v42 = vsel %vm18498_vm12, %v3691_v36, 0 }
 0x2cf   : > { %v3692_v7 = vsel %vm18049_vm2, 0, %v3676_v14 }
 0x2d0   : > { %v3703_v47 = vsel %vm18498_vm12, %v3692_v7, 0 }
 0x2d1   : > { %v3718_v33 = vcombine.low %v3702_v42, %v3703_v47  ;;  %v3719_v37 = vcombine.high %v3702_v42, %v3703_v47 }
 0x2d3   : > { %v3768_v46 = vrot.slane %v3718_v33, %v17991_v11  ;;  %v18612_v15 = vrot.slane %v3719_v37, %v17991_v11 }
 0x2d5   : > { %v3779_v43 = vcombine.low %v3754_v6, %v3768_v46  ;;  %v3780_v48 = vcombine.high %v3754_v6, %v3768_v46 }
 0x2d7   : > { %v3809_v50 = vrot.slane %v3779_v43, %v17991_v11  ;;  %v3823_v28 = vrot.slane %v3780_v48, %v17991_v11 }
 0x2d9   : > { %v3827_v57 = vcombine.low %v3802_v2, %v3823_v28  ;;  %v14326_v45 = vcombine.low %v3823_v28, %v3823_v28  ;;  %v3824_v3 = vcombine.low %v3788_v62, %v3809_v50  ;;  %v3825_v59 = vcombine.high %v3788_v62, %v3809_v50 }
 0x2da   : > { %v3828_v60 = vcombine.high %v3802_v2, %v3823_v28  ;;  %v14325_v27 = vcombine.low %v3809_v50, %v3809_v50  ;;  %v14327_v41 = vcombine.high %v3809_v50, %v3809_v50  ;;  %v14328_v58 = vcombine.high %v3823_v28, %v3823_v28 }
 0x2db   : > { %v3836_v32 = vrot.slane %v3824_v3, %v17991_v11  ;;  %v3885_v56 = vrot.slane %v3827_v57, %v17991_v11  ;;  %v3934_v26 = vrot.slane %v3825_v59, %v17991_v11  ;;  %v18634_v34 = vrot.slane %v14326_v45, %v17991_v11 }
 0x2dc   : > { %v3983_v18 = vrot.slane %v3828_v60, %v17991_v11  ;;  %v18631_v19 = vrot.slane %v14325_v27, %v17991_v11  ;;  %v18637_v20 = vrot.slane %v14327_v41, %v17991_v11  ;;  %v18659_v31 = vrot.slane %v14328_v58, %v17991_v11 }
 0x2dd   : > { %v3844_v44 = vcombine.high %v3836_v32, %v3836_v32  ;;  %v3893_v0 = vcombine.high %v3885_v56, %v3885_v56  ;;  %v3942_v9 = vcombine.high %v3934_v26, %v3934_v26  ;;  %v18640_v29 = vrot.slane %v3836_v32, %v17991_v11 }
 0x2de   : > { %v3991_v10 = vcombine.high %v3983_v18, %v3983_v18  ;;  %v18643_v4 = vrot.slane %v3885_v56, %v17991_v11  ;;  %v18646_v22 = vrot.slane %v3934_v26, %v17991_v11  ;;  %v18649_v49 = vrot.slane %v3983_v18, %v17991_v11 }
 0x2df   : > { %v18652_v52 = vrot.slane %v3844_v44, %v17991_v11  ;;  %v3915_v30 = vrot.slane %v3893_v0, %v17991_v11  ;;  %v18656_v24 = vrot.slane %v3942_v9, %v17991_v11  ;;  %v19396_v14 = vunpack.c.l.b16 %v18640_v29  ;;  %v15788_v44 = vld [vmem:[#allocation6 + $0x4e0] ss:$16 sps:$4 sm:$0xff]  }
 0x2e0   : > { %v18662_v12 = vrot.slane %v3991_v10, %v17991_v11  ;;  %v18665_v16 = vunpack.c.l.b16 %v18643_v4  ;;  %v19395_v35 = vunpack.c.l.b16 %v18646_v22  ;;  %v19394_v51 = vunpack.c.l.b16 %v18649_v49 }
 0x2e1   : > { %v4026_v40 = vunpack.c.l.b16 %v18652_v52  ;;  %v18670_v25 = vunpack.c.l.b16 %v3915_v30  ;;  %v19400_v36 = vunpack.c.l.b16 %v18656_v24  ;;  %v3876_v33 = vcombine.high %v18652_v52, %v18652_v52 }
 0x2e2   : > { %v19399_v7 = vunpack.c.l.b16 %v18662_v12  ;;  %v4057_v42 = vrot.slane %v18665_v16, 7  ;;  %v4059_v47 = vrot.slane %v19395_v35, 6  ;;  %v3925_v46 = vcombine.high %v3915_v30, %v3915_v30 }
 0x2e3   : > { %v4063_v37 = vrot.slane %v18670_v25, 7  ;;  %v4065_v6 = vrot.slane %v19400_v36, 6  ;;  %v3974_v43 = vcombine.high %v18656_v24, %v18656_v24  ;;  %v4061_v2 = vrot.slane %v19394_v51, 5 }
 0x2e4   : > { %v4067_v48 = vrot.slane %v19399_v7, 5  ;;  %v4058_v62 = vsel %vm653_vm3, %v4057_v42, %v19396_v14  ;;  %v4023_v50 = vcombine.high %v18662_v12, %v18662_v12  ;;  %v18698_v45 = vunpack.c.l.b16 %v3925_v46 }
 0x2e5   : > { %v4064_v28 = vsel %vm653_vm3, %v4063_v37, %v4026_v40  ;;  %v4060_v57 = vsel %vm656_vm4, %v4059_v47, %v4058_v62  ;;  %v18700_v3 = vunpack.c.l.b16 %v3974_v43  ;;  %v3845_v41 = vcombine.high %v18631_v19, %v18631_v19  ;;  %v15796_v37 = vld [vmem:[#allocation6 + $0x4c4] ss:$16 sps:$4 sm:$0xff]  }
 0x2e6   : > { %v4066_v59 = vsel %vm656_vm4, %v4065_v6, %v4064_v28  ;;  %v4062_v60 = vsel %vm659_vm5, %v4061_v2, %v4060_v57  ;;  %v18704_v27 = vunpack.c.l.b16 %v4023_v50  ;;  %v18709_v56 = vunpack.c.l.b16 %v3876_v33 }
 0x2e7   : > { %v4068_v32 = vsel %vm659_vm5, %v4067_v48, %v4066_v59  ;;  %v4075_v26 = vrot.slane %v18698_v45, 7  ;;  %v4077_v58 = vrot.slane %v18700_v3, 6  ;;  %v18715_v0 = vpack.c.b16 %v4062_v60, %v4062_v60 }
 0x2e8   : > { %v18713_v18 = vpack.c.b16 %v4068_v32, %v4068_v32  ;;  %v18718_v9 = vrot.slane %v3845_v41, %v17991_v11  ;;  %v3894_v10 = vcombine.high %v18634_v34, %v18634_v34  ;;  %v4079_v42 = vrot.slane %v18704_v27, 5  ;;  %v15794_v41 = vld [vmem:[#allocation6 + $0x4c0] ss:$16 sps:$4 sm:$0xff]  }
 0x2e9   : > { %v4076_v30 = vsel %vm653_vm3, %v4075_v26, %v18709_v56  ;;  %v3943_v47 = vcombine.high %v18637_v20, %v18637_v20  ;;  %v3992_v33 = vcombine.high %v18659_v31, %v18659_v31  ;;  %v3874_v43 = vcombine.high %v18640_v29, %v18640_v29 }
 0x2ea   : > { %8952 = vmatprep.mubr.bf16.mxu0 %v18713_v18  ;;  %v4078_v6 = vsel %vm656_vm4, %v4077_v58, %v4076_v30  ;;  %v3922_v46 = vrot.slane %v3894_v10, %v17991_v11  ;;  %v3923_v48 = vcombine.high %v18643_v4, %v18643_v4  ;;  %v3972_v28 = vcombine.high %v18646_v22, %v18646_v22 }
 0x2eb   : > { %8953 = vmatmul.mubr.bf16.vlgmr.msra.gmra.mxu0 %v18715_v0  ;;  %v4080_v62 = vsel %vm659_vm5, %v4079_v42, %v4078_v6  ;;  %v18739_v2 = vrot.slane %v3943_v47, %v17991_v11  ;;  %v18742_v50 = vrot.slane %v3992_v33, %v17991_v11  ;;  %v19398_v59 = vunpack.c.l.b16 %v18718_v9 }
 0x2ec   : > { %9003 = vmatpush1.bf16.msra.mxu0 %v15788_v44  ;;  %v18746_v57 = vpack.c.b16 %v4080_v62, %v4080_v62  ;;  %v18749_v60 = vunpack.c.l.b16 %v3922_v46  ;;  %v4021_v4 = vcombine.high %v18649_v49, %v18649_v49  ;;  %v18755_v58 = vunpack.c.l.b16 %v3923_v48  ;;  %v15802_v44 = vld [vmem:[#allocation6 + $0x4a4] ss:$16 sps:$4 sm:$0xff]  }
 0x2ed   : > { %v19393_v32 = vunpack.c.l.b16 %v18739_v2  ;;  %v19397_v26 = vunpack.c.l.b16 %v18742_v50  ;;  %v18757_v10 = vunpack.c.l.b16 %v3972_v28  ;;  %9004 = vmatprep.subr.bf16.mxu0 %v15796_v37  ;;  %v18761_v42 = vunpack.c.l.b16 %v3874_v43 }
 0x2ee   : > { %8993 = vmatprep.mubr.bf16.mxu1 %v18746_v57  ;;  %v4087_v30 = vrot.slane %v18749_v60, 7  ;;  %v18763_v47 = vunpack.c.l.b16 %v4021_v4  ;;  %v3926_v33 = vcombine.high %v3922_v46, %v3922_v46  ;;  %v4069_v62 = vrot.slane %v18755_v58, 7 }
 0x2ef   : > { %v4089_v6 = vrot.slane %v19393_v32, 6  ;;  %v4071_v48 = vrot.slane %v18757_v10, 6  ;;  %v3877_v37 = vcombine.high %v18718_v9, %v18718_v9  ;;  %v4091_v43 = vrot.slane %v19397_v26, 5  ;;  %v15800_v32 = vld [vmem:[#allocation6 + $0x4a0] ss:$16 sps:$4 sm:$0xff]  }
 0x2f0   : > { %v4088_v28 = vsel %vm653_vm3, %v4087_v30, %v19398_v59  ;;  %v3975_v46 = vcombine.high %v18739_v2, %v18739_v2  ;;  %v4024_v4 = vcombine.high %v18742_v50, %v18742_v50  ;;  %9005 = vmatpush1.bf16.msra.mxu0 %v15794_v41  ;;  %v4070_v35 = vsel %vm653_vm3, %v4069_v62, %v18761_v42  ;;  %v15808_v30 = vld [vmem:[#allocation6 + $0x484] ss:$16 sps:$4 sm:$0xff]  }
 0x2f1   : > { %v4090_v51 = vsel %vm656_vm4, %v4089_v6, %v4088_v28  ;;  %v4073_v14 = vrot.slane %v18763_v47, 5  ;;  %v18784_v8 = vunpack.c.l.b16 %v3926_v33  ;;  %9006 = vmatprep.subr.bf16.mxu0 %v15802_v44  ;;  %v4072_v59 = vsel %vm656_vm4, %v4071_v48, %v4070_v35  ;;  %v15791_v6 = vld [vmem:[#allocation6 + $0x6e0] ss:$16 sps:$4 sm:$0xff]  }
 0x2f2   : > { %v4092_v26 = vsel %vm659_vm5, %v4091_v43, %v4090_v51  ;;  %v18788_v23 = vunpack.c.l.b16 %v3975_v46  ;;  %v18790_v7 = vunpack.c.l.b16 %v4024_v4  ;;  %v18795_v62 = vunpack.c.l.b16 %v3877_v37  ;;  %v15799_v51 = vld [vmem:[#allocation6 + $0x6c4] ss:$16 sps:$4 sm:$0xff]   ;;  %v15806_v35 = vld [vmem:[#allocation6 + $0x480] ss:$16 sps:$4 sm:$0xff]  }
 0x2f3   : > { %v18792_v41 = vpack.c.b16 %v4092_v26, %v4092_v26  ;;  %v4074_v28 = vsel %vm659_vm5, %v4073_v14, %v4072_v59  ;;  %v4099_v33 = vrot.slane %v18784_v8, 7  ;;  %v15814_v14 = vld [vmem:[#allocation6 + $0x464] ss:$16 sps:$4 sm:$0xff]   ;;  %v4127_v37 = vrot.slane %v4026_v40, 1  ;;  %v15797_v4 = vld [vmem:[#allocation6 + $0x6c0] ss:$16 sps:$4 sm:$0xff]  }
 0x2f4   : > { %v18798_v36 = vpack.c.b16 %v4074_v28, %v4074_v28  ;;  %v4101_v44 = vrot.slane %v18788_v23, 6  ;;  %9007 = vmatpush1.bf16.msra.mxu0 %v15800_v32  ;;  %v4103_v48 = vrot.slane %v18790_v7, 5  ;;  %v19437_v43 = vunpack.c.l.b16 %v18656_v24  ;;  %v15820_v24 = vld [vmem:[#allocation6 + $0x444] ss:$16 sps:$4 sm:$0xff]  }
 0x2f5   : > { %9034 = vmatprep.mubr.bf16.mxu0 %v18792_v41  ;;  %v4100_v26 = vsel %vm653_vm3, %v4099_v33, %v18795_v62  ;;  %9008 = vmatprep.subr.bf16.mxu0 %v15808_v30  ;;  %v15805_v30 = vld [vmem:[#allocation6 + $0x6a4] ss:$16 sps:$4 sm:$0xff]   ;;  %v15812_v33 = vld [vmem:[#allocation6 + $0x460] ss:$16 sps:$4 sm:$0xff]   ;;  %v19438_v52 = vunpack.c.l.b16 %v18662_v12  ;;  %v19451_v63 = vrot.slane %v18790_v7, 6 }
 0x2f6   : > { %8994 = vmatmul.mubr.bf16.vlgmr.msra.gmra.mxu1 %v18798_v36  ;;  %v4102_v59 = vsel %vm656_vm4, %v4101_v44, %v4100_v26  ;;  %v18811_v32 = vrot.slane %v19437_v43, 7  ;;  %v4128_v44 = vsel %vm653_vm3, %v18670_v25, %v4127_v37  ;;  %v3908_v26 = vrot.slane %v18634_v34, %v17991_v11  ;;  %v15818_v37 = vld [vmem:[#allocation6 + $0x440] ss:$16 sps:$4 sm:$0xff]  }
 0x2f7   : > { %9044 = vmatpush1.bf16.msra.mxu1 %v15791_v6  ;;  %v4104_v46 = vsel %vm659_vm5, %v4103_v48, %v4102_v59  ;;  %v18820_v40 = vrot.slane %v19438_v52, 6  ;;  %v18824_v6 = vrot.slane %v18631_v19, %v17991_v11  ;;  %v15803_v48 = vld [vmem:[#allocation6 + $0x6a0] ss:$16 sps:$4 sm:$0xff]   ;;  %v19439_v19 = vcombine.low %v18552_v54, %v18558_v1  ;;  %v15811_v59 = vld [vmem:[#allocation6 + $0x684] ss:$16 sps:$4 sm:$0xff]  }
 0x2f8   : > { %v18814_v28 = vpack.c.b16 %v4104_v46, %v4104_v46  ;;  %9045 = vmatprep.subr.bf16.mxu1 %v15799_v51  ;;  %9009 = vmatpush1.bf16.msra.mxu0 %v15806_v35  ;;  %v18830_v51 = vrot.slane %v18637_v20, %v17991_v11  ;;  %v4130_v35 = vsel %vm656_vm4, %v18811_v32, %v4128_v44  ;;  %v4139_v46 = vrot.slane %v18709_v56, 1  ;;  %v15826_v54 = vld [vmem:[#allocation6 + $0x424] ss:$16 sps:$4 sm:$0xff]   ;;  %v15809_v52 = vld [vmem:[#allocation6 + $0x680] ss:$16 sps:$4 sm:$0xff]  }
 0x2f9   : > { %9010 = vmatprep.subr.bf16.mxu0 %v15814_v14  ;;  %v18837_v12 = vsel %vm659_vm5, %v18820_v40, %v4130_v35  ;;  %v18843_v34 = vrot.slane %v19439_v19, %v17991_v11  ;;  %v19440_v20 = vcombine.low %v18608_v38, %v18612_v15  ;;  %v18853_v43 = vrot.slane %v18659_v31, %v17991_v11  ;;  %v15824_v1 = vld [vmem:[#allocation6 + $0x420] ss:$16 sps:$4 sm:$0xff]  }
 0x2fa   : > { %9075 = vmatprep.mubr.bf16.mxu1 %v18814_v28  ;;  %v19402_v15 = vrot.slane %v18700_v3, 7  ;;  %v19401_v31 = vrot.slane %v18704_v27, 6  ;;  %v19441_v56 = vunpack.c.l.b16 %v18640_v29  ;;  %v3973_v35 = vcombine.high %v18830_v51, %v18830_v51 }
 0x2fb   : > { %9046 = vmatpush1.bf16.msra.mxu1 %v15797_v4  ;;  %v18849_v14 = vrot.slane %v19440_v20, %v17991_v11  ;;  %v18857_v4 = vunpack.c.l.b16 %v3908_v26  ;;  %v19442_v20 = vunpack.c.l.b16 %v18646_v22  ;;  %v19444_v22 = vunpack.c.l.b16 %v18718_v9 }
 0x2fc   : > { %9047 = vmatprep.subr.bf16.mxu1 %v15805_v30  ;;  %9011 = vmatpush1.bf16.msra.mxu0 %v15812_v33  ;;  %v3875_v30 = vcombine.high %v18824_v6, %v18824_v6  ;;  %v4140_v33 = vsel %vm653_vm3, %v18698_v45, %v4139_v46  ;;  %v4121_v44 = vrot.slane %v19441_v56, 1  ;;  %v15817_v46 = vld [vmem:[#allocation6 + $0x664] ss:$16 sps:$4 sm:$0xff]  }
 0x2fd   : > { %9012 = vmatprep.subr.bf16.mxu0 %v15820_v24  ;;  %v3924_v24 = vcombine.high %v3908_v26, %v3908_v26  ;;  %v4142_v19 = vsel %vm656_vm4, %v19402_v15, %v4140_v33  ;;  %v18875_v38 = vrot.slane %v19442_v20, 7  ;;  %v4151_v33 = vrot.slane %v19444_v22, 1  ;;  %v15815_v15 = vld [vmem:[#allocation6 + $0x660] ss:$16 sps:$4 sm:$0xff]  }
 0x2fe   : > { %v18880_v29 = vsel %vm659_vm5, %v19401_v31, %v4142_v19  ;;  %v4122_v26 = vsel %vm653_vm3, %v18665_v16, %v4121_v44  ;;  %v4022_v20 = vcombine.high %v18853_v43, %v18853_v43  ;;  %v19445_v31 = vunpack.c.l.b16 %v18739_v2 }
 0x2ff   : > { %9048 = vmatpush1.bf16.msra.mxu1 %v15803_v48  ;;  %v19443_v48 = vunpack.c.l.b16 %v18649_v49  ;;  %v4124_v19 = vsel %vm656_vm4, %v18875_v38, %v4122_v26  ;;  %v18899_v49 = vunpack.c.l.b16 %v3875_v30  ;;  %v18911_v26 = vunpack.c.l.b16 %v3924_v24 }
 0x300   : > { %9049 = vmatprep.subr.bf16.mxu1 %v15811_v59  ;;  %9013 = vmatpush1.bf16.msra.mxu0 %v15818_v37  ;;  %v15832_v59 = vld [vmem:[#allocation6 + $0x404] ss:$16 sps:$4 sm:$0xff]   ;;  %v18897_v44 = vrot.slane %v19445_v31, 7  ;;  %v4133_v30 = vrot.slane %v18761_v42, 1  ;;  %v19405_v31 = vrot.slane %v18757_v10, 7  ;;  %v18956_v39 = vunpack.c.l.b16 %v4022_v20 }
 0x301   : > { %v18886_v56 = vrot.slane %v19443_v48, 6  ;;  %9014 = vmatprep.subr.bf16.mxu0 %v15826_v54  ;;  %v4152_v54 = vsel %vm653_vm3, %v18749_v60, %v4151_v33  ;;  %v19446_v48 = vunpack.c.l.b16 %v18742_v50  ;;  %v15830_v37 = vld [vmem:[#allocation6 + $0x400] ss:$16 sps:$4 sm:$0xff]   ;;  %v18917_v33 = vunpack.c.l.b16 %v3973_v35 }
 0x302   : > { %v4154_v2 = vsel %vm656_vm4, %v18897_v44, %v4152_v54  ;;  %v15838_v54 = vld [vmem:[#allocation6 + $0x5e4] ss:$16 sps:$4 sm:$0xff]   ;;  %v4134_v42 = vsel %vm653_vm3, %v18755_v58, %v4133_v30  ;;  %v19447_v35 = vunpack.c.l.b16 %v18824_v6  ;;  %v19449_v30 = vunpack.c.l.b16 %v18853_v43 }
 0x303   : > { %v18903_v9 = vsel %vm659_vm5, %v18886_v56, %v4124_v19  ;;  %v18909_v22 = vrot.slane %v19446_v48, 6  ;;  %9050 = vmatpush1.bf16.msra.mxu1 %v15809_v52  ;;  %v15823_v19 = vld [vmem:[#allocation6 + $0x644] ss:$16 sps:$4 sm:$0xff]   ;;  %v4163_v52 = vrot.slane %v18795_v62, 1  ;;  %v4246_v20 = vsel %vm653_vm3, %v18811_v32, %v18670_v25 }
 0x304   : > { %9051 = vmatprep.subr.bf16.mxu1 %v15817_v46  ;;  %9015 = vmatpush1.bf16.msra.mxu0 %v15824_v1  ;;  %v19410_v46 = vrot.slane %v18763_v47, 6  ;;  %v4145_v48 = vrot.slane %v19447_v35, 1  ;;  %v18942_v61 = vrot.slane %v19449_v30, 6  ;;  %v15821_v1 = vld [vmem:[#allocation6 + $0x640] ss:$16 sps:$4 sm:$0xff]   ;;  %v4242_v25 = vsel %vm653_vm3, %v18875_v38, %v18665_v16 }
 0x305   : > { %v18921_v50 = vsel %vm659_vm5, %v18909_v22, %v4154_v2  ;;  %9016 = vmatprep.subr.bf16.mxu0 %v15832_v59  ;;  %v4136_v2 = vsel %vm656_vm4, %v19405_v31, %v4134_v42  ;;  %v4164_v62 = vsel %vm653_vm3, %v18784_v8, %v4163_v52  ;;  %v19448_v59 = vunpack.c.l.b16 %v18830_v51  ;;  %v15829_v30 = vld [vmem:[#allocation6 + $0x624] ss:$16 sps:$4 sm:$0xff]  }
 0x306   : > { %v18947_v35 = vsel %vm659_vm5, %v19410_v46, %v4136_v2  ;;  %v19450_v42 = vrot.slane %v18788_v23, 7  ;;  %v4146_v52 = vsel %vm653_vm3, %v18857_v4, %v4145_v48  ;;  %v15844_v48 = vld [vmem:[#allocation6 + $0x5c4] ss:$16 sps:$4 sm:$0xff]  }
 0x307   : > { %v18938_v24 = vrot.slane %v19448_v59, 7  ;;  %9052 = vmatpush1.bf16.msra.mxu1 %v15815_v15  ;;  %v3826_v59 = vcombine.low %v18843_v34, %v18849_v14  ;;  %v15836_v15 = vld [vmem:[#allocation6 + $0x5e0] ss:$16 sps:$4 sm:$0xff]   ;;  %v15835_v32 = vld [vmem:[#allocation6 + $0x604] ss:$16 sps:$4 sm:$0xff]  }
 0x308   : > { %v4166_v31 = vsel %vm656_vm4, %v19450_v42, %v4164_v62  ;;  %9053 = vmatprep.subr.bf16.mxu1 %v15823_v19  ;;  %9017 = vmatpush1.bf16.msra.mxu0 %v15830_v37  ;;  %v4157_v42 = vrot.slane %v18899_v49, 1  ;;  %v4159_v19 = vrot.slane %v18917_v33, 7 }
 0x309   : > { %v18961_v2 = vsel %vm659_vm5, %v19451_v63, %v4166_v31  ;;  %v4148_v62 = vsel %vm656_vm4, %v18938_v24, %v4146_v52  ;;  %9018 = vmatprep.subr.bf16.mxu0 %v15838_v54  ;;  %v4192_v37 = vrot.slane %v3826_v59, %v17991_v11  ;;  %v4247_v63 = vsel %vm656_vm4, %v18820_v40, %v4246_v20  ;;  %v15827_v54 = vld [vmem:[#allocation6 + $0x620] ss:$16 sps:$4 sm:$0xff]   ;;  %v15850_v20 = vld [vmem:[#allocation6 + $0x5a4] ss:$16 sps:$4 sm:$0xff]  }
 0x30a   : > { %v18968_v34 = vsel %vm659_vm5, %v18942_v61, %v4148_v62  ;;  %v4158_v31 = vsel %vm653_vm3, %v18911_v26, %v4157_v42  ;;  %v19452_v62 = vrot.slane %v18700_v3, 7  ;;  %v15842_v40 = vld [vmem:[#allocation6 + $0x5c0] ss:$16 sps:$4 sm:$0xff]   ;;  %v4161_v42 = vrot.slane %v18956_v39, 6 }
 0x30b   : > { %9054 = vmatpush1.bf16.msra.mxu1 %v15821_v1  ;;  %v4200_v52 = vcombine.high %v4192_v37, %v4192_v37  ;;  %v4208_v46 = vrot.slane %v4192_v37, %v17991_v11  ;;  %v4160_v1 = vsel %vm656_vm4, %v4159_v19, %v4158_v31  ;;  %v19453_v3 = vrot.slane %v18704_v27, 6 }
 0x30c   : > { %v4254_v59 = vsel %vm653_vm3, %v19452_v62, %v18698_v45  ;;  %9055 = vmatprep.subr.bf16.mxu1 %v15829_v30  ;;  %9019 = vmatpush2.bf16.msra.mxu0 %v15836_v15  ;;  %v4243_v37 = vsel %vm656_vm4, %v18886_v56, %v4242_v25  ;;  %v14329_v30 = vcombine.low %v18849_v14, %v18849_v14  ;;  %v19454_v56 = vrot.slane %v18757_v10, 7 }
 0x30d   : > { %v4255_v45 = vsel %vm656_vm4, %v19453_v3, %v4254_v59  ;;  %9020 = vmatprep.subr.bf16.mxu0 %v15844_v48  ;;  %v4222_v16 = vrot.slane %v4200_v52, %v17991_v11  ;;  %v4234_v38 = vunpack.c.l.b16 %v4208_v46  ;;  %v4262_v15 = vsel %vm653_vm3, %v18897_v44, %v18749_v60  ;;  %v15833_v52 = vld [vmem:[#allocation6 + $0x600] ss:$16 sps:$4 sm:$0xff]   ;;  %v15841_v60 = vld [vmem:[#allocation6 + $0x7e4] ss:$16 sps:$4 sm:$0xff]  }
 0x30e   : > { %v19003_v31 = vsel %vm659_vm5, %v4161_v42, %v4160_v1  ;;  %v4263_v27 = vsel %vm656_vm4, %v18909_v22, %v4262_v15  ;;  %v4230_v62 = vcombine.high %v4208_v46, %v4208_v46  ;;  %v4250_v48 = vsel %vm653_vm3, %v19454_v56, %v18755_v58  ;;  %v15848_v44 = vld [vmem:[#allocation6 + $0x5a0] ss:$16 sps:$4 sm:$0xff]  }
 0x30f   : > { %9056 = vmatpush1.bf16.msra.mxu1 %v15827_v54  ;;  %v4235_v59 = vunpack.c.l.b16 %v4222_v16  ;;  %v4232_v14 = vcombine.high %v4222_v16, %v4222_v16  ;;  %v4199_v25 = vrot.slane %v14329_v30, %v17991_v11  ;;  %v4244_v1 = vrot.slane %v4234_v38, 5  ;;  %v15856_v54 = vld [vmem:[#allocation6 + $0x584] ss:$16 sps:$4 sm:$0xff]  }
 0x310   : > { %9057 = vmatprep.subr.bf16.mxu1 %v15835_v32  ;;  %9021 = vmatpush2.bf16.msra.mxu0 %v15842_v40  ;;  %v4236_v3 = vunpack.c.l.b16 %v4230_v62  ;;  %v19455_v22 = vrot.slane %v18763_v47, 6  ;;  %v19456_v10 = vrot.slane %v18788_v23, 7  ;;  %v19457_v32 = vrot.slane %v18790_v7, 6 }
 0x311   : > { %9022 = vmatprep.subr.bf16.mxu0 %v15850_v20  ;;  %v4248_v16 = vrot.slane %v4235_v59, 5  ;;  %v4237_v15 = vunpack.c.l.b16 %v4232_v14  ;;  %v4201_v30 = vcombine.high %v4199_v25, %v4199_v25  ;;  %v19023_v38 = vsel %vm659_vm5, %v4244_v1, %v4243_v37  ;;  %v15847_v37 = vld [vmem:[#allocation6 + $0x7c4] ss:$16 sps:$4 sm:$0xff]  }
 0x312   : > { %v4251_v46 = vsel %vm656_vm4, %v19455_v22, %v4250_v48  ;;  %v4270_v58 = vsel %vm653_vm3, %v19456_v10, %v18784_v8  ;;  %v4252_v47 = vrot.slane %v4236_v3, 5  ;;  %v4215_v62 = vrot.slane %v4199_v25, %v17991_v11  ;;  %v15839_v8 = vld [vmem:[#allocation6 + $0x7e0] ss:$16 sps:$4 sm:$0xff]  }
 0x313   : > { %v4271_v40 = vsel %vm656_vm4, %v19457_v32, %v4270_v58  ;;  %v4258_v23 = vsel %vm653_vm3, %v18938_v24, %v18857_v4  ;;  %9058 = vmatpush1.bf16.msra.mxu1 %v15833_v52  ;;  %v19030_v20 = vsel %vm659_vm5, %v4248_v16, %v4247_v63  ;;  %v4229_v56 = vrot.slane %v4201_v30, %v17991_v11  ;;  %v15854_v48 = vld [vmem:[#allocation6 + $0x580] ss:$16 sps:$4 sm:$0xff]   ;;  %v15862_v24 = vld [vmem:[#allocation6 + $0x564] ss:$16 sps:$4 sm:$0xff]  }
 0x314   : > { %v4259_v7 = vsel %vm656_vm4, %v18942_v61, %v4258_v23  ;;  %9059 = vmatprep.subr.bf16.mxu1 %v15841_v60  ;;  %9023 = vmatpush2.bf16.msra.mxu0 %v15848_v44  ;;  %v4256_v59 = vrot.slane %v4237_v15, 5  ;;  %v19036_v14 = vsel %vm659_vm5, %v4252_v47, %v4251_v46  ;;  %v4238_v25 = vunpack.c.l.b16 %v4215_v62  ;;  %v15845_v60 = vld [vmem:[#allocation6 + $0x7c0] ss:$16 sps:$4 sm:$0xff]   ;;  %v15853_v58 = vld [vmem:[#allocation6 + $0x7a4] ss:$16 sps:$4 sm:$0xff]  }
 0x315   : > { %9024 = vmatprep.subr.bf16.mxu0 %v15856_v54  ;;  %v4239_v52 = vunpack.c.l.b16 %v4229_v56  ;;  %v4233_v1 = vcombine.high %v4229_v56, %v4229_v56  ;;  %v4231_v63 = vcombine.high %v4215_v62, %v4215_v62  ;;  %v4266_v61 = vsel %vm653_vm3, %v4159_v19, %v18911_v26  ;;  %v15860_v54 = vld [vmem:[#allocation6 + $0x560] ss:$16 sps:$4 sm:$0xff]   ;;  %v15868_v15 = vld [vmem:[#allocation6 + $0x544] ss:$16 sps:$4 sm:$0xff]  }
 0x316   : > { %v19039_v3 = vsel %vm659_vm5, %v4256_v59, %v4255_v45  ;;  %v4260_v22 = vrot.slane %v4238_v25, 5  ;;  %v4267_v10 = vsel %vm656_vm4, %v4161_v42, %v4266_v61  ;;  %v15851_v47 = vld [vmem:[#allocation6 + $0x7a0] ss:$16 sps:$4 sm:$0xff]   ;;  %v15859_v23 = vld [vmem:[#allocation6 + $0x784] ss:$16 sps:$4 sm:$0xff]   ;;  %v4081_v56 = vrot.slane %v18857_v4, 7 }
 0x317   : > { %9060 = vmatpush2.bf16.msra.mxu1 %v15839_v8  ;;  %v4241_v44 = vunpack.c.l.b16 %v4233_v1  ;;  %v4240_v46 = vunpack.c.l.b16 %v4231_v63  ;;  %v4264_v16 = vrot.slane %v4239_v52, 5  ;;  %v15866_v8 = vld [vmem:[#allocation6 + $0x540] ss:$16 sps:$4 sm:$0xff]   ;;  %v15865_v59 = vld [vmem:[#allocation6 + $0x764] ss:$16 sps:$4 sm:$0xff]   ;;  %v19459_v25 = vunpack.c.l.b16 %v18824_v6 }
 0x318   : > { %9061 = vmatprep.subr.bf16.mxu1 %v15847_v37  ;;  %9025 = vmatpush2.bf16.msra.mxu0 %v15854_v48  ;;  %v19047_v45 = vsel %vm659_vm5, %v4260_v22, %v4259_v7  ;;  %v15874_v7 = vld [vmem:[#allocation6 + $0x524] ss:$16 sps:$4 sm:$0xff]   ;;  %v15857_v37 = vld [vmem:[#allocation6 + $0x780] ss:$16 sps:$4 sm:$0xff]  }
 0x319   : > { %9026 = vmatprep.subr.bf16.mxu0 %v15862_v24  ;;  %v4272_v30 = vrot.slane %v4241_v44, 5  ;;  %v4268_v32 = vrot.slane %v4240_v46, 5  ;;  %v19050_v19 = vsel %vm659_vm5, %v4264_v16, %v4263_v27  ;;  %v19458_v27 = vunpack.c.l.b16 %v18830_v51  ;;  %v15880_v52 = vld [vmem:[#allocation6 + $0x504] ss:$16 sps:$4 sm:$0xff]   ;;  %v15863_v1 = vld [vmem:[#allocation6 + $0x760] ss:$16 sps:$4 sm:$0xff]  }
 0x31a   : > { %v4082_v24 = vsel %vm653_vm3, %v4081_v56, %v19459_v25  ;;  %v15871_v63 = vld [vmem:[#allocation6 + $0x744] ss:$16 sps:$4 sm:$0xff]   ;;  %v15878_v22 = vld [vmem:[#allocation6 + $0x500] ss:$16 sps:$4 sm:$0xff]   ;;  %v19460_v51 = vunpack.c.l.b16 %v18853_v43  ;;  %v4093_v46 = vrot.slane %v18911_v26, 7  ;;  %v4097_v56 = vrot.slane %v18956_v39, 5 }
 0x31b   : > { %9062 = vmatpush2.bf16.msra.mxu1 %v15845_v60  ;;  %v19053_v62 = vsel %vm659_vm5, %v4272_v30, %v4271_v40  ;;  %v19056_v42 = vsel %vm659_vm5, %v4268_v32, %v4267_v10  ;;  %v4083_v48 = vrot.slane %v19458_v27, 6  ;;  %v15872_v40 = vld [vmem:[#allocation6 + $0x520] ss:$16 sps:$4 sm:$0xff]   ;;  %v15886_v60 = vld [vmem:[#allocation6 + $0x8e4] ss:$16 sps:$4 sm:$0xff]   ;;  %v19075_v30 = vpack.c.b16 %v18837_v12, %v18837_v12 }
 0x31c   : > { %9063 = vmatprep.subr.bf16.mxu1 %v15853_v58  ;;  %9027 = vmatpush2.bf16.msra.mxu0 %v15860_v54  ;;  %v4085_v61 = vrot.slane %v19460_v51, 5  ;;  %v15869_v6 = vld [vmem:[#allocation6 + $0x740] ss:$16 sps:$4 sm:$0xff]   ;;  %v15877_v10 = vld [vmem:[#allocation6 + $0x724] ss:$16 sps:$4 sm:$0xff]   ;;  %v4094_v26 = vsel %vm653_vm3, %v4093_v46, %v18899_v49  ;;  %v19087_v25 = vpack.c.b16 %v18880_v29, %v18880_v29 }
 0x31d   : > { %9028 = vmatprep.subr.bf16.mxu0 %v15868_v15  ;;  %v4084_v4 = vsel %vm656_vm4, %v4083_v48, %v4082_v24  ;;  %v15884_v58 = vld [vmem:[#allocation6 + $0x8e0] ss:$16 sps:$4 sm:$0xff]   ;;  %v15892_v16 = vld [vmem:[#allocation6 + $0x8c4] ss:$16 sps:$4 sm:$0xff]   ;;  %v4095_v15 = vrot.slane %v18917_v33, 6 }
 0x31e   : > { %v4086_v44 = vsel %vm659_vm5, %v4085_v61, %v4084_v4  ;;  %v15875_v43 = vld [vmem:[#allocation6 + $0x720] ss:$16 sps:$4 sm:$0xff]   ;;  %v15883_v32 = vld [vmem:[#allocation6 + $0x704] ss:$16 sps:$4 sm:$0xff]  }
 0x31f   : > { %9064 = vmatpush2.bf16.msra.mxu1 %v15851_v47  ;;  %v19069_v54 = vpack.c.b16 %v4086_v44, %v4086_v44  ;;  %v15890_v47 = vld [vmem:[#allocation6 + $0x8c0] ss:$16 sps:$4 sm:$0xff]   ;;  %v4096_v33 = vsel %vm656_vm4, %v4095_v15, %v4094_v26  ;;  %v15889_v12 = vld [vmem:[#allocation6 + $0xae4] ss:$16 sps:$4 sm:$0xff]  }
 0x320   : > { %9065 = vmatprep.subr.bf16.mxu1 %v15859_v23  ;;  %9029 = vmatpush2.bf16.msra.mxu0 %v15866_v8  ;;  %v15898_v23 = vld [vmem:[#allocation6 + $0x8a4] ss:$16 sps:$4 sm:$0xff]   ;;  %v15881_v8 = vld [vmem:[#allocation6 + $0x700] ss:$16 sps:$4 sm:$0xff]   ;;  %v4098_v49 = vsel %vm659_vm5, %v4097_v56, %v4096_v33 }
 0x321   : > { %9030 = vmatprep.subr.bf16.mxu0 %v15874_v7  ;;  %v15896_v7 = vld [vmem:[#allocation6 + $0x8a0] ss:$16 sps:$4 sm:$0xff]   ;;  %v19083_v48 = vpack.c.b16 %v4098_v49, %v4098_v49  ;;  %v15910_v39 = vld [vmem:[#allocation6 + $0x864] ss:$16 sps:$4 sm:$0xff]  }
 0x322   : > { %v15887_v27 = vld [vmem:[#allocation6 + $0xae0] ss:$16 sps:$4 sm:$0xff]   ;;  %v15916_v4 = vld [vmem:[#allocation6 + $0x844] ss:$16 sps:$4 sm:$0xff]  }
 0x323   : > { %9066 = vmatpush2.bf16.msra.mxu1 %v15857_v37  ;;  %v15904_v37 = vld [vmem:[#allocation6 + $0x884] ss:$16 sps:$4 sm:$0xff]   ;;  %v15893_v24 = vld [vmem:[#allocation6 + $0xac0] ss:$16 sps:$4 sm:$0xff]  }
 0x324   : > { %9067 = vmatprep.subr.bf16.mxu1 %v15865_v59  ;;  %9031 = vmatpush2.bf16.msra.mxu0 %v15872_v40  ;;  %v15895_v59 = vld [vmem:[#allocation6 + $0xac4] ss:$16 sps:$4 sm:$0xff]   ;;  %v15902_v40 = vld [vmem:[#allocation6 + $0x880] ss:$16 sps:$4 sm:$0xff]  }
 0x325   : > { %9032 = vmatprep.subr.bf16.mxu0 %v15880_v52  ;;  %v15901_v52 = vld [vmem:[#allocation6 + $0xaa4] ss:$16 sps:$4 sm:$0xff]   ;;  %v15914_v29 = vld [vmem:[#allocation6 + $0x840] ss:$16 sps:$4 sm:$0xff]  }
 0x326   : > { %v15922_v51 = vld [vmem:[#allocation6 + $0x824] ss:$16 sps:$4 sm:$0xff]   ;;  %v15905_v61 = vld [vmem:[#allocation6 + $0xa80] ss:$16 sps:$4 sm:$0xff]  }
 0x327   : > { %9068 = vmatpush2.bf16.msra.mxu1 %v15863_v1  ;;  %v15908_v1 = vld [vmem:[#allocation6 + $0x860] ss:$16 sps:$4 sm:$0xff]   ;;  %v15952_v49 = vld [vmem:[#allocation6 + $0x984] ss:$16 sps:$4 sm:$0xff]  }
 0x328   : > { %9069 = vmatprep.subr.bf16.mxu1 %v15871_v63  ;;  %9033 = vmatpush2.bf16.msra.mxu0 %v15878_v22  ;;  %v15899_v63 = vld [vmem:[#allocation6 + $0xaa0] ss:$16 sps:$4 sm:$0xff]   ;;  %v15907_v22 = vld [vmem:[#allocation6 + $0xa84] ss:$16 sps:$4 sm:$0xff]  }
 0x329   : > { %9084 = vmatprep.subr.bf16.mxu0 %v15886_v60  ;;  %v15913_v60 = vld [vmem:[#allocation6 + $0xa64] ss:$16 sps:$4 sm:$0xff]   ;;  %v15920_v44 = vld [vmem:[#allocation6 + $0x820] ss:$16 sps:$4 sm:$0xff]  }
 0x32a   : > { %v15911_v46 = vld [vmem:[#allocation6 + $0xa60] ss:$16 sps:$4 sm:$0xff]  }
 0x32b   : > { %9070 = vmatpush2.bf16.msra.mxu1 %v15869_v6  ;;  %9035 = vmatmul.mubr.bf16.vlgmr.msra.gmra.mxu0 %v19069_v54  ;;  %v15928_v6 = vld [vmem:[#allocation6 + $0x804] ss:$16 sps:$4 sm:$0xff]   ;;  %v15917_v15 = vld [vmem:[#allocation6 + $0xa40] ss:$16 sps:$4 sm:$0xff]  }
 0x32c   : > { %9071 = vmatprep.subr.bf16.mxu1 %v15877_v10  ;;  %9085 = vmatpush1.bf16.msra.mxu0 %v15884_v58  ;;  %v15919_v10 = vld [vmem:[#allocation6 + $0xa44] ss:$16 sps:$4 sm:$0xff]   ;;  %v15926_v58 = vld [vmem:[#allocation6 + $0x800] ss:$16 sps:$4 sm:$0xff]  }
 0x32d   : > { %9116 = vmatprep.mubr.bf16.mxu0 %v19075_v30  ;;  %9086 = vmatprep.subr.bf16.mxu0 %v15892_v16  ;;  %v15934_v16 = vld [vmem:[#allocation6 + $0x9e4] ss:$16 sps:$4 sm:$0xff]   ;;  %v15932_v26 = vld [vmem:[#allocation6 + $0x9e0] ss:$16 sps:$4 sm:$0xff]  }
 0x32e   : > { %v15938_v33 = vld [vmem:[#allocation6 + $0x9c0] ss:$16 sps:$4 sm:$0xff]  }
 0x32f   : > { %9072 = vmatpush2.bf16.msra.mxu1 %v15875_v43  ;;  %v15925_v43 = vld [vmem:[#allocation6 + $0xa24] ss:$16 sps:$4 sm:$0xff]   ;;  %v15929_v56 = vld [vmem:[#allocation6 + $0xa00] ss:$16 sps:$4 sm:$0xff]  }
 0x330   : > { %9073 = vmatprep.subr.bf16.mxu1 %v15883_v32  ;;  %9087 = vmatpush1.bf16.msra.mxu0 %v15890_v47  ;;  %v15940_v32 = vld [vmem:[#allocation6 + $0x9c4] ss:$16 sps:$4 sm:$0xff]   ;;  %v15923_v47 = vld [vmem:[#allocation6 + $0xa20] ss:$16 sps:$4 sm:$0xff]  }
 0x331   : > { %9088 = vmatprep.subr.bf16.mxu0 %v15898_v23  ;;  %v15931_v23 = vld [vmem:[#allocation6 + $0xa04] ss:$16 sps:$4 sm:$0xff]  }
 0x333   : > { %9074 = vmatpush2.bf16.msra.mxu1 %v15881_v8  ;;  %v15946_v8 = vld [vmem:[#allocation6 + $0x9a4] ss:$16 sps:$4 sm:$0xff]  }
 0x334   : > { %9125 = vmatprep.subr.bf16.mxu1 %v15889_v12  ;;  %9089 = vmatpush1.bf16.msra.mxu0 %v15896_v7  ;;  %v15937_v12 = vld [vmem:[#allocation6 + $0xbe4] ss:$16 sps:$4 sm:$0xff]   ;;  %v15944_v7 = vld [vmem:[#allocation6 + $0x9a0] ss:$16 sps:$4 sm:$0xff]  }
 0x335   : > { %9090 = vmatprep.subr.bf16.mxu0 %v15904_v37  ;;  %v15935_v37 = vld [vmem:[#allocation6 + $0xbe0] ss:$16 sps:$4 sm:$0xff]  }
 0x336   : > { %9076 = vmatmul.mubr.bf16.vlgmr.msra.gmra.mxu1 %v19083_v48 }
 0x337   : > { %9126 = vmatpush1.bf16.msra.mxu1 %v15887_v27  ;;  %9157 = vmatprep.mubr.bf16.mxu1 %v19087_v25  ;;  %v15943_v27 = vld [vmem:[#allocation6 + $0xbc4] ss:$16 sps:$4 sm:$0xff]  }
 0x338   : > { %9127 = vmatprep.subr.bf16.mxu1 %v15895_v59  ;;  %9091 = vmatpush1.bf16.msra.mxu0 %v15902_v40  ;;  %v15950_v59 = vld [vmem:[#allocation6 + $0x980] ss:$16 sps:$4 sm:$0xff]   ;;  %v15958_v40 = vld [vmem:[#allocation6 + $0x964] ss:$16 sps:$4 sm:$0xff]  }
 0x339   : > { %9092 = vmatprep.subr.bf16.mxu0 %v15910_v39  ;;  %v15941_v39 = vld [vmem:[#allocation6 + $0xbc0] ss:$16 sps:$4 sm:$0xff]  }
 0x33b   : > { %9128 = vmatpush1.bf16.msra.mxu1 %v15893_v24  ;;  %v15949_v24 = vld [vmem:[#allocation6 + $0xba4] ss:$16 sps:$4 sm:$0xff]  }
 0x33c   : > { %9129 = vmatprep.subr.bf16.mxu1 %v15901_v52  ;;  %9093 = vmatpush1.bf16.msra.mxu0 %v15908_v1  ;;  %v15956_v52 = vld [vmem:[#allocation6 + $0x960] ss:$16 sps:$4 sm:$0xff]   ;;  %v15964_v1 = vld [vmem:[#allocation6 + $0x944] ss:$16 sps:$4 sm:$0xff]  }
 0x33d   : > { %9094 = vmatprep.subr.bf16.mxu0 %v15916_v4  ;;  %v15947_v4 = vld [vmem:[#allocation6 + $0xba0] ss:$16 sps:$4 sm:$0xff]  }
 0x33f   : > { %9130 = vmatpush1.bf16.msra.mxu1 %v15899_v63  ;;  %v15955_v63 = vld [vmem:[#allocation6 + $0xb84] ss:$16 sps:$4 sm:$0xff]  }
 0x340   : > { %9131 = vmatprep.subr.bf16.mxu1 %v15907_v22  ;;  %9095 = vmatpush1.bf16.msra.mxu0 %v15914_v29  ;;  %v15962_v22 = vld [vmem:[#allocation6 + $0x940] ss:$16 sps:$4 sm:$0xff]   ;;  %v15970_v29 = vld [vmem:[#allocation6 + $0x924] ss:$16 sps:$4 sm:$0xff]  }
 0x341   : > { %9096 = vmatprep.subr.bf16.mxu0 %v15922_v51  ;;  %v15953_v51 = vld [vmem:[#allocation6 + $0xb80] ss:$16 sps:$4 sm:$0xff]  }
 0x343   : > { %9132 = vmatpush1.bf16.msra.mxu1 %v15905_v61  ;;  %v15961_v61 = vld [vmem:[#allocation6 + $0xb64] ss:$16 sps:$4 sm:$0xff]  }
 0x344   : > { %9133 = vmatprep.subr.bf16.mxu1 %v15913_v60  ;;  %9097 = vmatpush1.bf16.msra.mxu0 %v15920_v44  ;;  %v15968_v60 = vld [vmem:[#allocation6 + $0x920] ss:$16 sps:$4 sm:$0xff]   ;;  %v15976_v44 = vld [vmem:[#allocation6 + $0x904] ss:$16 sps:$4 sm:$0xff]  }
 0x345   : > { %9098 = vmatprep.subr.bf16.mxu0 %v15928_v6  ;;  %v15959_v6 = vld [vmem:[#allocation6 + $0xb60] ss:$16 sps:$4 sm:$0xff]  }
 0x347   : > { %9134 = vmatpush1.bf16.msra.mxu1 %v15911_v46  ;;  %v15967_v46 = vld [vmem:[#allocation6 + $0xb44] ss:$16 sps:$4 sm:$0xff]  }
 0x348   : > { %9135 = vmatprep.subr.bf16.mxu1 %v15919_v10  ;;  %9099 = vmatpush1.bf16.msra.mxu0 %v15926_v58  ;;  %v15974_v10 = vld [vmem:[#allocation6 + $0x900] ss:$16 sps:$4 sm:$0xff]   ;;  %v15982_v58 = vld [vmem:[#allocation6 + $0xce4] ss:$16 sps:$4 sm:$0xff]  }
 0x349   : > { %9100 = vmatprep.subr.bf16.mxu0 %v15934_v16  ;;  %v15965_v16 = vld [vmem:[#allocation6 + $0xb40] ss:$16 sps:$4 sm:$0xff]  }
 0x34b   : > { %9136 = vmatpush1.bf16.msra.mxu1 %v15917_v15  ;;  %v15973_v15 = vld [vmem:[#allocation6 + $0xb24] ss:$16 sps:$4 sm:$0xff]  }
 0x34c   : > { %9137 = vmatprep.subr.bf16.mxu1 %v15925_v43  ;;  %9101 = vmatpush2.bf16.msra.mxu0 %v15932_v26  ;;  %v15980_v43 = vld [vmem:[#allocation6 + $0xce0] ss:$16 sps:$4 sm:$0xff]   ;;  %v19093_v26 = vpack.c.b16 %v18903_v9, %v18903_v9 }
 0x34d   : > { %9102 = vmatprep.subr.bf16.mxu0 %v15940_v32  ;;  %v15988_v32 = vld [vmem:[#allocation6 + $0xcc4] ss:$16 sps:$4 sm:$0xff]   ;;  %v15977_v9 = vld [vmem:[#allocation6 + $0xb00] ss:$16 sps:$4 sm:$0xff]  }
 0x34f   : > { %9138 = vmatpush1.bf16.msra.mxu1 %v15923_v47  ;;  %v15971_v47 = vld [vmem:[#allocation6 + $0xb20] ss:$16 sps:$4 sm:$0xff]  }
 0x350   : > { %9139 = vmatprep.subr.bf16.mxu1 %v15931_v23  ;;  %9103 = vmatpush2.bf16.msra.mxu0 %v15938_v33  ;;  %v19098_v23 = vpack.c.b16 %v18921_v50, %v18921_v50  ;;  %v15979_v33 = vld [vmem:[#allocation6 + $0xb04] ss:$16 sps:$4 sm:$0xff]   ;;  %v19103_v50 = vpack.c.b16 %v18947_v35, %v18947_v35  ;;  %v16004_v35 = vld [vmem:[#allocation6 + $0xc60] ss:$16 sps:$4 sm:$0xff]  }
 0x351   : > { %9104 = vmatprep.subr.bf16.mxu0 %v15946_v8  ;;  %v15986_v8 = vld [vmem:[#allocation6 + $0xcc0] ss:$16 sps:$4 sm:$0xff]  }
 0x353   : > { %9140 = vmatpush1.bf16.msra.mxu1 %v15929_v56  ;;  %v15994_v56 = vld [vmem:[#allocation6 + $0xca4] ss:$16 sps:$4 sm:$0xff]  }
 0x354   : > { %9141 = vmatprep.subr.bf16.mxu1 %v15937_v12  ;;  %9105 = vmatpush2.bf16.msra.mxu0 %v15944_v7  ;;  %v15985_v12 = vld [vmem:[#allocation6 + $0xee4] ss:$16 sps:$4 sm:$0xff]   ;;  %v15992_v7 = vld [vmem:[#allocation6 + $0xca0] ss:$16 sps:$4 sm:$0xff]  }
 0x355   : > { %9106 = vmatprep.subr.bf16.mxu0 %v15952_v49  ;;  %v16000_v49 = vld [vmem:[#allocation6 + $0xc84] ss:$16 sps:$4 sm:$0xff]  }
 0x357   : > { %9142 = vmatpush2.bf16.msra.mxu1 %v15935_v37  ;;  %v15983_v37 = vld [vmem:[#allocation6 + $0xee0] ss:$16 sps:$4 sm:$0xff]  }
 0x358   : > { %9143 = vmatprep.subr.bf16.mxu1 %v15943_v27  ;;  %9107 = vmatpush2.bf16.msra.mxu0 %v15950_v59  ;;  %v15991_v27 = vld [vmem:[#allocation6 + $0xec4] ss:$16 sps:$4 sm:$0xff]   ;;  %v15998_v59 = vld [vmem:[#allocation6 + $0xc80] ss:$16 sps:$4 sm:$0xff]  }
 0x359   : > { %9108 = vmatprep.subr.bf16.mxu0 %v15958_v40  ;;  %v19107_v40 = vpack.c.b16 %v18961_v2, %v18961_v2  ;;  %v16010_v2 = vld [vmem:[#allocation6 + $0xc40] ss:$16 sps:$4 sm:$0xff]  }
 0x35b   : > { %9144 = vmatpush2.bf16.msra.mxu1 %v15941_v39  ;;  %v16006_v39 = vld [vmem:[#allocation6 + $0xc64] ss:$16 sps:$4 sm:$0xff]  }
 0x35c   : > { %9145 = vmatprep.subr.bf16.mxu1 %v15949_v24  ;;  %9109 = vmatpush2.bf16.msra.mxu0 %v15956_v52  ;;  %v15989_v24 = vld [vmem:[#allocation6 + $0xec0] ss:$16 sps:$4 sm:$0xff]   ;;  %v15997_v52 = vld [vmem:[#allocation6 + $0xea4] ss:$16 sps:$4 sm:$0xff]  }
 0x35d   : > { %9110 = vmatprep.subr.bf16.mxu0 %v15964_v1  ;;  %v16012_v1 = vld [vmem:[#allocation6 + $0xc44] ss:$16 sps:$4 sm:$0xff]  }
 0x35f   : > { %9146 = vmatpush2.bf16.msra.mxu1 %v15947_v4  ;;  %v15995_v4 = vld [vmem:[#allocation6 + $0xea0] ss:$16 sps:$4 sm:$0xff]  }
 0x360   : > { %9147 = vmatprep.subr.bf16.mxu1 %v15955_v63  ;;  %9111 = vmatpush2.bf16.msra.mxu0 %v15962_v22  ;;  %v16003_v63 = vld [vmem:[#allocation6 + $0xe84] ss:$16 sps:$4 sm:$0xff]  }
 0x361   : > { %9112 = vmatprep.subr.bf16.mxu0 %v15970_v29  ;;  %v16018_v22 = vld [vmem:[#allocation6 + $0xc24] ss:$16 sps:$4 sm:$0xff]   ;;  %v16001_v29 = vld [vmem:[#allocation6 + $0xe80] ss:$16 sps:$4 sm:$0xff]  }
 0x363   : > { %9148 = vmatpush2.bf16.msra.mxu1 %v15953_v51  ;;  %v16009_v51 = vld [vmem:[#allocation6 + $0xe64] ss:$16 sps:$4 sm:$0xff]  }
 0x364   : > { %9149 = vmatprep.subr.bf16.mxu1 %v15961_v61  ;;  %9113 = vmatpush2.bf16.msra.mxu0 %v15968_v60  ;;  %v16016_v61 = vld [vmem:[#allocation6 + $0xc20] ss:$16 sps:$4 sm:$0xff]   ;;  %v16024_v60 = vld [vmem:[#allocation6 + $0xc04] ss:$16 sps:$4 sm:$0xff]  }
 0x365   : > { %9114 = vmatprep.subr.bf16.mxu0 %v15976_v44  ;;  %v16007_v44 = vld [vmem:[#allocation6 + $0xe60] ss:$16 sps:$4 sm:$0xff]  }
 0x367   : > { %9150 = vmatpush2.bf16.msra.mxu1 %v15959_v6  ;;  %v16015_v6 = vld [vmem:[#allocation6 + $0xe44] ss:$16 sps:$4 sm:$0xff]  }
 0x368   : > { %9151 = vmatprep.subr.bf16.mxu1 %v15967_v46  ;;  %9115 = vmatpush2.bf16.msra.mxu0 %v15974_v10  ;;  %v16022_v46 = vld [vmem:[#allocation6 + $0xc00] ss:$16 sps:$4 sm:$0xff]   ;;  %v16030_v10 = vld [vmem:[#allocation6 + $0xde4] ss:$16 sps:$4 sm:$0xff]  }
 0x369   : > { %9166 = vmatprep.subr.bf16.mxu0 %v15982_v58  ;;  %v16013_v58 = vld [vmem:[#allocation6 + $0xe40] ss:$16 sps:$4 sm:$0xff]  }
 0x36b   : > { %9152 = vmatpush2.bf16.msra.mxu1 %v15965_v16  ;;  %9117 = vmatmul.mubr.bf16.vlgmr.msra.gmra.mxu0 %v19093_v26  ;;  %v16021_v16 = vld [vmem:[#allocation6 + $0xe24] ss:$16 sps:$4 sm:$0xff]  }
 0x36c   : > { %9153 = vmatprep.subr.bf16.mxu1 %v15973_v15  ;;  %9167 = vmatpush1.bf16.msra.mxu0 %v15980_v43  ;;  %v16028_v15 = vld [vmem:[#allocation6 + $0xde0] ss:$16 sps:$4 sm:$0xff]   ;;  %v16036_v43 = vld [vmem:[#allocation6 + $0xdc4] ss:$16 sps:$4 sm:$0xff]  }
 0x36d   : > { %9198 = vmatprep.mubr.bf16.mxu0 %v19098_v23  ;;  %9168 = vmatprep.subr.bf16.mxu0 %v15988_v32  ;;  %v16019_v32 = vld [vmem:[#allocation6 + $0xe20] ss:$16 sps:$4 sm:$0xff]  }
 0x36f   : > { %9154 = vmatpush2.bf16.msra.mxu1 %v15971_v47  ;;  %v16027_v47 = vld [vmem:[#allocation6 + $0xe04] ss:$16 sps:$4 sm:$0xff]  }
 0x370   : > { %9155 = vmatprep.subr.bf16.mxu1 %v15979_v33  ;;  %9169 = vmatpush1.bf16.msra.mxu0 %v15986_v8  ;;  %v16034_v33 = vld [vmem:[#allocation6 + $0xdc0] ss:$16 sps:$4 sm:$0xff]   ;;  %v16042_v8 = vld [vmem:[#allocation6 + $0xda4] ss:$16 sps:$4 sm:$0xff]  }
 0x371   : > { %9170 = vmatprep.subr.bf16.mxu0 %v15994_v56  ;;  %v16025_v56 = vld [vmem:[#allocation6 + $0xe00] ss:$16 sps:$4 sm:$0xff]  }
 0x373   : > { %9156 = vmatpush2.bf16.msra.mxu1 %v15977_v9  ;;  %v16033_v9 = vld [vmem:[#allocation6 + $0xfe4] ss:$16 sps:$4 sm:$0xff]  }
 0x374   : > { %9207 = vmatprep.subr.bf16.mxu1 %v15985_v12  ;;  %9171 = vmatpush1.bf16.msra.mxu0 %v15992_v7  ;;  %v16040_v12 = vld [vmem:[#allocation6 + $0xda0] ss:$16 sps:$4 sm:$0xff]   ;;  %v16048_v7 = vld [vmem:[#allocation6 + $0xd84] ss:$16 sps:$4 sm:$0xff]  }
 0x375   : > { %9172 = vmatprep.subr.bf16.mxu0 %v16000_v49  ;;  %v16031_v49 = vld [vmem:[#allocation6 + $0xfe0] ss:$16 sps:$4 sm:$0xff]  }
 0x376   : > { %9158 = vmatmul.mubr.bf16.vlgmr.msra.gmra.mxu1 %v19103_v50 }
 0x377   : > { %9208 = vmatpush1.bf16.msra.mxu1 %v15983_v37  ;;  %9239 = vmatprep.mubr.bf16.mxu1 %v19107_v40  ;;  %v16039_v37 = vld [vmem:[#allocation6 + $0xfc4] ss:$16 sps:$4 sm:$0xff]  }
 0x378   : > { %9209 = vmatprep.subr.bf16.mxu1 %v15991_v27  ;;  %9173 = vmatpush1.bf16.msra.mxu0 %v15998_v59  ;;  %v16046_v27 = vld [vmem:[#allocation6 + $0xd80] ss:$16 sps:$4 sm:$0xff]   ;;  %v16054_v59 = vld [vmem:[#allocation6 + $0xd64] ss:$16 sps:$4 sm:$0xff]  }
 0x379   : > { %9174 = vmatprep.subr.bf16.mxu0 %v16006_v39  ;;  %v16037_v39 = vld [vmem:[#allocation6 + $0xfc0] ss:$16 sps:$4 sm:$0xff]  }
 0x37b   : > { %9210 = vmatpush1.bf16.msra.mxu1 %v15989_v24  ;;  %v16045_v24 = vld [vmem:[#allocation6 + $0xfa4] ss:$16 sps:$4 sm:$0xff]  }
 0x37c   : > { %9211 = vmatprep.subr.bf16.mxu1 %v15997_v52  ;;  %9175 = vmatpush1.bf16.msra.mxu0 %v16004_v35  ;;  %v16052_v52 = vld [vmem:[#allocation6 + $0xd60] ss:$16 sps:$4 sm:$0xff]   ;;  %v16060_v35 = vld [vmem:[#allocation6 + $0xd44] ss:$16 sps:$4 sm:$0xff]  }
 0x37d   : > { %9176 = vmatprep.subr.bf16.mxu0 %v16012_v1  ;;  %v16043_v1 = vld [vmem:[#allocation6 + $0xfa0] ss:$16 sps:$4 sm:$0xff]  }
 0x37f   : > { %9212 = vmatpush1.bf16.msra.mxu1 %v15995_v4  ;;  %v16051_v4 = vld [vmem:[#allocation6 + $0xf84] ss:$16 sps:$4 sm:$0xff]  }
 0x380   : > { %9213 = vmatprep.subr.bf16.mxu1 %v16003_v63  ;;  %9177 = vmatpush1.bf16.msra.mxu0 %v16010_v2  ;;  %v16058_v63 = vld [vmem:[#allocation6 + $0xd40] ss:$16 sps:$4 sm:$0xff]   ;;  %v16066_v2 = vld [vmem:[#allocation6 + $0xd24] ss:$16 sps:$4 sm:$0xff]  }
 0x381   : > { %9178 = vmatprep.subr.bf16.mxu0 %v16018_v22  ;;  %v16049_v22 = vld [vmem:[#allocation6 + $0xf80] ss:$16 sps:$4 sm:$0xff]  }
 0x383   : > { %9214 = vmatpush1.bf16.msra.mxu1 %v16001_v29  ;;  %v16057_v29 = vld [vmem:[#allocation6 + $0xf64] ss:$16 sps:$4 sm:$0xff]  }
 0x384   : > { %9215 = vmatprep.subr.bf16.mxu1 %v16009_v51  ;;  %9179 = vmatpush1.bf16.msra.mxu0 %v16016_v61  ;;  %v16064_v51 = vld [vmem:[#allocation6 + $0xd20] ss:$16 sps:$4 sm:$0xff]   ;;  %v16072_v61 = vld [vmem:[#allocation6 + $0xd04] ss:$16 sps:$4 sm:$0xff]  }
 0x385   : > { %9180 = vmatprep.subr.bf16.mxu0 %v16024_v60  ;;  %v16055_v60 = vld [vmem:[#allocation6 + $0xf60] ss:$16 sps:$4 sm:$0xff]  }
 0x387   : > { %9216 = vmatpush1.bf16.msra.mxu1 %v16007_v44  ;;  %v16063_v44 = vld [vmem:[#allocation6 + $0xf44] ss:$16 sps:$4 sm:$0xff]  }
 0x388   : > { %9217 = vmatprep.subr.bf16.mxu1 %v16015_v6  ;;  %9181 = vmatpush1.bf16.msra.mxu0 %v16022_v46  ;;  %v16070_v6 = vld [vmem:[#allocation6 + $0xd00] ss:$16 sps:$4 sm:$0xff]   ;;  %v16078_v46 = vld [vmem:[#allocation6 + $0x10e4] ss:$16 sps:$4 sm:$0xff]  }
 0x389   : > { %9182 = vmatprep.subr.bf16.mxu0 %v16030_v10  ;;  %v16061_v10 = vld [vmem:[#allocation6 + $0xf40] ss:$16 sps:$4 sm:$0xff]  }
 0x38b   : > { %9218 = vmatpush1.bf16.msra.mxu1 %v16013_v58  ;;  %v16069_v58 = vld [vmem:[#allocation6 + $0xf24] ss:$16 sps:$4 sm:$0xff]  }
 0x38c   : > { %9219 = vmatprep.subr.bf16.mxu1 %v16021_v16  ;;  %9183 = vmatpush2.bf16.msra.mxu0 %v16028_v15  ;;  %v16076_v16 = vld [vmem:[#allocation6 + $0x10e0] ss:$16 sps:$4 sm:$0xff]   ;;  %v19113_v15 = vpack.c.b16 %v18968_v34, %v18968_v34 }
 0x38d   : > { %9184 = vmatprep.subr.bf16.mxu0 %v16036_v43  ;;  %v16084_v43 = vld [vmem:[#allocation6 + $0x10c4] ss:$16 sps:$4 sm:$0xff]  }
 0x38f   : > { %9220 = vmatpush1.bf16.msra.mxu1 %v16019_v32  ;;  %v16067_v32 = vld [vmem:[#allocation6 + $0xf20] ss:$16 sps:$4 sm:$0xff]  }
 0x390   : > { %9221 = vmatprep.subr.bf16.mxu1 %v16027_v47  ;;  %9185 = vmatpush2.bf16.msra.mxu0 %v16034_v33  ;;  %v19118_v33 = vpack.c.b16 %v19030_v20, %v19030_v20  ;;  %v16088_v20 = vld [vmem:[#allocation6 + $0x10a0] ss:$16 sps:$4 sm:$0xff]  }
 0x391   : > { %9186 = vmatprep.subr.bf16.mxu0 %v16042_v8  ;;  %v16075_v8 = vld [vmem:[#allocation6 + $0xf04] ss:$16 sps:$4 sm:$0xff]  }
 0x393   : > { %9222 = vmatpush1.bf16.msra.mxu1 %v16025_v56  ;;  %v5058_v56 = vld [vmem:[#allocation7] sm:$0xf] }
 0x394   : > { %9223 = vmatprep.subr.bf16.mxu1 %v16033_v9  ;;  %9187 = vmatpush2.bf16.msra.mxu0 %v16040_v12  ;;  %v16082_v9 = vld [vmem:[#allocation6 + $0x10c0] ss:$16 sps:$4 sm:$0xff]   ;;  %v16090_v12 = vld [vmem:[#allocation6 + $0x10a4] ss:$16 sps:$4 sm:$0xff]  }
 0x395   : > { %9188 = vmatprep.subr.bf16.mxu0 %v16048_v7  ;;  %v16073_v7 = vld [vmem:[#allocation6 + $0xf00] ss:$16 sps:$4 sm:$0xff]  }
 0x397   : > { %9224 = vmatpush2.bf16.msra.mxu1 %v16031_v49  ;;  %v5063_v49 = vrot.slane %v5058_v56, %v18471_v5 }
 0x398   : > { %9225 = vmatprep.subr.bf16.mxu1 %v16039_v37  ;;  %9189 = vmatpush2.bf16.msra.mxu0 %v16046_v27  ;;  %v16081_v27 = vld [vmem:[#allocation6 + $0x12e4] ss:$16 sps:$4 sm:$0xff]  }
 0x399   : > { %9190 = vmatprep.subr.bf16.mxu0 %v16054_v59  ;;  %v5067_v59 = vrot.slane %v5058_v56, %v18474_v53  ;;  %v16105_v56 = vld [vmem:[#allocation6 + $0x1264] ss:$16 sps:$4 sm:$0xff]  }
 0x39b   : > { %9226 = vmatpush2.bf16.msra.mxu1 %v16037_v39 }
 0x39c   : > { %9227 = vmatprep.subr.bf16.mxu1 %v16045_v24  ;;  %9191 = vmatpush2.bf16.msra.mxu0 %v16052_v52  ;;  %v16096_v24 = vld [vmem:[#allocation6 + $0x1084] ss:$16 sps:$4 sm:$0xff]  }
 0x39d   : > { %9192 = vmatprep.subr.bf16.mxu0 %v16060_v35  ;;  %v16079_v35 = vld [vmem:[#allocation6 + $0x12e0] ss:$16 sps:$4 sm:$0xff]  }
 0x39f   : > { %9228 = vmatpush2.bf16.msra.mxu1 %v16043_v1  ;;  %v19125_v1 = vpack.c.b16 %v19003_v31, %v19003_v31  ;;  %v16085_v31 = vld [vmem:[#allocation6 + $0x12c0] ss:$16 sps:$4 sm:$0xff]  }
 0x3a0   : > { %9229 = vmatprep.subr.bf16.mxu1 %v16051_v4  ;;  %9193 = vmatpush2.bf16.msra.mxu0 %v16058_v63  ;;  %v16087_v4 = vld [vmem:[#allocation6 + $0x12c4] ss:$16 sps:$4 sm:$0xff]   ;;  %v16094_v63 = vld [vmem:[#allocation6 + $0x1080] ss:$16 sps:$4 sm:$0xff]  }
 0x3a1   : > { %9194 = vmatprep.subr.bf16.mxu0 %v16066_v2 }
 0x3a3   : > { %9230 = vmatpush2.bf16.msra.mxu1 %v16049_v22  ;;  %v19129_v22 = vpack.c.b16 %v19039_v3, %v19039_v3  ;;  %v16108_v3 = vld [vmem:[#allocation6 + $0x1044] ss:$16 sps:$4 sm:$0xff]  }
 0x3a4   : > { %9231 = vmatprep.subr.bf16.mxu1 %v16057_v29  ;;  %9195 = vmatpush2.bf16.msra.mxu0 %v16064_v51  ;;  %v16102_v29 = vld [vmem:[#allocation6 + $0x1064] ss:$16 sps:$4 sm:$0xff]  }
 0x3a5   : > { %9196 = vmatprep.subr.bf16.mxu0 %v16072_v61 }
 0x3a7   : > { %9232 = vmatpush2.bf16.msra.mxu1 %v16055_v60 }
 0x3a8   : > { %9233 = vmatprep.subr.bf16.mxu1 %v16063_v44  ;;  %9197 = vmatpush2.bf16.msra.mxu0 %v16070_v6  ;;  %v16093_v44 = vld [vmem:[#allocation6 + $0x12a4] ss:$16 sps:$4 sm:$0xff]   ;;  %v16100_v6 = vld [vmem:[#allocation6 + $0x1060] ss:$16 sps:$4 sm:$0xff]  }
 0x3a9   : > { %9248 = vmatprep.subr.bf16.mxu0 %v16078_v46 }
 0x3ab   : > { %9234 = vmatpush2.bf16.msra.mxu1 %v16061_v10  ;;  %9199 = vmatmul.mubr.bf16.vlgmr.msra.gmra.mxu0 %v19113_v15  ;;  %v8954_v47 = vpop.f32.mrf.mxu0 }
 0x3ac   : > { %9235 = vmatprep.subr.bf16.mxu1 %v16069_v58  ;;  %9249 = vmatpush1.bf16.msra.mxu0 %v16076_v16  ;;  %v8955_v52 = vadd.f32 %v8954_v47, %v5063_v49  ;;  %v16091_v58 = vld [vmem:[#allocation6 + $0x12a0] ss:$16 sps:$4 sm:$0xff]   ;;  %v16114_v47 = vld [vmem:[#allocation6 + $0x1024] ss:$16 sps:$4 sm:$0xff]  }
 0x3ad   : > { %9280 = vmatprep.mubr.bf16.mxu0 %v19118_v33  ;;  %v8956_v34 = vpop.f32.mrf.mxu0  ;;  %9250 = vmatprep.subr.bf16.mxu0 %v16084_v43  ;;  %v16099_v43 = vld [vmem:[#allocation6 + $0x1284] ss:$16 sps:$4 sm:$0xff]   ;;  %v16118_v49 = vld [vmem:[#allocation6 + $0x1000] ss:$16 sps:$4 sm:$0xff]  }
 0x3ae   : > { %v8957_v2 = vadd.f32 %v8956_v34, %v5067_v59  ;;  %v16120_v34 = vld [vmem:[#allocation6 + $0x1004] ss:$16 sps:$4 sm:$0xff]   ;;  %v16124_v59 = vld [vmem:[#allocation6 + $0x11e0] ss:$16 sps:$4 sm:$0xff]  }
 0x3af   : > { %9236 = vmatpush2.bf16.msra.mxu1 %v16067_v32  ;;  %v8958_v37 = vpop.f32.mrf.mxu0  ;;  %v16106_v32 = vld [vmem:[#allocation6 + $0x1040] ss:$16 sps:$4 sm:$0xff]  }
 0x3b0   : > { %9237 = vmatprep.subr.bf16.mxu1 %v16075_v8  ;;  %9251 = vmatpush1.bf16.msra.mxu0 %v16082_v9  ;;  %v16097_v8 = vld [vmem:[#allocation6 + $0x1280] ss:$16 sps:$4 sm:$0xff]   ;;  %v16126_v37 = vld [vmem:[#allocation6 + $0x11e4] ss:$16 sps:$4 sm:$0xff]  }
 0x3b1   : > { %v8959_v39 = vpop.f32.mrf.mxu0  ;;  %9252 = vmatprep.subr.bf16.mxu0 %v16090_v12  ;;  %v16112_v9 = vld [vmem:[#allocation6 + $0x1020] ss:$16 sps:$4 sm:$0xff]  }
 0x3b2   : > { %v16103_v12 = vld [vmem:[#allocation6 + $0x1260] ss:$16 sps:$4 sm:$0xff]   ;;  %v16132_v39 = vld [vmem:[#allocation6 + $0x11c4] ss:$16 sps:$4 sm:$0xff]  }
 0x3b3   : > { %9238 = vmatpush2.bf16.msra.mxu1 %v16073_v7  ;;  %v16111_v7 = vld [vmem:[#allocation6 + $0x1244] ss:$16 sps:$4 sm:$0xff]  }
 0x3b4   : > { %9289 = vmatprep.subr.bf16.mxu1 %v16081_v27  ;;  %9253 = vmatpush1.bf16.msra.mxu0 %v16088_v20  ;;  %v16109_v27 = vld [vmem:[#allocation6 + $0x1240] ss:$16 sps:$4 sm:$0xff]   ;;  %v16117_v20 = vld [vmem:[#allocation6 + $0x1224] ss:$16 sps:$4 sm:$0xff]  }
 0x3b5   : > { %9254 = vmatprep.subr.bf16.mxu0 %v16096_v24  ;;  %v16115_v24 = vld [vmem:[#allocation6 + $0x1220] ss:$16 sps:$4 sm:$0xff]  }
 0x3b6   : > { %9240 = vmatmul.mubr.bf16.vlgmr.msra.gmra.mxu1 %v19125_v1  ;;  %v8995_v51 = vpop.f32.mrf.mxu1 }
 0x3b7   : > { %v19132_v61 = vadd.f32 %v8995_v51, %v8955_v52  ;;  %9290 = vmatpush1.bf16.msra.mxu1 %v16079_v35  ;;  %9321 = vmatprep.mubr.bf16.mxu1 %v19129_v22  ;;  %v16123_v52 = vld [vmem:[#allocation6 + $0x1204] ss:$16 sps:$4 sm:$0xff]   ;;  %v16130_v35 = vld [vmem:[#allocation6 + $0x11c0] ss:$16 sps:$4 sm:$0xff]  }
 0x3b8   : > { %v8997_v60 = vpop.f32.mrf.mxu1  ;;  %9291 = vmatprep.subr.bf16.mxu1 %v16087_v4  ;;  %9255 = vmatpush1.bf16.msra.mxu0 %v16094_v63  ;;  %v16138_v4 = vld [vmem:[#allocation6 + $0x11a4] ss:$16 sps:$4 sm:$0xff]   ;;  %v16121_v63 = vld [vmem:[#allocation6 + $0x1200] ss:$16 sps:$4 sm:$0xff]  }
 0x3b9   : > { %v19135_v46 = vadd.f32 %v8997_v60, %v8957_v2  ;;  %9256 = vmatprep.subr.bf16.mxu0 %v16102_v29  ;;  %v16129_v2 = vld [vmem:[#allocation6 + $0x13e4] ss:$16 sps:$4 sm:$0xff]   ;;  %v16136_v29 = vld [vmem:[#allocation6 + $0x11a0] ss:$16 sps:$4 sm:$0xff]  }
 0x3ba   : > { %v8999_v10 = vpop.f32.mrf.mxu1  ;;  %v16144_v51 = vld [vmem:[#allocation6 + $0x1184] ss:$16 sps:$4 sm:$0xff]  }
 0x3bb   : > { %9292 = vmatpush1.bf16.msra.mxu1 %v16085_v31  ;;  %v16127_v31 = vld [vmem:[#allocation6 + $0x13e0] ss:$16 sps:$4 sm:$0xff]   ;;  %v16135_v60 = vld [vmem:[#allocation6 + $0x13c4] ss:$16 sps:$4 sm:$0xff]  }
 0x3bc   : > { %v9000_v16 = vpop.f32.mrf.mxu1  ;;  %9293 = vmatprep.subr.bf16.mxu1 %v16093_v44  ;;  %9257 = vmatpush1.bf16.msra.mxu0 %v16100_v6  ;;  %v16142_v44 = vld [vmem:[#allocation6 + $0x1180] ss:$16 sps:$4 sm:$0xff]   ;;  %v16150_v6 = vld [vmem:[#allocation6 + $0x1164] ss:$16 sps:$4 sm:$0xff]  }
 0x3bd   : > { %9258 = vmatprep.subr.bf16.mxu0 %v16108_v3  ;;  %v16133_v3 = vld [vmem:[#allocation6 + $0x13c0] ss:$16 sps:$4 sm:$0xff]   ;;  %v16141_v10 = vld [vmem:[#allocation6 + $0x13a4] ss:$16 sps:$4 sm:$0xff]  }
 0x3be   : > { %v16156_v16 = vld [vmem:[#allocation6 + $0x1144] ss:$16 sps:$4 sm:$0xff]  }
 0x3bf   : > { %9294 = vmatpush1.bf16.msra.mxu1 %v16091_v58  ;;  %v16148_v58 = vld [vmem:[#allocation6 + $0x1160] ss:$16 sps:$4 sm:$0xff]  }
 0x3c0   : > { %9295 = vmatprep.subr.bf16.mxu1 %v16099_v43  ;;  %9259 = vmatpush1.bf16.msra.mxu0 %v16106_v32  ;;  %v16139_v43 = vld [vmem:[#allocation6 + $0x13a0] ss:$16 sps:$4 sm:$0xff]   ;;  %v16147_v32 = vld [vmem:[#allocation6 + $0x1384] ss:$16 sps:$4 sm:$0xff]  }
 0x3c1   : > { %9260 = vmatprep.subr.bf16.mxu0 %v16114_v47  ;;  %v16154_v47 = vld [vmem:[#allocation6 + $0x1140] ss:$16 sps:$4 sm:$0xff]  }
 0x3c3   : > { %9296 = vmatpush1.bf16.msra.mxu1 %v16097_v8  ;;  %v16162_v8 = vld [vmem:[#allocation6 + $0x1124] ss:$16 sps:$4 sm:$0xff]  }
 0x3c4   : > { %9297 = vmatprep.subr.bf16.mxu1 %v16105_v56  ;;  %9261 = vmatpush1.bf16.msra.mxu0 %v16112_v9  ;;  %v16145_v56 = vld [vmem:[#allocation6 + $0x1380] ss:$16 sps:$4 sm:$0xff]   ;;  %v16153_v9 = vld [vmem:[#allocation6 + $0x1364] ss:$16 sps:$4 sm:$0xff]  }
 0x3c5   : > { %9262 = vmatprep.subr.bf16.mxu0 %v16120_v34  ;;  %v16160_v34 = vld [vmem:[#allocation6 + $0x1120] ss:$16 sps:$4 sm:$0xff]  }
 0x3c7   : > { %9298 = vmatpush1.bf16.msra.mxu1 %v16103_v12  ;;  %v16168_v12 = vld [vmem:[#allocation6 + $0x1104] ss:$16 sps:$4 sm:$0xff]  }
 0x3c8   : > { %9299 = vmatprep.subr.bf16.mxu1 %v16111_v7  ;;  %9263 = vmatpush1.bf16.msra.mxu0 %v16118_v49  ;;  %v16151_v7 = vld [vmem:[#allocation6 + $0x1360] ss:$16 sps:$4 sm:$0xff]   ;;  %v16159_v49 = vld [vmem:[#allocation6 + $0x1344] ss:$16 sps:$4 sm:$0xff]  }
 0x3c9   : > { %9264 = vmatprep.subr.bf16.mxu0 %v16126_v37  ;;  %v16166_v37 = vld [vmem:[#allocation6 + $0x1100] ss:$16 sps:$4 sm:$0xff]  }
 0x3cb   : > { %9300 = vmatpush1.bf16.msra.mxu1 %v16109_v27  ;;  %v16174_v27 = vld [vmem:[#allocation6 + $0x14e4] ss:$16 sps:$4 sm:$0xff]  }
 0x3cc   : > { %9301 = vmatprep.subr.bf16.mxu1 %v16117_v20  ;;  %9265 = vmatpush2.bf16.msra.mxu0 %v16124_v59  ;;  %v16157_v20 = vld [vmem:[#allocation6 + $0x1340] ss:$16 sps:$4 sm:$0xff]   ;;  %v16165_v59 = vld [vmem:[#allocation6 + $0x1324] ss:$16 sps:$4 sm:$0xff]  }
 0x3cd   : > { %9266 = vmatprep.subr.bf16.mxu0 %v16132_v39  ;;  %v16172_v39 = vld [vmem:[#allocation6 + $0x14e0] ss:$16 sps:$4 sm:$0xff]  }
 0x3cf   : > { %9302 = vmatpush1.bf16.msra.mxu1 %v16115_v24  ;;  %v19139_v24 = vpack.c.b16 %v19023_v38, %v19023_v38 }
 0x3d0   : > { %9303 = vmatprep.subr.bf16.mxu1 %v16123_v52  ;;  %9267 = vmatpush2.bf16.msra.mxu0 %v16130_v35  ;;  %v16180_v52 = vld [vmem:[#allocation6 + $0x14c4] ss:$16 sps:$4 sm:$0xff]   ;;  %v16163_v35 = vld [vmem:[#allocation6 + $0x1320] ss:$16 sps:$4 sm:$0xff]  }
 0x3d1   : > { %9268 = vmatprep.subr.bf16.mxu0 %v16138_v4 }
 0x3d3   : > { %9304 = vmatpush1.bf16.msra.mxu1 %v16121_v63  ;;  %v19144_v63 = vpack.c.b16 %v19050_v19, %v19050_v19  ;;  %v16184_v19 = vld [vmem:[#allocation6 + $0x14a0] ss:$16 sps:$4 sm:$0xff]  }
 0x3d4   : > { %9305 = vmatprep.subr.bf16.mxu1 %v16129_v2  ;;  %9269 = vmatpush2.bf16.msra.mxu0 %v16136_v29  ;;  %v16171_v2 = vld [vmem:[#allocation6 + $0x1304] ss:$16 sps:$4 sm:$0xff]  }
 0x3d5   : > { %9270 = vmatprep.subr.bf16.mxu0 %v16144_v51  ;;  %v16178_v51 = vld [vmem:[#allocation6 + $0x14c0] ss:$16 sps:$4 sm:$0xff]  }
 0x3d7   : > { %9306 = vmatpush2.bf16.msra.mxu1 %v16127_v31  ;;  %v16186_v31 = vld [vmem:[#allocation6 + $0x14a4] ss:$16 sps:$4 sm:$0xff]  }
 0x3d8   : > { %9307 = vmatprep.subr.bf16.mxu1 %v16135_v60  ;;  %9271 = vmatpush2.bf16.msra.mxu0 %v16142_v44  ;;  %v16169_v44 = vld [vmem:[#allocation6 + $0x1300] ss:$16 sps:$4 sm:$0xff]  }
 0x3d9   : > { %9272 = vmatprep.subr.bf16.mxu0 %v16150_v6 }
 0x3db   : > { %9308 = vmatpush2.bf16.msra.mxu1 %v16133_v3  ;;  %v16177_v3 = vld [vmem:[#allocation6 + $0x16e4] ss:$16 sps:$4 sm:$0xff]  }
 0x3dc   : > { %9309 = vmatprep.subr.bf16.mxu1 %v16141_v10  ;;  %9273 = vmatpush2.bf16.msra.mxu0 %v16148_v58  ;;  %v16192_v58 = vld [vmem:[#allocation6 + $0x1484] ss:$16 sps:$4 sm:$0xff]  }
 0x3dd   : > { %9274 = vmatprep.subr.bf16.mxu0 %v16156_v16  ;;  %v19151_v16 = vpack.c.b16 %v19036_v14, %v19036_v14  ;;  %v16181_v14 = vld [vmem:[#allocation6 + $0x16c0] ss:$16 sps:$4 sm:$0xff]  }
 0x3df   : > { %9310 = vmatpush2.bf16.msra.mxu1 %v16139_v43  ;;  %v16183_v43 = vld [vmem:[#allocation6 + $0x16c4] ss:$16 sps:$4 sm:$0xff]  }
 0x3e0   : > { %9311 = vmatprep.subr.bf16.mxu1 %v16147_v32  ;;  %9275 = vmatpush2.bf16.msra.mxu0 %v16154_v47  ;;  %v19155_v32 = vpack.c.b16 %v19053_v62, %v19053_v62  ;;  %v16198_v47 = vld [vmem:[#allocation6 + $0x1464] ss:$16 sps:$4 sm:$0xff]  }
 0x3e1   : > { %9276 = vmatprep.subr.bf16.mxu0 %v16162_v8  ;;  %v16204_v62 = vld [vmem:[#allocation6 + $0x1444] ss:$16 sps:$4 sm:$0xff]  }
 0x3e3   : > { %9312 = vmatpush2.bf16.msra.mxu1 %v16145_v56 }
 0x3e4   : > { %9313 = vmatprep.subr.bf16.mxu1 %v16153_v9  ;;  %9277 = vmatpush2.bf16.msra.mxu0 %v16160_v34  ;;  %v16189_v34 = vld [vmem:[#allocation6 + $0x16a4] ss:$16 sps:$4 sm:$0xff]  }
 0x3e5   : > { %9278 = vmatprep.subr.bf16.mxu0 %v16168_v12  ;;  %v16196_v12 = vld [vmem:[#allocation6 + $0x1460] ss:$16 sps:$4 sm:$0xff]  }
 0x3e7   : > { %9314 = vmatpush2.bf16.msra.mxu1 %v16151_v7 }
 0x3e8   : > { %9315 = vmatprep.subr.bf16.mxu1 %v16159_v49  ;;  %9279 = vmatpush2.bf16.msra.mxu0 %v16166_v37  ;;  %v16187_v37 = vld [vmem:[#allocation6 + $0x16a0] ss:$16 sps:$4 sm:$0xff]  }
 0x3e9   : > { %9330 = vmatprep.subr.bf16.mxu0 %v16174_v27 }
 0x3eb   : > { %9316 = vmatpush2.bf16.msra.mxu1 %v16157_v20  ;;  %v9036_v4 = vpop.f32.mrf.mxu0  ;;  %9281 = vmatmul.mubr.bf16.vlgmr.msra.gmra.mxu0 %v19139_v24  ;;  %v16195_v20 = vld [vmem:[#allocation6 + $0x1684] ss:$16 sps:$4 sm:$0xff]  }
 0x3ec   : > { %9317 = vmatprep.subr.bf16.mxu1 %v16165_v59  ;;  %v9037_v29 = vadd.f32 %v9036_v4, %v19132_v61  ;;  %9331 = vmatpush1.bf16.msra.mxu0 %v16172_v39  ;;  %v16175_v61 = vld [vmem:[#allocation6 + $0x16e0] ss:$16 sps:$4 sm:$0xff]   ;;  %v16210_v39 = vld [vmem:[#allocation6 + $0x1424] ss:$16 sps:$4 sm:$0xff]  }
 0x3ed   : > { %9362 = vmatprep.mubr.bf16.mxu0 %v19144_v63  ;;  %v9038_v38 = vpop.f32.mrf.mxu0  ;;  %9332 = vmatprep.subr.bf16.mxu0 %v16180_v52  ;;  %v16202_v59 = vld [vmem:[#allocation6 + $0x1440] ss:$16 sps:$4 sm:$0xff]  }
 0x3ee   : > { %v9039_v60 = vadd.f32 %v9038_v38, %v19135_v46  ;;  %v16190_v46 = vld [vmem:[#allocation6 + $0x1480] ss:$16 sps:$4 sm:$0xff]  }
 0x3ef   : > { %9318 = vmatpush2.bf16.msra.mxu1 %v16163_v35  ;;  %v9040_v6 = vpop.f32.mrf.mxu0  ;;  %v16193_v52 = vld [vmem:[#allocation6 + $0x1680] ss:$16 sps:$4 sm:$0xff]   ;;  %v16201_v35 = vld [vmem:[#allocation6 + $0x1664] ss:$16 sps:$4 sm:$0xff]  }
 0x3f0   : > { %9319 = vmatprep.subr.bf16.mxu1 %v16171_v2  ;;  %9333 = vmatpush1.bf16.msra.mxu0 %v16178_v51  ;;  %v16208_v4 = vld [vmem:[#allocation6 + $0x1420] ss:$16 sps:$4 sm:$0xff]   ;;  %v16216_v2 = vld [vmem:[#allocation6 + $0x1404] ss:$16 sps:$4 sm:$0xff]  }
 0x3f1   : > { %v9041_v10 = vpop.f32.mrf.mxu0  ;;  %9334 = vmatprep.subr.bf16.mxu0 %v16186_v31  ;;  %v16207_v51 = vld [vmem:[#allocation6 + $0x1644] ss:$16 sps:$4 sm:$0xff]   ;;  %v16214_v38 = vld [vmem:[#allocation6 + $0x1400] ss:$16 sps:$4 sm:$0xff]  }
 0x3f2   : > { %v16222_v31 = vld [vmem:[#allocation6 + $0x15e4] ss:$16 sps:$4 sm:$0xff]   ;;  %v16220_v6 = vld [vmem:[#allocation6 + $0x15e0] ss:$16 sps:$4 sm:$0xff]  }
 0x3f3   : > { %9320 = vmatpush2.bf16.msra.mxu1 %v16169_v44  ;;  %v16213_v44 = vld [vmem:[#allocation6 + $0x1624] ss:$16 sps:$4 sm:$0xff]  }
 0x3f4   : > { %9371 = vmatprep.subr.bf16.mxu1 %v16177_v3  ;;  %9335 = vmatpush1.bf16.msra.mxu0 %v16184_v19  ;;  %v16228_v3 = vld [vmem:[#allocation6 + $0x15c4] ss:$16 sps:$4 sm:$0xff]   ;;  %v16211_v19 = vld [vmem:[#allocation6 + $0x1620] ss:$16 sps:$4 sm:$0xff]  }
 0x3f5   : > { %9336 = vmatprep.subr.bf16.mxu0 %v16192_v58  ;;  %v16219_v10 = vld [vmem:[#allocation6 + $0x1604] ss:$16 sps:$4 sm:$0xff]   ;;  %v16226_v58 = vld [vmem:[#allocation6 + $0x15c0] ss:$16 sps:$4 sm:$0xff]  }
 0x3f6   : > { %v9077_v8 = vpop.f32.mrf.mxu1  ;;  %9322 = vmatmul.mubr.bf16.vlgmr.msra.gmra.mxu1 %v19151_v16 }
 0x3f7   : > { %v19158_v56 = vadd.f32 %v9077_v8, %v9037_v29  ;;  %9372 = vmatpush1.bf16.msra.mxu1 %v16175_v61  ;;  %9403 = vmatprep.mubr.bf16.mxu1 %v19155_v32  ;;  %v16199_v29 = vld [vmem:[#allocation6 + $0x1660] ss:$16 sps:$4 sm:$0xff]   ;;  %v16234_v61 = vld [vmem:[#allocation6 + $0x15a4] ss:$16 sps:$4 sm:$0xff]  }
 0x3f8   : > { %v9079_v9 = vpop.f32.mrf.mxu1  ;;  %9373 = vmatprep.subr.bf16.mxu1 %v16183_v43  ;;  %9337 = vmatpush1.bf16.msra.mxu0 %v16190_v46  ;;  %v16217_v43 = vld [vmem:[#allocation6 + $0x1600] ss:$16 sps:$4 sm:$0xff]   ;;  %v16225_v46 = vld [vmem:[#allocation6 + $0x17e4] ss:$16 sps:$4 sm:$0xff]  }
 0x3f9   : > { %v19161_v7 = vadd.f32 %v9079_v9, %v9039_v60  ;;  %9338 = vmatprep.subr.bf16.mxu0 %v16198_v47  ;;  %v16205_v60 = vld [vmem:[#allocation6 + $0x1640] ss:$16 sps:$4 sm:$0xff]   ;;  %v16240_v8 = vld [vmem:[#allocation6 + $0x1584] ss:$16 sps:$4 sm:$0xff]  }
 0x3fa   : > { %v9081_v49 = vpop.f32.mrf.mxu1  ;;  %v16232_v47 = vld [vmem:[#allocation6 + $0x15a0] ss:$16 sps:$4 sm:$0xff]   ;;  %v16231_v9 = vld [vmem:[#allocation6 + $0x17c4] ss:$16 sps:$4 sm:$0xff]  }
 0x3fb   : > { %9374 = vmatpush1.bf16.msra.mxu1 %v16181_v14  ;;  %v16223_v14 = vld [vmem:[#allocation6 + $0x17e0] ss:$16 sps:$4 sm:$0xff]   ;;  %v16237_v49 = vld [vmem:[#allocation6 + $0x17a4] ss:$16 sps:$4 sm:$0xff]  }
 0x3fc   : > { %v9082_v27 = vpop.f32.mrf.mxu1  ;;  %9375 = vmatprep.subr.bf16.mxu1 %v16189_v34  ;;  %9339 = vmatpush1.bf16.msra.mxu0 %v16196_v12  ;;  %v16238_v34 = vld [vmem:[#allocation6 + $0x1580] ss:$16 sps:$4 sm:$0xff]   ;;  %v16246_v12 = vld [vmem:[#allocation6 + $0x1564] ss:$16 sps:$4 sm:$0xff]  }
 0x3fd   : > { %9340 = vmatprep.subr.bf16.mxu0 %v16204_v62  ;;  %v16229_v62 = vld [vmem:[#allocation6 + $0x17c0] ss:$16 sps:$4 sm:$0xff]   ;;  %v16252_v27 = vld [vmem:[#allocation6 + $0x1544] ss:$16 sps:$4 sm:$0xff]  }
 0x3ff   : > { %9376 = vmatpush1.bf16.msra.mxu1 %v16187_v37  ;;  %v16244_v37 = vld [vmem:[#allocation6 + $0x1560] ss:$16 sps:$4 sm:$0xff]  }
 0x400   : > { %9377 = vmatprep.subr.bf16.mxu1 %v16195_v20  ;;  %9341 = vmatpush1.bf16.msra.mxu0 %v16202_v59  ;;  %v16235_v20 = vld [vmem:[#allocation6 + $0x17a0] ss:$16 sps:$4 sm:$0xff]   ;;  %v16243_v59 = vld [vmem:[#allocation6 + $0x1784] ss:$16 sps:$4 sm:$0xff]  }
 0x401   : > { %9342 = vmatprep.subr.bf16.mxu0 %v16210_v39  ;;  %v16250_v39 = vld [vmem:[#allocation6 + $0x1540] ss:$16 sps:$4 sm:$0xff]  }
 0x403   : > { %9378 = vmatpush1.bf16.msra.mxu1 %v16193_v52  ;;  %v16258_v52 = vld [vmem:[#allocation6 + $0x1524] ss:$16 sps:$4 sm:$0xff]  }
 0x404   : > { %9379 = vmatprep.subr.bf16.mxu1 %v16201_v35  ;;  %9343 = vmatpush1.bf16.msra.mxu0 %v16208_v4  ;;  %v16241_v35 = vld [vmem:[#allocation6 + $0x1780] ss:$16 sps:$4 sm:$0xff]   ;;  %v16249_v4 = vld [vmem:[#allocation6 + $0x1764] ss:$16 sps:$4 sm:$0xff]  }
 0x405   : > { %9344 = vmatprep.subr.bf16.mxu0 %v16216_v2  ;;  %v16256_v2 = vld [vmem:[#allocation6 + $0x1520] ss:$16 sps:$4 sm:$0xff]  }
 0x407   : > { %9380 = vmatpush1.bf16.msra.mxu1 %v16199_v29  ;;  %v16264_v29 = vld [vmem:[#allocation6 + $0x1504] ss:$16 sps:$4 sm:$0xff]  }
 0x408   : > { %9381 = vmatprep.subr.bf16.mxu1 %v16207_v51  ;;  %9345 = vmatpush1.bf16.msra.mxu0 %v16214_v38  ;;  %v16247_v51 = vld [vmem:[#allocation6 + $0x1760] ss:$16 sps:$4 sm:$0xff]   ;;  %v16255_v38 = vld [vmem:[#allocation6 + $0x1744] ss:$16 sps:$4 sm:$0xff]  }
 0x409   : > { %9346 = vmatprep.subr.bf16.mxu0 %v16222_v31  ;;  %v16262_v31 = vld [vmem:[#allocation6 + $0x1500] ss:$16 sps:$4 sm:$0xff]  }
 0x40b   : > { %9382 = vmatpush1.bf16.msra.mxu1 %v16205_v60  ;;  %v16270_v60 = vld [vmem:[#allocation6 + $0xec] ss:$16 sps:$4 sm:$0xff]  }
 0x40c   : > { %9383 = vmatprep.subr.bf16.mxu1 %v16213_v44  ;;  %9347 = vmatpush2.bf16.msra.mxu0 %v16220_v6  ;;  %v16253_v44 = vld [vmem:[#allocation6 + $0x1740] ss:$16 sps:$4 sm:$0xff]   ;;  %v16261_v6 = vld [vmem:[#allocation6 + $0x1724] ss:$16 sps:$4 sm:$0xff]  }
 0x40d   : > { %9348 = vmatprep.subr.bf16.mxu0 %v16228_v3  ;;  %v16268_v3 = vld [vmem:[#allocation6 + $0xe8] ss:$16 sps:$4 sm:$0xff]  }
 0x40f   : > { %9384 = vmatpush1.bf16.msra.mxu1 %v16211_v19  ;;  %v19165_v19 = vpack.c.b16 %v19047_v45, %v19047_v45 }
 0x410   : > { %9385 = vmatprep.subr.bf16.mxu1 %v16219_v10  ;;  %9349 = vmatpush2.bf16.msra.mxu0 %v16226_v58  ;;  %v16276_v10 = vld [vmem:[#allocation6 + $0xcc] ss:$16 sps:$4 sm:$0xff]   ;;  %v16259_v58 = vld [vmem:[#allocation6 + $0x1720] ss:$16 sps:$4 sm:$0xff]  }
 0x411   : > { %9350 = vmatprep.subr.bf16.mxu0 %v16234_v61 }
 0x413   : > { %9386 = vmatpush1.bf16.msra.mxu1 %v16217_v43  ;;  %v16267_v43 = vld [vmem:[#allocation6 + $0x1704] ss:$16 sps:$4 sm:$0xff]  }
 0x414   : > { %9387 = vmatprep.subr.bf16.mxu1 %v16225_v46  ;;  %9351 = vmatpush2.bf16.msra.mxu0 %v16232_v47  ;;  %v16274_v47 = vld [vmem:[#allocation6 + $0xc8] ss:$16 sps:$4 sm:$0xff]  }
 0x415   : > { %9352 = vmatprep.subr.bf16.mxu0 %v16240_v8 }
 0x417   : > { %9388 = vmatpush2.bf16.msra.mxu1 %v16223_v14  ;;  %v16282_v14 = vld [vmem:[#allocation6 + $0xac] ss:$16 sps:$4 sm:$0xff]  }
 0x418   : > { %9389 = vmatprep.subr.bf16.mxu1 %v16231_v9  ;;  %9353 = vmatpush2.bf16.msra.mxu0 %v16238_v34  ;;  %v16265_v9 = vld [vmem:[#allocation6 + $0x1700] ss:$16 sps:$4 sm:$0xff]  }
 0x419   : > { %9354 = vmatprep.subr.bf16.mxu0 %v16246_v12  ;;  %v16273_v12 = vld [vmem:[#allocation6 + $0x2ec] ss:$16 sps:$4 sm:$0xff]  }
 0x41b   : > { %9390 = vmatpush2.bf16.msra.mxu1 %v16229_v62  ;;  %v16280_v62 = vld [vmem:[#allocation6 + $0xa8] ss:$16 sps:$4 sm:$0xff]  }
 0x41c   : > { %9391 = vmatprep.subr.bf16.mxu1 %v16237_v49  ;;  %9355 = vmatpush2.bf16.msra.mxu0 %v16244_v37  ;;  %v16288_v37 = vld [vmem:[#allocation6 + $0x8c] ss:$16 sps:$4 sm:$0xff]  }
 0x41d   : > { %9356 = vmatprep.subr.bf16.mxu0 %v16252_v27  ;;  %v16279_v27 = vld [vmem:[#allocation6 + $0x2cc] ss:$16 sps:$4 sm:$0xff]  }
 0x41f   : > { %9392 = vmatpush2.bf16.msra.mxu1 %v16235_v20  ;;  %v16294_v20 = vld [vmem:[#allocation6 + $0x6c] ss:$16 sps:$4 sm:$0xff]  }
 0x420   : > { %9393 = vmatprep.subr.bf16.mxu1 %v16243_v59  ;;  %9357 = vmatpush2.bf16.msra.mxu0 %v16250_v39 }
 0x421   : > { %9358 = vmatprep.subr.bf16.mxu0 %v16258_v52  ;;  %v16277_v52 = vld [vmem:[#allocation6 + $0x2c8] ss:$16 sps:$4 sm:$0xff]  }
 0x423   : > { %9394 = vmatpush2.bf16.msra.mxu1 %v16241_v35 }
 0x424   : > { %9395 = vmatprep.subr.bf16.mxu1 %v16249_v4  ;;  %9359 = vmatpush2.bf16.msra.mxu0 %v16256_v2  ;;  %v16285_v4 = vld [vmem:[#allocation6 + $0x2ac] ss:$16 sps:$4 sm:$0xff]  }
 0x425   : > { %9360 = vmatprep.subr.bf16.mxu0 %v16264_v29  ;;  %v16300_v29 = vld [vmem:[#allocation6 + $0x4c] ss:$16 sps:$4 sm:$0xff]  }
 0x427   : > { %9396 = vmatpush2.bf16.msra.mxu1 %v16247_v51 }
 0x428   : > { %9397 = vmatprep.subr.bf16.mxu1 %v16255_v38  ;;  %9361 = vmatpush2.bf16.msra.mxu0 %v16262_v31  ;;  %v16283_v38 = vld [vmem:[#allocation6 + $0x2a8] ss:$16 sps:$4 sm:$0xff]  }
 0x429   : > { %9412 = vmatprep.subr.bf16.mxu0 %v16270_v60  ;;  %v16291_v60 = vld [vmem:[#allocation6 + $0x28c] ss:$16 sps:$4 sm:$0xff]  }
 0x42b   : > { %9398 = vmatpush2.bf16.msra.mxu1 %v16253_v44  ;;  %v9118_v61 = vpop.f32.mrf.mxu0  ;;  %9363 = vmatmul.mubr.bf16.vlgmr.msra.gmra.mxu0 %v19165_v19  ;;  %v16298_v44 = vld [vmem:[#allocation6 + $0x48] ss:$16 sps:$4 sm:$0xff]  }
 0x42c   : > { %9399 = vmatprep.subr.bf16.mxu1 %v16261_v6  ;;  %v9119_v46 = vadd.f32 %v9118_v61, %v19158_v56  ;;  %9413 = vmatpush1.bf16.msra.mxu0 %v16268_v3  ;;  %v16271_v56 = vld [vmem:[#allocation6 + $0x2e8] ss:$16 sps:$4 sm:$0xff]   ;;  %v16297_v3 = vld [vmem:[#allocation6 + $0x26c] ss:$16 sps:$4 sm:$0xff]  }
 0x42d   : > { %9444 = vmatprep.mubr.bf16.mxu0 %v18713_v18  ;;  %v9120_v8 = vpop.f32.mrf.mxu0  ;;  %9414 = vmatprep.subr.bf16.mxu0 %v16276_v10  ;;  %v19173_v18 = vpack.c.b16 %v19056_v42, %v19056_v42  ;;  %v16292_v42 = vld [vmem:[#allocation6 + $0x68] ss:$16 sps:$4 sm:$0xff]  }
 0x42e   : > { %v9121_v45 = vadd.f32 %v9120_v8, %v19161_v7  ;;  %v16286_v7 = vld [vmem:[#allocation6 + $0x88] ss:$16 sps:$4 sm:$0xff]  }
 0x42f   : > { %9400 = vmatpush2.bf16.msra.mxu1 %v16259_v58  ;;  %v9122_v34 = vpop.f32.mrf.mxu0  ;;  %v16289_v6 = vld [vmem:[#allocation6 + $0x288] ss:$16 sps:$4 sm:$0xff]   ;;  %v16312_v58 = vld [vmem:[#allocation6 + $0xc] ss:$16 sps:$4 sm:$0xff]  }
 0x430   : > { %9401 = vmatprep.subr.bf16.mxu1 %v16267_v43  ;;  %9415 = vmatpush1.bf16.msra.mxu0 %v16274_v47  ;;  %v16304_v10 = vld [vmem:[#allocation6 + $0x28] ss:$16 sps:$4 sm:$0xff]   ;;  %v16303_v43 = vld [vmem:[#allocation6 + $0x24c] ss:$16 sps:$4 sm:$0xff]  }
 0x431   : > { %v9123_v49 = vpop.f32.mrf.mxu0  ;;  %9416 = vmatprep.subr.bf16.mxu0 %v16282_v14  ;;  %v16295_v61 = vld [vmem:[#allocation6 + $0x268] ss:$16 sps:$4 sm:$0xff]   ;;  %v16318_v47 = vld [vmem:[#allocation6 + $0x1ec] ss:$16 sps:$4 sm:$0xff]  }
 0x432   : > { %v16301_v8 = vld [vmem:[#allocation6 + $0x248] ss:$16 sps:$4 sm:$0xff]   ;;  %v16309_v14 = vld [vmem:[#allocation6 + $0x22c] ss:$16 sps:$4 sm:$0xff]  }
 0x433   : > { %9402 = vmatpush2.bf16.msra.mxu1 %v16265_v9  ;;  %v16324_v9 = vld [vmem:[#allocation6 + $0x1cc] ss:$16 sps:$4 sm:$0xff]   ;;  %v16307_v34 = vld [vmem:[#allocation6 + $0x228] ss:$16 sps:$4 sm:$0xff]  }
 0x434   : > { %9453 = vmatprep.subr.bf16.mxu1 %v16273_v12  ;;  %9417 = vmatpush1.bf16.msra.mxu0 %v16280_v62  ;;  %v16315_v12 = vld [vmem:[#allocation6 + $0x20c] ss:$16 sps:$4 sm:$0xff]   ;;  %v16322_v62 = vld [vmem:[#allocation6 + $0x1c8] ss:$16 sps:$4 sm:$0xff]  }
 0x435   : > { %9418 = vmatprep.subr.bf16.mxu0 %v16288_v37  ;;  %v16330_v49 = vld [vmem:[#allocation6 + $0x1ac] ss:$16 sps:$4 sm:$0xff]   ;;  %v16313_v37 = vld [vmem:[#allocation6 + $0x208] ss:$16 sps:$4 sm:$0xff]  }
 0x436   : > { %v9159_v59 = vpop.f32.mrf.mxu1  ;;  %9404 = vmatmul.mubr.bf16.vlgmr.msra.gmra.mxu1 %v19173_v18 }
 0x437   : > { %v19176_v39 = vadd.f32 %v9159_v59, %v9119_v46  ;;  %9454 = vmatpush1.bf16.msra.mxu1 %v16271_v56  ;;  %9485 = vmatprep.mubr.bf16.mxu1 %v18746_v57  ;;  %v16306_v57 = vld [vmem:[#allocation6 + $0x2c] ss:$16 sps:$4 sm:$0xff]   ;;  %v16310_v46 = vld [vmem:[#allocation6 + $0x8] ss:$16 sps:$4 sm:$0xff]  }
 0x438   : > { %v9161_v35 = vpop.f32.mrf.mxu1  ;;  %9455 = vmatprep.subr.bf16.mxu1 %v16279_v27  ;;  %9419 = vmatpush1.bf16.msra.mxu0 %v16286_v7  ;;  %v16321_v56 = vld [vmem:[#allocation6 + $0x3ec] ss:$16 sps:$4 sm:$0xff]   ;;  %v16328_v27 = vld [vmem:[#allocation6 + $0x1a8] ss:$16 sps:$4 sm:$0xff]  }
 0x439   : > { %v19179_v2 = vadd.f32 %v9161_v35, %v9121_v45  ;;  %9420 = vmatprep.subr.bf16.mxu0 %v16294_v20  ;;  %v16316_v45 = vld [vmem:[#allocation6 + $0x1e8] ss:$16 sps:$4 sm:$0xff]   ;;  %v16336_v7 = vld [vmem:[#allocation6 + $0x18c] ss:$16 sps:$4 sm:$0xff]  }
 0x43a   : > { %v9163_v51 = vpop.f32.mrf.mxu1  ;;  %v16319_v20 = vld [vmem:[#allocation6 + $0x3e8] ss:$16 sps:$4 sm:$0xff]   ;;  %v16327_v59 = vld [vmem:[#allocation6 + $0x3cc] ss:$16 sps:$4 sm:$0xff]  }
 0x43b   : > { %9456 = vmatpush1.bf16.msra.mxu1 %v16277_v52  ;;  %v16334_v52 = vld [vmem:[#allocation6 + $0x188] ss:$16 sps:$4 sm:$0xff]   ;;  %v16342_v35 = vld [vmem:[#allocation6 + $0x16c] ss:$16 sps:$4 sm:$0xff]  }
 0x43c   : > { %v9164_v31 = vpop.f32.mrf.mxu1  ;;  %9457 = vmatprep.subr.bf16.mxu1 %v16285_v4  ;;  %9421 = vmatpush1.bf16.msra.mxu0 %v16292_v42  ;;  %v16325_v4 = vld [vmem:[#allocation6 + $0x3c8] ss:$16 sps:$4 sm:$0xff]   ;;  %v16333_v42 = vld [vmem:[#allocation6 + $0x3ac] ss:$16 sps:$4 sm:$0xff]  }
 0x43d   : > { %9422 = vmatprep.subr.bf16.mxu0 %v16300_v29  ;;  %v16340_v29 = vld [vmem:[#allocation6 + $0x168] ss:$16 sps:$4 sm:$0xff]   ;;  %v16348_v51 = vld [vmem:[#allocation6 + $0x14c] ss:$16 sps:$4 sm:$0xff]  }
 0x43e   : > { %v16339_v31 = vld [vmem:[#allocation6 + $0x38c] ss:$16 sps:$4 sm:$0xff]  }
 0x43f   : > { %9458 = vmatpush1.bf16.msra.mxu1 %v16283_v38  ;;  %v16331_v38 = vld [vmem:[#allocation6 + $0x3a8] ss:$16 sps:$4 sm:$0xff]  }
 0x440   : > { %9459 = vmatprep.subr.bf16.mxu1 %v16291_v60  ;;  %9423 = vmatpush1.bf16.msra.mxu0 %v16298_v44  ;;  %v16346_v60 = vld [vmem:[#allocation6 + $0x148] ss:$16 sps:$4 sm:$0xff]   ;;  %v16354_v44 = vld [vmem:[#allocation6 + $0x12c] ss:$16 sps:$4 sm:$0xff]  }
 0x441   : > { %9424 = vmatprep.subr.bf16.mxu0 %v16306_v57  ;;  %v16337_v57 = vld [vmem:[#allocation6 + $0x388] ss:$16 sps:$4 sm:$0xff]  }
 0x443   : > { %9460 = vmatpush1.bf16.msra.mxu1 %v16289_v6  ;;  %v16345_v6 = vld [vmem:[#allocation6 + $0x36c] ss:$16 sps:$4 sm:$0xff]  }
 0x444   : > { %9461 = vmatprep.subr.bf16.mxu1 %v16297_v3  ;;  %9425 = vmatpush1.bf16.msra.mxu0 %v16304_v10  ;;  %v16352_v3 = vld [vmem:[#allocation6 + $0x128] ss:$16 sps:$4 sm:$0xff]   ;;  %v16360_v10 = vld [vmem:[#allocation6 + $0x10c] ss:$16 sps:$4 sm:$0xff]  }
 0x445   : > { %9426 = vmatprep.subr.bf16.mxu0 %v16312_v58  ;;  %v16343_v58 = vld [vmem:[#allocation6 + $0x368] ss:$16 sps:$4 sm:$0xff]  }
 0x447   : > { %9462 = vmatpush1.bf16.msra.mxu1 %v16295_v61  ;;  %v16351_v61 = vld [vmem:[#allocation6 + $0x34c] ss:$16 sps:$4 sm:$0xff]  }
 0x448   : > { %9463 = vmatprep.subr.bf16.mxu1 %v16303_v43  ;;  %9427 = vmatpush1.bf16.msra.mxu0 %v16310_v46  ;;  %v16358_v43 = vld [vmem:[#allocation6 + $0x108] ss:$16 sps:$4 sm:$0xff]   ;;  %v16366_v46 = vld [vmem:[#allocation6 + $0x4ec] ss:$16 sps:$4 sm:$0xff]  }
 0x449   : > { %9428 = vmatprep.subr.bf16.mxu0 %v16318_v47  ;;  %v16349_v47 = vld [vmem:[#allocation6 + $0x348] ss:$16 sps:$4 sm:$0xff]  }
 0x44b   : > { %9464 = vmatpush1.bf16.msra.mxu1 %v16301_v8  ;;  %v16357_v8 = vld [vmem:[#allocation6 + $0x32c] ss:$16 sps:$4 sm:$0xff]  }
 0x44c   : > { %9465 = vmatprep.subr.bf16.mxu1 %v16309_v14  ;;  %9429 = vmatpush2.bf16.msra.mxu0 %v16316_v45  ;;  %v16364_v14 = vld [vmem:[#allocation6 + $0x4e8] ss:$16 sps:$4 sm:$0xff]   ;;  %v16372_v45 = vld [vmem:[#allocation6 + $0x4cc] ss:$16 sps:$4 sm:$0xff]  }
 0x44d   : > { %9430 = vmatprep.subr.bf16.mxu0 %v16324_v9  ;;  %v16355_v9 = vld [vmem:[#allocation6 + $0x328] ss:$16 sps:$4 sm:$0xff]  }
 0x44f   : > { %9466 = vmatpush1.bf16.msra.mxu1 %v16307_v34 }
 0x450   : > { %9467 = vmatprep.subr.bf16.mxu1 %v16315_v12  ;;  %9431 = vmatpush2.bf16.msra.mxu0 %v16322_v62  ;;  %v16363_v12 = vld [vmem:[#allocation6 + $0x30c] ss:$16 sps:$4 sm:$0xff]  }
 0x451   : > { %9432 = vmatprep.subr.bf16.mxu0 %v16330_v49  ;;  %v16370_v49 = vld [vmem:[#allocation6 + $0x4c8] ss:$16 sps:$4 sm:$0xff]  }
 0x453   : > { %9468 = vmatpush1.bf16.msra.mxu1 %v16313_v37 }
 0x454   : > { %9469 = vmatprep.subr.bf16.mxu1 %v16321_v56  ;;  %9433 = vmatpush2.bf16.msra.mxu0 %v16328_v27  ;;  %v16378_v56 = vld [vmem:[#allocation6 + $0x4ac] ss:$16 sps:$4 sm:$0xff]  }
 0x455   : > { %9434 = vmatprep.subr.bf16.mxu0 %v16336_v7  ;;  %v16361_v7 = vld [vmem:[#allocation6 + $0x308] ss:$16 sps:$4 sm:$0xff]  }
 0x457   : > { %9470 = vmatpush2.bf16.msra.mxu1 %v16319_v20 }
 0x458   : > { %9471 = vmatprep.subr.bf16.mxu1 %v16327_v59  ;;  %9435 = vmatpush2.bf16.msra.mxu0 %v16334_v52  ;;  %v16369_v59 = vld [vmem:[#allocation6 + $0x6ec] ss:$16 sps:$4 sm:$0xff]  }
 0x459   : > { %9436 = vmatprep.subr.bf16.mxu0 %v16342_v35  ;;  %v16384_v35 = vld [vmem:[#allocation6 + $0x48c] ss:$16 sps:$4 sm:$0xff]  }
 0x45b   : > { %9472 = vmatpush2.bf16.msra.mxu1 %v16325_v4  ;;  %v16375_v4 = vld [vmem:[#allocation6 + $0x6cc] ss:$16 sps:$4 sm:$0xff]  }
 0x45c   : > { %9473 = vmatprep.subr.bf16.mxu1 %v16333_v42  ;;  %9437 = vmatpush2.bf16.msra.mxu0 %v16340_v29  ;;  %v16390_v42 = vld [vmem:[#allocation6 + $0x46c] ss:$16 sps:$4 sm:$0xff]  }
 0x45d   : > { %9438 = vmatprep.subr.bf16.mxu0 %v16348_v51  ;;  %v16373_v51 = vld [vmem:[#allocation6 + $0x6c8] ss:$16 sps:$4 sm:$0xff]  }
 0x45f   : > { %9474 = vmatpush2.bf16.msra.mxu1 %v16331_v38 }
 0x460   : > { %9475 = vmatprep.subr.bf16.mxu1 %v16339_v31  ;;  %9439 = vmatpush2.bf16.msra.mxu0 %v16346_v60  ;;  %v16381_v31 = vld [vmem:[#allocation6 + $0x6ac] ss:$16 sps:$4 sm:$0xff]   ;;  %v16388_v60 = vld [vmem:[#allocation6 + $0x468] ss:$16 sps:$4 sm:$0xff]  }
 0x461   : > { %9440 = vmatprep.subr.bf16.mxu0 %v16354_v44 }
 0x463   : > { %9476 = vmatpush2.bf16.msra.mxu1 %v16337_v57  ;;  %v16396_v57 = vld [vmem:[#allocation6 + $0x44c] ss:$16 sps:$4 sm:$0xff]  }
 0x464   : > { %9477 = vmatprep.subr.bf16.mxu1 %v16345_v6  ;;  %9441 = vmatpush2.bf16.msra.mxu0 %v16352_v3  ;;  %v16379_v3 = vld [vmem:[#allocation6 + $0x6a8] ss:$16 sps:$4 sm:$0xff]  }
 0x465   : > { %9442 = vmatprep.subr.bf16.mxu0 %v16360_v10 }
 0x467   : > { %9478 = vmatpush2.bf16.msra.mxu1 %v16343_v58  ;;  %v16394_v58 = vld [vmem:[#allocation6 + $0x448] ss:$16 sps:$4 sm:$0xff]  }
 0x468   : > { %9479 = vmatprep.subr.bf16.mxu1 %v16351_v61  ;;  %9443 = vmatpush2.bf16.msra.mxu0 %v16358_v43  ;;  %v16385_v61 = vld [vmem:[#allocation6 + $0x688] ss:$16 sps:$4 sm:$0xff]   ;;  %v16393_v43 = vld [vmem:[#allocation6 + $0x66c] ss:$16 sps:$4 sm:$0xff]  }
 0x469   : > { %9494 = vmatprep.subr.bf16.mxu0 %v16366_v46  ;;  %v16400_v46 = vld [vmem:[#allocation6 + $0x428] ss:$16 sps:$4 sm:$0xff]  }
 0x46b   : > { %9480 = vmatpush2.bf16.msra.mxu1 %v16349_v47  ;;  %v9200_v34 = vpop.f32.mrf.mxu0  ;;  %9445 = vmatmul.mubr.bf16.vlgmr.msra.gmra.mxu0 %v18715_v0  ;;  %v16376_v0 = vld [vmem:[#allocation6 + $0x4a8] ss:$16 sps:$4 sm:$0xff]   ;;  %v16408_v47 = vld [vmem:[#allocation6 + $0x40c] ss:$16 sps:$4 sm:$0xff]  }
 0x46c   : > { %9481 = vmatprep.subr.bf16.mxu1 %v16357_v8  ;;  %v9201_v62 = vadd.f32 %v9200_v34, %v19176_v39  ;;  %9495 = vmatpush1.bf16.msra.mxu0 %v16364_v14  ;;  %v16367_v39 = vld [vmem:[#allocation6 + $0x6e8] ss:$16 sps:$4 sm:$0xff]   ;;  %v16399_v14 = vld [vmem:[#allocation6 + $0x64c] ss:$16 sps:$4 sm:$0xff]  }
 0x46d   : > { %9526 = vmatprep.mubr.bf16.mxu0 %v18792_v41  ;;  %v9202_v37 = vpop.f32.mrf.mxu0  ;;  %9496 = vmatprep.subr.bf16.mxu0 %v16372_v45  ;;  %v16382_v41 = vld [vmem:[#allocation6 + $0x488] ss:$16 sps:$4 sm:$0xff]  }
 0x46e   : > { %v9203_v27 = vadd.f32 %v9202_v37, %v19179_v2  ;;  %v16391_v8 = vld [vmem:[#allocation6 + $0x668] ss:$16 sps:$4 sm:$0xff]  }
 0x46f   : > { %9482 = vmatpush2.bf16.msra.mxu1 %v16355_v9  ;;  %v9204_v20 = vpop.f32.mrf.mxu0  ;;  %v16406_v45 = vld [vmem:[#allocation6 + $0x408] ss:$16 sps:$4 sm:$0xff]   ;;  %v16414_v9 = vld [vmem:[#allocation6 + $0x5ec] ss:$16 sps:$4 sm:$0xff]  }
 0x470   : > { %9483 = vmatprep.subr.bf16.mxu1 %v16363_v12  ;;  %9497 = vmatpush1.bf16.msra.mxu0 %v16370_v49  ;;  %v16397_v34 = vld [vmem:[#allocation6 + $0x648] ss:$16 sps:$4 sm:$0xff]   ;;  %v16405_v12 = vld [vmem:[#allocation6 + $0x62c] ss:$16 sps:$4 sm:$0xff]  }
 0x471   : > { %v9205_v52 = vpop.f32.mrf.mxu0  ;;  %9498 = vmatprep.subr.bf16.mxu0 %v16378_v56  ;;  %v16420_v49 = vld [vmem:[#allocation6 + $0x5cc] ss:$16 sps:$4 sm:$0xff]   ;;  %v16403_v37 = vld [vmem:[#allocation6 + $0x628] ss:$16 sps:$4 sm:$0xff]  }
 0x472   : > { %v16411_v56 = vld [vmem:[#allocation6 + $0x60c] ss:$16 sps:$4 sm:$0xff]   ;;  %v16409_v20 = vld [vmem:[#allocation6 + $0x608] ss:$16 sps:$4 sm:$0xff]  }
 0x473   : > { %9484 = vmatpush2.bf16.msra.mxu1 %v16361_v7  ;;  %v16426_v7 = vld [vmem:[#allocation6 + $0x5ac] ss:$16 sps:$4 sm:$0xff]  }
 0x474   : > { %9535 = vmatprep.subr.bf16.mxu1 %v16369_v59  ;;  %9499 = vmatpush1.bf16.msra.mxu0 %v16376_v0  ;;  %v16417_v59 = vld [vmem:[#allocation6 + $0x7ec] ss:$16 sps:$4 sm:$0xff]   ;;  %v16424_v0 = vld [vmem:[#allocation6 + $0x5a8] ss:$16 sps:$4 sm:$0xff]  }
 0x475   : > { %9500 = vmatprep.subr.bf16.mxu0 %v16384_v35  ;;  %v16432_v52 = vld [vmem:[#allocation6 + $0x58c] ss:$16 sps:$4 sm:$0xff]   ;;  %v16415_v35 = vld [vmem:[#allocation6 + $0x7e8] ss:$16 sps:$4 sm:$0xff]  }
 0x476   : > { %v9241_v29 = vpop.f32.mrf.mxu1  ;;  %9486 = vmatmul.mubr.bf16.vlgmr.msra.gmra.mxu1 %v18798_v36  ;;  %v16387_v36 = vld [vmem:[#allocation6 + $0x68c] ss:$16 sps:$4 sm:$0xff]  }
 0x477   : > { %v19186_v2 = vadd.f32 %v9241_v29, %v9201_v62  ;;  %9536 = vmatpush1.bf16.msra.mxu1 %v16367_v39  ;;  %9567 = vmatprep.mubr.bf16.mxu1 %v18814_v28  ;;  %v16402_v28 = vld [vmem:[#allocation6 + $0x42c] ss:$16 sps:$4 sm:$0xff]   ;;  %v16412_v62 = vld [vmem:[#allocation6 + $0x5e8] ss:$16 sps:$4 sm:$0xff]  }
 0x478   : > { %v9243_v38 = vpop.f32.mrf.mxu1  ;;  %9537 = vmatprep.subr.bf16.mxu1 %v16375_v4  ;;  %9501 = vmatpush1.bf16.msra.mxu0 %v16382_v41  ;;  %v16423_v39 = vld [vmem:[#allocation6 + $0x7cc] ss:$16 sps:$4 sm:$0xff]   ;;  %v16430_v4 = vld [vmem:[#allocation6 + $0x588] ss:$16 sps:$4 sm:$0xff]  }
 0x479   : > { %v19189_v44 = vadd.f32 %v9243_v38, %v9203_v27  ;;  %9502 = vmatprep.subr.bf16.mxu0 %v16390_v42  ;;  %v16418_v27 = vld [vmem:[#allocation6 + $0x5c8] ss:$16 sps:$4 sm:$0xff]   ;;  %v16438_v41 = vld [vmem:[#allocation6 + $0x56c] ss:$16 sps:$4 sm:$0xff]  }
 0x47a   : > { %v9245_v6 = vpop.f32.mrf.mxu1  ;;  %v16421_v42 = vld [vmem:[#allocation6 + $0x7c8] ss:$16 sps:$4 sm:$0xff]   ;;  %v16429_v29 = vld [vmem:[#allocation6 + $0x7ac] ss:$16 sps:$4 sm:$0xff]  }
 0x47b   : > { %9538 = vmatpush1.bf16.msra.mxu1 %v16373_v51  ;;  %v16436_v51 = vld [vmem:[#allocation6 + $0x568] ss:$16 sps:$4 sm:$0xff]   ;;  %v16444_v38 = vld [vmem:[#allocation6 + $0x54c] ss:$16 sps:$4 sm:$0xff]  }
 0x47c   : > { %v9246_v10 = vpop.f32.mrf.mxu1  ;;  %9539 = vmatprep.subr.bf16.mxu1 %v16381_v31  ;;  %9503 = vmatpush1.bf16.msra.mxu0 %v16388_v60  ;;  %v16427_v31 = vld [vmem:[#allocation6 + $0x7a8] ss:$16 sps:$4 sm:$0xff]   ;;  %v16435_v60 = vld [vmem:[#allocation6 + $0x78c] ss:$16 sps:$4 sm:$0xff]  }
 0x47d   : > { %9504 = vmatprep.subr.bf16.mxu0 %v16396_v57  ;;  %v16442_v57 = vld [vmem:[#allocation6 + $0x548] ss:$16 sps:$4 sm:$0xff]   ;;  %v16450_v6 = vld [vmem:[#allocation6 + $0x52c] ss:$16 sps:$4 sm:$0xff]  }
 0x47e   : > { %v16441_v10 = vld [vmem:[#allocation6 + $0x76c] ss:$16 sps:$4 sm:$0xff]  }
 0x47f   : > { %9540 = vmatpush1.bf16.msra.mxu1 %v16379_v3  ;;  %v16433_v3 = vld [vmem:[#allocation6 + $0x788] ss:$16 sps:$4 sm:$0xff]  }
 0x480   : > { %9541 = vmatprep.subr.bf16.mxu1 %v16387_v36  ;;  %9505 = vmatpush1.bf16.msra.mxu0 %v16394_v58  ;;  %v16448_v36 = vld [vmem:[#allocation6 + $0x528] ss:$16 sps:$4 sm:$0xff]   ;;  %v16456_v58 = vld [vmem:[#allocation6 + $0x50c] ss:$16 sps:$4 sm:$0xff]  }
 0x481   : > { %9506 = vmatprep.subr.bf16.mxu0 %v16402_v28  ;;  %v16439_v28 = vld [vmem:[#allocation6 + $0x768] ss:$16 sps:$4 sm:$0xff]  }
 0x483   : > { %9542 = vmatpush1.bf16.msra.mxu1 %v16385_v61  ;;  %v16447_v61 = vld [vmem:[#allocation6 + $0x74c] ss:$16 sps:$4 sm:$0xff]  }
 0x484   : > { %9543 = vmatprep.subr.bf16.mxu1 %v16393_v43  ;;  %9507 = vmatpush1.bf16.msra.mxu0 %v16400_v46  ;;  %v16454_v43 = vld [vmem:[#allocation6 + $0x508] ss:$16 sps:$4 sm:$0xff]   ;;  %v16462_v46 = vld [vmem:[#allocation6 + $0x8ec] ss:$16 sps:$4 sm:$0xff]  }
 0x485   : > { %9508 = vmatprep.subr.bf16.mxu0 %v16408_v47  ;;  %v16445_v47 = vld [vmem:[#allocation6 + $0x748] ss:$16 sps:$4 sm:$0xff]  }
 0x487   : > { %9544 = vmatpush1.bf16.msra.mxu1 %v16391_v8  ;;  %v16453_v8 = vld [vmem:[#allocation6 + $0x72c] ss:$16 sps:$4 sm:$0xff]  }
 0x488   : > { %9545 = vmatprep.subr.bf16.mxu1 %v16399_v14  ;;  %9509 = vmatpush1.bf16.msra.mxu0 %v16406_v45  ;;  %v16460_v14 = vld [vmem:[#allocation6 + $0x8e8] ss:$16 sps:$4 sm:$0xff]   ;;  %v16468_v45 = vld [vmem:[#allocation6 + $0x8cc] ss:$16 sps:$4 sm:$0xff]  }
 0x489   : > { %9510 = vmatprep.subr.bf16.mxu0 %v16414_v9  ;;  %v16451_v9 = vld [vmem:[#allocation6 + $0x728] ss:$16 sps:$4 sm:$0xff]  }
 0x48b   : > { %9546 = vmatpush1.bf16.msra.mxu1 %v16397_v34 }
 0x48c   : > { %9547 = vmatprep.subr.bf16.mxu1 %v16405_v12  ;;  %9511 = vmatpush2.bf16.msra.mxu0 %v16412_v62  ;;  %v16459_v12 = vld [vmem:[#allocation6 + $0x70c] ss:$16 sps:$4 sm:$0xff]  }
 0x48d   : > { %9512 = vmatprep.subr.bf16.mxu0 %v16420_v49  ;;  %v16466_v49 = vld [vmem:[#allocation6 + $0x8c8] ss:$16 sps:$4 sm:$0xff]  }
 0x48f   : > { %9548 = vmatpush1.bf16.msra.mxu1 %v16403_v37 }
 0x490   : > { %9549 = vmatprep.subr.bf16.mxu1 %v16411_v56  ;;  %9513 = vmatpush2.bf16.msra.mxu0 %v16418_v27  ;;  %v16474_v56 = vld [vmem:[#allocation6 + $0x8ac] ss:$16 sps:$4 sm:$0xff]  }
 0x491   : > { %9514 = vmatprep.subr.bf16.mxu0 %v16426_v7  ;;  %v16457_v7 = vld [vmem:[#allocation6 + $0x708] ss:$16 sps:$4 sm:$0xff]  }
 0x493   : > { %9550 = vmatpush1.bf16.msra.mxu1 %v16409_v20 }
 0x494   : > { %9551 = vmatprep.subr.bf16.mxu1 %v16417_v59  ;;  %9515 = vmatpush2.bf16.msra.mxu0 %v16424_v0  ;;  %v16465_v59 = vld [vmem:[#allocation6 + $0xaec] ss:$16 sps:$4 sm:$0xff]  }
 0x495   : > { %9516 = vmatprep.subr.bf16.mxu0 %v16432_v52  ;;  %v16480_v52 = vld [vmem:[#allocation6 + $0x88c] ss:$16 sps:$4 sm:$0xff]  }
 0x497   : > { %9552 = vmatpush2.bf16.msra.mxu1 %v16415_v35  ;;  %v16471_v35 = vld [vmem:[#allocation6 + $0xacc] ss:$16 sps:$4 sm:$0xff]  }
 0x498   : > { %9553 = vmatprep.subr.bf16.mxu1 %v16423_v39  ;;  %9517 = vmatpush2.bf16.msra.mxu0 %v16430_v4  ;;  %v16486_v39 = vld [vmem:[#allocation6 + $0x86c] ss:$16 sps:$4 sm:$0xff]  }
 0x499   : > { %9518 = vmatprep.subr.bf16.mxu0 %v16438_v41  ;;  %v16469_v41 = vld [vmem:[#allocation6 + $0xac8] ss:$16 sps:$4 sm:$0xff]  }
 0x49b   : > { %9554 = vmatpush2.bf16.msra.mxu1 %v16421_v42 }
 0x49c   : > { %9555 = vmatprep.subr.bf16.mxu1 %v16429_v29  ;;  %9519 = vmatpush2.bf16.msra.mxu0 %v16436_v51  ;;  %v16477_v29 = vld [vmem:[#allocation6 + $0xaac] ss:$16 sps:$4 sm:$0xff]   ;;  %v16484_v51 = vld [vmem:[#allocation6 + $0x868] ss:$16 sps:$4 sm:$0xff]  }
 0x49d   : > { %9520 = vmatprep.subr.bf16.mxu0 %v16444_v38 }
 0x49f   : > { %9556 = vmatpush2.bf16.msra.mxu1 %v16427_v31  ;;  %v16492_v31 = vld [vmem:[#allocation6 + $0x84c] ss:$16 sps:$4 sm:$0xff]  }
 0x4a0   : > { %9557 = vmatprep.subr.bf16.mxu1 %v16435_v60  ;;  %9521 = vmatpush2.bf16.msra.mxu0 %v16442_v57  ;;  %v16475_v57 = vld [vmem:[#allocation6 + $0xaa8] ss:$16 sps:$4 sm:$0xff]  }
 0x4a1   : > { %9522 = vmatprep.subr.bf16.mxu0 %v16450_v6 }
 0x4a3   : > { %9558 = vmatpush2.bf16.msra.mxu1 %v16433_v3  ;;  %v16490_v3 = vld [vmem:[#allocation6 + $0x848] ss:$16 sps:$4 sm:$0xff]  }
 0x4a4   : > { %9559 = vmatprep.subr.bf16.mxu1 %v16441_v10  ;;  %9523 = vmatpush2.bf16.msra.mxu0 %v16448_v36  ;;  %v16481_v10 = vld [vmem:[#allocation6 + $0xa88] ss:$16 sps:$4 sm:$0xff]   ;;  %v16489_v36 = vld [vmem:[#allocation6 + $0xa6c] ss:$16 sps:$4 sm:$0xff]  }
 0x4a5   : > { %9524 = vmatprep.subr.bf16.mxu0 %v16456_v58  ;;  %v16496_v58 = vld [vmem:[#allocation6 + $0x828] ss:$16 sps:$4 sm:$0xff]  }
 0x4a7   : > { %9560 = vmatpush2.bf16.msra.mxu1 %v16439_v28  ;;  %v16504_v28 = vld [vmem:[#allocation6 + $0x80c] ss:$16 sps:$4 sm:$0xff]  }
 0x4a8   : > { %9561 = vmatprep.subr.bf16.mxu1 %v16447_v61  ;;  %9525 = vmatpush2.bf16.msra.mxu0 %v16454_v43  ;;  %v16487_v61 = vld [vmem:[#allocation6 + $0xa68] ss:$16 sps:$4 sm:$0xff]   ;;  %v16495_v43 = vld [vmem:[#allocation6 + $0xa4c] ss:$16 sps:$4 sm:$0xff]  }
 0x4a9   : > { %9576 = vmatprep.subr.bf16.mxu0 %v16462_v46  ;;  %v16502_v46 = vld [vmem:[#allocation6 + $0x808] ss:$16 sps:$4 sm:$0xff]  }
 0x4ab   : > { %9562 = vmatpush2.bf16.msra.mxu1 %v16445_v47  ;;  %v9282_v34 = vpop.f32.mrf.mxu0  ;;  %9527 = vmatmul.mubr.bf16.vlgmr.msra.gmra.mxu0 %v19069_v54  ;;  %v16472_v54 = vld [vmem:[#allocation6 + $0x8a8] ss:$16 sps:$4 sm:$0xff]   ;;  %v16510_v47 = vld [vmem:[#allocation6 + $0x9ec] ss:$16 sps:$4 sm:$0xff]  }
 0x4ac   : > { %9563 = vmatprep.subr.bf16.mxu1 %v16453_v8  ;;  %v9283_v62 = vadd.f32 %v9282_v34, %v19186_v2  ;;  %9577 = vmatpush1.bf16.msra.mxu0 %v16460_v14  ;;  %v16463_v2 = vld [vmem:[#allocation6 + $0xae8] ss:$16 sps:$4 sm:$0xff]   ;;  %v16501_v14 = vld [vmem:[#allocation6 + $0xa2c] ss:$16 sps:$4 sm:$0xff]  }
 0x4ad   : > { %9608 = vmatprep.mubr.bf16.mxu0 %v19075_v30  ;;  %v9284_v37 = vpop.f32.mrf.mxu0  ;;  %9578 = vmatprep.subr.bf16.mxu0 %v16468_v45  ;;  %v16478_v30 = vld [vmem:[#allocation6 + $0x888] ss:$16 sps:$4 sm:$0xff]  }
 0x4ae   : > { %v9285_v27 = vadd.f32 %v9284_v37, %v19189_v44  ;;  %v16493_v8 = vld [vmem:[#allocation6 + $0xa48] ss:$16 sps:$4 sm:$0xff]  }
 0x4af   : > { %9564 = vmatpush2.bf16.msra.mxu1 %v16451_v9  ;;  %v9286_v20 = vpop.f32.mrf.mxu0  ;;  %v16508_v45 = vld [vmem:[#allocation6 + $0x9e8] ss:$16 sps:$4 sm:$0xff]   ;;  %v16516_v9 = vld [vmem:[#allocation6 + $0x9cc] ss:$16 sps:$4 sm:$0xff]  }
 0x4b0   : > { %9565 = vmatprep.subr.bf16.mxu1 %v16459_v12  ;;  %9579 = vmatpush1.bf16.msra.mxu0 %v16466_v49  ;;  %v16499_v34 = vld [vmem:[#allocation6 + $0xa28] ss:$16 sps:$4 sm:$0xff]   ;;  %v16507_v12 = vld [vmem:[#allocation6 + $0xa0c] ss:$16 sps:$4 sm:$0xff]  }
 0x4b1   : > { %v9287_v0 = vpop.f32.mrf.mxu0  ;;  %9580 = vmatprep.subr.bf16.mxu0 %v16474_v56  ;;  %v16522_v49 = vld [vmem:[#allocation6 + $0x9ac] ss:$16 sps:$4 sm:$0xff]   ;;  %v16505_v37 = vld [vmem:[#allocation6 + $0xa08] ss:$16 sps:$4 sm:$0xff]  }
 0x4b2   : > { %v16513_v56 = vld [vmem:[#allocation6 + $0xbec] ss:$16 sps:$4 sm:$0xff]   ;;  %v16511_v20 = vld [vmem:[#allocation6 + $0xbe8] ss:$16 sps:$4 sm:$0xff]  }
 0x4b3   : > { %9566 = vmatpush2.bf16.msra.mxu1 %v16457_v7  ;;  %v16528_v7 = vld [vmem:[#allocation6 + $0x98c] ss:$16 sps:$4 sm:$0xff]  }
 0x4b4   : > { %9617 = vmatprep.subr.bf16.mxu1 %v16465_v59  ;;  %9581 = vmatpush1.bf16.msra.mxu0 %v16472_v54  ;;  %v16519_v59 = vld [vmem:[#allocation6 + $0xbcc] ss:$16 sps:$4 sm:$0xff]   ;;  %v16526_v54 = vld [vmem:[#allocation6 + $0x988] ss:$16 sps:$4 sm:$0xff]  }
 0x4b5   : > { %9582 = vmatprep.subr.bf16.mxu0 %v16480_v52  ;;  %v16534_v0 = vld [vmem:[#allocation6 + $0x96c] ss:$16 sps:$4 sm:$0xff]   ;;  %v16517_v52 = vld [vmem:[#allocation6 + $0xbc8] ss:$16 sps:$4 sm:$0xff]  }
 0x4b6   : > { %v9323_v4 = vpop.f32.mrf.mxu1  ;;  %9568 = vmatmul.mubr.bf16.vlgmr.msra.gmra.mxu1 %v19083_v48  ;;  %v16483_v48 = vld [vmem:[#allocation6 + $0xa8c] ss:$16 sps:$4 sm:$0xff]  }
 0x4b7   : > { %v19196_v44 = vadd.f32 %v9323_v4, %v9283_v62  ;;  %9618 = vmatpush1.bf16.msra.mxu1 %v16463_v2  ;;  %9649 = vmatprep.mubr.bf16.mxu1 %v19087_v25  ;;  %v16498_v25 = vld [vmem:[#allocation6 + $0x82c] ss:$16 sps:$4 sm:$0xff]   ;;  %v16514_v62 = vld [vmem:[#allocation6 + $0x9c8] ss:$16 sps:$4 sm:$0xff]  }
 0x4b8   : > { %v9325_v42 = vpop.f32.mrf.mxu1  ;;  %9619 = vmatprep.subr.bf16.mxu1 %v16471_v35  ;;  %9583 = vmatpush1.bf16.msra.mxu0 %v16478_v30  ;;  %v16525_v2 = vld [vmem:[#allocation6 + $0xbac] ss:$16 sps:$4 sm:$0xff]   ;;  %v16532_v35 = vld [vmem:[#allocation6 + $0x968] ss:$16 sps:$4 sm:$0xff]  }
 0x4b9   : > { %v19199_v38 = vadd.f32 %v9325_v42, %v9285_v27  ;;  %9584 = vmatprep.subr.bf16.mxu0 %v16486_v39  ;;  %v16520_v27 = vld [vmem:[#allocation6 + $0x9a8] ss:$16 sps:$4 sm:$0xff]   ;;  %v16540_v30 = vld [vmem:[#allocation6 + $0x94c] ss:$16 sps:$4 sm:$0xff]  }
 0x4ba   : > { %v9327_v60 = vpop.f32.mrf.mxu1  ;;  %v16523_v39 = vld [vmem:[#allocation6 + $0xba8] ss:$16 sps:$4 sm:$0xff]   ;;  %v16531_v4 = vld [vmem:[#allocation6 + $0xb8c] ss:$16 sps:$4 sm:$0xff]  }
 0x4bb   : > { %9620 = vmatpush1.bf16.msra.mxu1 %v16469_v41  ;;  %v16538_v41 = vld [vmem:[#allocation6 + $0x948] ss:$16 sps:$4 sm:$0xff]   ;;  %v16546_v42 = vld [vmem:[#allocation6 + $0x92c] ss:$16 sps:$4 sm:$0xff]  }
 0x4bc   : > { %v9328_v6 = vpop.f32.mrf.mxu1  ;;  %9621 = vmatprep.subr.bf16.mxu1 %v16477_v29  ;;  %9585 = vmatpush1.bf16.msra.mxu0 %v16484_v51  ;;  %v16529_v29 = vld [vmem:[#allocation6 + $0xb88] ss:$16 sps:$4 sm:$0xff]   ;;  %v16537_v51 = vld [vmem:[#allocation6 + $0xb6c] ss:$16 sps:$4 sm:$0xff]  }
 0x4bd   : > { %9586 = vmatprep.subr.bf16.mxu0 %v16492_v31  ;;  %v16544_v31 = vld [vmem:[#allocation6 + $0x928] ss:$16 sps:$4 sm:$0xff]   ;;  %v16552_v60 = vld [vmem:[#allocation6 + $0x90c] ss:$16 sps:$4 sm:$0xff]  }
 0x4be   : > { %v16543_v6 = vld [vmem:[#allocation6 + $0xb4c] ss:$16 sps:$4 sm:$0xff]  }
 0x4bf   : > { %9622 = vmatpush1.bf16.msra.mxu1 %v16475_v57  ;;  %v16535_v57 = vld [vmem:[#allocation6 + $0xb68] ss:$16 sps:$4 sm:$0xff]  }
 0x4c0   : > { %9623 = vmatprep.subr.bf16.mxu1 %v16483_v48  ;;  %9587 = vmatpush1.bf16.msra.mxu0 %v16490_v3  ;;  %v16550_v48 = vld [vmem:[#allocation6 + $0x908] ss:$16 sps:$4 sm:$0xff]   ;;  %v16558_v3 = vld [vmem:[#allocation6 + $0xcec] ss:$16 sps:$4 sm:$0xff]  }
 0x4c1   : > { %9588 = vmatprep.subr.bf16.mxu0 %v16498_v25  ;;  %v16541_v25 = vld [vmem:[#allocation6 + $0xb48] ss:$16 sps:$4 sm:$0xff]  }
 0x4c3   : > { %9624 = vmatpush1.bf16.msra.mxu1 %v16481_v10  ;;  %v16549_v10 = vld [vmem:[#allocation6 + $0xb2c] ss:$16 sps:$4 sm:$0xff]  }
 0x4c4   : > { %9625 = vmatprep.subr.bf16.mxu1 %v16489_v36  ;;  %9589 = vmatpush1.bf16.msra.mxu0 %v16496_v58  ;;  %v16556_v36 = vld [vmem:[#allocation6 + $0xce8] ss:$16 sps:$4 sm:$0xff]   ;;  %v16564_v58 = vld [vmem:[#allocation6 + $0xccc] ss:$16 sps:$4 sm:$0xff]  }
 0x4c5   : > { %9590 = vmatprep.subr.bf16.mxu0 %v16504_v28  ;;  %v16547_v28 = vld [vmem:[#allocation6 + $0xb28] ss:$16 sps:$4 sm:$0xff]  }
 0x4c7   : > { %9626 = vmatpush1.bf16.msra.mxu1 %v16487_v61 }
 0x4c8   : > { %9627 = vmatprep.subr.bf16.mxu1 %v16495_v43  ;;  %9591 = vmatpush1.bf16.msra.mxu0 %v16502_v46  ;;  %v16555_v43 = vld [vmem:[#allocation6 + $0xb0c] ss:$16 sps:$4 sm:$0xff]  }
 0x4c9   : > { %9592 = vmatprep.subr.bf16.mxu0 %v16510_v47  ;;  %v16562_v47 = vld [vmem:[#allocation6 + $0xcc8] ss:$16 sps:$4 sm:$0xff]  }
 0x4cb   : > { %9628 = vmatpush1.bf16.msra.mxu1 %v16493_v8 }
 0x4cc   : > { %9629 = vmatprep.subr.bf16.mxu1 %v16501_v14  ;;  %9593 = vmatpush2.bf16.msra.mxu0 %v16508_v45  ;;  %v16570_v14 = vld [vmem:[#allocation6 + $0xcac] ss:$16 sps:$4 sm:$0xff]  }
 0x4cd   : > { %9594 = vmatprep.subr.bf16.mxu0 %v16516_v9  ;;  %v16553_v9 = vld [vmem:[#allocation6 + $0xb08] ss:$16 sps:$4 sm:$0xff]  }
 0x4cf   : > { %9630 = vmatpush1.bf16.msra.mxu1 %v16499_v34 }
 0x4d0   : > { %9631 = vmatprep.subr.bf16.mxu1 %v16507_v12  ;;  %9595 = vmatpush2.bf16.msra.mxu0 %v16514_v62  ;;  %v16561_v12 = vld [vmem:[#allocation6 + $0xeec] ss:$16 sps:$4 sm:$0xff]  }
 0x4d1   : > { %9596 = vmatprep.subr.bf16.mxu0 %v16522_v49  ;;  %v16576_v49 = vld [vmem:[#allocation6 + $0xc8c] ss:$16 sps:$4 sm:$0xff]  }
 0x4d3   : > { %9632 = vmatpush1.bf16.msra.mxu1 %v16505_v37  ;;  %v16567_v37 = vld [vmem:[#allocation6 + $0xecc] ss:$16 sps:$4 sm:$0xff]  }
 0x4d4   : > { %9633 = vmatprep.subr.bf16.mxu1 %v16513_v56  ;;  %9597 = vmatpush2.bf16.msra.mxu0 %v16520_v27  ;;  %v16582_v56 = vld [vmem:[#allocation6 + $0xc6c] ss:$16 sps:$4 sm:$0xff]  }
 0x4d5   : > { %9598 = vmatprep.subr.bf16.mxu0 %v16528_v7  ;;  %v16565_v7 = vld [vmem:[#allocation6 + $0xec8] ss:$16 sps:$4 sm:$0xff]  }
 0x4d7   : > { %9634 = vmatpush2.bf16.msra.mxu1 %v16511_v20 }
 0x4d8   : > { %9635 = vmatprep.subr.bf16.mxu1 %v16519_v59  ;;  %9599 = vmatpush2.bf16.msra.mxu0 %v16526_v54  ;;  %v16573_v59 = vld [vmem:[#allocation6 + $0xeac] ss:$16 sps:$4 sm:$0xff]   ;;  %v16580_v54 = vld [vmem:[#allocation6 + $0xc68] ss:$16 sps:$4 sm:$0xff]  }
 0x4d9   : > { %9600 = vmatprep.subr.bf16.mxu0 %v16534_v0 }
 0x4db   : > { %9636 = vmatpush2.bf16.msra.mxu1 %v16517_v52  ;;  %v16588_v52 = vld [vmem:[#allocation6 + $0xc4c] ss:$16 sps:$4 sm:$0xff]  }
 0x4dc   : > { %9637 = vmatprep.subr.bf16.mxu1 %v16525_v2  ;;  %9601 = vmatpush2.bf16.msra.mxu0 %v16532_v35 }
 0x4dd   : > { %9602 = vmatprep.subr.bf16.mxu0 %v16540_v30 }
 0x4df   : > { %9638 = vmatpush2.bf16.msra.mxu1 %v16523_v39  ;;  %v16571_v39 = vld [vmem:[#allocation6 + $0xea8] ss:$16 sps:$4 sm:$0xff]  }
 0x4e0   : > { %9639 = vmatprep.subr.bf16.mxu1 %v16531_v4  ;;  %9603 = vmatpush2.bf16.msra.mxu0 %v16538_v41  ;;  %v16586_v41 = vld [vmem:[#allocation6 + $0xc48] ss:$16 sps:$4 sm:$0xff]  }
 0x4e1   : > { %9604 = vmatprep.subr.bf16.mxu0 %v16546_v42  ;;  %v16594_v42 = vld [vmem:[#allocation6 + $0xc2c] ss:$16 sps:$4 sm:$0xff]  }
 0x4e3   : > { %9640 = vmatpush2.bf16.msra.mxu1 %v16529_v29  ;;  %v16577_v29 = vld [vmem:[#allocation6 + $0xe88] ss:$16 sps:$4 sm:$0xff]  }
 0x4e4   : > { %9641 = vmatprep.subr.bf16.mxu1 %v16537_v51  ;;  %9605 = vmatpush2.bf16.msra.mxu0 %v16544_v31  ;;  %v16585_v51 = vld [vmem:[#allocation6 + $0xe6c] ss:$16 sps:$4 sm:$0xff]   ;;  %v16592_v31 = vld [vmem:[#allocation6 + $0xc28] ss:$16 sps:$4 sm:$0xff]  }
 0x4e5   : > { %9606 = vmatprep.subr.bf16.mxu0 %v16552_v60  ;;  %v16600_v60 = vld [vmem:[#allocation6 + $0xc0c] ss:$16 sps:$4 sm:$0xff]  }
 0x4e7   : > { %9642 = vmatpush2.bf16.msra.mxu1 %v16535_v57  ;;  %v16583_v57 = vld [vmem:[#allocation6 + $0xe68] ss:$16 sps:$4 sm:$0xff]  }
 0x4e8   : > { %9643 = vmatprep.subr.bf16.mxu1 %v16543_v6  ;;  %9607 = vmatpush2.bf16.msra.mxu0 %v16550_v48  ;;  %v16591_v6 = vld [vmem:[#allocation6 + $0xe4c] ss:$16 sps:$4 sm:$0xff]   ;;  %v16598_v48 = vld [vmem:[#allocation6 + $0xc08] ss:$16 sps:$4 sm:$0xff]  }
 0x4e9   : > { %9658 = vmatprep.subr.bf16.mxu0 %v16558_v3  ;;  %v16606_v3 = vld [vmem:[#allocation6 + $0xdec] ss:$16 sps:$4 sm:$0xff]  }
 0x4eb   : > { %9644 = vmatpush2.bf16.msra.mxu1 %v16541_v25  ;;  %v9364_v61 = vpop.f32.mrf.mxu0  ;;  %9609 = vmatmul.mubr.bf16.vlgmr.msra.gmra.mxu0 %v19093_v26  ;;  %v16568_v26 = vld [vmem:[#allocation6 + $0xca8] ss:$16 sps:$4 sm:$0xff]  }
 0x4ec   : > { %9645 = vmatprep.subr.bf16.mxu1 %v16549_v10  ;;  %v9365_v46 = vadd.f32 %v9364_v61, %v19196_v44  ;;  %9659 = vmatpush1.bf16.msra.mxu0 %v16556_v36  ;;  %v16559_v44 = vld [vmem:[#allocation6 + $0xee8] ss:$16 sps:$4 sm:$0xff]   ;;  %v16597_v10 = vld [vmem:[#allocation6 + $0xe2c] ss:$16 sps:$4 sm:$0xff]  }
 0x4ed   : > { %9690 = vmatprep.mubr.bf16.mxu0 %v19098_v23  ;;  %v9366_v8 = vpop.f32.mrf.mxu0  ;;  %9660 = vmatprep.subr.bf16.mxu0 %v16564_v58  ;;  %v16574_v23 = vld [vmem:[#allocation6 + $0xc88] ss:$16 sps:$4 sm:$0xff]   ;;  %v16612_v58 = vld [vmem:[#allocation6 + $0xdcc] ss:$16 sps:$4 sm:$0xff]  }
 0x4ee   : > { %v9367_v45 = vadd.f32 %v9366_v8, %v19199_v38  ;;  %v16589_v25 = vld [vmem:[#allocation6 + $0xe48] ss:$16 sps:$4 sm:$0xff]   ;;  %v16603_v61 = vld [vmem:[#allocation6 + $0xe0c] ss:$16 sps:$4 sm:$0xff]  }
 0x4ef   : > { %9646 = vmatpush2.bf16.msra.mxu1 %v16547_v28  ;;  %v9368_v34 = vpop.f32.mrf.mxu0  ;;  %v16604_v36 = vld [vmem:[#allocation6 + $0xde8] ss:$16 sps:$4 sm:$0xff]   ;;  %v16609_v8 = vld [vmem:[#allocation6 + $0xfec] ss:$16 sps:$4 sm:$0xff]  }
 0x4f0   : > { %9647 = vmatprep.subr.bf16.mxu1 %v16555_v43  ;;  %9661 = vmatpush1.bf16.msra.mxu0 %v16562_v47  ;;  %v16595_v28 = vld [vmem:[#allocation6 + $0xe28] ss:$16 sps:$4 sm:$0xff]   ;;  %v16615_v34 = vld [vmem:[#allocation6 + $0xfcc] ss:$16 sps:$4 sm:$0xff]  }
 0x4f1   : > { %v9369_v62 = vpop.f32.mrf.mxu0  ;;  %9662 = vmatprep.subr.bf16.mxu0 %v16570_v14  ;;  %v16610_v43 = vld [vmem:[#allocation6 + $0xdc8] ss:$16 sps:$4 sm:$0xff]  }
 0x4f2   : > { %v16601_v47 = vld [vmem:[#allocation6 + $0xe08] ss:$16 sps:$4 sm:$0xff]  }
 0x4f3   : > { %9648 = vmatpush2.bf16.msra.mxu1 %v16553_v9  ;;  %v16616_v14 = vld [vmem:[#allocation6 + $0xda8] ss:$16 sps:$4 sm:$0xff]  }
 0x4f4   : > { %9699 = vmatprep.subr.bf16.mxu1 %v16561_v12  ;;  %9663 = vmatpush1.bf16.msra.mxu0 %v16568_v26  ;;  %v16607_v9 = vld [vmem:[#allocation6 + $0xfe8] ss:$16 sps:$4 sm:$0xff]   ;;  %v16630_v26 = vld [vmem:[#allocation6 + $0xd6c] ss:$16 sps:$4 sm:$0xff]  }
 0x4f5   : > { %9664 = vmatprep.subr.bf16.mxu0 %v16576_v49  ;;  %v16622_v12 = vld [vmem:[#allocation6 + $0xd88] ss:$16 sps:$4 sm:$0xff]   ;;  %v16621_v49 = vld [vmem:[#allocation6 + $0xfac] ss:$16 sps:$4 sm:$0xff]  }
 0x4f6   : > { %v9405_v27 = vpop.f32.mrf.mxu1  ;;  %9650 = vmatmul.mubr.bf16.vlgmr.msra.gmra.mxu1 %v19103_v50  ;;  %v16579_v50 = vld [vmem:[#allocation6 + $0xe8c] ss:$16 sps:$4 sm:$0xff]   ;;  %v16613_v62 = vld [vmem:[#allocation6 + $0xfc8] ss:$16 sps:$4 sm:$0xff]  }
 0x4f7   : > { %v9406_v38 = vadd.f32 %v9405_v27, %v9365_v46  ;;  %9700 = vmatpush1.bf16.msra.mxu1 %v16559_v44  ;;  %9731 = vmatprep.mubr.bf16.mxu1 %v19107_v40  ;;  %v16618_v46 = vld [vmem:[#allocation6 + $0xdac] ss:$16 sps:$4 sm:$0xff]   ;;  %v16628_v44 = vld [vmem:[#allocation6 + $0xd68] ss:$16 sps:$4 sm:$0xff]  }
 0x4f8   : > { %v9407_v20 = vpop.f32.mrf.mxu1  ;;  %9701 = vmatprep.subr.bf16.mxu1 %v16567_v37  ;;  %9665 = vmatpush1.bf16.msra.mxu0 %v16574_v23  ;;  %v16636_v37 = vld [vmem:[#allocation6 + $0xd4c] ss:$16 sps:$4 sm:$0xff]   ;;  %v16619_v23 = vld [vmem:[#allocation6 + $0xfa8] ss:$16 sps:$4 sm:$0xff]  }
 0x4f9   : > { %v9408_v0 = vadd.f32 %v9407_v20, %v9367_v45  ;;  %9666 = vmatprep.subr.bf16.mxu0 %v16582_v56  ;;  %v9904_v35 = vmax.f32 %v9406_v38, 0.0  ;;  %v16624_v45 = vld [vmem:[#allocation6 + $0xd8c] ss:$16 sps:$4 sm:$0xff]   ;;  %v16634_v27 = vld [vmem:[#allocation6 + $0xd48] ss:$16 sps:$4 sm:$0xff]  }
 0x4fa   : > { %v9409_v2 = vpop.f32.mrf.mxu1  ;;  %v16627_v56 = vld [vmem:[#allocation6 + $0xf8c] ss:$16 sps:$4 sm:$0xff]  }
 0x4fb   : > { %v9905_v30 = vmax.f32 %v9408_v0, 0.0  ;;  %9702 = vmatpush1.bf16.msra.mxu1 %v16565_v7  ;;  %v16642_v38 = vld [vmem:[#allocation6 + $0xd2c] ss:$16 sps:$4 sm:$0xff]   ;;  %v16625_v7 = vld [vmem:[#allocation6 + $0xf88] ss:$16 sps:$4 sm:$0xff]  }
 0x4fc   : > { %v9410_v4 = vpop.f32.mrf.mxu1  ;;  %9703 = vmatprep.subr.bf16.mxu1 %v16573_v59  ;;  %9667 = vmatpush1.bf16.msra.mxu0 %v16580_v54  ;;  %v16633_v20 = vld [vmem:[#allocation6 + $0xf6c] ss:$16 sps:$4 sm:$0xff]   ;;  %v16640_v59 = vld [vmem:[#allocation6 + $0xd28] ss:$16 sps:$4 sm:$0xff]  }
 0x4fd   : > { %v19207_v40 = vpack.c.bf16 %v9905_v30, %v9904_v35  ;;  %9668 = vmatprep.subr.bf16.mxu0 %v16588_v52  ;;  %v16648_v54 = vld [vmem:[#allocation6 + $0xd0c] ss:$16 sps:$4 sm:$0xff]   ;;  %v16631_v0 = vld [vmem:[#allocation6 + $0xf68] ss:$16 sps:$4 sm:$0xff]  }
 0x4fe   : > { %v16639_v52 = vld [vmem:[#allocation6 + $0xf4c] ss:$16 sps:$4 sm:$0xff]   ;;  %v16646_v2 = vld [vmem:[#allocation6 + $0xd08] ss:$16 sps:$4 sm:$0xff]  }
 0x4ff   : > { %9704 = vmatpush1.bf16.msra.mxu1 %v16571_v39  ;;  %v16654_v35 = vld [vmem:[#allocation6 + $0x10ec] ss:$16 sps:$4 sm:$0xff]   ;;  %v16637_v30 = vld [vmem:[#allocation6 + $0xf48] ss:$16 sps:$4 sm:$0xff]  }
 0x500   : > { %9705 = vmatprep.subr.bf16.mxu1 %v16579_v50  ;;  %9669 = vmatpush1.bf16.msra.mxu0 %v16586_v41  ;;  %v16645_v39 = vld [vmem:[#allocation6 + $0xf2c] ss:$16 sps:$4 sm:$0xff]   ;;  %v16652_v4 = vld [vmem:[#allocation6 + $0x10e8] ss:$16 sps:$4 sm:$0xff]  }
 0x501   : > { %9670 = vmatprep.subr.bf16.mxu0 %v16594_v42  ;;  %v16660_v50 = vld [vmem:[#allocation6 + $0x10cc] ss:$16 sps:$4 sm:$0xff]   ;;  %v16643_v41 = vld [vmem:[#allocation6 + $0xf28] ss:$16 sps:$4 sm:$0xff]  }
 0x503   : > { %9706 = vmatpush1.bf16.msra.mxu1 %v16577_v29  ;;  %v16651_v29 = vld [vmem:[#allocation6 + $0xf0c] ss:$16 sps:$4 sm:$0xff]  }
 0x504   : > { %9707 = vmatprep.subr.bf16.mxu1 %v16585_v51  ;;  %9671 = vmatpush1.bf16.msra.mxu0 %v16592_v31  ;;  %v16658_v51 = vld [vmem:[#allocation6 + $0x10c8] ss:$16 sps:$4 sm:$0xff]  }
 0x505   : > { %9672 = vmatprep.subr.bf16.mxu0 %v16600_v60  ;;  %v16666_v60 = vld [vmem:[#allocation6 + $0x10ac] ss:$16 sps:$4 sm:$0xff]  }
 0x507   : > { %9708 = vmatpush1.bf16.msra.mxu1 %v16583_v57  ;;  %v16649_v57 = vld [vmem:[#allocation6 + $0xf08] ss:$16 sps:$4 sm:$0xff]  }
 0x508   : > { %9709 = vmatprep.subr.bf16.mxu1 %v16591_v6  ;;  %9673 = vmatpush1.bf16.msra.mxu0 %v16598_v48  ;;  %v17614_v6 = vld [vmem:[#allocation7] sm:$0xf] }
 0x509   : > { %9674 = vmatprep.subr.bf16.mxu0 %v16606_v3  ;;  %v5071_v48 = vrot.slane %v17614_v6, %v18519_v13 }
 0x50b   : > { %9710 = vmatpush1.bf16.msra.mxu1 %v16589_v25  ;;  %v16657_v25 = vld [vmem:[#allocation6 + $0x12ec] ss:$16 sps:$4 sm:$0xff]  }
 0x50c   : > { %9711 = vmatprep.subr.bf16.mxu1 %v16597_v10  ;;  %9675 = vmatpush2.bf16.msra.mxu0 %v16604_v36  ;;  %v16664_v10 = vld [vmem:[#allocation6 + $0x10a8] ss:$16 sps:$4 sm:$0xff]  }
 0x50d   : > { %9676 = vmatprep.subr.bf16.mxu0 %v16612_v58  ;;  %v16672_v58 = vld [vmem:[#allocation6 + $0x108c] ss:$16 sps:$4 sm:$0xff]  }
 0x50f   : > { %9712 = vmatpush1.bf16.msra.mxu1 %v16595_v28  ;;  %v16655_v28 = vld [vmem:[#allocation6 + $0x12e8] ss:$16 sps:$4 sm:$0xff]  }
 0x510   : > { %9713 = vmatprep.subr.bf16.mxu1 %v16603_v61  ;;  %9677 = vmatpush2.bf16.msra.mxu0 %v16610_v43  ;;  %v16663_v61 = vld [vmem:[#allocation6 + $0x12cc] ss:$16 sps:$4 sm:$0xff]   ;;  %v16670_v43 = vld [vmem:[#allocation6 + $0x1088] ss:$16 sps:$4 sm:$0xff]  }
 0x511   : > { %9678 = vmatprep.subr.bf16.mxu0 %v16618_v46 }
 0x513   : > { %9714 = vmatpush1.bf16.msra.mxu1 %v16601_v47  ;;  %v16678_v47 = vld [vmem:[#allocation6 + $0x106c] ss:$16 sps:$4 sm:$0xff]  }
 0x514   : > { %9715 = vmatprep.subr.bf16.mxu1 %v16609_v8  ;;  %9679 = vmatpush2.bf16.msra.mxu0 %v16616_v14 }
 0x515   : > { %9680 = vmatprep.subr.bf16.mxu0 %v16624_v45  ;;  %v16661_v45 = vld [vmem:[#allocation6 + $0x12c8] ss:$16 sps:$4 sm:$0xff]  }
 0x517   : > { %9716 = vmatpush2.bf16.msra.mxu1 %v16607_v9 }
 0x518   : > { %9717 = vmatprep.subr.bf16.mxu1 %v16615_v34  ;;  %9681 = vmatpush2.bf16.msra.mxu0 %v16622_v12  ;;  %v16669_v34 = vld [vmem:[#allocation6 + $0x12ac] ss:$16 sps:$4 sm:$0xff]   ;;  %v16676_v12 = vld [vmem:[#allocation6 + $0x1068] ss:$16 sps:$4 sm:$0xff]  }
 0x519   : > { %9682 = vmatprep.subr.bf16.mxu0 %v16630_v26 }
 0x51b   : > { %9718 = vmatpush2.bf16.msra.mxu1 %v16613_v62  ;;  %v16684_v62 = vld [vmem:[#allocation6 + $0x104c] ss:$16 sps:$4 sm:$0xff]  }
 0x51c   : > { %9719 = vmatprep.subr.bf16.mxu1 %v16621_v49  ;;  %9683 = vmatpush2.bf16.msra.mxu0 %v16628_v44  ;;  %v16667_v44 = vld [vmem:[#allocation6 + $0x12a8] ss:$16 sps:$4 sm:$0xff]  }
 0x51d   : > { %9684 = vmatprep.subr.bf16.mxu0 %v16636_v37 }
 0x51f   : > { %9720 = vmatpush2.bf16.msra.mxu1 %v16619_v23  ;;  %v16682_v23 = vld [vmem:[#allocation6 + $0x1048] ss:$16 sps:$4 sm:$0xff]  }
 0x520   : > { %9721 = vmatprep.subr.bf16.mxu1 %v16627_v56  ;;  %9685 = vmatpush2.bf16.msra.mxu0 %v16634_v27  ;;  %v16673_v56 = vld [vmem:[#allocation6 + $0x1288] ss:$16 sps:$4 sm:$0xff]   ;;  %v16681_v27 = vld [vmem:[#allocation6 + $0x126c] ss:$16 sps:$4 sm:$0xff]  }
 0x521   : > { %9686 = vmatprep.subr.bf16.mxu0 %v16642_v38  ;;  %v16688_v38 = vld [vmem:[#allocation6 + $0x1028] ss:$16 sps:$4 sm:$0xff]  }
 0x523   : > { %9722 = vmatpush2.bf16.msra.mxu1 %v16625_v7  ;;  %v16696_v7 = vld [vmem:[#allocation6 + $0x100c] ss:$16 sps:$4 sm:$0xff]  }
 0x524   : > { %9723 = vmatprep.subr.bf16.mxu1 %v16633_v20  ;;  %9687 = vmatpush2.bf16.msra.mxu0 %v16640_v59  ;;  %v16679_v20 = vld [vmem:[#allocation6 + $0x1268] ss:$16 sps:$4 sm:$0xff]   ;;  %v16687_v59 = vld [vmem:[#allocation6 + $0x124c] ss:$16 sps:$4 sm:$0xff]  }
 0x525   : > { %9688 = vmatprep.subr.bf16.mxu0 %v16648_v54  ;;  %v16694_v54 = vld [vmem:[#allocation6 + $0x1008] ss:$16 sps:$4 sm:$0xff]  }
 0x527   : > { %9724 = vmatpush2.bf16.msra.mxu1 %v16631_v0  ;;  %v16702_v0 = vld [vmem:[#allocation6 + $0x11ec] ss:$16 sps:$4 sm:$0xff]  }
 0x528   : > { %9725 = vmatprep.subr.bf16.mxu1 %v16639_v52  ;;  %9689 = vmatpush2.bf16.msra.mxu0 %v16646_v2  ;;  %v16685_v52 = vld [vmem:[#allocation6 + $0x1248] ss:$16 sps:$4 sm:$0xff]   ;;  %v16693_v2 = vld [vmem:[#allocation6 + $0x122c] ss:$16 sps:$4 sm:$0xff]  }
 0x529   : > { %9740 = vmatprep.subr.bf16.mxu0 %v16654_v35  ;;  %v16700_v35 = vld [vmem:[#allocation6 + $0x11e8] ss:$16 sps:$4 sm:$0xff]  }
 0x52b   : > { %9726 = vmatpush2.bf16.msra.mxu1 %v16637_v30  ;;  %v9446_v42 = vpop.f32.mrf.mxu0  ;;  %9691 = vmatmul.mubr.bf16.vlgmr.msra.gmra.mxu0 %v19113_v15  ;;  %v5075_v15 = vrot.slane %v17614_v6, %v18522_v17  ;;  %v16708_v30 = vld [vmem:[#allocation6 + $0x11cc] ss:$16 sps:$4 sm:$0xff]   ;;  %v16718_v6 = vld [vmem:[#allocation6 + $0x1188] ss:$16 sps:$4 sm:$0xff]  }
 0x52c   : > { %9727 = vmatprep.subr.bf16.mxu1 %v16645_v39  ;;  %9741 = vmatpush1.bf16.msra.mxu0 %v16652_v4  ;;  %v16691_v39 = vld [vmem:[#allocation6 + $0x1228] ss:$16 sps:$4 sm:$0xff]   ;;  %v16699_v4 = vld [vmem:[#allocation6 + $0x120c] ss:$16 sps:$4 sm:$0xff]  }
 0x52d   : > { %9772 = vmatprep.mubr.bf16.mxu0 %v19118_v33  ;;  %v9448_v31 = vpop.f32.mrf.mxu0  ;;  %9742 = vmatprep.subr.bf16.mxu0 %v16660_v50  ;;  %v9447_v33 = vadd.f32 %v9446_v42, %v5071_v48  ;;  %v16706_v50 = vld [vmem:[#allocation6 + $0x11c8] ss:$16 sps:$4 sm:$0xff]   ;;  %v16726_v48 = vld [vmem:[#allocation6 + $0x116c] ss:$16 sps:$4 sm:$0xff]  }
 0x52e   : > { %v9449_v46 = vadd.f32 %v9448_v31, %v5075_v15  ;;  %v16697_v42 = vld [vmem:[#allocation6 + $0x1208] ss:$16 sps:$4 sm:$0xff]   ;;  %v16720_v31 = vld [vmem:[#allocation6 + $0x118c] ss:$16 sps:$4 sm:$0xff]  }
 0x52f   : > { %9728 = vmatpush2.bf16.msra.mxu1 %v16643_v41  ;;  %v9450_v3 = vpop.f32.mrf.mxu0  ;;  %v16714_v41 = vld [vmem:[#allocation6 + $0x11ac] ss:$16 sps:$4 sm:$0xff]  }
 0x530   : > { %9729 = vmatprep.subr.bf16.mxu1 %v16651_v29  ;;  %9743 = vmatpush1.bf16.msra.mxu0 %v16658_v51  ;;  %v16705_v29 = vld [vmem:[#allocation6 + $0x13ec] ss:$16 sps:$4 sm:$0xff]   ;;  %v16712_v51 = vld [vmem:[#allocation6 + $0x11a8] ss:$16 sps:$4 sm:$0xff]  }
 0x531   : > { %v9451_v36 = vpop.f32.mrf.mxu0  ;;  %9744 = vmatprep.subr.bf16.mxu0 %v16666_v60  ;;  %v16703_v60 = vld [vmem:[#allocation6 + $0x13e8] ss:$16 sps:$4 sm:$0xff]   ;;  %v16732_v15 = vld [vmem:[#allocation6 + $0x114c] ss:$16 sps:$4 sm:$0xff]  }
 0x532   : > { %v16709_v3 = vld [vmem:[#allocation6 + $0x13c8] ss:$16 sps:$4 sm:$0xff]  }
 0x533   : > { %9730 = vmatpush2.bf16.msra.mxu1 %v16649_v57  ;;  %v16711_v57 = vld [vmem:[#allocation6 + $0x13cc] ss:$16 sps:$4 sm:$0xff]   ;;  %v16715_v36 = vld [vmem:[#allocation6 + $0x13a8] ss:$16 sps:$4 sm:$0xff]  }
 0x534   : > { %9781 = vmatprep.subr.bf16.mxu1 %v16657_v25  ;;  %9745 = vmatpush1.bf16.msra.mxu0 %v16664_v10  ;;  %v16717_v25 = vld [vmem:[#allocation6 + $0x13ac] ss:$16 sps:$4 sm:$0xff]   ;;  %v16724_v10 = vld [vmem:[#allocation6 + $0x1168] ss:$16 sps:$4 sm:$0xff]  }
 0x535   : > { %9746 = vmatprep.subr.bf16.mxu0 %v16672_v58  ;;  %v16723_v58 = vld [vmem:[#allocation6 + $0x138c] ss:$16 sps:$4 sm:$0xff]  }
 0x536   : > { %v9487_v8 = vpop.f32.mrf.mxu1  ;;  %9732 = vmatmul.mubr.bf16.vlgmr.msra.gmra.mxu1 %v19125_v1  ;;  %v16675_v1 = vld [vmem:[#allocation6 + $0x128c] ss:$16 sps:$4 sm:$0xff]  }
 0x537   : > { %v19214_v14 = vadd.f32 %v9487_v8, %v9447_v33  ;;  %9782 = vmatpush1.bf16.msra.mxu1 %v16655_v28  ;;  %9813 = vmatprep.mubr.bf16.mxu1 %v19129_v22  ;;  %v16690_v22 = vld [vmem:[#allocation6 + $0x102c] ss:$16 sps:$4 sm:$0xff]   ;;  %v16730_v33 = vld [vmem:[#allocation6 + $0x1148] ss:$16 sps:$4 sm:$0xff]  }
 0x538   : > { %v9489_v9 = vpop.f32.mrf.mxu1  ;;  %9783 = vmatprep.subr.bf16.mxu1 %v16663_v61  ;;  %9747 = vmatpush1.bf16.msra.mxu0 %v16670_v43  ;;  %v16738_v28 = vld [vmem:[#allocation6 + $0x112c] ss:$16 sps:$4 sm:$0xff]   ;;  %v16721_v61 = vld [vmem:[#allocation6 + $0x1388] ss:$16 sps:$4 sm:$0xff]  }
 0x539   : > { %v19217_v26 = vadd.f32 %v9489_v9, %v9449_v46  ;;  %9748 = vmatprep.subr.bf16.mxu0 %v16678_v47  ;;  %v16729_v43 = vld [vmem:[#allocation6 + $0x136c] ss:$16 sps:$4 sm:$0xff]   ;;  %v16736_v46 = vld [vmem:[#allocation6 + $0x1128] ss:$16 sps:$4 sm:$0xff]  }
 0x53a   : > { %v9491_v49 = vpop.f32.mrf.mxu1  ;;  %v16744_v47 = vld [vmem:[#allocation6 + $0x110c] ss:$16 sps:$4 sm:$0xff]   ;;  %v16727_v8 = vld [vmem:[#allocation6 + $0x1368] ss:$16 sps:$4 sm:$0xff]  }
 0x53b   : > { %9784 = vmatpush1.bf16.msra.mxu1 %v16661_v45  ;;  %v16735_v45 = vld [vmem:[#allocation6 + $0x134c] ss:$16 sps:$4 sm:$0xff]   ;;  %v16742_v9 = vld [vmem:[#allocation6 + $0x1108] ss:$16 sps:$4 sm:$0xff]  }
 0x53c   : > { %v9492_v37 = vpop.f32.mrf.mxu1  ;;  %9785 = vmatprep.subr.bf16.mxu1 %v16669_v34  ;;  %9749 = vmatpush1.bf16.msra.mxu0 %v16676_v12  ;;  %v16750_v34 = vld [vmem:[#allocation6 + $0x14ec] ss:$16 sps:$4 sm:$0xff]   ;;  %v16733_v12 = vld [vmem:[#allocation6 + $0x1348] ss:$16 sps:$4 sm:$0xff]  }
 0x53d   : > { %9750 = vmatprep.subr.bf16.mxu0 %v16684_v62  ;;  %v16741_v62 = vld [vmem:[#allocation6 + $0x132c] ss:$16 sps:$4 sm:$0xff]   ;;  %v16748_v49 = vld [vmem:[#allocation6 + $0x14e8] ss:$16 sps:$4 sm:$0xff]  }
 0x53e   : > { %v16739_v37 = vld [vmem:[#allocation6 + $0x1328] ss:$16 sps:$4 sm:$0xff]  }
 0x53f   : > { %9786 = vmatpush1.bf16.msra.mxu1 %v16667_v44  ;;  %v16756_v44 = vld [vmem:[#allocation6 + $0x14cc] ss:$16 sps:$4 sm:$0xff]  }
 0x540   : > { %9787 = vmatprep.subr.bf16.mxu1 %v16675_v1  ;;  %9751 = vmatpush1.bf16.msra.mxu0 %v16682_v23  ;;  %v16747_v23 = vld [vmem:[#allocation6 + $0x130c] ss:$16 sps:$4 sm:$0xff]  }
 0x541   : > { %9752 = vmatprep.subr.bf16.mxu0 %v16690_v22 }
 0x543   : > { %9788 = vmatpush1.bf16.msra.mxu1 %v16673_v56  ;;  %v16754_v56 = vld [vmem:[#allocation6 + $0x14c8] ss:$16 sps:$4 sm:$0xff]  }
 0x544   : > { %9789 = vmatprep.subr.bf16.mxu1 %v16681_v27  ;;  %9753 = vmatpush1.bf16.msra.mxu0 %v16688_v38  ;;  %v16762_v38 = vld [vmem:[#allocation6 + $0x14ac] ss:$16 sps:$4 sm:$0xff]  }
 0x545   : > { %9754 = vmatprep.subr.bf16.mxu0 %v16696_v7 }
 0x547   : > { %9790 = vmatpush1.bf16.msra.mxu1 %v16679_v20  ;;  %v16745_v20 = vld [vmem:[#allocation6 + $0x1308] ss:$16 sps:$4 sm:$0xff]  }
 0x548   : > { %9791 = vmatprep.subr.bf16.mxu1 %v16687_v59  ;;  %9755 = vmatpush1.bf16.msra.mxu0 %v16694_v54  ;;  %v16753_v54 = vld [vmem:[#allocation6 + $0x16ec] ss:$16 sps:$4 sm:$0xff]  }
 0x549   : > { %9756 = vmatprep.subr.bf16.mxu0 %v16702_v0 }
 0x54b   : > { %9792 = vmatpush1.bf16.msra.mxu1 %v16685_v52  ;;  %v16768_v52 = vld [vmem:[#allocation6 + $0x148c] ss:$16 sps:$4 sm:$0xff]  }
 0x54c   : > { %9793 = vmatprep.subr.bf16.mxu1 %v16693_v2  ;;  %9757 = vmatpush2.bf16.msra.mxu0 %v16700_v35  ;;  %v16759_v2 = vld [vmem:[#allocation6 + $0x16cc] ss:$16 sps:$4 sm:$0xff]  }
 0x54d   : > { %9758 = vmatprep.subr.bf16.mxu0 %v16708_v30  ;;  %v16774_v35 = vld [vmem:[#allocation6 + $0x146c] ss:$16 sps:$4 sm:$0xff]  }
 0x54f   : > { %9794 = vmatpush1.bf16.msra.mxu1 %v16691_v39  ;;  %v16757_v39 = vld [vmem:[#allocation6 + $0x16c8] ss:$16 sps:$4 sm:$0xff]  }
 0x550   : > { %9795 = vmatprep.subr.bf16.mxu1 %v16699_v4  ;;  %9759 = vmatpush2.bf16.msra.mxu0 %v16706_v50  ;;  %v16765_v50 = vld [vmem:[#allocation6 + $0x16ac] ss:$16 sps:$4 sm:$0xff]  }
 0x551   : > { %9760 = vmatprep.subr.bf16.mxu0 %v16714_v41  ;;  %v16772_v41 = vld [vmem:[#allocation6 + $0x1468] ss:$16 sps:$4 sm:$0xff]  }
 0x553   : > { %9796 = vmatpush1.bf16.msra.mxu1 %v16697_v42 }
 0x554   : > { %9797 = vmatprep.subr.bf16.mxu1 %v16705_v29  ;;  %9761 = vmatpush2.bf16.msra.mxu0 %v16712_v51  ;;  %v16780_v29 = vld [vmem:[#allocation6 + $0x144c] ss:$16 sps:$4 sm:$0xff]  }
 0x555   : > { %9762 = vmatprep.subr.bf16.mxu0 %v16720_v31  ;;  %v16763_v31 = vld [vmem:[#allocation6 + $0x16a8] ss:$16 sps:$4 sm:$0xff]  }
 0x557   : > { %9798 = vmatpush2.bf16.msra.mxu1 %v16703_v60 }
 0x558   : > { %9799 = vmatprep.subr.bf16.mxu1 %v16711_v57  ;;  %9763 = vmatpush2.bf16.msra.mxu0 %v16718_v6  ;;  %v16778_v57 = vld [vmem:[#allocation6 + $0x1448] ss:$16 sps:$4 sm:$0xff]  }
 0x559   : > { %9764 = vmatprep.subr.bf16.mxu0 %v16726_v48  ;;  %v16769_v6 = vld [vmem:[#allocation6 + $0x1688] ss:$16 sps:$4 sm:$0xff]   ;;  %v16777_v48 = vld [vmem:[#allocation6 + $0x166c] ss:$16 sps:$4 sm:$0xff]  }
 0x55b   : > { %9800 = vmatpush2.bf16.msra.mxu1 %v16709_v3  ;;  %v16784_v3 = vld [vmem:[#allocation6 + $0x1428] ss:$16 sps:$4 sm:$0xff]  }
 0x55c   : > { %9801 = vmatprep.subr.bf16.mxu1 %v16717_v25  ;;  %9765 = vmatpush2.bf16.msra.mxu0 %v16724_v10  ;;  %v16792_v25 = vld [vmem:[#allocation6 + $0x140c] ss:$16 sps:$4 sm:$0xff]   ;;  %v16775_v10 = vld [vmem:[#allocation6 + $0x1668] ss:$16 sps:$4 sm:$0xff]  }
 0x55d   : > { %9766 = vmatprep.subr.bf16.mxu0 %v16732_v15  ;;  %v16783_v15 = vld [vmem:[#allocation6 + $0x164c] ss:$16 sps:$4 sm:$0xff]  }
 0x55f   : > { %9802 = vmatpush2.bf16.msra.mxu1 %v16715_v36  ;;  %v16790_v36 = vld [vmem:[#allocation6 + $0x1408] ss:$16 sps:$4 sm:$0xff]  }
 0x560   : > { %9803 = vmatprep.subr.bf16.mxu1 %v16723_v58  ;;  %9767 = vmatpush2.bf16.msra.mxu0 %v16730_v33  ;;  %v16798_v58 = vld [vmem:[#allocation6 + $0x15ec] ss:$16 sps:$4 sm:$0xff]   ;;  %v16781_v33 = vld [vmem:[#allocation6 + $0x1648] ss:$16 sps:$4 sm:$0xff]  }
 0x561   : > { %9768 = vmatprep.subr.bf16.mxu0 %v16738_v28  ;;  %v16789_v28 = vld [vmem:[#allocation6 + $0x162c] ss:$16 sps:$4 sm:$0xff]  }
 0x563   : > { %9804 = vmatpush2.bf16.msra.mxu1 %v16721_v61  ;;  %v16796_v61 = vld [vmem:[#allocation6 + $0x15e8] ss:$16 sps:$4 sm:$0xff]  }
 0x564   : > { %9805 = vmatprep.subr.bf16.mxu1 %v16729_v43  ;;  %9769 = vmatpush2.bf16.msra.mxu0 %v16736_v46  ;;  %v16804_v43 = vld [vmem:[#allocation6 + $0x15cc] ss:$16 sps:$4 sm:$0xff]   ;;  %v16787_v46 = vld [vmem:[#allocation6 + $0x1628] ss:$16 sps:$4 sm:$0xff]  }
 0x565   : > { %9770 = vmatprep.subr.bf16.mxu0 %v16744_v47  ;;  %v16795_v47 = vld [vmem:[#allocation6 + $0x160c] ss:$16 sps:$4 sm:$0xff]  }
 0x567   : > { %9806 = vmatpush2.bf16.msra.mxu1 %v16727_v8  ;;  %v16802_v8 = vld [vmem:[#allocation6 + $0x15c8] ss:$16 sps:$4 sm:$0xff]  }
 0x568   : > { %9807 = vmatprep.subr.bf16.mxu1 %v16735_v45  ;;  %9771 = vmatpush2.bf16.msra.mxu0 %v16742_v9  ;;  %v16810_v45 = vld [vmem:[#allocation6 + $0x15ac] ss:$16 sps:$4 sm:$0xff]   ;;  %v16793_v9 = vld [vmem:[#allocation6 + $0x1608] ss:$16 sps:$4 sm:$0xff]  }
 0x569   : > { %9822 = vmatprep.subr.bf16.mxu0 %v16750_v34  ;;  %v16801_v34 = vld [vmem:[#allocation6 + $0x17ec] ss:$16 sps:$4 sm:$0xff]  }
 0x56b   : > { %9808 = vmatpush2.bf16.msra.mxu1 %v16733_v12  ;;  %v9528_v1 = vpop.f32.mrf.mxu0  ;;  %9773 = vmatmul.mubr.bf16.vlgmr.msra.gmra.mxu0 %v19139_v24  ;;  %v16760_v24 = vld [vmem:[#allocation6 + $0x14a8] ss:$16 sps:$4 sm:$0xff]  }
 0x56c   : > { %9809 = vmatprep.subr.bf16.mxu1 %v16741_v62  ;;  %v9529_v22 = vadd.f32 %v9528_v1, %v19214_v14  ;;  %9823 = vmatpush1.bf16.msra.mxu0 %v16748_v49  ;;  %v16751_v14 = vld [vmem:[#allocation6 + $0x16e8] ss:$16 sps:$4 sm:$0xff]   ;;  %v16816_v62 = vld [vmem:[#allocation6 + $0x158c] ss:$16 sps:$4 sm:$0xff]  }
 0x56d   : > { %9854 = vmatprep.mubr.bf16.mxu0 %v19144_v63  ;;  %v9530_v27 = vpop.f32.mrf.mxu0  ;;  %9824 = vmatprep.subr.bf16.mxu0 %v16756_v44  ;;  %v16766_v63 = vld [vmem:[#allocation6 + $0x1488] ss:$16 sps:$4 sm:$0xff]   ;;  %v16807_v44 = vld [vmem:[#allocation6 + $0x17cc] ss:$16 sps:$4 sm:$0xff]  }
 0x56e   : > { %v9531_v7 = vadd.f32 %v9530_v27, %v19217_v26  ;;  %v16808_v12 = vld [vmem:[#allocation6 + $0x15a8] ss:$16 sps:$4 sm:$0xff]   ;;  %v16822_v1 = vld [vmem:[#allocation6 + $0x156c] ss:$16 sps:$4 sm:$0xff]  }
 0x56f   : > { %9810 = vmatpush2.bf16.msra.mxu1 %v16739_v37  ;;  %v9532_v59 = vpop.f32.mrf.mxu0  ;;  %v16799_v49 = vld [vmem:[#allocation6 + $0x17e8] ss:$16 sps:$4 sm:$0xff]   ;;  %v16828_v27 = vld [vmem:[#allocation6 + $0x154c] ss:$16 sps:$4 sm:$0xff]  }
 0x570   : > { %9811 = vmatprep.subr.bf16.mxu1 %v16747_v23  ;;  %9825 = vmatpush1.bf16.msra.mxu0 %v16754_v56  ;;  %v16814_v37 = vld [vmem:[#allocation6 + $0x1588] ss:$16 sps:$4 sm:$0xff]   ;;  %v16834_v59 = vld [vmem:[#allocation6 + $0x152c] ss:$16 sps:$4 sm:$0xff]  }
 0x571   : > { %v9533_v0 = vpop.f32.mrf.mxu0  ;;  %9826 = vmatprep.subr.bf16.mxu0 %v16762_v38  ;;  %v16805_v23 = vld [vmem:[#allocation6 + $0x17c8] ss:$16 sps:$4 sm:$0xff]  }
 0x572   : > { %v16820_v56 = vld [vmem:[#allocation6 + $0x1568] ss:$16 sps:$4 sm:$0xff]  }
 0x573   : > { %9812 = vmatpush2.bf16.msra.mxu1 %v16745_v20  ;;  %v16811_v38 = vld [vmem:[#allocation6 + $0x17a8] ss:$16 sps:$4 sm:$0xff]  }
 0x574   : > { %9863 = vmatprep.subr.bf16.mxu1 %v16753_v54  ;;  %9827 = vmatpush1.bf16.msra.mxu0 %v16760_v24  ;;  %v16826_v20 = vld [vmem:[#allocation6 + $0x1548] ss:$16 sps:$4 sm:$0xff]   ;;  %v16825_v24 = vld [vmem:[#allocation6 + $0x176c] ss:$16 sps:$4 sm:$0xff]  }
 0x575   : > { %9828 = vmatprep.subr.bf16.mxu0 %v16768_v52  ;;  %v16817_v54 = vld [vmem:[#allocation6 + $0x1788] ss:$16 sps:$4 sm:$0xff]   ;;  %v16840_v52 = vld [vmem:[#allocation6 + $0x150c] ss:$16 sps:$4 sm:$0xff]  }
 0x576   : > { %v9569_v30 = vpop.f32.mrf.mxu1  ;;  %9814 = vmatmul.mubr.bf16.vlgmr.msra.gmra.mxu1 %v19151_v16  ;;  %v16771_v16 = vld [vmem:[#allocation6 + $0x168c] ss:$16 sps:$4 sm:$0xff]   ;;  %v16832_v0 = vld [vmem:[#allocation6 + $0x1528] ss:$16 sps:$4 sm:$0xff]  }
 0x577   : > { %v19224_v26 = vadd.f32 %v9569_v30, %v9529_v22  ;;  %9864 = vmatpush1.bf16.msra.mxu1 %v16751_v14  ;;  %9895 = vmatprep.mubr.bf16.mxu1 %v19155_v32  ;;  %v16786_v32 = vld [vmem:[#allocation6 + $0x142c] ss:$16 sps:$4 sm:$0xff]   ;;  %v16823_v14 = vld [vmem:[#allocation6 + $0x1768] ss:$16 sps:$4 sm:$0xff]  }
 0x578   : > { %v9571_v4 = vpop.f32.mrf.mxu1  ;;  %9865 = vmatprep.subr.bf16.mxu1 %v16759_v2  ;;  %9829 = vmatpush1.bf16.msra.mxu0 %v16766_v63  ;;  %v16813_v22 = vld [vmem:[#allocation6 + $0x17ac] ss:$16 sps:$4 sm:$0xff]   ;;  %v16838_v63 = vld [vmem:[#allocation6 + $0x1508] ss:$16 sps:$4 sm:$0xff]  }
 0x579   : > { %v19227_v42 = vadd.f32 %v9571_v4, %v9531_v7  ;;  %9830 = vmatprep.subr.bf16.mxu0 %v16774_v35  ;;  %v16819_v7 = vld [vmem:[#allocation6 + $0x178c] ss:$16 sps:$4 sm:$0xff]   ;;  %v16829_v35 = vld [vmem:[#allocation6 + $0x1748] ss:$16 sps:$4 sm:$0xff]  }
 0x57a   : > { %v9573_v51 = vpop.f32.mrf.mxu1  ;;  %v16831_v2 = vld [vmem:[#allocation6 + $0x174c] ss:$16 sps:$4 sm:$0xff]  }
 0x57b   : > { %9866 = vmatpush1.bf16.msra.mxu1 %v16757_v39  ;;  %v16837_v30 = vld [vmem:[#allocation6 + $0x172c] ss:$16 sps:$4 sm:$0xff]   ;;  %v16835_v39 = vld [vmem:[#allocation6 + $0x1728] ss:$16 sps:$4 sm:$0xff]  }
 0x57c   : > { %v9574_v60 = vpop.f32.mrf.mxu1  ;;  %9867 = vmatprep.subr.bf16.mxu1 %v16765_v50  ;;  %9831 = vmatpush1.bf16.msra.mxu0 %v16772_v41  ;;  %v16843_v50 = vld [vmem:[#allocation6 + $0x170c] ss:$16 sps:$4 sm:$0xff]  }
 0x57d   : > { %9832 = vmatprep.subr.bf16.mxu0 %v16780_v29 }
 0x57f   : > { %9868 = vmatpush1.bf16.msra.mxu1 %v16763_v31  ;;  %v16841_v31 = vld [vmem:[#allocation6 + $0x1708] ss:$16 sps:$4 sm:$0xff]  }
 0x580   : > { %9869 = vmatprep.subr.bf16.mxu1 %v16771_v16  ;;  %9833 = vmatpush1.bf16.msra.mxu0 %v16778_v57 }
 0x581   : > { %9834 = vmatprep.subr.bf16.mxu0 %v16786_v32 }
 0x583   : > { %9870 = vmatpush1.bf16.msra.mxu1 %v16769_v6 }
 0x584   : > { %9871 = vmatprep.subr.bf16.mxu1 %v16777_v48  ;;  %9835 = vmatpush1.bf16.msra.mxu0 %v16784_v3 }
 0x585   : > { %9836 = vmatprep.subr.bf16.mxu0 %v16792_v25  ;;  %v16846_v25 = vld [vmem:[#allocation9 + $0xe4] ss:$16 sps:$4 sm:$0xff]  }
 0x587   : > { %9872 = vmatpush1.bf16.msra.mxu1 %v16775_v10  ;;  %v16847_v10 = vld [vmem:[#allocation9 + $0x2e0] ss:$16 sps:$4 sm:$0xff]  }
 0x588   : > { %9873 = vmatprep.subr.bf16.mxu1 %v16783_v15  ;;  %9837 = vmatpush1.bf16.msra.mxu0 %v16790_v36  ;;  %v16852_v15 = vld [vmem:[#allocation9 + $0xc4] ss:$16 sps:$4 sm:$0xff]  }
 0x589   : > { %9838 = vmatprep.subr.bf16.mxu0 %v16798_v58  ;;  %v16855_v36 = vld [vmem:[#allocation9 + $0x2c4] ss:$16 sps:$4 sm:$0xff]   ;;  %v16850_v58 = vld [vmem:[#allocation9 + $0xc0] ss:$16 sps:$4 sm:$0xff]  }
 0x58b   : > { %9874 = vmatpush1.bf16.msra.mxu1 %v16781_v33  ;;  %v16858_v33 = vld [vmem:[#allocation9 + $0xa4] ss:$16 sps:$4 sm:$0xff]  }
 0x58c   : > { %9875 = vmatprep.subr.bf16.mxu1 %v16789_v28  ;;  %9839 = vmatpush2.bf16.msra.mxu0 %v16796_v61  ;;  %v16861_v28 = vld [vmem:[#allocation9 + $0x2a4] ss:$16 sps:$4 sm:$0xff]   ;;  %v16856_v61 = vld [vmem:[#allocation9 + $0xa0] ss:$16 sps:$4 sm:$0xff]  }
 0x58d   : > { %9840 = vmatprep.subr.bf16.mxu0 %v16804_v43  ;;  %v16859_v43 = vld [vmem:[#allocation9 + $0x2a0] ss:$16 sps:$4 sm:$0xff]  }
 0x58f   : > { %9876 = vmatpush1.bf16.msra.mxu1 %v16787_v46  ;;  %v16864_v46 = vld [vmem:[#allocation9 + $0x84] ss:$16 sps:$4 sm:$0xff]  }
 0x590   : > { %9877 = vmatprep.subr.bf16.mxu1 %v16795_v47  ;;  %9841 = vmatpush2.bf16.msra.mxu0 %v16802_v8  ;;  %v16867_v47 = vld [vmem:[#allocation9 + $0x284] ss:$16 sps:$4 sm:$0xff]   ;;  %v16862_v8 = vld [vmem:[#allocation9 + $0x80] ss:$16 sps:$4 sm:$0xff]  }
 0x591   : > { %9842 = vmatprep.subr.bf16.mxu0 %v16810_v45  ;;  %v16865_v45 = vld [vmem:[#allocation9 + $0x280] ss:$16 sps:$4 sm:$0xff]  }
 0x593   : > { %9878 = vmatpush1.bf16.msra.mxu1 %v16793_v9  ;;  %v16870_v9 = vld [vmem:[#allocation9 + $0x64] ss:$16 sps:$4 sm:$0xff]  }
 0x594   : > { %9879 = vmatprep.subr.bf16.mxu1 %v16801_v34  ;;  %9843 = vmatpush2.bf16.msra.mxu0 %v16808_v12  ;;  %v16873_v34 = vld [vmem:[#allocation9 + $0x264] ss:$16 sps:$4 sm:$0xff]   ;;  %v16868_v12 = vld [vmem:[#allocation9 + $0x60] ss:$16 sps:$4 sm:$0xff]  }
 0x595   : > { %9844 = vmatprep.subr.bf16.mxu0 %v16816_v62  ;;  %v16871_v62 = vld [vmem:[#allocation9 + $0x260] ss:$16 sps:$4 sm:$0xff]  }
 0x597   : > { %9880 = vmatpush2.bf16.msra.mxu1 %v16799_v49  ;;  %v16876_v49 = vld [vmem:[#allocation9 + $0x44] ss:$16 sps:$4 sm:$0xff]  }
 0x598   : > { %9881 = vmatprep.subr.bf16.mxu1 %v16807_v44  ;;  %9845 = vmatpush2.bf16.msra.mxu0 %v16814_v37  ;;  %v16879_v44 = vld [vmem:[#allocation9 + $0x244] ss:$16 sps:$4 sm:$0xff]   ;;  %v16874_v37 = vld [vmem:[#allocation9 + $0x40] ss:$16 sps:$4 sm:$0xff]  }
 0x599   : > { %9846 = vmatprep.subr.bf16.mxu0 %v16822_v1  ;;  %v16877_v1 = vld [vmem:[#allocation9 + $0x240] ss:$16 sps:$4 sm:$0xff]  }
 0x59b   : > { %9882 = vmatpush2.bf16.msra.mxu1 %v16805_v23  ;;  %v16882_v23 = vld [vmem:[#allocation9 + $0x24] ss:$16 sps:$4 sm:$0xff]  }
 0x59c   : > { %9883 = vmatprep.subr.bf16.mxu1 %v16813_v22  ;;  %9847 = vmatpush2.bf16.msra.mxu0 %v16820_v56  ;;  %v16885_v22 = vld [vmem:[#allocation9 + $0x224] ss:$16 sps:$4 sm:$0xff]   ;;  %v16880_v56 = vld [vmem:[#allocation9 + $0x20] ss:$16 sps:$4 sm:$0xff]  }
 0x59d   : > { %9848 = vmatprep.subr.bf16.mxu0 %v16828_v27  ;;  %v16883_v27 = vld [vmem:[#allocation9 + $0x220] ss:$16 sps:$4 sm:$0xff]  }
 0x59f   : > { %9884 = vmatpush2.bf16.msra.mxu1 %v16811_v38  ;;  %v16888_v38 = vld [vmem:[#allocation9 + $0x4] ss:$16 sps:$4 sm:$0xff]  }
 0x5a0   : > { %9885 = vmatprep.subr.bf16.mxu1 %v16819_v7  ;;  %9849 = vmatpush2.bf16.msra.mxu0 %v16826_v20  ;;  %v16891_v7 = vld [vmem:[#allocation9 + $0x204] ss:$16 sps:$4 sm:$0xff]   ;;  %v16886_v20 = vld [vmem:[#allocation9] ss:$16 sps:$4 sm:$0xff]  }
 0x5a1   : > { %9850 = vmatprep.subr.bf16.mxu0 %v16834_v59  ;;  %v16889_v59 = vld [vmem:[#allocation9 + $0x200] ss:$16 sps:$4 sm:$0xff]  }
 0x5a3   : > { %9886 = vmatpush2.bf16.msra.mxu1 %v16817_v54  ;;  %v16894_v54 = vld [vmem:[#allocation9 + $0x1e4] ss:$16 sps:$4 sm:$0xff]  }
 0x5a4   : > { %9887 = vmatprep.subr.bf16.mxu1 %v16825_v24  ;;  %9851 = vmatpush2.bf16.msra.mxu0 %v16832_v0  ;;  %v16897_v24 = vld [vmem:[#allocation9 + $0x3e4] ss:$16 sps:$4 sm:$0xff]   ;;  %v16892_v0 = vld [vmem:[#allocation9 + $0x1e0] ss:$16 sps:$4 sm:$0xff]  }
 0x5a5   : > { %9852 = vmatprep.subr.bf16.mxu0 %v16840_v52  ;;  %v16895_v52 = vld [vmem:[#allocation9 + $0x3e0] ss:$16 sps:$4 sm:$0xff]  }
 0x5a7   : > { %9888 = vmatpush2.bf16.msra.mxu1 %v16823_v14  ;;  %v16900_v14 = vld [vmem:[#allocation9 + $0x1c4] ss:$16 sps:$4 sm:$0xff]  }
 0x5a8   : > { %9889 = vmatprep.subr.bf16.mxu1 %v16831_v2  ;;  %9853 = vmatpush2.bf16.msra.mxu0 %v16838_v63  ;;  %v16903_v2 = vld [vmem:[#allocation9 + $0x3c4] ss:$16 sps:$4 sm:$0xff]   ;;  %v16898_v63 = vld [vmem:[#allocation9 + $0x1c0] ss:$16 sps:$4 sm:$0xff]  }
 0x5a9   : > { %13114 = vmatprep.subr.bf16.mxu0 %v16846_v25  ;;  %v16912_v25 = vld [vmem:[#allocation9 + $0x184] ss:$16 sps:$4 sm:$0xff]  }
 0x5ab   : > { %9890 = vmatpush2.bf16.msra.mxu1 %v16829_v35  ;;  %v9610_v4 = vpop.f32.mrf.mxu0  ;;  %9855 = vmatmul.mubr.bf16.vlgmr.msra.gmra.mxu0 %v19165_v19  ;;  %v16901_v35 = vld [vmem:[#allocation9 + $0x3c0] ss:$16 sps:$4 sm:$0xff]  }
 0x5ac   : > { %9891 = vmatprep.subr.bf16.mxu1 %v16837_v30  ;;  %v9611_v41 = vadd.f32 %v9610_v4, %v19224_v26  ;;  %v16844_v26 = vld [vmem:[#allocation9 + $0xe0] ss:$16 sps:$4 sm:$0xff]   ;;  %v16906_v30 = vld [vmem:[#allocation9 + $0x1a4] ss:$16 sps:$4 sm:$0xff]  }
 0x5ad   : > { %v9612_v29 = vpop.f32.mrf.mxu0  ;;  %13115 = vmatpush1.bf16.msra.mxu0 %v16844_v26  ;;  %v16904_v4 = vld [vmem:[#allocation9 + $0x1a0] ss:$16 sps:$4 sm:$0xff]  }
 0x5ae   : > { %v9613_v51 = vadd.f32 %v9612_v29, %v19227_v42  ;;  %v16849_v42 = vld [vmem:[#allocation9 + $0x2e4] ss:$16 sps:$4 sm:$0xff]   ;;  %13116 = vmatprep.subr.bf16.mxu0 %v16852_v15  ;;  %v16910_v26 = vld [vmem:[#allocation9 + $0x180] ss:$16 sps:$4 sm:$0xff]  }
 0x5af   : > { %9892 = vmatpush2.bf16.msra.mxu1 %v16835_v39  ;;  %v9614_v60 = vpop.f32.mrf.mxu0  ;;  %v16909_v39 = vld [vmem:[#allocation9 + $0x3a4] ss:$16 sps:$4 sm:$0xff]  }
 0x5b0   : > { %9893 = vmatprep.subr.bf16.mxu1 %v16843_v50  ;;  %v16907_v50 = vld [vmem:[#allocation9 + $0x3a0] ss:$16 sps:$4 sm:$0xff]   ;;  %v16915_v15 = vld [vmem:[#allocation9 + $0x384] ss:$16 sps:$4 sm:$0xff]  }
 0x5b1   : > { %v9615_v16 = vpop.f32.mrf.mxu0  ;;  %13117 = vmatpush1.bf16.msra.mxu0 %v16850_v58  ;;  %v16918_v58 = vld [vmem:[#allocation9 + $0x164] ss:$16 sps:$4 sm:$0xff]  }
 0x5b2   : > { %13118 = vmatprep.subr.bf16.mxu0 %v16858_v33  ;;  %v16924_v33 = vld [vmem:[#allocation9 + $0x144] ss:$16 sps:$4 sm:$0xff]  }
 0x5b3   : > { %9894 = vmatpush2.bf16.msra.mxu1 %v16841_v31 }
 0x5b4   : > { %13155 = vmatprep.subr.bf16.mxu1 %v16849_v42 }
 0x5b5   : > { %13119 = vmatpush1.bf16.msra.mxu0 %v16856_v61  ;;  %v16922_v61 = vld [vmem:[#allocation9 + $0x140] ss:$16 sps:$4 sm:$0xff]  }
 0x5b6   : > { %v9651_v57 = vpop.f32.mrf.mxu1  ;;  %9896 = vmatmul.mubr.bf16.vlgmr.msra.gmra.mxu1 %v19173_v18  ;;  %v16853_v18 = vld [vmem:[#allocation9 + $0x2c0] ss:$16 sps:$4 sm:$0xff]   ;;  %13120 = vmatprep.subr.bf16.mxu0 %v16864_v46  ;;  %v16930_v46 = vld [vmem:[#allocation9 + $0x124] ss:$16 sps:$4 sm:$0xff]  }
 0x5b7   : > { %v19233_v32 = vadd.f32 %v9651_v57, %v9611_v41  ;;  %13156 = vmatpush1.bf16.msra.mxu1 %v16847_v10  ;;  %v16913_v10 = vld [vmem:[#allocation9 + $0x380] ss:$16 sps:$4 sm:$0xff]  }
 0x5b8   : > { %v9653_v6 = vpop.f32.mrf.mxu1  ;;  %13157 = vmatprep.subr.bf16.mxu1 %v16855_v36 }
 0x5b9   : > { %v19235_v19 = vadd.f32 %v9653_v6, %v9613_v51  ;;  %13121 = vmatpush1.bf16.msra.mxu0 %v16862_v8  ;;  %v16928_v8 = vld [vmem:[#allocation9 + $0x120] ss:$16 sps:$4 sm:$0xff]  }
 0x5ba   : > { %v9655_v48 = vpop.f32.mrf.mxu1  ;;  %13122 = vmatprep.subr.bf16.mxu0 %v16870_v9  ;;  %v16936_v9 = vld [vmem:[#allocation9 + $0x104] ss:$16 sps:$4 sm:$0xff]  }
 0x5bb   : > { %13158 = vmatpush1.bf16.msra.mxu1 %v16853_v18  ;;  %v16919_v18 = vld [vmem:[#allocation9 + $0x360] ss:$16 sps:$4 sm:$0xff]  }
 0x5bc   : > { %v9656_v3 = vpop.f32.mrf.mxu1  ;;  %13159 = vmatprep.subr.bf16.mxu1 %v16861_v28  ;;  %v16927_v28 = vld [vmem:[#allocation9 + $0x344] ss:$16 sps:$4 sm:$0xff]  }
 0x5bd   : > { %13123 = vmatpush1.bf16.msra.mxu0 %v16868_v12  ;;  %v16934_v12 = vld [vmem:[#allocation9 + $0x100] ss:$16 sps:$4 sm:$0xff]  }
 0x5be   : > { %13124 = vmatprep.subr.bf16.mxu0 %v16876_v49  ;;  %v16942_v49 = vld [vmem:[#allocation9 + $0x4e4] ss:$16 sps:$4 sm:$0xff]  }
 0x5bf   : > { %13160 = vmatpush1.bf16.msra.mxu1 %v16859_v43  ;;  %v16925_v43 = vld [vmem:[#allocation9 + $0x340] ss:$16 sps:$4 sm:$0xff]  }
 0x5c0   : > { %13161 = vmatprep.subr.bf16.mxu1 %v16867_v47  ;;  %v16933_v47 = vld [vmem:[#allocation9 + $0x324] ss:$16 sps:$4 sm:$0xff]  }
 0x5c1   : > { %13125 = vmatpush1.bf16.msra.mxu0 %v16874_v37 }
 0x5c2   : > { %13126 = vmatprep.subr.bf16.mxu0 %v16882_v23 }
 0x5c3   : > { %13162 = vmatpush1.bf16.msra.mxu1 %v16865_v45  ;;  %v16931_v45 = vld [vmem:[#allocation9 + $0x320] ss:$16 sps:$4 sm:$0xff]  }
 0x5c4   : > { %13163 = vmatprep.subr.bf16.mxu1 %v16873_v34  ;;  %v16939_v34 = vld [vmem:[#allocation9 + $0x304] ss:$16 sps:$4 sm:$0xff]  }
 0x5c5   : > { %13127 = vmatpush1.bf16.msra.mxu0 %v16880_v56 }
 0x5c6   : > { %13128 = vmatprep.subr.bf16.mxu0 %v16888_v38 }
 0x5c7   : > { %13164 = vmatpush1.bf16.msra.mxu1 %v16871_v62  ;;  %v16937_v62 = vld [vmem:[#allocation9 + $0x300] ss:$16 sps:$4 sm:$0xff]  }
 0x5c8   : > { %13165 = vmatprep.subr.bf16.mxu1 %v16879_v44  ;;  %v16945_v44 = vld [vmem:[#allocation9 + $0x6e4] ss:$16 sps:$4 sm:$0xff]  }
 0x5c9   : > { %13129 = vmatpush1.bf16.msra.mxu0 %v16886_v20 }
 0x5ca   : > { %13130 = vmatprep.subr.bf16.mxu0 %v16894_v54 }
 0x5cb   : > { %13166 = vmatpush1.bf16.msra.mxu1 %v16877_v1 }
 0x5cc   : > { %13167 = vmatprep.subr.bf16.mxu1 %v16885_v22 }
 0x5cd   : > { %13131 = vmatpush2.bf16.msra.mxu0 %v16892_v0 }
 0x5ce   : > { %13132 = vmatprep.subr.bf16.mxu0 %v16900_v14 }
 0x5cf   : > { %13168 = vmatpush1.bf16.msra.mxu1 %v16883_v27 }
 0x5d0   : > { %13169 = vmatprep.subr.bf16.mxu1 %v16891_v7 }
 0x5d1   : > { %13133 = vmatpush2.bf16.msra.mxu0 %v16898_v63 }
 0x5d2   : > { %13134 = vmatprep.subr.bf16.mxu0 %v16906_v30 }
 0x5d3   : > { %13170 = vmatpush1.bf16.msra.mxu1 %v16889_v59 }
 0x5d4   : > { %13171 = vmatprep.subr.bf16.mxu1 %v16897_v24 }
 0x5d5   : > { %13135 = vmatpush2.bf16.msra.mxu0 %v16904_v4 }
 0x5d6   : > { %13136 = vmatprep.subr.bf16.mxu0 %v16912_v25 }
 0x5d7   : > { %13172 = vmatpush2.bf16.msra.mxu1 %v16895_v52 }
 0x5d8   : > { %13173 = vmatprep.subr.bf16.mxu1 %v16903_v2  ;;  %v17807_v2 = vmov 1983009808  }
 0x5d9   : > { %13137 = vmatpush2.bf16.msra.mxu0 %v16910_v26  ;;  %v9919_v63 = vunpack.c.l.s4 %v17807_v2  ;;  %v16985_v2 = vld [vmem:[#allocation9 + $0x600] ss:$16 sps:$4 sm:$0xff]  }
 0x5da   : > { %13138 = vmatprep.subr.bf16.mxu0 %v16918_v58  ;;  %v16943_v58 = vld [vmem:[#allocation9 + $0x6e0] ss:$16 sps:$4 sm:$0xff]  }
 0x5db   : > { %13174 = vmatpush2.bf16.msra.mxu1 %v16901_v35 }
 0x5dc   : > { %13175 = vmatprep.subr.bf16.mxu1 %v16909_v39 }
 0x5df   : > { %13176 = vmatpush2.bf16.msra.mxu1 %v16907_v50  ;;  %v9920_v50 = vunpack.c.0.s8 %v9919_v63  ;;  %v16990_v63 = vld [vmem:[#allocation9 + $0x5e4] ss:$16 sps:$4 sm:$0xff]  }
 0x5e0   : > { %13177 = vmatprep.subr.bf16.mxu1 %v16915_v15 }
 0x5e3   : > { %13178 = vmatpush2.bf16.msra.mxu1 %v16913_v10 }
 0x5eb   : > { %v9692_v41 = vpop.f32.mrf.mxu0 }
 0x5ec   : > { %v9693_v29 = vadd.f32 %v9692_v41, %v19233_v32  ;;  %v16916_v32 = vld [vmem:[#allocation9 + $0x160] ss:$16 sps:$4 sm:$0xff]  }
 0x5ed   : > { %v9694_v51 = vpop.f32.mrf.mxu0  ;;  %13139 = vmatpush2.bf16.msra.mxu0 %v16916_v32  ;;  %v16940_v32 = vld [vmem:[#allocation9 + $0x4e0] ss:$16 sps:$4 sm:$0xff]  }
 0x5ee   : > { %v9695_v31 = vadd.f32 %v9694_v51, %v19235_v19  ;;  %v16921_v19 = vld [vmem:[#allocation9 + $0x364] ss:$16 sps:$4 sm:$0xff]   ;;  %13140 = vmatprep.subr.bf16.mxu0 %v16924_v33 }
 0x5ef   : > { %v9696_v60 = vpop.f32.mrf.mxu0  ;;  %13179 = vmatprep.subr.bf16.mxu1 %v16921_v19  ;;  %v16948_v19 = vld [vmem:[#allocation9 + $0x4c4] ss:$16 sps:$4 sm:$0xff]  }
 0x5f0   : > { %13180 = vmatpush2.bf16.msra.mxu1 %v16919_v18  ;;  %v9923_v60 = vsub.s32 %v9920_v50, %v17966_v55  ;;  %v16951_v33 = vld [vmem:[#allocation9 + $0x6c4] ss:$16 sps:$4 sm:$0xff]  }
 0x5f1   : > { %v9697_v16 = vpop.f32.mrf.mxu0  ;;  %13181 = vmatprep.subr.bf16.mxu1 %v16927_v28  ;;  %13141 = vmatpush2.bf16.msra.mxu0 %v16922_v61  ;;  %v19461_v61 = vld [vmem:[#allocation18_spill] sm:$0xff] }
 0x5f2   : > { %13142 = vmatprep.subr.bf16.mxu0 %v16930_v46  ;;  %v16946_v46 = vld [vmem:[#allocation9 + $0x4c0] ss:$16 sps:$4 sm:$0xff]   ;;  %v16999_v50 = vld [vmem:[#allocation9 + $0x7c4] ss:$16 sps:$4 sm:$0xff]  }
 0x5f4   : > { %13182 = vmatpush2.bf16.msra.mxu1 %v16925_v43 }
 0x5f5   : > { %13183 = vmatprep.subr.bf16.mxu1 %v16933_v47  ;;  %13143 = vmatpush2.bf16.msra.mxu0 %v16928_v8  ;;  %v16949_v47 = vld [vmem:[#allocation9 + $0x6c0] ss:$16 sps:$4 sm:$0xff]   ;;  %v16954_v8 = vld [vmem:[#allocation9 + $0x4a4] ss:$16 sps:$4 sm:$0xff]  }
 0x5f6   : > { %v9733_v57 = vpop.f32.mrf.mxu1  ;;  %13144 = vmatprep.subr.bf16.mxu0 %v16936_v9  ;;  %v16952_v9 = vld [vmem:[#allocation9 + $0x4a0] ss:$16 sps:$4 sm:$0xff]  }
 0x5f7   : > { %v9734_v6 = vadd.f32 %v9733_v57, %v9693_v29 }
 0x5f8   : > { %v9735_v48 = vpop.f32.mrf.mxu1  ;;  %13184 = vmatpush2.bf16.msra.mxu1 %v16931_v45  ;;  %v16957_v45 = vld [vmem:[#allocation9 + $0x6a4] ss:$16 sps:$4 sm:$0xff]  }
 0x5f9   : > { %v9736_v3 = vadd.f32 %v9735_v48, %v9695_v31  ;;  %13185 = vmatprep.subr.bf16.mxu1 %v16939_v34  ;;  %13145 = vmatpush2.bf16.msra.mxu0 %v16934_v12  ;;  %v16955_v34 = vld [vmem:[#allocation9 + $0x6a0] ss:$16 sps:$4 sm:$0xff]   ;;  %v16960_v12 = vld [vmem:[#allocation9 + $0x484] ss:$16 sps:$4 sm:$0xff]  }
 0x5fa   : > { %v9737_v42 = vpop.f32.mrf.mxu1  ;;  %13196 = vmatprep.subr.bf16.mxu0 %v16942_v49  ;;  %v16958_v49 = vld [vmem:[#allocation9 + $0x480] ss:$16 sps:$4 sm:$0xff]  }
 0x5fc   : > { %v9738_v36 = vpop.f32.mrf.mxu1  ;;  %13186 = vmatpush2.bf16.msra.mxu1 %v16937_v62  ;;  %v16963_v62 = vld [vmem:[#allocation9 + $0x684] ss:$16 sps:$4 sm:$0xff]  }
 0x5fd   : > { %13237 = vmatprep.subr.bf16.mxu1 %v16945_v44  ;;  %v16961_v44 = vld [vmem:[#allocation9 + $0x680] ss:$16 sps:$4 sm:$0xff]  }
 0x62b   : > { %v9774_v37 = vpop.f32.mrf.mxu0 }
 0x62c   : > { %v9775_v1 = vadd.f32 %v9774_v37, %v9734_v6  ;;  %v16966_v37 = vld [vmem:[#allocation9 + $0x464] ss:$16 sps:$4 sm:$0xff]  }
 0x62d   : > { %v9776_v23 = vpop.f32.mrf.mxu0 }
 0x62e   : > { %v9777_v22 = vadd.f32 %v9776_v23, %v9736_v3  ;;  %v9924_v3 = vrot.slane %v19207_v40, %v9923_v60  ;;  %v16964_v23 = vld [vmem:[#allocation9 + $0x460] ss:$16 sps:$4 sm:$0xff]  }
 0x62f   : > { %v9778_v56 = vpop.f32.mrf.mxu0 }
 0x630   : > { %v16972_v56 = vld [vmem:[#allocation9 + $0x444] ss:$16 sps:$4 sm:$0xff]  }
 0x631   : > { %v9779_v27 = vpop.f32.mrf.mxu0 }
 0x632   : > { %v16975_v27 = vld [vmem:[#allocation9 + $0x644] ss:$16 sps:$4 sm:$0xff]  }
 0x636   : > { %v9815_v38 = vpop.f32.mrf.mxu1 }
 0x637   : > { %v9816_v52 = vadd.f32 %v9815_v38, %v9775_v1  ;;  %v16969_v1 = vld [vmem:[#allocation9 + $0x664] ss:$16 sps:$4 sm:$0xff]   ;;  %v16970_v38 = vld [vmem:[#allocation9 + $0x440] ss:$16 sps:$4 sm:$0xff]  }
 0x638   : > { %v9817_v7 = vpop.f32.mrf.mxu1 }
 0x639   : > { %v9818_v35 = vadd.f32 %v9817_v7, %v9777_v22  ;;  %v16967_v22 = vld [vmem:[#allocation9 + $0x660] ss:$16 sps:$4 sm:$0xff]  }
 0x63a   : > { %v9819_v20 = vpop.f32.mrf.mxu1  ;;  %v16973_v7 = vld [vmem:[#allocation9 + $0x640] ss:$16 sps:$4 sm:$0xff]  }
 0x63b   : > { %v16978_v20 = vld [vmem:[#allocation9 + $0x424] ss:$16 sps:$4 sm:$0xff]  }
 0x63c   : > { %v9820_v59 = vpop.f32.mrf.mxu1 }
 0x63d   : > { %v16981_v59 = vld [vmem:[#allocation9 + $0x624] ss:$16 sps:$4 sm:$0xff]  }
 0x66b   : > { %v9856_v54 = vpop.f32.mrf.mxu0 }
 0x66c   : > { %v9857_v30 = vadd.f32 %v9856_v54, %v9816_v52  ;;  %v16976_v54 = vld [vmem:[#allocation9 + $0x420] ss:$16 sps:$4 sm:$0xff]   ;;  %v16987_v52 = vld [vmem:[#allocation9 + $0x604] ss:$16 sps:$4 sm:$0xff]  }
 0x66d   : > { %v9858_v24 = vpop.f32.mrf.mxu0 }
 0x66e   : > { %v9859_v39 = vadd.f32 %v9858_v24, %v9818_v35  ;;  %v16979_v24 = vld [vmem:[#allocation9 + $0x620] ss:$16 sps:$4 sm:$0xff]   ;;  %v16993_v35 = vld [vmem:[#allocation9 + $0x7e4] ss:$16 sps:$4 sm:$0xff]  }
 0x66f   : > { %v9860_v0 = vpop.f32.mrf.mxu0 }
 0x670   : > { %v16984_v0 = vld [vmem:[#allocation9 + $0x404] ss:$16 sps:$4 sm:$0xff]  }
 0x671   : > { %v9861_v14 = vpop.f32.mrf.mxu0 }
 0x672   : > { %v16982_v14 = vld [vmem:[#allocation9 + $0x400] ss:$16 sps:$4 sm:$0xff]  }
 0x676   : > { %v9897_v4 = vpop.f32.mrf.mxu1 }
 0x677   : > { %v9898_v41 = vadd.f32 %v9897_v4, %v9857_v30  ;;  %v16988_v30 = vld [vmem:[#allocation9 + $0x5e0] ss:$16 sps:$4 sm:$0xff]   ;;  %v16996_v4 = vld [vmem:[#allocation9 + $0x5c4] ss:$16 sps:$4 sm:$0xff]  }
 0x678   : > { %v9899_v29 = vpop.f32.mrf.mxu1 }
 0x679   : > { %v9900_v51 = vadd.f32 %v9899_v29, %v9859_v39  ;;  %v9906_v16 = vmax.f32 %v9898_v41, 0.0  ;;  %v16991_v39 = vld [vmem:[#allocation9 + $0x7e0] ss:$16 sps:$4 sm:$0xff]  }
 0x67a   : > { %v9901_v31 = vpop.f32.mrf.mxu1  ;;  %v16994_v41 = vld [vmem:[#allocation9 + $0x5c0] ss:$16 sps:$4 sm:$0xff]  }
 0x67b   : > { %v9907_v57 = vmax.f32 %v9900_v51, 0.0  ;;  %v16997_v29 = vld [vmem:[#allocation9 + $0x7c0] ss:$16 sps:$4 sm:$0xff]   ;;  %v17002_v51 = vld [vmem:[#allocation9 + $0x5a4] ss:$16 sps:$4 sm:$0xff]  }
 0x67c   : > { %v9902_v6 = vpop.f32.mrf.mxu1  ;;  %v17005_v31 = vld [vmem:[#allocation9 + $0x7a4] ss:$16 sps:$4 sm:$0xff]  }
 0x67d   : > { %v15099_v48 = vpack.c.bf16 %v9907_v57, %v9906_v16  ;;  %v17003_v16 = vld [vmem:[#allocation9 + $0x7a0] ss:$16 sps:$4 sm:$0xff]   ;;  %v17008_v57 = vld [vmem:[#allocation9 + $0x584] ss:$16 sps:$4 sm:$0xff]  }
 0x67e   : > { %v17011_v6 = vld [vmem:[#allocation9 + $0x784] ss:$16 sps:$4 sm:$0xff]  }
 0x67f   : > { %v9931_v26 = vrot.slane %v15099_v48, %v9923_v60  ;;  %v17000_v60 = vld [vmem:[#allocation9 + $0x5a0] ss:$16 sps:$4 sm:$0xff]  }
 0x680   : > { %v17006_v48 = vld [vmem:[#allocation9 + $0x580] ss:$16 sps:$4 sm:$0xff]  }
 0x681   : > { %v9932_v25 = vcombine.low %v9924_v3, %v9931_v26  ;;  %v17009_v3 = vld [vmem:[#allocation9 + $0x780] ss:$16 sps:$4 sm:$0xff]   ;;  %v17014_v26 = vld [vmem:[#allocation9 + $0x564] ss:$16 sps:$4 sm:$0xff]  }
 0x683   : > { %v9934_v10 = vunpack.i.h.s16 %v9932_v25 }
 0x685   : > { %v19241_v42 = vpack.c.b16 %v9934_v10, %v9932_v25  ;;  %v17017_v25 = vld [vmem:[#allocation9 + $0x764] ss:$16 sps:$4 sm:$0xff]   ;;  %v17012_v10 = vld [vmem:[#allocation9 + $0x560] ss:$16 sps:$4 sm:$0xff]  }
 0x687   : > { %v19245_v15 = vpack.i.b16 %v19241_v42, %v19241_v42 }
 0x689   : > { %v19249_v36 = vrot.slane %v19245_v15, %v18474_v53  ;;  %v19253_v55 = vrot.slane %v19245_v15, %v18522_v17  ;;  %v19257_v40 = vrot.slane %v19245_v15, %v18471_v5  ;;  %v19261_v18 = vrot.slane %v19245_v15, %v18519_v13 }
 0x68a   : > { %v19269_v28 = vrot.slane %v19245_v15, %v18570_v21  ;;  %v19273_v43 = vrot.slane %v19245_v15, %v19461_v61 }
 0x68b   : > { %13146 = vmatprep.mubr.bf16.mxu0 %v19249_v36  ;;  %13187 = vmatprep.mubr.bf16.mxu1 %v19253_v55 }
 0x68c   : > { %13147 = vmatmul.mubr.bf16.vlgmr.msra.gmra.mxu0 %v19257_v40  ;;  %13188 = vmatmul.mubr.bf16.vlgmr.msra.gmra.mxu1 %v19261_v18 }
 0x68d   : > { %13197 = vmatpush1.bf16.msra.mxu0 %v16940_v32  ;;  %13238 = vmatpush1.bf16.msra.mxu1 %v16943_v58  ;;  %v17015_v32 = vld [vmem:[#allocation9 + $0x760] ss:$16 sps:$4 sm:$0xff]   ;;  %v17020_v58 = vld [vmem:[#allocation9 + $0x544] ss:$16 sps:$4 sm:$0xff]  }
 0x68e   : > { %13228 = vmatprep.mubr.bf16.mxu0 %v19269_v28  ;;  %13269 = vmatprep.mubr.bf16.mxu1 %v19273_v43 }
 0x68f   : > { %13198 = vmatprep.subr.bf16.mxu0 %v16948_v19  ;;  %13239 = vmatprep.subr.bf16.mxu1 %v16951_v33  ;;  %v17023_v19 = vld [vmem:[#allocation9 + $0x744] ss:$16 sps:$4 sm:$0xff]   ;;  %v17018_v33 = vld [vmem:[#allocation9 + $0x540] ss:$16 sps:$4 sm:$0xff]  }
 0x691   : > { %13199 = vmatpush1.bf16.msra.mxu0 %v16946_v46  ;;  %13240 = vmatpush1.bf16.msra.mxu1 %v16949_v47  ;;  %v17021_v46 = vld [vmem:[#allocation9 + $0x740] ss:$16 sps:$4 sm:$0xff]   ;;  %v17026_v47 = vld [vmem:[#allocation9 + $0x524] ss:$16 sps:$4 sm:$0xff]  }
 0x692   : > { %13200 = vmatprep.subr.bf16.mxu0 %v16954_v8  ;;  %13241 = vmatprep.subr.bf16.mxu1 %v16957_v45  ;;  %v17029_v8 = vld [vmem:[#allocation9 + $0x724] ss:$16 sps:$4 sm:$0xff]   ;;  %v17024_v45 = vld [vmem:[#allocation9 + $0x520] ss:$16 sps:$4 sm:$0xff]  }
 0x695   : > { %13201 = vmatpush1.bf16.msra.mxu0 %v16952_v9  ;;  %13242 = vmatpush1.bf16.msra.mxu1 %v16955_v34  ;;  %v17027_v9 = vld [vmem:[#allocation9 + $0x720] ss:$16 sps:$4 sm:$0xff]   ;;  %v17032_v34 = vld [vmem:[#allocation9 + $0x504] ss:$16 sps:$4 sm:$0xff]  }
 0x696   : > { %13202 = vmatprep.subr.bf16.mxu0 %v16960_v12  ;;  %13243 = vmatprep.subr.bf16.mxu1 %v16963_v62  ;;  %v17035_v12 = vld [vmem:[#allocation9 + $0x704] ss:$16 sps:$4 sm:$0xff]   ;;  %v9937_v62 = vunpack.i.h.s16 %v19241_v42 }
 0x699   : > { %13203 = vmatpush1.bf16.msra.mxu0 %v16958_v49  ;;  %13244 = vmatpush1.bf16.msra.mxu1 %v16961_v44  ;;  %v17030_v49 = vld [vmem:[#allocation9 + $0x500] ss:$16 sps:$4 sm:$0xff]  }
 0x69a   : > { %13204 = vmatprep.subr.bf16.mxu0 %v16966_v37  ;;  %13245 = vmatprep.subr.bf16.mxu1 %v16969_v1  ;;  %v17033_v44 = vld [vmem:[#allocation9 + $0x700] ss:$16 sps:$4 sm:$0xff]   ;;  %v17038_v37 = vld [vmem:[#allocation9 + $0x8e4] ss:$16 sps:$4 sm:$0xff]  }
 0x69b   : > { %v17041_v1 = vld [vmem:[#allocation9 + $0xae4] ss:$16 sps:$4 sm:$0xff]  }
 0x69d   : > { %13205 = vmatpush1.bf16.msra.mxu0 %v16964_v23  ;;  %13246 = vmatpush1.bf16.msra.mxu1 %v16967_v22  ;;  %v19278_v23 = vpack.i.b16 %v9937_v62, %v9937_v62  ;;  %v17036_v22 = vld [vmem:[#allocation9 + $0x8e0] ss:$16 sps:$4 sm:$0xff]   ;;  %v17101_v62 = vld [vmem:[#allocation9 + $0xba4] ss:$16 sps:$4 sm:$0xff]  }
 0x69e   : > { %13206 = vmatprep.subr.bf16.mxu0 %v16972_v56  ;;  %13247 = vmatprep.subr.bf16.mxu1 %v16975_v27  ;;  %v19462_v56 = vld [vmem:[#allocation16_spill] sm:$0xff] }
 0x69f   : > { %v19282_v27 = vrot.slane %v19245_v15, %v19462_v56 }
 0x6a1   : > { %13207 = vmatpush1.bf16.msra.mxu0 %v16970_v38  ;;  %13248 = vmatpush1.bf16.msra.mxu1 %v16973_v7  ;;  %v19463_v38 = vld [vmem:[#allocation17_spill] sm:$0xff] }
 0x6a2   : > { %13208 = vmatprep.subr.bf16.mxu0 %v16978_v20  ;;  %13249 = vmatprep.subr.bf16.mxu1 %v16981_v59  ;;  %v19286_v42 = vrot.slane %v19245_v15, %v19463_v38  ;;  %v17039_v7 = vld [vmem:[#allocation9 + $0xae0] ss:$16 sps:$4 sm:$0xff]   ;;  %v19290_v20 = vrot.slane %v19278_v23, %v18474_v53  ;;  %v17044_v59 = vld [vmem:[#allocation9 + $0x8c4] ss:$16 sps:$4 sm:$0xff]  }
 0x6a3   : > { %v17042_v15 = vld [vmem:[#allocation9 + $0x8c0] ss:$16 sps:$4 sm:$0xff]  }
 0x6a5   : > { %13209 = vmatpush1.bf16.msra.mxu0 %v16976_v54  ;;  %13250 = vmatpush1.bf16.msra.mxu1 %v16979_v24  ;;  %v17047_v54 = vld [vmem:[#allocation9 + $0xac4] ss:$16 sps:$4 sm:$0xff]   ;;  %v19296_v24 = vrot.slane %v19278_v23, %v18522_v17 }
 0x6a6   : > { %13210 = vmatprep.subr.bf16.mxu0 %v16984_v0  ;;  %13251 = vmatprep.subr.bf16.mxu1 %v16987_v52  ;;  %v17045_v0 = vld [vmem:[#allocation9 + $0xac0] ss:$16 sps:$4 sm:$0xff]   ;;  %v17050_v52 = vld [vmem:[#allocation9 + $0x8a4] ss:$16 sps:$4 sm:$0xff]  }
 0x6a9   : > { %13211 = vmatpush1.bf16.msra.mxu0 %v16982_v14  ;;  %13252 = vmatpush1.bf16.msra.mxu1 %v16985_v2  ;;  %v17053_v14 = vld [vmem:[#allocation9 + $0xaa4] ss:$16 sps:$4 sm:$0xff]   ;;  %v17048_v2 = vld [vmem:[#allocation9 + $0x8a0] ss:$16 sps:$4 sm:$0xff]  }
 0x6aa   : > { %13212 = vmatprep.subr.bf16.mxu0 %v16990_v63  ;;  %13253 = vmatprep.subr.bf16.mxu1 %v16993_v35  ;;  %v17051_v63 = vld [vmem:[#allocation9 + $0xaa0] ss:$16 sps:$4 sm:$0xff]   ;;  %v17056_v35 = vld [vmem:[#allocation9 + $0x884] ss:$16 sps:$4 sm:$0xff]  }
 0x6ad   : > { %13213 = vmatpush2.bf16.msra.mxu0 %v16988_v30  ;;  %13254 = vmatpush2.bf16.msra.mxu1 %v16991_v39  ;;  %v17059_v30 = vld [vmem:[#allocation9 + $0xa84] ss:$16 sps:$4 sm:$0xff]   ;;  %v17054_v39 = vld [vmem:[#allocation9 + $0x880] ss:$16 sps:$4 sm:$0xff]  }
 0x6ae   : > { %13214 = vmatprep.subr.bf16.mxu0 %v16996_v4  ;;  %13255 = vmatprep.subr.bf16.mxu1 %v16999_v50  ;;  %v17057_v4 = vld [vmem:[#allocation9 + $0xa80] ss:$16 sps:$4 sm:$0xff]   ;;  %v17062_v50 = vld [vmem:[#allocation9 + $0x864] ss:$16 sps:$4 sm:$0xff]  }
 0x6b1   : > { %13215 = vmatpush2.bf16.msra.mxu0 %v16994_v41  ;;  %13256 = vmatpush2.bf16.msra.mxu1 %v16997_v29  ;;  %v17065_v41 = vld [vmem:[#allocation9 + $0xa64] ss:$16 sps:$4 sm:$0xff]   ;;  %v17060_v29 = vld [vmem:[#allocation9 + $0x860] ss:$16 sps:$4 sm:$0xff]  }
 0x6b2   : > { %13216 = vmatprep.subr.bf16.mxu0 %v17002_v51  ;;  %13257 = vmatprep.subr.bf16.mxu1 %v17005_v31  ;;  %v17063_v51 = vld [vmem:[#allocation9 + $0xa60] ss:$16 sps:$4 sm:$0xff]   ;;  %v17068_v31 = vld [vmem:[#allocation9 + $0x844] ss:$16 sps:$4 sm:$0xff]  }
 0x6b5   : > { %13217 = vmatpush2.bf16.msra.mxu0 %v17000_v60  ;;  %13258 = vmatpush2.bf16.msra.mxu1 %v17003_v16  ;;  %v17071_v60 = vld [vmem:[#allocation9 + $0xa44] ss:$16 sps:$4 sm:$0xff]   ;;  %v17066_v16 = vld [vmem:[#allocation9 + $0x840] ss:$16 sps:$4 sm:$0xff]  }
 0x6b6   : > { %13218 = vmatprep.subr.bf16.mxu0 %v17008_v57  ;;  %13259 = vmatprep.subr.bf16.mxu1 %v17011_v6  ;;  %v17069_v57 = vld [vmem:[#allocation9 + $0xa40] ss:$16 sps:$4 sm:$0xff]   ;;  %v17074_v6 = vld [vmem:[#allocation9 + $0x824] ss:$16 sps:$4 sm:$0xff]  }
 0x6b9   : > { %13219 = vmatpush2.bf16.msra.mxu0 %v17006_v48  ;;  %13260 = vmatpush2.bf16.msra.mxu1 %v17009_v3  ;;  %v17077_v48 = vld [vmem:[#allocation9 + $0xa24] ss:$16 sps:$4 sm:$0xff]   ;;  %v17072_v3 = vld [vmem:[#allocation9 + $0x820] ss:$16 sps:$4 sm:$0xff]  }
 0x6ba   : > { %13220 = vmatprep.subr.bf16.mxu0 %v17014_v26  ;;  %13261 = vmatprep.subr.bf16.mxu1 %v17017_v25  ;;  %v17075_v26 = vld [vmem:[#allocation9 + $0xa20] ss:$16 sps:$4 sm:$0xff]   ;;  %v17080_v25 = vld [vmem:[#allocation9 + $0x804] ss:$16 sps:$4 sm:$0xff]  }
 0x6bd   : > { %13221 = vmatpush2.bf16.msra.mxu0 %v17012_v10  ;;  %13262 = vmatpush2.bf16.msra.mxu1 %v17015_v32  ;;  %v17083_v10 = vld [vmem:[#allocation9 + $0xa04] ss:$16 sps:$4 sm:$0xff]   ;;  %v17078_v32 = vld [vmem:[#allocation9 + $0x800] ss:$16 sps:$4 sm:$0xff]  }
 0x6be   : > { %13222 = vmatprep.subr.bf16.mxu0 %v17020_v58  ;;  %13263 = vmatprep.subr.bf16.mxu1 %v17023_v19  ;;  %v17081_v58 = vld [vmem:[#allocation9 + $0xa00] ss:$16 sps:$4 sm:$0xff]   ;;  %v17086_v19 = vld [vmem:[#allocation9 + $0x9e4] ss:$16 sps:$4 sm:$0xff]  }
 0x6c1   : > { %13223 = vmatpush2.bf16.msra.mxu0 %v17018_v33  ;;  %13264 = vmatpush2.bf16.msra.mxu1 %v17021_v46  ;;  %v17089_v33 = vld [vmem:[#allocation9 + $0xbe4] ss:$16 sps:$4 sm:$0xff]   ;;  %v17084_v46 = vld [vmem:[#allocation9 + $0x9e0] ss:$16 sps:$4 sm:$0xff]  }
 0x6c2   : > { %13224 = vmatprep.subr.bf16.mxu0 %v17026_v47  ;;  %13265 = vmatprep.subr.bf16.mxu1 %v17029_v8  ;;  %v17087_v47 = vld [vmem:[#allocation9 + $0xbe0] ss:$16 sps:$4 sm:$0xff]   ;;  %v17092_v8 = vld [vmem:[#allocation9 + $0x9c4] ss:$16 sps:$4 sm:$0xff]  }
 0x6c5   : > { %13225 = vmatpush2.bf16.msra.mxu0 %v17024_v45  ;;  %13266 = vmatpush2.bf16.msra.mxu1 %v17027_v9  ;;  %v17095_v45 = vld [vmem:[#allocation9 + $0xbc4] ss:$16 sps:$4 sm:$0xff]   ;;  %v17090_v9 = vld [vmem:[#allocation9 + $0x9c0] ss:$16 sps:$4 sm:$0xff]  }
 0x6c6   : > { %13226 = vmatprep.subr.bf16.mxu0 %v17032_v34  ;;  %13267 = vmatprep.subr.bf16.mxu1 %v17035_v12  ;;  %v17093_v34 = vld [vmem:[#allocation9 + $0xbc0] ss:$16 sps:$4 sm:$0xff]   ;;  %v17098_v12 = vld [vmem:[#allocation9 + $0x9a4] ss:$16 sps:$4 sm:$0xff]  }
 0x6c9   : > { %13227 = vmatpush2.bf16.msra.mxu0 %v17030_v49  ;;  %13268 = vmatpush2.bf16.msra.mxu1 %v17033_v44  ;;  %v17096_v49 = vld [vmem:[#allocation9 + $0x9a0] ss:$16 sps:$4 sm:$0xff]  }
 0x6ca   : > { %13278 = vmatprep.subr.bf16.mxu0 %v17038_v37  ;;  %13319 = vmatprep.subr.bf16.mxu1 %v17041_v1  ;;  %v17099_v44 = vld [vmem:[#allocation9 + $0xba0] ss:$16 sps:$4 sm:$0xff]   ;;  %v17104_v37 = vld [vmem:[#allocation9 + $0x984] ss:$16 sps:$4 sm:$0xff]  }
 0x6cb   : > { %v17107_v1 = vld [vmem:[#allocation9 + $0xb84] ss:$16 sps:$4 sm:$0xff]  }
 0x6cc   : > { %13229 = vmatmul.mubr.bf16.vlgmr.msra.gmra.mxu0 %v19282_v27  ;;  %13270 = vmatmul.mubr.bf16.vlgmr.msra.gmra.mxu1 %v19286_v42 }
 0x6cd   : > { %13279 = vmatpush1.bf16.msra.mxu0 %v17036_v22  ;;  %13310 = vmatprep.mubr.bf16.mxu0 %v19290_v20  ;;  %v17102_v22 = vld [vmem:[#allocation9 + $0x980] ss:$16 sps:$4 sm:$0xff]  }
 0x6ce   : > { %13320 = vmatpush1.bf16.msra.mxu1 %v17039_v7  ;;  %13351 = vmatprep.mubr.bf16.mxu1 %v19296_v24  ;;  %v17105_v7 = vld [vmem:[#allocation9 + $0xb80] ss:$16 sps:$4 sm:$0xff]  }
 0x6cf   : > { %13280 = vmatprep.subr.bf16.mxu0 %v17044_v59  ;;  %13321 = vmatprep.subr.bf16.mxu1 %v17047_v54  ;;  %v17110_v59 = vld [vmem:[#allocation9 + $0x964] ss:$16 sps:$4 sm:$0xff]  }
 0x6d0   : > { %v17113_v54 = vld [vmem:[#allocation9 + $0xb64] ss:$16 sps:$4 sm:$0xff]  }
 0x6d1   : > { %13281 = vmatpush1.bf16.msra.mxu0 %v17042_v15  ;;  %v17108_v15 = vld [vmem:[#allocation9 + $0x960] ss:$16 sps:$4 sm:$0xff]  }
 0x6d2   : > { %13322 = vmatpush1.bf16.msra.mxu1 %v17045_v0  ;;  %13282 = vmatprep.subr.bf16.mxu0 %v17050_v52  ;;  %v17111_v0 = vld [vmem:[#allocation9 + $0xb60] ss:$16 sps:$4 sm:$0xff]   ;;  %v17116_v52 = vld [vmem:[#allocation9 + $0x944] ss:$16 sps:$4 sm:$0xff]  }
 0x6d3   : > { %13323 = vmatprep.subr.bf16.mxu1 %v17053_v14  ;;  %v17119_v14 = vld [vmem:[#allocation9 + $0xb44] ss:$16 sps:$4 sm:$0xff]  }
 0x6d5   : > { %13283 = vmatpush1.bf16.msra.mxu0 %v17048_v2  ;;  %v17114_v2 = vld [vmem:[#allocation9 + $0x940] ss:$16 sps:$4 sm:$0xff]  }
 0x6d6   : > { %13324 = vmatpush1.bf16.msra.mxu1 %v17051_v63  ;;  %13284 = vmatprep.subr.bf16.mxu0 %v17056_v35  ;;  %v17117_v63 = vld [vmem:[#allocation9 + $0xb40] ss:$16 sps:$4 sm:$0xff]   ;;  %v17122_v35 = vld [vmem:[#allocation9 + $0x924] ss:$16 sps:$4 sm:$0xff]  }
 0x6d7   : > { %13325 = vmatprep.subr.bf16.mxu1 %v17059_v30  ;;  %v17125_v30 = vld [vmem:[#allocation9 + $0xb24] ss:$16 sps:$4 sm:$0xff]  }
 0x6d9   : > { %13285 = vmatpush1.bf16.msra.mxu0 %v17054_v39  ;;  %v17120_v39 = vld [vmem:[#allocation9 + $0x920] ss:$16 sps:$4 sm:$0xff]  }
 0x6da   : > { %13326 = vmatpush1.bf16.msra.mxu1 %v17057_v4  ;;  %13286 = vmatprep.subr.bf16.mxu0 %v17062_v50  ;;  %v17123_v4 = vld [vmem:[#allocation9 + $0xb20] ss:$16 sps:$4 sm:$0xff]   ;;  %v17128_v50 = vld [vmem:[#allocation9 + $0x904] ss:$16 sps:$4 sm:$0xff]  }
 0x6db   : > { %13327 = vmatprep.subr.bf16.mxu1 %v17065_v41  ;;  %v17131_v41 = vld [vmem:[#allocation9 + $0xb04] ss:$16 sps:$4 sm:$0xff]  }
 0x6dd   : > { %13287 = vmatpush1.bf16.msra.mxu0 %v17060_v29  ;;  %v17126_v29 = vld [vmem:[#allocation9 + $0x900] ss:$16 sps:$4 sm:$0xff]  }
 0x6de   : > { %13328 = vmatpush1.bf16.msra.mxu1 %v17063_v51  ;;  %13288 = vmatprep.subr.bf16.mxu0 %v17068_v31  ;;  %v17129_v51 = vld [vmem:[#allocation9 + $0xb00] ss:$16 sps:$4 sm:$0xff]   ;;  %v17134_v31 = vld [vmem:[#allocation9 + $0xce4] ss:$16 sps:$4 sm:$0xff]  }
 0x6df   : > { %13329 = vmatprep.subr.bf16.mxu1 %v17071_v60  ;;  %v17137_v60 = vld [vmem:[#allocation9 + $0xee4] ss:$16 sps:$4 sm:$0xff]  }
 0x6e1   : > { %13289 = vmatpush1.bf16.msra.mxu0 %v17066_v16  ;;  %v17132_v16 = vld [vmem:[#allocation9 + $0xce0] ss:$16 sps:$4 sm:$0xff]  }
 0x6e2   : > { %13330 = vmatpush1.bf16.msra.mxu1 %v17069_v57  ;;  %13290 = vmatprep.subr.bf16.mxu0 %v17074_v6  ;;  %v19302_v57 = vrot.slane %v19278_v23, %v18471_v5  ;;  %v17135_v6 = vld [vmem:[#allocation9 + $0xee0] ss:$16 sps:$4 sm:$0xff]  }
 0x6e3   : > { %13331 = vmatprep.subr.bf16.mxu1 %v17077_v48  ;;  %v19306_v48 = vrot.slane %v19278_v23, %v18519_v13 }
 0x6e5   : > { %13291 = vmatpush1.bf16.msra.mxu0 %v17072_v3  ;;  %v17140_v3 = vld [vmem:[#allocation9 + $0xcc4] ss:$16 sps:$4 sm:$0xff]  }
 0x6e6   : > { %13332 = vmatpush1.bf16.msra.mxu1 %v17075_v26  ;;  %13292 = vmatprep.subr.bf16.mxu0 %v17080_v25  ;;  %v19311_v26 = vrot.slane %v19278_v23, %v18570_v21  ;;  %v17143_v25 = vld [vmem:[#allocation9 + $0xec4] ss:$16 sps:$4 sm:$0xff]   ;;  %v17144_v21 = vld [vmem:[#allocation9 + $0xca0] ss:$16 sps:$4 sm:$0xff]  }
 0x6e7   : > { %13333 = vmatprep.subr.bf16.mxu1 %v17083_v10  ;;  %v19316_v10 = vrot.slane %v19278_v23, %v19461_v61  ;;  %v17155_v61 = vld [vmem:[#allocation9 + $0xe84] ss:$16 sps:$4 sm:$0xff]  }
 0x6e9   : > { %13293 = vmatpush1.bf16.msra.mxu0 %v17078_v32  ;;  %v17138_v32 = vld [vmem:[#allocation9 + $0xcc0] ss:$16 sps:$4 sm:$0xff]  }
 0x6ea   : > { %13334 = vmatpush1.bf16.msra.mxu1 %v17081_v58  ;;  %13294 = vmatprep.subr.bf16.mxu0 %v17086_v19  ;;  %v17141_v58 = vld [vmem:[#allocation9 + $0xec0] ss:$16 sps:$4 sm:$0xff]   ;;  %v17146_v19 = vld [vmem:[#allocation9 + $0xca4] ss:$16 sps:$4 sm:$0xff]  }
 0x6eb   : > { %13335 = vmatprep.subr.bf16.mxu1 %v17089_v33  ;;  %v17149_v33 = vld [vmem:[#allocation9 + $0xea4] ss:$16 sps:$4 sm:$0xff]  }
 0x6ed   : > { %13295 = vmatpush2.bf16.msra.mxu0 %v17084_v46  ;;  %v17147_v46 = vld [vmem:[#allocation9 + $0xea0] ss:$16 sps:$4 sm:$0xff]  }
 0x6ee   : > { %13336 = vmatpush2.bf16.msra.mxu1 %v17087_v47  ;;  %13296 = vmatprep.subr.bf16.mxu0 %v17092_v8  ;;  %v17152_v47 = vld [vmem:[#allocation9 + $0xc84] ss:$16 sps:$4 sm:$0xff]   ;;  %v17150_v8 = vld [vmem:[#allocation9 + $0xc80] ss:$16 sps:$4 sm:$0xff]  }
 0x6ef   : > { %13337 = vmatprep.subr.bf16.mxu1 %v17095_v45  ;;  %v17153_v45 = vld [vmem:[#allocation9 + $0xe80] ss:$16 sps:$4 sm:$0xff]  }
 0x6f1   : > { %13297 = vmatpush2.bf16.msra.mxu0 %v17090_v9  ;;  %v17158_v9 = vld [vmem:[#allocation9 + $0xc64] ss:$16 sps:$4 sm:$0xff]  }
 0x6f2   : > { %13338 = vmatpush2.bf16.msra.mxu1 %v17093_v34  ;;  %13298 = vmatprep.subr.bf16.mxu0 %v17098_v12  ;;  %v17161_v34 = vld [vmem:[#allocation9 + $0xe64] ss:$16 sps:$4 sm:$0xff]   ;;  %v17156_v12 = vld [vmem:[#allocation9 + $0xc60] ss:$16 sps:$4 sm:$0xff]  }
 0x6f3   : > { %13339 = vmatprep.subr.bf16.mxu1 %v17101_v62  ;;  %v17159_v62 = vld [vmem:[#allocation9 + $0xe60] ss:$16 sps:$4 sm:$0xff]  }
 0x6f5   : > { %13299 = vmatpush2.bf16.msra.mxu0 %v17096_v49  ;;  %v17164_v49 = vld [vmem:[#allocation9 + $0xc44] ss:$16 sps:$4 sm:$0xff]  }
 0x6f6   : > { %13340 = vmatpush2.bf16.msra.mxu1 %v17099_v44  ;;  %13300 = vmatprep.subr.bf16.mxu0 %v17104_v37  ;;  %v17167_v44 = vld [vmem:[#allocation9 + $0xe44] ss:$16 sps:$4 sm:$0xff]   ;;  %v17162_v37 = vld [vmem:[#allocation9 + $0xc40] ss:$16 sps:$4 sm:$0xff]  }
 0x6f7   : > { %13341 = vmatprep.subr.bf16.mxu1 %v17107_v1  ;;  %v17165_v1 = vld [vmem:[#allocation9 + $0xe40] ss:$16 sps:$4 sm:$0xff]  }
 0x6f9   : > { %13301 = vmatpush2.bf16.msra.mxu0 %v17102_v22  ;;  %v17170_v22 = vld [vmem:[#allocation9 + $0xc24] ss:$16 sps:$4 sm:$0xff]  }
 0x6fa   : > { %13342 = vmatpush2.bf16.msra.mxu1 %v17105_v7  ;;  %13302 = vmatprep.subr.bf16.mxu0 %v17110_v59  ;;  %v17173_v7 = vld [vmem:[#allocation9 + $0xe24] ss:$16 sps:$4 sm:$0xff]   ;;  %v17168_v59 = vld [vmem:[#allocation9 + $0xc20] ss:$16 sps:$4 sm:$0xff]  }
 0x6fb   : > { %13343 = vmatprep.subr.bf16.mxu1 %v17113_v54  ;;  %v17171_v54 = vld [vmem:[#allocation9 + $0xe20] ss:$16 sps:$4 sm:$0xff]  }
 0x6fd   : > { %13303 = vmatpush2.bf16.msra.mxu0 %v17108_v15  ;;  %v17176_v15 = vld [vmem:[#allocation9 + $0xc04] ss:$16 sps:$4 sm:$0xff]  }
 0x6fe   : > { %13344 = vmatpush2.bf16.msra.mxu1 %v17111_v0  ;;  %13304 = vmatprep.subr.bf16.mxu0 %v17116_v52  ;;  %v17179_v0 = vld [vmem:[#allocation9 + $0xe04] ss:$16 sps:$4 sm:$0xff]   ;;  %v17174_v52 = vld [vmem:[#allocation9 + $0xc00] ss:$16 sps:$4 sm:$0xff]  }
 0x6ff   : > { %13345 = vmatprep.subr.bf16.mxu1 %v17119_v14  ;;  %v17177_v14 = vld [vmem:[#allocation9 + $0xe00] ss:$16 sps:$4 sm:$0xff]  }
 0x701   : > { %13305 = vmatpush2.bf16.msra.mxu0 %v17114_v2  ;;  %v17182_v2 = vld [vmem:[#allocation9 + $0xde4] ss:$16 sps:$4 sm:$0xff]  }
 0x702   : > { %13346 = vmatpush2.bf16.msra.mxu1 %v17117_v63  ;;  %13306 = vmatprep.subr.bf16.mxu0 %v17122_v35  ;;  %v17185_v63 = vld [vmem:[#allocation9 + $0xfe4] ss:$16 sps:$4 sm:$0xff]   ;;  %v17180_v35 = vld [vmem:[#allocation9 + $0xde0] ss:$16 sps:$4 sm:$0xff]  }
 0x703   : > { %13347 = vmatprep.subr.bf16.mxu1 %v17125_v30  ;;  %v17183_v30 = vld [vmem:[#allocation9 + $0xfe0] ss:$16 sps:$4 sm:$0xff]  }
 0x705   : > { %13307 = vmatpush2.bf16.msra.mxu0 %v17120_v39  ;;  %v17188_v39 = vld [vmem:[#allocation9 + $0xdc4] ss:$16 sps:$4 sm:$0xff]  }
 0x706   : > { %13348 = vmatpush2.bf16.msra.mxu1 %v17123_v4  ;;  %13308 = vmatprep.subr.bf16.mxu0 %v17128_v50  ;;  %v17191_v4 = vld [vmem:[#allocation9 + $0xfc4] ss:$16 sps:$4 sm:$0xff]   ;;  %v17186_v50 = vld [vmem:[#allocation9 + $0xdc0] ss:$16 sps:$4 sm:$0xff]  }
 0x707   : > { %13349 = vmatprep.subr.bf16.mxu1 %v17131_v41  ;;  %v17189_v41 = vld [vmem:[#allocation9 + $0xfc0] ss:$16 sps:$4 sm:$0xff]  }
 0x709   : > { %13309 = vmatpush2.bf16.msra.mxu0 %v17126_v29  ;;  %v17194_v29 = vld [vmem:[#allocation9 + $0xda4] ss:$16 sps:$4 sm:$0xff]  }
 0x70a   : > { %13350 = vmatpush2.bf16.msra.mxu1 %v17129_v51  ;;  %13360 = vmatprep.subr.bf16.mxu0 %v17134_v31  ;;  %v17197_v51 = vld [vmem:[#allocation9 + $0xfa4] ss:$16 sps:$4 sm:$0xff]   ;;  %v17192_v31 = vld [vmem:[#allocation9 + $0xda0] ss:$16 sps:$4 sm:$0xff]  }
 0x70b   : > { %13401 = vmatprep.subr.bf16.mxu1 %v17137_v60  ;;  %v17195_v60 = vld [vmem:[#allocation9 + $0xfa0] ss:$16 sps:$4 sm:$0xff]  }
 0x70c   : > { %13311 = vmatmul.mubr.bf16.vlgmr.msra.gmra.mxu0 %v19302_v57 }
 0x70d   : > { %13352 = vmatmul.mubr.bf16.vlgmr.msra.gmra.mxu1 %v19306_v48  ;;  %13361 = vmatpush1.bf16.msra.mxu0 %v17132_v16  ;;  %v17200_v16 = vld [vmem:[#allocation9 + $0xd84] ss:$16 sps:$4 sm:$0xff]  }
 0x70e   : > { %13392 = vmatprep.mubr.bf16.mxu0 %v19311_v26  ;;  %13402 = vmatpush1.bf16.msra.mxu1 %v17135_v6  ;;  %v17203_v6 = vld [vmem:[#allocation9 + $0xf84] ss:$16 sps:$4 sm:$0xff]  }
 0x70f   : > { %13433 = vmatprep.mubr.bf16.mxu1 %v19316_v10  ;;  %13362 = vmatprep.subr.bf16.mxu0 %v17140_v3  ;;  %v17198_v3 = vld [vmem:[#allocation9 + $0xd80] ss:$16 sps:$4 sm:$0xff]  }
 0x710   : > { %13403 = vmatprep.subr.bf16.mxu1 %v17143_v25  ;;  %v17201_v25 = vld [vmem:[#allocation9 + $0xf80] ss:$16 sps:$4 sm:$0xff]  }
 0x711   : > { %13363 = vmatpush1.bf16.msra.mxu0 %v17138_v32  ;;  %v17206_v32 = vld [vmem:[#allocation9 + $0xd64] ss:$16 sps:$4 sm:$0xff]  }
 0x712   : > { %13404 = vmatpush1.bf16.msra.mxu1 %v17141_v58  ;;  %13364 = vmatprep.subr.bf16.mxu0 %v17146_v19  ;;  %v17209_v58 = vld [vmem:[#allocation9 + $0xf64] ss:$16 sps:$4 sm:$0xff]   ;;  %v17204_v19 = vld [vmem:[#allocation9 + $0xd60] ss:$16 sps:$4 sm:$0xff]  }
 0x713   : > { %13405 = vmatprep.subr.bf16.mxu1 %v17149_v33  ;;  %v17207_v33 = vld [vmem:[#allocation9 + $0xf60] ss:$16 sps:$4 sm:$0xff]  }
 0x715   : > { %13365 = vmatpush1.bf16.msra.mxu0 %v17144_v21  ;;  %v17212_v21 = vld [vmem:[#allocation9 + $0xd44] ss:$16 sps:$4 sm:$0xff]  }
 0x716   : > { %13406 = vmatpush1.bf16.msra.mxu1 %v17147_v46  ;;  %13366 = vmatprep.subr.bf16.mxu0 %v17152_v47  ;;  %v17215_v46 = vld [vmem:[#allocation9 + $0xf44] ss:$16 sps:$4 sm:$0xff]   ;;  %v17210_v47 = vld [vmem:[#allocation9 + $0xd40] ss:$16 sps:$4 sm:$0xff]  }
 0x717   : > { %13407 = vmatprep.subr.bf16.mxu1 %v17155_v61  ;;  %v17213_v61 = vld [vmem:[#allocation9 + $0xf40] ss:$16 sps:$4 sm:$0xff]  }
 0x719   : > { %13367 = vmatpush1.bf16.msra.mxu0 %v17150_v8  ;;  %v17218_v8 = vld [vmem:[#allocation9 + $0xd24] ss:$16 sps:$4 sm:$0xff]  }
 0x71a   : > { %13408 = vmatpush1.bf16.msra.mxu1 %v17153_v45  ;;  %13368 = vmatprep.subr.bf16.mxu0 %v17158_v9  ;;  %v17221_v45 = vld [vmem:[#allocation9 + $0xf24] ss:$16 sps:$4 sm:$0xff]   ;;  %v17216_v9 = vld [vmem:[#allocation9 + $0xd20] ss:$16 sps:$4 sm:$0xff]  }
 0x71b   : > { %13409 = vmatprep.subr.bf16.mxu1 %v17161_v34  ;;  %v17219_v34 = vld [vmem:[#allocation9 + $0xf20] ss:$16 sps:$4 sm:$0xff]  }
 0x71d   : > { %13369 = vmatpush1.bf16.msra.mxu0 %v17156_v12  ;;  %v17224_v12 = vld [vmem:[#allocation9 + $0xd04] ss:$16 sps:$4 sm:$0xff]  }
 0x71e   : > { %13410 = vmatpush1.bf16.msra.mxu1 %v17159_v62  ;;  %13370 = vmatprep.subr.bf16.mxu0 %v17164_v49  ;;  %v17227_v62 = vld [vmem:[#allocation9 + $0xf04] ss:$16 sps:$4 sm:$0xff]   ;;  %v17222_v49 = vld [vmem:[#allocation9 + $0xd00] ss:$16 sps:$4 sm:$0xff]  }
 0x71f   : > { %13411 = vmatprep.subr.bf16.mxu1 %v17167_v44  ;;  %v17225_v44 = vld [vmem:[#allocation9 + $0xf00] ss:$16 sps:$4 sm:$0xff]  }
 0x721   : > { %13371 = vmatpush1.bf16.msra.mxu0 %v17162_v37  ;;  %v17230_v37 = vld [vmem:[#allocation9 + $0xec] ss:$16 sps:$4 sm:$0xff]  }
 0x722   : > { %13412 = vmatpush1.bf16.msra.mxu1 %v17165_v1  ;;  %13372 = vmatprep.subr.bf16.mxu0 %v17170_v22  ;;  %v10450_v1 = vld [vmem:[#allocation10] sm:$0xf]  ;;  %v17233_v22 = vld [vmem:[#allocation9 + $0x2ec] ss:$16 sps:$4 sm:$0xff]  }
 0x723   : > { %13413 = vmatprep.subr.bf16.mxu1 %v17173_v7  ;;  %v17228_v7 = vld [vmem:[#allocation9 + $0xe8] ss:$16 sps:$4 sm:$0xff]  }
 0x725   : > { %13373 = vmatpush1.bf16.msra.mxu0 %v17168_v59  ;;  %v13097_v59 = vrot.slane %v10450_v1, %v18471_v5  ;;  %v17239_v5 = vld [vmem:[#allocation9 + $0x2cc] ss:$16 sps:$4 sm:$0xff]  }
 0x726   : > { %13414 = vmatpush1.bf16.msra.mxu1 %v17171_v54  ;;  %13374 = vmatprep.subr.bf16.mxu0 %v17176_v15  ;;  %v19323_v54 = vrot.slane %v19278_v23, %v19462_v56  ;;  %v17231_v15 = vld [vmem:[#allocation9 + $0x2e8] ss:$16 sps:$4 sm:$0xff]  }
 0x727   : > { %13415 = vmatprep.subr.bf16.mxu1 %v17179_v0  ;;  %v19327_v0 = vrot.slane %v19278_v23, %v19463_v38  ;;  %v17234_v56 = vld [vmem:[#allocation9 + $0xc8] ss:$16 sps:$4 sm:$0xff]  }
 0x728   : > { %v17237_v38 = vld [vmem:[#allocation9 + $0x2c8] ss:$16 sps:$4 sm:$0xff]  }
 0x729   : > { %13375 = vmatpush1.bf16.msra.mxu0 %v17174_v52  ;;  %v13101_v52 = vrot.slane %v10450_v1, %v18474_v53  ;;  %v17281_v1 = vld [vmem:[#allocation9 + $0x3ec] ss:$16 sps:$4 sm:$0xff]  }
 0x72a   : > { %13416 = vmatpush1.bf16.msra.mxu1 %v17177_v14  ;;  %13376 = vmatprep.subr.bf16.mxu0 %v17182_v2  ;;  %v17236_v14 = vld [vmem:[#allocation9 + $0xcc] ss:$16 sps:$4 sm:$0xff]  }
 0x72b   : > { %13417 = vmatprep.subr.bf16.mxu1 %v17185_v63 }
 0x72d   : > { %13377 = vmatpush2.bf16.msra.mxu0 %v17180_v35 }
 0x72e   : > { %13418 = vmatpush2.bf16.msra.mxu1 %v17183_v30  ;;  %13378 = vmatprep.subr.bf16.mxu0 %v17188_v39  ;;  %v17242_v39 = vld [vmem:[#allocation9 + $0xac] ss:$16 sps:$4 sm:$0xff]  }
 0x72f   : > { %13419 = vmatprep.subr.bf16.mxu1 %v17191_v4 }
 0x731   : > { %13379 = vmatpush2.bf16.msra.mxu0 %v17186_v50  ;;  %v17245_v50 = vld [vmem:[#allocation9 + $0x2ac] ss:$16 sps:$4 sm:$0xff]  }
 0x732   : > { %13420 = vmatpush2.bf16.msra.mxu1 %v17189_v41  ;;  %13380 = vmatprep.subr.bf16.mxu0 %v17194_v29 }
 0x733   : > { %13421 = vmatprep.subr.bf16.mxu1 %v17197_v51 }
 0x735   : > { %13381 = vmatpush2.bf16.msra.mxu0 %v17192_v31  ;;  %v17240_v31 = vld [vmem:[#allocation9 + $0xa8] ss:$16 sps:$4 sm:$0xff]  }
 0x736   : > { %13422 = vmatpush2.bf16.msra.mxu1 %v17195_v60  ;;  %13382 = vmatprep.subr.bf16.mxu0 %v17200_v16  ;;  %v17243_v16 = vld [vmem:[#allocation9 + $0x2a8] ss:$16 sps:$4 sm:$0xff]  }
 0x737   : > { %13423 = vmatprep.subr.bf16.mxu1 %v17203_v6  ;;  %v17248_v6 = vld [vmem:[#allocation9 + $0x8c] ss:$16 sps:$4 sm:$0xff]  }
 0x739   : > { %13383 = vmatpush2.bf16.msra.mxu0 %v17198_v3  ;;  %v17251_v3 = vld [vmem:[#allocation9 + $0x28c] ss:$16 sps:$4 sm:$0xff]  }
 0x73a   : > { %13424 = vmatpush2.bf16.msra.mxu1 %v17201_v25  ;;  %13384 = vmatprep.subr.bf16.mxu0 %v17206_v32  ;;  %v17249_v25 = vld [vmem:[#allocation9 + $0x288] ss:$16 sps:$4 sm:$0xff]   ;;  %v17254_v32 = vld [vmem:[#allocation9 + $0x6c] ss:$16 sps:$4 sm:$0xff]  }
 0x73b   : > { %13425 = vmatprep.subr.bf16.mxu1 %v17209_v58  ;;  %v17257_v58 = vld [vmem:[#allocation9 + $0x26c] ss:$16 sps:$4 sm:$0xff]  }
 0x73d   : > { %13385 = vmatpush2.bf16.msra.mxu0 %v17204_v19  ;;  %v17252_v19 = vld [vmem:[#allocation9 + $0x68] ss:$16 sps:$4 sm:$0xff]  }
 0x73e   : > { %13426 = vmatpush2.bf16.msra.mxu1 %v17207_v33  ;;  %13386 = vmatprep.subr.bf16.mxu0 %v17212_v21  ;;  %v17255_v33 = vld [vmem:[#allocation9 + $0x268] ss:$16 sps:$4 sm:$0xff]   ;;  %v17260_v21 = vld [vmem:[#allocation9 + $0x4c] ss:$16 sps:$4 sm:$0xff]  }
 0x73f   : > { %13427 = vmatprep.subr.bf16.mxu1 %v17215_v46  ;;  %v17263_v46 = vld [vmem:[#allocation9 + $0x24c] ss:$16 sps:$4 sm:$0xff]  }
 0x741   : > { %13387 = vmatpush2.bf16.msra.mxu0 %v17210_v47  ;;  %v17258_v47 = vld [vmem:[#allocation9 + $0x48] ss:$16 sps:$4 sm:$0xff]  }
 0x742   : > { %13428 = vmatpush2.bf16.msra.mxu1 %v17213_v61  ;;  %13388 = vmatprep.subr.bf16.mxu0 %v17218_v8  ;;  %v17261_v61 = vld [vmem:[#allocation9 + $0x248] ss:$16 sps:$4 sm:$0xff]   ;;  %v17266_v8 = vld [vmem:[#allocation9 + $0x2c] ss:$16 sps:$4 sm:$0xff]  }
 0x743   : > { %13429 = vmatprep.subr.bf16.mxu1 %v17221_v45  ;;  %v17269_v45 = vld [vmem:[#allocation9 + $0x22c] ss:$16 sps:$4 sm:$0xff]  }
 0x745   : > { %13389 = vmatpush2.bf16.msra.mxu0 %v17216_v9  ;;  %v17264_v9 = vld [vmem:[#allocation9 + $0x28] ss:$16 sps:$4 sm:$0xff]  }
 0x746   : > { %13430 = vmatpush2.bf16.msra.mxu1 %v17219_v34  ;;  %13390 = vmatprep.subr.bf16.mxu0 %v17224_v12  ;;  %v17267_v34 = vld [vmem:[#allocation9 + $0x228] ss:$16 sps:$4 sm:$0xff]   ;;  %v17272_v12 = vld [vmem:[#allocation9 + $0xc] ss:$16 sps:$4 sm:$0xff]  }
 0x747   : > { %13431 = vmatprep.subr.bf16.mxu1 %v17227_v62  ;;  %v17275_v62 = vld [vmem:[#allocation9 + $0x20c] ss:$16 sps:$4 sm:$0xff]  }
 0x749   : > { %13391 = vmatpush2.bf16.msra.mxu0 %v17222_v49  ;;  %v17270_v49 = vld [vmem:[#allocation9 + $0x8] ss:$16 sps:$4 sm:$0xff]  }
 0x74a   : > { %13432 = vmatpush2.bf16.msra.mxu1 %v17225_v44  ;;  %13442 = vmatprep.subr.bf16.mxu0 %v17230_v37  ;;  %v17273_v44 = vld [vmem:[#allocation9 + $0x208] ss:$16 sps:$4 sm:$0xff]   ;;  %v17278_v37 = vld [vmem:[#allocation9 + $0x1ec] ss:$16 sps:$4 sm:$0xff]  }
 0x74b   : > { %13483 = vmatprep.subr.bf16.mxu1 %v17233_v22  ;;  %v17276_v22 = vld [vmem:[#allocation9 + $0x1e8] ss:$16 sps:$4 sm:$0xff]  }
 0x74c   : > { %13393 = vmatmul.mubr.bf16.vlgmr.msra.gmra.mxu0 %v19323_v54  ;;  %v13148_v2 = vpop.f32.mrf.mxu0  ;;  %v13189_v63 = vpop.f32.mrf.mxu1 }
 0x74d   : > { %13434 = vmatmul.mubr.bf16.vlgmr.msra.gmra.mxu1 %v19327_v0  ;;  %v13149_v35 = vadd.f32 %v13148_v2, %v13097_v59  ;;  %13443 = vmatpush1.bf16.msra.mxu0 %v17228_v7  ;;  %v17279_v7 = vld [vmem:[#allocation9 + $0x3e8] ss:$16 sps:$4 sm:$0xff]   ;;  %v17284_v59 = vld [vmem:[#allocation9 + $0x1cc] ss:$16 sps:$4 sm:$0xff]  }
 0x74e   : > { %13474 = vmatprep.mubr.bf16.mxu0 %v19249_v36  ;;  %13484 = vmatpush1.bf16.msra.mxu1 %v17231_v15  ;;  %v13150_v30 = vpop.f32.mrf.mxu0  ;;  %v13191_v23 = vpop.f32.mrf.mxu1  ;;  %v17287_v15 = vld [vmem:[#allocation9 + $0x3cc] ss:$16 sps:$4 sm:$0xff]  }
 0x74f   : > { %v19333_v4 = vadd.f32 %v13189_v63, %v13149_v35  ;;  %13515 = vmatprep.mubr.bf16.mxu1 %v19253_v55  ;;  %v13151_v53 = vadd.f32 %v13150_v30, %v13101_v52  ;;  %13444 = vmatprep.subr.bf16.mxu0 %v17236_v14  ;;  %v17246_v55 = vld [vmem:[#allocation9 + $0x88] ss:$16 sps:$4 sm:$0xff]   ;;  %v17290_v2 = vld [vmem:[#allocation9 + $0x1ac] ss:$16 sps:$4 sm:$0xff]  }
 0x750   : > { %13485 = vmatprep.subr.bf16.mxu1 %v17239_v5  ;;  %v13152_v41 = vpop.f32.mrf.mxu0  ;;  %v13193_v29 = vpop.f32.mrf.mxu1  ;;  %v17282_v52 = vld [vmem:[#allocation9 + $0x1c8] ss:$16 sps:$4 sm:$0xff]   ;;  %v17293_v63 = vld [vmem:[#allocation9 + $0x3ac] ss:$16 sps:$4 sm:$0xff]  }
 0x751   : > { %v19336_v51 = vadd.f32 %v13191_v23, %v13151_v53  ;;  %13445 = vmatpush1.bf16.msra.mxu0 %v17234_v56  ;;  %v17285_v14 = vld [vmem:[#allocation9 + $0x3c8] ss:$16 sps:$4 sm:$0xff]   ;;  %v17296_v56 = vld [vmem:[#allocation9 + $0x18c] ss:$16 sps:$4 sm:$0xff]  }
 0x752   : > { %13486 = vmatpush1.bf16.msra.mxu1 %v17237_v38  ;;  %v13153_v36 = vpop.f32.mrf.mxu0  ;;  %v13194_v60 = vpop.f32.mrf.mxu1  ;;  %13446 = vmatprep.subr.bf16.mxu0 %v17242_v39  ;;  %v17288_v5 = vld [vmem:[#allocation9 + $0x1a8] ss:$16 sps:$4 sm:$0xff]   ;;  %v17299_v30 = vld [vmem:[#allocation9 + $0x38c] ss:$16 sps:$4 sm:$0xff]  }
 0x753   : > { %13487 = vmatprep.subr.bf16.mxu1 %v17245_v50  ;;  %v17291_v35 = vld [vmem:[#allocation9 + $0x3a8] ss:$16 sps:$4 sm:$0xff]   ;;  %v17302_v39 = vld [vmem:[#allocation9 + $0x16c] ss:$16 sps:$4 sm:$0xff]  }
 0x754   : > { %v17294_v23 = vld [vmem:[#allocation9 + $0x188] ss:$16 sps:$4 sm:$0xff]   ;;  %v17305_v53 = vld [vmem:[#allocation9 + $0x36c] ss:$16 sps:$4 sm:$0xff]  }
 0x755   : > { %13447 = vmatpush1.bf16.msra.mxu0 %v17240_v31  ;;  %v17297_v38 = vld [vmem:[#allocation9 + $0x388] ss:$16 sps:$4 sm:$0xff]   ;;  %v17308_v29 = vld [vmem:[#allocation9 + $0x14c] ss:$16 sps:$4 sm:$0xff]  }
 0x756   : > { %13488 = vmatpush1.bf16.msra.mxu1 %v17243_v16  ;;  %13448 = vmatprep.subr.bf16.mxu0 %v17248_v6  ;;  %v17300_v50 = vld [vmem:[#allocation9 + $0x168] ss:$16 sps:$4 sm:$0xff]   ;;  %v17311_v31 = vld [vmem:[#allocation9 + $0x34c] ss:$16 sps:$4 sm:$0xff]  }
 0x757   : > { %13489 = vmatprep.subr.bf16.mxu1 %v17251_v3  ;;  %v17303_v41 = vld [vmem:[#allocation9 + $0x368] ss:$16 sps:$4 sm:$0xff]   ;;  %v17314_v16 = vld [vmem:[#allocation9 + $0x12c] ss:$16 sps:$4 sm:$0xff]  }
 0x758   : > { %v17306_v36 = vld [vmem:[#allocation9 + $0x148] ss:$16 sps:$4 sm:$0xff]   ;;  %v17317_v6 = vld [vmem:[#allocation9 + $0x32c] ss:$16 sps:$4 sm:$0xff]  }
 0x759   : > { %13449 = vmatpush1.bf16.msra.mxu0 %v17246_v55  ;;  %v17309_v60 = vld [vmem:[#allocation9 + $0x348] ss:$16 sps:$4 sm:$0xff]  }
 0x75a   : > { %13490 = vmatpush1.bf16.msra.mxu1 %v17249_v25  ;;  %13450 = vmatprep.subr.bf16.mxu0 %v17254_v32  ;;  %v17312_v3 = vld [vmem:[#allocation9 + $0x128] ss:$16 sps:$4 sm:$0xff]   ;;  %v17320_v25 = vld [vmem:[#allocation9 + $0x10c] ss:$16 sps:$4 sm:$0xff]  }
 0x75b   : > { %13491 = vmatprep.subr.bf16.mxu1 %v17257_v58  ;;  %v17315_v55 = vld [vmem:[#allocation9 + $0x328] ss:$16 sps:$4 sm:$0xff]   ;;  %v17323_v32 = vld [vmem:[#allocation9 + $0x30c] ss:$16 sps:$4 sm:$0xff]  }
 0x75c   : > { %v17318_v58 = vld [vmem:[#allocation9 + $0x108] ss:$16 sps:$4 sm:$0xff]  }
 0x75d   : > { %13451 = vmatpush1.bf16.msra.mxu0 %v17252_v19  ;;  %v17321_v19 = vld [vmem:[#allocation9 + $0x308] ss:$16 sps:$4 sm:$0xff]  }
 0x75e   : > { %13492 = vmatpush1.bf16.msra.mxu1 %v17255_v33  ;;  %13452 = vmatprep.subr.bf16.mxu0 %v17260_v21  ;;  %v17326_v33 = vld [vmem:[#allocation9 + $0x4ec] ss:$16 sps:$4 sm:$0xff]  }
 0x75f   : > { %13493 = vmatprep.subr.bf16.mxu1 %v17263_v46  ;;  %v17329_v21 = vld [vmem:[#allocation9 + $0x6ec] ss:$16 sps:$4 sm:$0xff]   ;;  %v17324_v46 = vld [vmem:[#allocation9 + $0x4e8] ss:$16 sps:$4 sm:$0xff]  }
 0x761   : > { %13453 = vmatpush1.bf16.msra.mxu0 %v17258_v47  ;;  %v17327_v47 = vld [vmem:[#allocation9 + $0x6e8] ss:$16 sps:$4 sm:$0xff]  }
 0x762   : > { %13494 = vmatpush1.bf16.msra.mxu1 %v17261_v61  ;;  %13454 = vmatprep.subr.bf16.mxu0 %v17266_v8  ;;  %v17332_v61 = vld [vmem:[#allocation9 + $0x4cc] ss:$16 sps:$4 sm:$0xff]  }
 0x763   : > { %13495 = vmatprep.subr.bf16.mxu1 %v17269_v45 }
 0x765   : > { %13455 = vmatpush1.bf16.msra.mxu0 %v17264_v9  ;;  %v17335_v9 = vld [vmem:[#allocation9 + $0x6cc] ss:$16 sps:$4 sm:$0xff]  }
 0x766   : > { %13496 = vmatpush1.bf16.msra.mxu1 %v17267_v34  ;;  %13456 = vmatprep.subr.bf16.mxu0 %v17272_v12  ;;  %v17330_v12 = vld [vmem:[#allocation9 + $0x4c8] ss:$16 sps:$4 sm:$0xff]  }
 0x767   : > { %13497 = vmatprep.subr.bf16.mxu1 %v17275_v62 }
 0x769   : > { %13457 = vmatpush1.bf16.msra.mxu0 %v17270_v49 }
 0x76a   : > { %13498 = vmatpush1.bf16.msra.mxu1 %v17273_v44  ;;  %13458 = vmatprep.subr.bf16.mxu0 %v17278_v37  ;;  %v17333_v44 = vld [vmem:[#allocation9 + $0x6c8] ss:$16 sps:$4 sm:$0xff]   ;;  %v17338_v37 = vld [vmem:[#allocation9 + $0x4ac] ss:$16 sps:$4 sm:$0xff]  }
 0x76b   : > { %13499 = vmatprep.subr.bf16.mxu1 %v17281_v1 }
 0x76d   : > { %13459 = vmatpush2.bf16.msra.mxu0 %v17276_v22  ;;  %v17341_v22 = vld [vmem:[#allocation9 + $0x6ac] ss:$16 sps:$4 sm:$0xff]  }
 0x76e   : > { %13500 = vmatpush2.bf16.msra.mxu1 %v17279_v7  ;;  %13460 = vmatprep.subr.bf16.mxu0 %v17284_v59 }
 0x76f   : > { %13501 = vmatprep.subr.bf16.mxu1 %v17287_v15 }
 0x771   : > { %13461 = vmatpush2.bf16.msra.mxu0 %v17282_v52  ;;  %v17339_v52 = vld [vmem:[#allocation9 + $0x6a8] ss:$16 sps:$4 sm:$0xff]  }
 0x772   : > { %13502 = vmatpush2.bf16.msra.mxu1 %v17285_v14  ;;  %13462 = vmatprep.subr.bf16.mxu0 %v17290_v2  ;;  %v17344_v14 = vld [vmem:[#allocation9 + $0x48c] ss:$16 sps:$4 sm:$0xff]  }
 0x773   : > { %13503 = vmatprep.subr.bf16.mxu1 %v17293_v63  ;;  %v17347_v2 = vld [vmem:[#allocation9 + $0x68c] ss:$16 sps:$4 sm:$0xff]  }
 0x774   : > { %v17350_v63 = vld [vmem:[#allocation9 + $0x46c] ss:$16 sps:$4 sm:$0xff]  }
 0x775   : > { %13463 = vmatpush2.bf16.msra.mxu0 %v17288_v5  ;;  %v17353_v5 = vld [vmem:[#allocation9 + $0x66c] ss:$16 sps:$4 sm:$0xff]  }
 0x776   : > { %13504 = vmatpush2.bf16.msra.mxu1 %v17291_v35  ;;  %13464 = vmatprep.subr.bf16.mxu0 %v17296_v56  ;;  %v17348_v35 = vld [vmem:[#allocation9 + $0x468] ss:$16 sps:$4 sm:$0xff]  }
 0x777   : > { %13505 = vmatprep.subr.bf16.mxu1 %v17299_v30  ;;  %v17351_v56 = vld [vmem:[#allocation9 + $0x668] ss:$16 sps:$4 sm:$0xff]   ;;  %v17356_v30 = vld [vmem:[#allocation9 + $0x44c] ss:$16 sps:$4 sm:$0xff]  }
 0x779   : > { %13465 = vmatpush2.bf16.msra.mxu0 %v17294_v23  ;;  %v17359_v23 = vld [vmem:[#allocation9 + $0x64c] ss:$16 sps:$4 sm:$0xff]  }
 0x77a   : > { %13506 = vmatpush2.bf16.msra.mxu1 %v17297_v38  ;;  %13466 = vmatprep.subr.bf16.mxu0 %v17302_v39  ;;  %v17354_v38 = vld [vmem:[#allocation9 + $0x448] ss:$16 sps:$4 sm:$0xff]  }
 0x77b   : > { %13507 = vmatprep.subr.bf16.mxu1 %v17305_v53  ;;  %v17357_v39 = vld [vmem:[#allocation9 + $0x648] ss:$16 sps:$4 sm:$0xff]   ;;  %v17362_v53 = vld [vmem:[#allocation9 + $0x42c] ss:$16 sps:$4 sm:$0xff]  }
 0x77d   : > { %13467 = vmatpush2.bf16.msra.mxu0 %v17300_v50  ;;  %v17365_v50 = vld [vmem:[#allocation9 + $0x62c] ss:$16 sps:$4 sm:$0xff]  }
 0x77e   : > { %13508 = vmatpush2.bf16.msra.mxu1 %v17303_v41  ;;  %13468 = vmatprep.subr.bf16.mxu0 %v17308_v29  ;;  %v17360_v41 = vld [vmem:[#allocation9 + $0x428] ss:$16 sps:$4 sm:$0xff]  }
 0x77f   : > { %13509 = vmatprep.subr.bf16.mxu1 %v17311_v31  ;;  %v17363_v29 = vld [vmem:[#allocation9 + $0x628] ss:$16 sps:$4 sm:$0xff]   ;;  %v17368_v31 = vld [vmem:[#allocation9 + $0x40c] ss:$16 sps:$4 sm:$0xff]  }
 0x781   : > { %13469 = vmatpush2.bf16.msra.mxu0 %v17306_v36  ;;  %v17371_v36 = vld [vmem:[#allocation9 + $0x60c] ss:$16 sps:$4 sm:$0xff]  }
 0x782   : > { %13510 = vmatpush2.bf16.msra.mxu1 %v17309_v60  ;;  %13470 = vmatprep.subr.bf16.mxu0 %v17314_v16  ;;  %v17366_v60 = vld [vmem:[#allocation9 + $0x408] ss:$16 sps:$4 sm:$0xff]  }
 0x783   : > { %13511 = vmatprep.subr.bf16.mxu1 %v17317_v6  ;;  %v17369_v16 = vld [vmem:[#allocation9 + $0x608] ss:$16 sps:$4 sm:$0xff]   ;;  %v17374_v6 = vld [vmem:[#allocation9 + $0x5ec] ss:$16 sps:$4 sm:$0xff]  }
 0x785   : > { %13471 = vmatpush2.bf16.msra.mxu0 %v17312_v3  ;;  %v17377_v3 = vld [vmem:[#allocation9 + $0x7ec] ss:$16 sps:$4 sm:$0xff]  }
 0x786   : > { %13512 = vmatpush2.bf16.msra.mxu1 %v17315_v55  ;;  %13472 = vmatprep.subr.bf16.mxu0 %v17320_v25  ;;  %v17372_v55 = vld [vmem:[#allocation9 + $0x5e8] ss:$16 sps:$4 sm:$0xff]  }
 0x787   : > { %13513 = vmatprep.subr.bf16.mxu1 %v17323_v32  ;;  %v17375_v25 = vld [vmem:[#allocation9 + $0x7e8] ss:$16 sps:$4 sm:$0xff]   ;;  %v17380_v32 = vld [vmem:[#allocation9 + $0x5cc] ss:$16 sps:$4 sm:$0xff]  }
 0x789   : > { %13473 = vmatpush2.bf16.msra.mxu0 %v17318_v58  ;;  %v17383_v58 = vld [vmem:[#allocation9 + $0x7cc] ss:$16 sps:$4 sm:$0xff]  }
 0x78a   : > { %13514 = vmatpush2.bf16.msra.mxu1 %v17321_v19  ;;  %13524 = vmatprep.subr.bf16.mxu0 %v17326_v33  ;;  %v17378_v19 = vld [vmem:[#allocation9 + $0x5c8] ss:$16 sps:$4 sm:$0xff]  }
 0x78b   : > { %13565 = vmatprep.subr.bf16.mxu1 %v17329_v21  ;;  %v17381_v33 = vld [vmem:[#allocation9 + $0x7c8] ss:$16 sps:$4 sm:$0xff]   ;;  %v17386_v21 = vld [vmem:[#allocation9 + $0x5ac] ss:$16 sps:$4 sm:$0xff]  }
 0x78c   : > { %v13230_v8 = vpop.f32.mrf.mxu0  ;;  %v13271_v45 = vpop.f32.mrf.mxu1  ;;  %13475 = vmatmul.mubr.bf16.vlgmr.msra.gmra.mxu0 %v19257_v40 }
 0x78d   : > { %v13231_v34 = vadd.f32 %v13230_v8, %v19333_v4  ;;  %13516 = vmatmul.mubr.bf16.vlgmr.msra.gmra.mxu1 %v19261_v18  ;;  %13525 = vmatpush1.bf16.msra.mxu0 %v17324_v46  ;;  %v17389_v46 = vld [vmem:[#allocation9 + $0x7ac] ss:$16 sps:$4 sm:$0xff]  }
 0x78e   : > { %13556 = vmatprep.mubr.bf16.mxu0 %v19269_v28  ;;  %13566 = vmatpush1.bf16.msra.mxu1 %v17327_v47  ;;  %v13232_v62 = vpop.f32.mrf.mxu0  ;;  %v13273_v49 = vpop.f32.mrf.mxu1  ;;  %v17336_v28 = vld [vmem:[#allocation9 + $0x4a8] ss:$16 sps:$4 sm:$0xff]   ;;  %v17392_v8 = vld [vmem:[#allocation9 + $0x58c] ss:$16 sps:$4 sm:$0xff]  }
 0x78f   : > { %v19342_v1 = vadd.f32 %v13271_v45, %v13231_v34  ;;  %13597 = vmatprep.mubr.bf16.mxu1 %v19273_v43  ;;  %v13233_v40 = vadd.f32 %v13232_v62, %v19336_v51  ;;  %13526 = vmatprep.subr.bf16.mxu0 %v17332_v61  ;;  %v17342_v43 = vld [vmem:[#allocation9 + $0x488] ss:$16 sps:$4 sm:$0xff]   ;;  %v17395_v45 = vld [vmem:[#allocation9 + $0x78c] ss:$16 sps:$4 sm:$0xff]  }
 0x790   : > { %v13234_v4 = vpop.f32.mrf.mxu0  ;;  %v13275_v7 = vpop.f32.mrf.mxu1  ;;  %13567 = vmatprep.subr.bf16.mxu1 %v17335_v9  ;;  %v17345_v51 = vld [vmem:[#allocation9 + $0x688] ss:$16 sps:$4 sm:$0xff]   ;;  %v17401_v62 = vld [vmem:[#allocation9 + $0x76c] ss:$16 sps:$4 sm:$0xff]  }
 0x791   : > { %v19346_v18 = vadd.f32 %v13273_v49, %v13233_v40  ;;  %13527 = vmatpush1.bf16.msra.mxu0 %v17330_v12  ;;  %v17384_v47 = vld [vmem:[#allocation9 + $0x5a8] ss:$16 sps:$4 sm:$0xff]   ;;  %v17398_v12 = vld [vmem:[#allocation9 + $0x56c] ss:$16 sps:$4 sm:$0xff]  }
 0x792   : > { %13568 = vmatpush1.bf16.msra.mxu1 %v17333_v44  ;;  %v13235_v59 = vpop.f32.mrf.mxu0  ;;  %v13276_v15 = vpop.f32.mrf.mxu1  ;;  %13528 = vmatprep.subr.bf16.mxu0 %v17338_v37  ;;  %v17387_v61 = vld [vmem:[#allocation9 + $0x7a8] ss:$16 sps:$4 sm:$0xff]   ;;  %v17404_v37 = vld [vmem:[#allocation9 + $0x54c] ss:$16 sps:$4 sm:$0xff]  }
 0x793   : > { %13569 = vmatprep.subr.bf16.mxu1 %v17341_v22  ;;  %v17390_v9 = vld [vmem:[#allocation9 + $0x588] ss:$16 sps:$4 sm:$0xff]   ;;  %v17407_v40 = vld [vmem:[#allocation9 + $0x74c] ss:$16 sps:$4 sm:$0xff]  }
 0x794   : > { %v17393_v34 = vld [vmem:[#allocation9 + $0x788] ss:$16 sps:$4 sm:$0xff]   ;;  %v17410_v7 = vld [vmem:[#allocation9 + $0x52c] ss:$16 sps:$4 sm:$0xff]  }
 0x795   : > { %13529 = vmatpush1.bf16.msra.mxu0 %v17336_v28  ;;  %v17396_v49 = vld [vmem:[#allocation9 + $0x568] ss:$16 sps:$4 sm:$0xff]   ;;  %v17413_v28 = vld [vmem:[#allocation9 + $0x72c] ss:$16 sps:$4 sm:$0xff]  }
 0x796   : > { %13570 = vmatpush1.bf16.msra.mxu1 %v17339_v52  ;;  %13530 = vmatprep.subr.bf16.mxu0 %v17344_v14  ;;  %v17399_v44 = vld [vmem:[#allocation9 + $0x768] ss:$16 sps:$4 sm:$0xff]   ;;  %v17416_v52 = vld [vmem:[#allocation9 + $0x50c] ss:$16 sps:$4 sm:$0xff]  }
 0x797   : > { %13571 = vmatprep.subr.bf16.mxu1 %v17347_v2  ;;  %v17402_v22 = vld [vmem:[#allocation9 + $0x548] ss:$16 sps:$4 sm:$0xff]   ;;  %v17419_v14 = vld [vmem:[#allocation9 + $0x70c] ss:$16 sps:$4 sm:$0xff]  }
 0x798   : > { %v17405_v4 = vld [vmem:[#allocation9 + $0x748] ss:$16 sps:$4 sm:$0xff]  }
 0x799   : > { %13531 = vmatpush1.bf16.msra.mxu0 %v17342_v43  ;;  %v17408_v59 = vld [vmem:[#allocation9 + $0x528] ss:$16 sps:$4 sm:$0xff]  }
 0x79a   : > { %13572 = vmatpush1.bf16.msra.mxu1 %v17345_v51  ;;  %13532 = vmatprep.subr.bf16.mxu0 %v17350_v63  ;;  %v17411_v15 = vld [vmem:[#allocation9 + $0x728] ss:$16 sps:$4 sm:$0xff]   ;;  %v17422_v51 = vld [vmem:[#allocation9 + $0x8ec] ss:$16 sps:$4 sm:$0xff]  }
 0x79b   : > { %13573 = vmatprep.subr.bf16.mxu1 %v17353_v5  ;;  %v17414_v2 = vld [vmem:[#allocation9 + $0x508] ss:$16 sps:$4 sm:$0xff]   ;;  %v17425_v63 = vld [vmem:[#allocation9 + $0xaec] ss:$16 sps:$4 sm:$0xff]  }
 0x79c   : > { %v17417_v43 = vld [vmem:[#allocation9 + $0x708] ss:$16 sps:$4 sm:$0xff]  }
 0x79d   : > { %13533 = vmatpush1.bf16.msra.mxu0 %v17348_v35  ;;  %v17420_v5 = vld [vmem:[#allocation9 + $0x8e8] ss:$16 sps:$4 sm:$0xff]  }
 0x79e   : > { %13574 = vmatpush1.bf16.msra.mxu1 %v17351_v56  ;;  %13534 = vmatprep.subr.bf16.mxu0 %v17356_v30  ;;  %v17423_v35 = vld [vmem:[#allocation9 + $0xae8] ss:$16 sps:$4 sm:$0xff]   ;;  %v17428_v56 = vld [vmem:[#allocation9 + $0x8cc] ss:$16 sps:$4 sm:$0xff]  }
 0x79f   : > { %13575 = vmatprep.subr.bf16.mxu1 %v17359_v23  ;;  %v17431_v23 = vld [vmem:[#allocation9 + $0xacc] ss:$16 sps:$4 sm:$0xff]  }
 0x7a1   : > { %13535 = vmatpush1.bf16.msra.mxu0 %v17354_v38 }
 0x7a2   : > { %13576 = vmatpush1.bf16.msra.mxu1 %v17357_v39  ;;  %13536 = vmatprep.subr.bf16.mxu0 %v17362_v53  ;;  %v17426_v53 = vld [vmem:[#allocation9 + $0x8c8] ss:$16 sps:$4 sm:$0xff]  }
 0x7a3   : > { %13577 = vmatprep.subr.bf16.mxu1 %v17365_v50 }
 0x7a5   : > { %13537 = vmatpush1.bf16.msra.mxu0 %v17360_v41  ;;  %v17429_v41 = vld [vmem:[#allocation9 + $0xac8] ss:$16 sps:$4 sm:$0xff]  }
 0x7a6   : > { %13578 = vmatpush1.bf16.msra.mxu1 %v17363_v29  ;;  %13538 = vmatprep.subr.bf16.mxu0 %v17368_v31  ;;  %v17434_v29 = vld [vmem:[#allocation9 + $0x8ac] ss:$16 sps:$4 sm:$0xff]  }
 0x7a7   : > { %13579 = vmatprep.subr.bf16.mxu1 %v17371_v36 }
 0x7a9   : > { %13539 = vmatpush1.bf16.msra.mxu0 %v17366_v60 }
 0x7aa   : > { %13580 = vmatpush1.bf16.msra.mxu1 %v17369_v16  ;;  %13540 = vmatprep.subr.bf16.mxu0 %v17374_v6 }
 0x7ab   : > { %13581 = vmatprep.subr.bf16.mxu1 %v17377_v3  ;;  %v17435_v3 = vld [vmem:[#allocation9 + $0xaa8] ss:$16 sps:$4 sm:$0xff]  }
 0x7ad   : > { %13541 = vmatpush2.bf16.msra.mxu0 %v17372_v55  ;;  %v17440_v55 = vld [vmem:[#allocation9 + $0x88c] ss:$16 sps:$4 sm:$0xff]  }
 0x7ae   : > { %13582 = vmatpush2.bf16.msra.mxu1 %v17375_v25  ;;  %13542 = vmatprep.subr.bf16.mxu0 %v17380_v32  ;;  %v17441_v32 = vld [vmem:[#allocation9 + $0xa88] ss:$16 sps:$4 sm:$0xff]  }
 0x7af   : > { %13583 = vmatprep.subr.bf16.mxu1 %v17383_v58  ;;  %v17446_v58 = vld [vmem:[#allocation9 + $0x86c] ss:$16 sps:$4 sm:$0xff]  }
 0x7b1   : > { %13543 = vmatpush2.bf16.msra.mxu0 %v17378_v19  ;;  %v17449_v19 = vld [vmem:[#allocation9 + $0xa6c] ss:$16 sps:$4 sm:$0xff]  }
 0x7b2   : > { %13584 = vmatpush2.bf16.msra.mxu1 %v17381_v33  ;;  %13544 = vmatprep.subr.bf16.mxu0 %v17386_v21  ;;  %v17444_v33 = vld [vmem:[#allocation9 + $0x868] ss:$16 sps:$4 sm:$0xff]  }
 0x7b3   : > { %13585 = vmatprep.subr.bf16.mxu1 %v17389_v46  ;;  %v17447_v21 = vld [vmem:[#allocation9 + $0xa68] ss:$16 sps:$4 sm:$0xff]   ;;  %v17452_v46 = vld [vmem:[#allocation9 + $0x84c] ss:$16 sps:$4 sm:$0xff]  }
 0x7b5   : > { %13545 = vmatpush2.bf16.msra.mxu0 %v17384_v47  ;;  %v17455_v47 = vld [vmem:[#allocation9 + $0xa4c] ss:$16 sps:$4 sm:$0xff]  }
 0x7b6   : > { %13586 = vmatpush2.bf16.msra.mxu1 %v17387_v61  ;;  %13546 = vmatprep.subr.bf16.mxu0 %v17392_v8  ;;  %v17450_v61 = vld [vmem:[#allocation9 + $0x848] ss:$16 sps:$4 sm:$0xff]  }
 0x7b7   : > { %13587 = vmatprep.subr.bf16.mxu1 %v17395_v45  ;;  %v17453_v8 = vld [vmem:[#allocation9 + $0xa48] ss:$16 sps:$4 sm:$0xff]   ;;  %v17458_v45 = vld [vmem:[#allocation9 + $0x82c] ss:$16 sps:$4 sm:$0xff]  }
 0x7b9   : > { %13547 = vmatpush2.bf16.msra.mxu0 %v17390_v9  ;;  %v17461_v9 = vld [vmem:[#allocation9 + $0xa2c] ss:$16 sps:$4 sm:$0xff]  }
 0x7ba   : > { %13588 = vmatpush2.bf16.msra.mxu1 %v17393_v34  ;;  %13548 = vmatprep.subr.bf16.mxu0 %v17398_v12  ;;  %v17456_v34 = vld [vmem:[#allocation9 + $0x828] ss:$16 sps:$4 sm:$0xff]  }
 0x7bb   : > { %13589 = vmatprep.subr.bf16.mxu1 %v17401_v62  ;;  %v17459_v12 = vld [vmem:[#allocation9 + $0xa28] ss:$16 sps:$4 sm:$0xff]   ;;  %v17464_v62 = vld [vmem:[#allocation9 + $0x80c] ss:$16 sps:$4 sm:$0xff]  }
 0x7bd   : > { %13549 = vmatpush2.bf16.msra.mxu0 %v17396_v49  ;;  %v17467_v49 = vld [vmem:[#allocation9 + $0xa0c] ss:$16 sps:$4 sm:$0xff]  }
 0x7be   : > { %13590 = vmatpush2.bf16.msra.mxu1 %v17399_v44  ;;  %13550 = vmatprep.subr.bf16.mxu0 %v17404_v37  ;;  %v17462_v44 = vld [vmem:[#allocation9 + $0x808] ss:$16 sps:$4 sm:$0xff]  }
 0x7bf   : > { %13591 = vmatprep.subr.bf16.mxu1 %v17407_v40  ;;  %v17465_v37 = vld [vmem:[#allocation9 + $0xa08] ss:$16 sps:$4 sm:$0xff]   ;;  %v17470_v40 = vld [vmem:[#allocation9 + $0x9ec] ss:$16 sps:$4 sm:$0xff]  }
 0x7c1   : > { %13551 = vmatpush2.bf16.msra.mxu0 %v17402_v22  ;;  %v17473_v22 = vld [vmem:[#allocation9 + $0xbec] ss:$16 sps:$4 sm:$0xff]  }
 0x7c2   : > { %13592 = vmatpush2.bf16.msra.mxu1 %v17405_v4  ;;  %13552 = vmatprep.subr.bf16.mxu0 %v17410_v7  ;;  %v17468_v4 = vld [vmem:[#allocation9 + $0x9e8] ss:$16 sps:$4 sm:$0xff]  }
 0x7c3   : > { %13593 = vmatprep.subr.bf16.mxu1 %v17413_v28  ;;  %v17471_v7 = vld [vmem:[#allocation9 + $0xbe8] ss:$16 sps:$4 sm:$0xff]   ;;  %v17476_v28 = vld [vmem:[#allocation9 + $0x9cc] ss:$16 sps:$4 sm:$0xff]  }
 0x7c5   : > { %13553 = vmatpush2.bf16.msra.mxu0 %v17408_v59  ;;  %v17479_v59 = vld [vmem:[#allocation9 + $0xbcc] ss:$16 sps:$4 sm:$0xff]  }
 0x7c6   : > { %13594 = vmatpush2.bf16.msra.mxu1 %v17411_v15  ;;  %13554 = vmatprep.subr.bf16.mxu0 %v17416_v52  ;;  %v17474_v15 = vld [vmem:[#allocation9 + $0x9c8] ss:$16 sps:$4 sm:$0xff]  }
 0x7c7   : > { %13595 = vmatprep.subr.bf16.mxu1 %v17419_v14  ;;  %v17477_v52 = vld [vmem:[#allocation9 + $0xbc8] ss:$16 sps:$4 sm:$0xff]   ;;  %v17482_v14 = vld [vmem:[#allocation9 + $0x9ac] ss:$16 sps:$4 sm:$0xff]  }
 0x7c9   : > { %13555 = vmatpush2.bf16.msra.mxu0 %v17414_v2  ;;  %v17485_v2 = vld [vmem:[#allocation9 + $0xbac] ss:$16 sps:$4 sm:$0xff]  }
 0x7ca   : > { %13596 = vmatpush2.bf16.msra.mxu1 %v17417_v43  ;;  %13606 = vmatprep.subr.bf16.mxu0 %v17422_v51  ;;  %v17480_v43 = vld [vmem:[#allocation9 + $0x9a8] ss:$16 sps:$4 sm:$0xff]  }
 0x7cb   : > { %13647 = vmatprep.subr.bf16.mxu1 %v17425_v63  ;;  %v17483_v51 = vld [vmem:[#allocation9 + $0xba8] ss:$16 sps:$4 sm:$0xff]   ;;  %v17488_v63 = vld [vmem:[#allocation9 + $0x98c] ss:$16 sps:$4 sm:$0xff]  }
 0x7cc   : > { %v13312_v30 = vpop.f32.mrf.mxu0  ;;  %13557 = vmatmul.mubr.bf16.vlgmr.msra.gmra.mxu0 %v19282_v27 }
 0x7cd   : > { %v13313_v38 = vadd.f32 %v13312_v30, %v19342_v1  ;;  %v13353_v39 = vpop.f32.mrf.mxu1  ;;  %13598 = vmatmul.mubr.bf16.vlgmr.msra.gmra.mxu1 %v19286_v42  ;;  %13607 = vmatpush1.bf16.msra.mxu0 %v17420_v5  ;;  %v17437_v1 = vld [vmem:[#allocation9 + $0xaac] ss:$16 sps:$4 sm:$0xff]  }
 0x7ce   : > { %13638 = vmatprep.mubr.bf16.mxu0 %v19290_v20  ;;  %13648 = vmatpush1.bf16.msra.mxu1 %v17423_v35  ;;  %v13314_v50 = vpop.f32.mrf.mxu0  ;;  %v17432_v20 = vld [vmem:[#allocation9 + $0x8a8] ss:$16 sps:$4 sm:$0xff]   ;;  %v17491_v5 = vld [vmem:[#allocation9 + $0xb8c] ss:$16 sps:$4 sm:$0xff]  }
 0x7cf   : > { %v19352_v31 = vadd.f32 %v13353_v39, %v13313_v38  ;;  %13679 = vmatprep.mubr.bf16.mxu1 %v19296_v24  ;;  %v13315_v27 = vadd.f32 %v13314_v50, %v19346_v18  ;;  %v13355_v36 = vpop.f32.mrf.mxu1  ;;  %13608 = vmatprep.subr.bf16.mxu0 %v17428_v56  ;;  %v17443_v24 = vld [vmem:[#allocation9 + $0xa8c] ss:$16 sps:$4 sm:$0xff]   ;;  %v17438_v18 = vld [vmem:[#allocation9 + $0x888] ss:$16 sps:$4 sm:$0xff]  }
 0x7d0   : > { %v13316_v60 = vpop.f32.mrf.mxu0  ;;  %13649 = vmatprep.subr.bf16.mxu1 %v17431_v23  ;;  %v17486_v35 = vld [vmem:[#allocation9 + $0x988] ss:$16 sps:$4 sm:$0xff]   ;;  %v17494_v30 = vld [vmem:[#allocation9 + $0x96c] ss:$16 sps:$4 sm:$0xff]  }
 0x7d1   : > { %v19356_v42 = vadd.f32 %v13355_v36, %v13315_v27  ;;  %v13357_v16 = vpop.f32.mrf.mxu1  ;;  %13609 = vmatpush1.bf16.msra.mxu0 %v17426_v53  ;;  %v17489_v56 = vld [vmem:[#allocation9 + $0xb88] ss:$16 sps:$4 sm:$0xff]   ;;  %v17497_v23 = vld [vmem:[#allocation9 + $0xb6c] ss:$16 sps:$4 sm:$0xff]  }
 0x7d2   : > { %13650 = vmatpush1.bf16.msra.mxu1 %v17429_v41  ;;  %v13317_v6 = vpop.f32.mrf.mxu0  ;;  %13610 = vmatprep.subr.bf16.mxu0 %v17434_v29  ;;  %v17492_v38 = vld [vmem:[#allocation9 + $0x968] ss:$16 sps:$4 sm:$0xff]   ;;  %v17500_v53 = vld [vmem:[#allocation9 + $0x94c] ss:$16 sps:$4 sm:$0xff]  }
 0x7d3   : > { %v13358_v25 = vpop.f32.mrf.mxu1  ;;  %13651 = vmatprep.subr.bf16.mxu1 %v17437_v1  ;;  %v17495_v39 = vld [vmem:[#allocation9 + $0xb68] ss:$16 sps:$4 sm:$0xff]   ;;  %v17503_v50 = vld [vmem:[#allocation9 + $0xb4c] ss:$16 sps:$4 sm:$0xff]  }
 0x7d4   : > { %v17498_v41 = vld [vmem:[#allocation9 + $0x948] ss:$16 sps:$4 sm:$0xff]   ;;  %v17506_v27 = vld [vmem:[#allocation9 + $0x92c] ss:$16 sps:$4 sm:$0xff]  }
 0x7d5   : > { %13611 = vmatpush1.bf16.msra.mxu0 %v17432_v20  ;;  %v17501_v29 = vld [vmem:[#allocation9 + $0xb48] ss:$16 sps:$4 sm:$0xff]   ;;  %v17509_v36 = vld [vmem:[#allocation9 + $0xb2c] ss:$16 sps:$4 sm:$0xff]  }
 0x7d6   : > { %13652 = vmatpush1.bf16.msra.mxu1 %v17435_v3  ;;  %13612 = vmatprep.subr.bf16.mxu0 %v17440_v55  ;;  %v17504_v1 = vld [vmem:[#allocation9 + $0x928] ss:$16 sps:$4 sm:$0xff]   ;;  %v17512_v16 = vld [vmem:[#allocation9 + $0x90c] ss:$16 sps:$4 sm:$0xff]  }
 0x7d7   : > { %13653 = vmatprep.subr.bf16.mxu1 %v17443_v24  ;;  %v17507_v60 = vld [vmem:[#allocation9 + $0xb28] ss:$16 sps:$4 sm:$0xff]   ;;  %v17515_v20 = vld [vmem:[#allocation9 + $0xb0c] ss:$16 sps:$4 sm:$0xff]  }
 0x7d8   : > { %v17510_v6 = vld [vmem:[#allocation9 + $0x908] ss:$16 sps:$4 sm:$0xff]   ;;  %v17518_v55 = vld [vmem:[#allocation9 + $0xcec] ss:$16 sps:$4 sm:$0xff]  }
 0x7d9   : > { %13613 = vmatpush1.bf16.msra.mxu0 %v17438_v18  ;;  %v17513_v3 = vld [vmem:[#allocation9 + $0xb08] ss:$16 sps:$4 sm:$0xff]   ;;  %v17521_v25 = vld [vmem:[#allocation9 + $0xeec] ss:$16 sps:$4 sm:$0xff]  }
 0x7da   : > { %13654 = vmatpush1.bf16.msra.mxu1 %v17441_v32  ;;  %13614 = vmatprep.subr.bf16.mxu0 %v17446_v58  ;;  %v17516_v24 = vld [vmem:[#allocation9 + $0xce8] ss:$16 sps:$4 sm:$0xff]   ;;  %v17524_v32 = vld [vmem:[#allocation9 + $0xccc] ss:$16 sps:$4 sm:$0xff]  }
 0x7db   : > { %13655 = vmatprep.subr.bf16.mxu1 %v17449_v19  ;;  %v17519_v18 = vld [vmem:[#allocation9 + $0xee8] ss:$16 sps:$4 sm:$0xff]   ;;  %v17527_v19 = vld [vmem:[#allocation9 + $0xecc] ss:$16 sps:$4 sm:$0xff]  }
 0x7dd   : > { %13615 = vmatpush1.bf16.msra.mxu0 %v17444_v33 }
 0x7de   : > { %13656 = vmatpush1.bf16.msra.mxu1 %v17447_v21  ;;  %13616 = vmatprep.subr.bf16.mxu0 %v17452_v46  ;;  %v17522_v46 = vld [vmem:[#allocation9 + $0xcc8] ss:$16 sps:$4 sm:$0xff]  }
 0x7df   : > { %13657 = vmatprep.subr.bf16.mxu1 %v17455_v47 }
 0x7e1   : > { %13617 = vmatpush1.bf16.msra.mxu0 %v17450_v61  ;;  %v17525_v61 = vld [vmem:[#allocation9 + $0xec8] ss:$16 sps:$4 sm:$0xff]  }
 0x7e2   : > { %13658 = vmatpush1.bf16.msra.mxu1 %v17453_v8  ;;  %13618 = vmatprep.subr.bf16.mxu0 %v17458_v45  ;;  %v17530_v8 = vld [vmem:[#allocation9 + $0xcac] ss:$16 sps:$4 sm:$0xff]  }
 0x7e3   : > { %13659 = vmatprep.subr.bf16.mxu1 %v17461_v9 }
 0x7e5   : > { %13619 = vmatpush1.bf16.msra.mxu0 %v17456_v34  ;;  %v17533_v34 = vld [vmem:[#allocation9 + $0xeac] ss:$16 sps:$4 sm:$0xff]  }
 0x7e6   : > { %13660 = vmatpush1.bf16.msra.mxu1 %v17459_v12  ;;  %13620 = vmatprep.subr.bf16.mxu0 %v17464_v62  ;;  %v17528_v62 = vld [vmem:[#allocation9 + $0xca8] ss:$16 sps:$4 sm:$0xff]  }
 0x7e7   : > { %13661 = vmatprep.subr.bf16.mxu1 %v17467_v49  ;;  %v17531_v49 = vld [vmem:[#allocation9 + $0xea8] ss:$16 sps:$4 sm:$0xff]  }
 0x7e9   : > { %13621 = vmatpush1.bf16.msra.mxu0 %v17462_v44  ;;  %v17536_v44 = vld [vmem:[#allocation9 + $0xc8c] ss:$16 sps:$4 sm:$0xff]  }
 0x7ea   : > { %13662 = vmatpush1.bf16.msra.mxu1 %v17465_v37  ;;  %13622 = vmatprep.subr.bf16.mxu0 %v17470_v40 }
 0x7eb   : > { %13663 = vmatprep.subr.bf16.mxu1 %v17473_v22 }
 0x7ed   : > { %13623 = vmatpush2.bf16.msra.mxu0 %v17468_v4  ;;  %v17534_v4 = vld [vmem:[#allocation9 + $0xc88] ss:$16 sps:$4 sm:$0xff]  }
 0x7ee   : > { %13664 = vmatpush2.bf16.msra.mxu1 %v17471_v7  ;;  %13624 = vmatprep.subr.bf16.mxu0 %v17476_v28  ;;  %v17537_v7 = vld [vmem:[#allocation9 + $0xe88] ss:$16 sps:$4 sm:$0xff]   ;;  %v17542_v28 = vld [vmem:[#allocation9 + $0xc6c] ss:$16 sps:$4 sm:$0xff]  }
 0x7ef   : > { %13665 = vmatprep.subr.bf16.mxu1 %v17479_v59  ;;  %v17545_v59 = vld [vmem:[#allocation9 + $0xe6c] ss:$16 sps:$4 sm:$0xff]  }
 0x7f1   : > { %13625 = vmatpush2.bf16.msra.mxu0 %v17474_v15  ;;  %v17540_v15 = vld [vmem:[#allocation9 + $0xc68] ss:$16 sps:$4 sm:$0xff]  }
 0x7f2   : > { %13666 = vmatpush2.bf16.msra.mxu1 %v17477_v52  ;;  %13626 = vmatprep.subr.bf16.mxu0 %v17482_v14  ;;  %v17543_v52 = vld [vmem:[#allocation9 + $0xe68] ss:$16 sps:$4 sm:$0xff]   ;;  %v17548_v14 = vld [vmem:[#allocation9 + $0xc4c] ss:$16 sps:$4 sm:$0xff]  }
 0x7f3   : > { %13667 = vmatprep.subr.bf16.mxu1 %v17485_v2  ;;  %v17551_v2 = vld [vmem:[#allocation9 + $0xe4c] ss:$16 sps:$4 sm:$0xff]  }
 0x7f5   : > { %13627 = vmatpush2.bf16.msra.mxu0 %v17480_v43  ;;  %v17546_v43 = vld [vmem:[#allocation9 + $0xc48] ss:$16 sps:$4 sm:$0xff]  }
 0x7f6   : > { %13668 = vmatpush2.bf16.msra.mxu1 %v17483_v51  ;;  %13628 = vmatprep.subr.bf16.mxu0 %v17488_v63  ;;  %v17549_v51 = vld [vmem:[#allocation9 + $0xe48] ss:$16 sps:$4 sm:$0xff]   ;;  %v17554_v63 = vld [vmem:[#allocation9 + $0xc2c] ss:$16 sps:$4 sm:$0xff]  }
 0x7f7   : > { %13669 = vmatprep.subr.bf16.mxu1 %v17491_v5  ;;  %v17557_v5 = vld [vmem:[#allocation9 + $0xe2c] ss:$16 sps:$4 sm:$0xff]  }
 0x7f9   : > { %13629 = vmatpush2.bf16.msra.mxu0 %v17486_v35  ;;  %v17552_v35 = vld [vmem:[#allocation9 + $0xc28] ss:$16 sps:$4 sm:$0xff]  }
 0x7fa   : > { %13670 = vmatpush2.bf16.msra.mxu1 %v17489_v56  ;;  %13630 = vmatprep.subr.bf16.mxu0 %v17494_v30  ;;  %v17555_v56 = vld [vmem:[#allocation9 + $0xe28] ss:$16 sps:$4 sm:$0xff]   ;;  %v17560_v30 = vld [vmem:[#allocation9 + $0xc0c] ss:$16 sps:$4 sm:$0xff]  }
 0x7fb   : > { %13671 = vmatprep.subr.bf16.mxu1 %v17497_v23  ;;  %v17563_v23 = vld [vmem:[#allocation9 + $0xe0c] ss:$16 sps:$4 sm:$0xff]  }
 0x7fd   : > { %13631 = vmatpush2.bf16.msra.mxu0 %v17492_v38  ;;  %v17558_v38 = vld [vmem:[#allocation9 + $0xc08] ss:$16 sps:$4 sm:$0xff]  }
 0x7fe   : > { %13672 = vmatpush2.bf16.msra.mxu1 %v17495_v39  ;;  %13632 = vmatprep.subr.bf16.mxu0 %v17500_v53  ;;  %v17561_v39 = vld [vmem:[#allocation9 + $0xe08] ss:$16 sps:$4 sm:$0xff]   ;;  %v17566_v53 = vld [vmem:[#allocation9 + $0xdec] ss:$16 sps:$4 sm:$0xff]  }
 0x7ff   : > { %13673 = vmatprep.subr.bf16.mxu1 %v17503_v50  ;;  %v17569_v50 = vld [vmem:[#allocation9 + $0xfec] ss:$16 sps:$4 sm:$0xff]  }
 0x801   : > { %13633 = vmatpush2.bf16.msra.mxu0 %v17498_v41  ;;  %v17564_v41 = vld [vmem:[#allocation9 + $0xde8] ss:$16 sps:$4 sm:$0xff]  }
 0x802   : > { %13674 = vmatpush2.bf16.msra.mxu1 %v17501_v29  ;;  %13634 = vmatprep.subr.bf16.mxu0 %v17506_v27  ;;  %v17567_v29 = vld [vmem:[#allocation9 + $0xfe8] ss:$16 sps:$4 sm:$0xff]   ;;  %v17572_v27 = vld [vmem:[#allocation9 + $0xdcc] ss:$16 sps:$4 sm:$0xff]  }
 0x803   : > { %13675 = vmatprep.subr.bf16.mxu1 %v17509_v36  ;;  %v17575_v36 = vld [vmem:[#allocation9 + $0xfcc] ss:$16 sps:$4 sm:$0xff]  }
 0x805   : > { %13635 = vmatpush2.bf16.msra.mxu0 %v17504_v1  ;;  %v17570_v1 = vld [vmem:[#allocation9 + $0xdc8] ss:$16 sps:$4 sm:$0xff]  }
 0x806   : > { %13676 = vmatpush2.bf16.msra.mxu1 %v17507_v60  ;;  %13636 = vmatprep.subr.bf16.mxu0 %v17512_v16  ;;  %v17573_v60 = vld [vmem:[#allocation9 + $0xfc8] ss:$16 sps:$4 sm:$0xff]   ;;  %v17578_v16 = vld [vmem:[#allocation9 + $0xdac] ss:$16 sps:$4 sm:$0xff]  }
 0x807   : > { %13677 = vmatprep.subr.bf16.mxu1 %v17515_v20  ;;  %v17581_v20 = vld [vmem:[#allocation9 + $0xfac] ss:$16 sps:$4 sm:$0xff]  }
 0x809   : > { %13637 = vmatpush2.bf16.msra.mxu0 %v17510_v6  ;;  %v17576_v6 = vld [vmem:[#allocation9 + $0xda8] ss:$16 sps:$4 sm:$0xff]  }
 0x80a   : > { %13678 = vmatpush2.bf16.msra.mxu1 %v17513_v3  ;;  %13688 = vmatprep.subr.bf16.mxu0 %v17518_v55  ;;  %v17579_v3 = vld [vmem:[#allocation9 + $0xfa8] ss:$16 sps:$4 sm:$0xff]   ;;  %v17584_v55 = vld [vmem:[#allocation9 + $0xd8c] ss:$16 sps:$4 sm:$0xff]  }
 0x80b   : > { %13729 = vmatprep.subr.bf16.mxu1 %v17521_v25  ;;  %v17587_v25 = vld [vmem:[#allocation9 + $0xf8c] ss:$16 sps:$4 sm:$0xff]  }
 0x80c   : > { %v13394_v58 = vpop.f32.mrf.mxu0  ;;  %13639 = vmatmul.mubr.bf16.vlgmr.msra.gmra.mxu0 %v19302_v57 }
 0x80d   : > { %v13395_v33 = vadd.f32 %v13394_v58, %v19352_v31  ;;  %v13435_v21 = vpop.f32.mrf.mxu1  ;;  %13680 = vmatmul.mubr.bf16.vlgmr.msra.gmra.mxu1 %v19306_v48  ;;  %13689 = vmatpush1.bf16.msra.mxu0 %v17516_v24  ;;  %v17582_v24 = vld [vmem:[#allocation9 + $0xd88] ss:$16 sps:$4 sm:$0xff]   ;;  %v17593_v58 = vld [vmem:[#allocation9 + $0xf6c] ss:$16 sps:$4 sm:$0xff]  }
 0x80e   : > { %13720 = vmatprep.mubr.bf16.mxu0 %v19311_v26  ;;  %13730 = vmatpush1.bf16.msra.mxu1 %v17519_v18  ;;  %v13396_v47 = vpop.f32.mrf.mxu0  ;;  %v17585_v18 = vld [vmem:[#allocation9 + $0xf88] ss:$16 sps:$4 sm:$0xff]  }
 0x80f   : > { %v13436_v45 = vadd.f32 %v13435_v21, %v13395_v33  ;;  %13761 = vmatprep.mubr.bf16.mxu1 %v19316_v10  ;;  %v13397_v9 = vadd.f32 %v13396_v47, %v19356_v42  ;;  %v13437_v57 = vpop.f32.mrf.mxu1  ;;  %13690 = vmatprep.subr.bf16.mxu0 %v17524_v32  ;;  %v17539_v10 = vld [vmem:[#allocation9 + $0xe8c] ss:$16 sps:$4 sm:$0xff]   ;;  %v17591_v33 = vld [vmem:[#allocation9 + $0xf68] ss:$16 sps:$4 sm:$0xff]  }
 0x810   : > { %v13398_v31 = vpop.f32.mrf.mxu0  ;;  %13731 = vmatprep.subr.bf16.mxu1 %v17527_v19  ;;  %v17590_v32 = vld [vmem:[#allocation9 + $0xd6c] ss:$16 sps:$4 sm:$0xff]   ;;  %v17588_v19 = vld [vmem:[#allocation9 + $0xd68] ss:$16 sps:$4 sm:$0xff]  }
 0x811   : > { %v13438_v12 = vadd.f32 %v13437_v57, %v13397_v9  ;;  %v13439_v48 = vpop.f32.mrf.mxu1  ;;  %13691 = vmatpush1.bf16.msra.mxu0 %v17522_v46  ;;  %v13770_v37 = vmax.f32 %v13436_v45, 0.0  ;;  %v17596_v21 = vld [vmem:[#allocation9 + $0xd4c] ss:$16 sps:$4 sm:$0xff]   ;;  %v17594_v47 = vld [vmem:[#allocation9 + $0xd48] ss:$16 sps:$4 sm:$0xff]  }
 0x812   : > { %13732 = vmatpush1.bf16.msra.mxu1 %v17525_v61  ;;  %v13399_v26 = vpop.f32.mrf.mxu0  ;;  %13692 = vmatprep.subr.bf16.mxu0 %v17530_v8  ;;  %v17599_v46 = vld [vmem:[#allocation9 + $0xf4c] ss:$16 sps:$4 sm:$0xff]   ;;  %v17597_v61 = vld [vmem:[#allocation9 + $0xf48] ss:$16 sps:$4 sm:$0xff]  }
 0x813   : > { %v13771_v40 = vmax.f32 %v13438_v12, 0.0  ;;  %v13440_v22 = vpop.f32.mrf.mxu1  ;;  %13733 = vmatprep.subr.bf16.mxu1 %v17533_v34  ;;  %v17602_v8 = vld [vmem:[#allocation9 + $0xd2c] ss:$16 sps:$4 sm:$0xff]   ;;  %v17600_v9 = vld [vmem:[#allocation9 + $0xd28] ss:$16 sps:$4 sm:$0xff]  }
 0x814   : > { %v17605_v45 = vld [vmem:[#allocation9 + $0xf2c] ss:$16 sps:$4 sm:$0xff]   ;;  %v17603_v57 = vld [vmem:[#allocation9 + $0xf28] ss:$16 sps:$4 sm:$0xff]  }
 0x815   : > { %v19364_v42 = vcombine.low %v13770_v37, %v13771_v40  ;;  %13693 = vmatpush1.bf16.msra.mxu0 %v17528_v62  ;;  %v17608_v34 = vld [vmem:[#allocation9 + $0xd0c] ss:$16 sps:$4 sm:$0xff]   ;;  %v17606_v12 = vld [vmem:[#allocation9 + $0xd08] ss:$16 sps:$4 sm:$0xff]   ;;  %v17615_v62 = vld [vmem:[#allocation10] sm:$0xf] }
 0x816   : > { %13734 = vmatpush1.bf16.msra.mxu1 %v17531_v49  ;;  %13694 = vmatprep.subr.bf16.mxu0 %v17536_v44  ;;  %v17611_v31 = vld [vmem:[#allocation9 + $0xf0c] ss:$16 sps:$4 sm:$0xff]   ;;  %v17609_v48 = vld [vmem:[#allocation9 + $0xf08] ss:$16 sps:$4 sm:$0xff]   ;;  %v13105_v26 = vrot.slane %v17615_v62, %v18519_v13  ;;  %v13109_v49 = vrot.slane %v17615_v62, %v18522_v17 }
 0x817   : > { %13735 = vmatprep.subr.bf16.mxu1 %v17539_v10 }
 0x819   : > { %13695 = vmatpush1.bf16.msra.mxu0 %v17534_v4 }
 0x81a   : > { %13736 = vmatpush1.bf16.msra.mxu1 %v17537_v7  ;;  %13696 = vmatprep.subr.bf16.mxu0 %v17542_v28 }
 0x81b   : > { %13737 = vmatprep.subr.bf16.mxu1 %v17545_v59 }
 0x81d   : > { %13697 = vmatpush1.bf16.msra.mxu0 %v17540_v15 }
 0x81e   : > { %13738 = vmatpush1.bf16.msra.mxu1 %v17543_v52  ;;  %13698 = vmatprep.subr.bf16.mxu0 %v17548_v14 }
 0x81f   : > { %13739 = vmatprep.subr.bf16.mxu1 %v17551_v2 }
 0x821   : > { %13699 = vmatpush1.bf16.msra.mxu0 %v17546_v43 }
 0x822   : > { %13740 = vmatpush1.bf16.msra.mxu1 %v17549_v51  ;;  %13700 = vmatprep.subr.bf16.mxu0 %v17554_v63 }
 0x823   : > { %13741 = vmatprep.subr.bf16.mxu1 %v17557_v5 }
 0x825   : > { %13701 = vmatpush1.bf16.msra.mxu0 %v17552_v35 }
 0x826   : > { %13742 = vmatpush1.bf16.msra.mxu1 %v17555_v56  ;;  %13702 = vmatprep.subr.bf16.mxu0 %v17560_v30 }
 0x827   : > { %13743 = vmatprep.subr.bf16.mxu1 %v17563_v23 }
 0x829   : > { %13703 = vmatpush1.bf16.msra.mxu0 %v17558_v38 }
 0x82a   : > { %13744 = vmatpush1.bf16.msra.mxu1 %v17561_v39  ;;  %13704 = vmatprep.subr.bf16.mxu0 %v17566_v53 }
 0x82b   : > { %13745 = vmatprep.subr.bf16.mxu1 %v17569_v50 }
 0x82d   : > { %13705 = vmatpush2.bf16.msra.mxu0 %v17564_v41 }
 0x82e   : > { %13746 = vmatpush2.bf16.msra.mxu1 %v17567_v29  ;;  %13706 = vmatprep.subr.bf16.mxu0 %v17572_v27 }
 0x82f   : > { %13747 = vmatprep.subr.bf16.mxu1 %v17575_v36 }
 0x831   : > { %13707 = vmatpush2.bf16.msra.mxu0 %v17570_v1 }
 0x832   : > { %13748 = vmatpush2.bf16.msra.mxu1 %v17573_v60  ;;  %13708 = vmatprep.subr.bf16.mxu0 %v17578_v16 }
 0x833   : > { %13749 = vmatprep.subr.bf16.mxu1 %v17581_v20 }
 0x835   : > { %13709 = vmatpush2.bf16.msra.mxu0 %v17576_v6 }
 0x836   : > { %13750 = vmatpush2.bf16.msra.mxu1 %v17579_v3  ;;  %13710 = vmatprep.subr.bf16.mxu0 %v17584_v55 }
 0x837   : > { %13751 = vmatprep.subr.bf16.mxu1 %v17587_v25 }
 0x839   : > { %13711 = vmatpush2.bf16.msra.mxu0 %v17582_v24 }
 0x83a   : > { %13752 = vmatpush2.bf16.msra.mxu1 %v17585_v18  ;;  %13712 = vmatprep.subr.bf16.mxu0 %v17590_v32 }
 0x83b   : > { %13753 = vmatprep.subr.bf16.mxu1 %v17593_v58 }
 0x83d   : > { %13713 = vmatpush2.bf16.msra.mxu0 %v17588_v19 }
 0x83e   : > { %13754 = vmatpush2.bf16.msra.mxu1 %v17591_v33  ;;  %13714 = vmatprep.subr.bf16.mxu0 %v17596_v21 }
 0x83f   : > { %13755 = vmatprep.subr.bf16.mxu1 %v17599_v46 }
 0x841   : > { %13715 = vmatpush2.bf16.msra.mxu0 %v17594_v47 }
 0x842   : > { %13756 = vmatpush2.bf16.msra.mxu1 %v17597_v61  ;;  %13716 = vmatprep.subr.bf16.mxu0 %v17602_v8  ;;  %v13786_v8 = vrot.slane %v19364_v42, %v17991_v11 }
 0x843   : > { %13757 = vmatprep.subr.bf16.mxu1 %v17605_v45 }
 0x845   : > { %13717 = vmatpush2.bf16.msra.mxu0 %v17600_v9 }
 0x846   : > { %13758 = vmatpush2.bf16.msra.mxu1 %v17603_v57  ;;  %13718 = vmatprep.subr.bf16.mxu0 %v17608_v34  ;;  %v19464_v57 = vlaneseq }
 0x847   : > { %13759 = vmatprep.subr.bf16.mxu1 %v17611_v31 }
 0x848   : > { %vm13805_vm13 = vcmp.lt.s32.totalorder %v19464_v57, 512 }
 0x849   : > { %13719 = vmatpush2.bf16.msra.mxu0 %v17606_v12 }
 0x84a   : > { %13760 = vmatpush2.bf16.msra.mxu1 %v17609_v48 }
 0x84c   : > { %v13476_v44 = vpop.f32.mrf.mxu0  ;;  %13721 = vmatmul.mubr.bf16.vlgmr.msra.gmra.mxu0 %v19323_v54 }
 0x84d   : > { %v13477_v37 = vadd.f32 %v13476_v44, %v13105_v26  ;;  %v13517_v40 = vpop.f32.mrf.mxu1  ;;  %13762 = vmatmul.mubr.bf16.vlgmr.msra.gmra.mxu1 %v19327_v0 }
 0x84e   : > { %v13478_v22 = vpop.f32.mrf.mxu0 }
 0x84f   : > { %v13518_v10 = vadd.f32 %v13517_v40, %v13477_v37  ;;  %v13479_v4 = vadd.f32 %v13478_v22, %v13109_v49  ;;  %v13519_v7 = vpop.f32.mrf.mxu1 }
 0x850   : > { %v13480_v28 = vpop.f32.mrf.mxu0 }
 0x851   : > { %v13520_v59 = vadd.f32 %v13519_v7, %v13479_v4  ;;  %v13521_v15 = vpop.f32.mrf.mxu1 }
 0x852   : > { %v13481_v52 = vpop.f32.mrf.mxu0 }
 0x853   : > { %v13522_v14 = vpop.f32.mrf.mxu1 }
 0x88c   : > { %v13558_v13 = vpop.f32.mrf.mxu0 }
 0x88d   : > { %v13559_v2 = vadd.f32 %v13558_v13, %v13518_v10  ;;  %v13599_v43 = vpop.f32.mrf.mxu1 }
 0x88e   : > { %v13560_v17 = vpop.f32.mrf.mxu0 }
 0x88f   : > { %v13600_v51 = vadd.f32 %v13599_v43, %v13559_v2  ;;  %v13561_v63 = vadd.f32 %v13560_v17, %v13520_v59  ;;  %v13601_v54 = vpop.f32.mrf.mxu1 }
 0x890   : > { %v13562_v5 = vpop.f32.mrf.mxu0 }
 0x891   : > { %v13602_v35 = vadd.f32 %v13601_v54, %v13561_v63  ;;  %v13603_v56 = vpop.f32.mrf.mxu1 }
 0x892   : > { %v13563_v0 = vpop.f32.mrf.mxu0 }
 0x893   : > { %v13604_v30 = vpop.f32.mrf.mxu1 }
 0x8cc   : > { %v13640_v23 = vpop.f32.mrf.mxu0 }
 0x8cd   : > { %v13681_v38 = vpop.f32.mrf.mxu1  ;;  %v13641_v36 = vadd.f32 %v13640_v23, %v13600_v51 }
 0x8ce   : > { %v13642_v39 = vpop.f32.mrf.mxu0 }
 0x8cf   : > { %v13683_v53 = vpop.f32.mrf.mxu1  ;;  %v13643_v1 = vadd.f32 %v13642_v39, %v13602_v35  ;;  %v13682_v60 = vadd.f32 %v13681_v38, %v13641_v36 }
 0x8d0   : > { %v13644_v50 = vpop.f32.mrf.mxu0 }
 0x8d1   : > { %v13685_v41 = vpop.f32.mrf.mxu1  ;;  %v13684_v20 = vadd.f32 %v13683_v53, %v13643_v1 }
 0x8d2   : > { %v13645_v29 = vpop.f32.mrf.mxu0 }
 0x8d3   : > { %v13686_v27 = vpop.f32.mrf.mxu1 }
 0x90c   : > { %v13722_v16 = vpop.f32.mrf.mxu0 }
 0x90d   : > { %v13723_v6 = vadd.f32 %v13722_v16, %v13682_v60  ;;  %v13763_v3 = vpop.f32.mrf.mxu1 }
 0x90e   : > { %v13724_v55 = vpop.f32.mrf.mxu0 }
 0x90f   : > { %v13764_v25 = vadd.f32 %v13763_v3, %v13723_v6  ;;  %v13725_v24 = vadd.f32 %v13724_v55, %v13684_v20  ;;  %v13765_v18 = vpop.f32.mrf.mxu1 }
 0x910   : > { %v13726_v32 = vpop.f32.mrf.mxu0 }
 0x911   : > { %v13766_v58 = vadd.f32 %v13765_v18, %v13725_v24  ;;  %v13767_v19 = vpop.f32.mrf.mxu1  ;;  %v13772_v21 = vmax.f32 %v13764_v25, 0.0 }
 0x912   : > { %v13727_v33 = vpop.f32.mrf.mxu0 }
 0x913   : > { %v13773_v46 = vmax.f32 %v13766_v58, 0.0  ;;  %v13768_v47 = vpop.f32.mrf.mxu1 }
 0x915   : > { %v13779_v61 = vcombine.low %v13772_v21, %v13773_v46 }
 0x917   : > { %v13793_v45 = vrot.slane %v13779_v61, %v17991_v11 }
 0x919   : > { %v13794_v9 = vcombine.low %v13786_v8, %v13793_v45 }
 0x91b   : > { %v13801_v34 = vrot.slane %v13794_v9, %v17991_v11 }
 0x91d   : > { %13807 = vst.msk [vmem:[%s358_s29] sm:$0xf] %vm13805_vm13, %v13801_v34 }
 0x91e PF: > { %s21_s24 = sadd.s32 1, %s17794_s24  }
 0x91f   : > { %p18_p9 = scmp.ge.s32.totalorder %s21_s24, 4  }
 0x921   :  { %20 = sbr.rel (!%p18_p9) target bundleno = 4 (0x4), region = 103 }
 0x926   :  { %13827 = vsyncpa [#allocation3], 1 }
 0x927   :  { %13829 = vsyncpa [#allocation3 + $0x1], 1 }
 0x928   :  { %13830 = vsyncpa [#allocation5], 1 }
 0x929   :  { %13831 = vsyncpa [#allocation8], 1 }
 0x92a   :  { %13832 = vsyncpa [#allocation11], 1 }

</bundles_post_ra>
